<compile_context>
chip_gen: v5e
topology: v5e:2x2
jax: 0.10.0
libtpu: 0.0.40
codegen_flags: <defaults>
</compile_context>

<pallas_src>
import numpy as np
import jax
import jax.numpy as jnp
from jax import lax
from jax.experimental import pallas as pl
from jax.experimental.pallas import tpu as pltpu


# ---------------- configuration (small, consistent with the module) ----------
LAYERS = 3
BLOCKS = 1                      # blocks > 1 hits the length-mismatch bug in the
                                # original forward (rf only counts block 0).
CLASSES = 256                   # hard-coded by the scatter in WaveNet.forward
HIDDEN = 128                    # self.hidden_dim = 128 (hard-coded)
SKIP_DIM = 256                  # constructor arg (default 512), shrunk for demo
INIT_FILTER = 2                 # start_conv kernel size
DILATIONS = tuple([2 ** i for i in range(LAYERS)] * BLOCKS)
RF = int(np.sum(DILATIONS[:LAYERS])) + INIT_FILTER
T = 24                          # per-sequence length (multiple of 8)
FINALOUT = (T - 1) - (RF - 2)   # y.size(2) - (rf - 2) after start_conv
BATCH = 16                      # total sequences processed per launch
B_BLK = 8                       # sequences per grid step  -> M = B_BLK*T rows
M_BLK = B_BLK * T

assert BATCH % B_BLK == 0
assert M_BLK % 8 == 0 and T % 8 == 0


def _check_config():
    # Static validity of the skip windows / roll-based shifts for this stack.
    L = T - 1
    for d in DILATIONS:
        L -= d
        assert L >= FINALOUT > 0, "skip window out of range for dilation stack"
_check_config()


# ---------------------------- the Pallas kernel -------------------------------
def make_wavenet_kernel(dilations, hidden, classes, finalout, seq_len):
    H = hidden

    def kernel(idx_ref,                  # (M, 1) int32
               sw_ref, sb_ref,           # start conv: (2C, H) bf16, (1, H) f32
               dw_ref, db_ref,           # dilated:   (N, 2H, 2H) bf16, (N,1,2H) f32
               dsw_ref, dsb_ref,         # dense+skip:(N, H, H+S) bf16, (N,1,H+S) f32
               e1w_ref, e2w_ref,         # end convs: (S, S), (S, C) bf16 (no bias)
               out_ref):                 # (M, C) f32
        M = idx_ref.shape[0]

        # one-hot "scatter": onehot[r, c] = (idx[r] == c)   (kept f32 for rolls)
        lane = lax.broadcasted_iota(jnp.int32, (M, classes), 1)
        onehot = (lane == idx_ref[...]).astype(jnp.float32)

        # start_conv (k=2): both taps fused along K -> one (M, 2C) @ (2C, H).
        x0 = jnp.concatenate(
            [onehot, pltpu.roll(onehot, M - 1, axis=0)], axis=-1
        ).astype(jnp.bfloat16)
        y = (jnp.dot(x0, sw_ref[...], preferred_element_type=jnp.float32)
             + sb_ref[...])                                    # (M, H) f32
        L = seq_len - 1                                        # valid rows / seq

        skip_acc = None
        for i, d in enumerate(dilations):                      # static unroll
            # dilated causal conv (k=2): taps fused along K -> (M,2H) @ (2H,2H).
            y_shift = pltpu.roll(y, M - d, axis=0)             # y_shift[t] = y[t+d]
            x2 = jnp.concatenate([y, y_shift], axis=-1).astype(jnp.bfloat16)
            in_act = (jnp.dot(x2, dw_ref[i],
                              preferred_element_type=jnp.float32)
                      + db_ref[i])                             # (M, 2H) f32
            # gated activation (f32 elementwise; cols :H filter, H: gate)
            acts = jnp.tanh(in_act[:, :H]) * jax.nn.sigmoid(in_act[:, H:])

            # residual 1x1 conv and skip 1x1 conv fused along N -> (M, H+S).
            ds = (jnp.dot(acts.astype(jnp.bfloat16), dsw_ref[i],
                          preferred_element_type=jnp.float32)
                  + dsb_ref[i])
            res = ds[:, :H]                                    # (M, H)
            sk = ds[:, H:]                                     # (M, S)

            # skip window = last `finalout` valid rows of this layer; align it
            # to row 0 with an XLU roll instead of a misaligned slice.
            L = L - d
            off = L - finalout                                 # static int >= 0
            sk_aligned = pltpu.roll(sk, M - off, axis=0) if off else sk
            skip_acc = sk_aligned if i == 0 else skip_acc + sk_aligned

            # residual connection: y_new[t] = res[t] + y_old[t + d]
            y = res + y_shift

        out = jnp.maximum(skip_acc, 0.0)                       # relu
        out = jnp.maximum(                                     # end_conv1 (no bias)
            jnp.dot(out.astype(jnp.bfloat16), e1w_ref[...],
                    preferred_element_type=jnp.float32), 0.0)  # + relu
        out_ref[...] = jnp.dot(out.astype(jnp.bfloat16), e2w_ref[...],
                               preferred_element_type=jnp.float32)  # end_conv2

    return kernel


# ---------------------------- parameters (deterministic) ----------------------
def xavier_uniform(key, cout, cin, k, gain):
    fan_in, fan_out = cin * k, cout * k
    bound = gain * np.sqrt(6.0 / (fan_in + fan_out))
    return jax.random.uniform(key, (cout, cin, k), jnp.float32, -bound, bound)


def conv_bias(key, cout, cin, k):
    bound = 1.0 / np.sqrt(cin * k)
    return jax.random.uniform(key, (cout,), jnp.float32, -bound, bound)


def init_params(seed=0):
    key = jax.random.PRNGKey(seed)
    n = len(DILATIONS)
    keys = jax.random.split(key, 4 + 6 * n)
    ki = iter(range(len(keys)))
    relu_gain = float(np.sqrt(2.0))
    bf16 = jnp.bfloat16

    # start_conv: Conv1d(classes, hidden, k=2); taps stacked along K -> (2C, H)
    w = xavier_uniform(keys[next(ki)], HIDDEN, CLASSES, 2, 1.0)
    sb = conv_bias(keys[next(ki)], HIDDEN, CLASSES, 2)
    sw = jnp.concatenate([w[:, :, 0].T, w[:, :, 1].T], axis=0)          # (2C, H)

    dw, db, dsw, dsb = [], [], [], []
    for _ in DILATIONS:
        wd = xavier_uniform(keys[next(ki)], 2 * HIDDEN, HIDDEN, 2, 1.0)
        bd = conv_bias(keys[next(ki)], 2 * HIDDEN, HIDDEN, 2)
        dw.append(jnp.concatenate([wd[:, :, 0].T, wd[:, :, 1].T], axis=0))  # (2H,2H)
        db.append(bd[None, :])                                              # (1,2H)

        wn = xavier_uniform(keys[next(ki)], HIDDEN, HIDDEN, 1, 1.0)
        bn = conv_bias(keys[next(ki)], HIDDEN, HIDDEN, 1)
        ws = xavier_uniform(keys[next(ki)], SKIP_DIM, HIDDEN, 1, relu_gain)
        bs = conv_bias(keys[next(ki)], SKIP_DIM, HIDDEN, 1)
        # dense (residual) and skip 1x1 convs fused along N -> (H, H+S)
        dsw.append(jnp.concatenate([wn[:, :, 0].T, ws[:, :, 0].T], axis=1))
        dsb.append(jnp.concatenate([bn, bs])[None, :])                      # (1,H+S)

    e1 = xavier_uniform(keys[next(ki)], SKIP_DIM, SKIP_DIM, 1, relu_gain)[:, :, 0].T
    e2 = xavier_uniform(keys[next(ki)], CLASSES, SKIP_DIM, 1, 1.0)[:, :, 0].T

    return dict(
        sw=sw.astype(bf16), sb=sb[None, :],                 # biases stay f32
        dw=jnp.stack(dw).astype(bf16), db=jnp.stack(db),
        dsw=jnp.stack(dsw).astype(bf16), dsb=jnp.stack(dsb),
        e1w=e1.astype(bf16), e2w=e2.astype(bf16),
    )


# ---------------------------- wrapper -----------------------------------------
def _const_index_map(ndim):
    return lambda b: (0,) * ndim


@jax.jit
def wavenet_forward(y_indices, params):
    """Batched WaveNet forward.  y_indices: (B, 1, T) int class ids.
    Returns (B, CLASSES, FINALOUT), matching the module's per-sequence output."""
    B = y_indices.shape[0]
    assert B % B_BLK == 0
    nb = B // B_BLK
    idx = y_indices.reshape(B * T, 1).astype(jnp.int32)

    kernel = make_wavenet_kernel(DILATIONS, HIDDEN, CLASSES, FINALOUT, T)

    weight_args = (params["sw"], params["sb"], params["dw"], params["db"],
                   params["dsw"], params["dsb"], params["e1w"], params["e2w"])
    # Full-array weight blocks at a constant block index -> DMA'd once, resident
    # in VMEM across all grid steps on each core.
    weight_specs = [pl.BlockSpec(w.shape, _const_index_map(w.ndim))
                    for w in weight_args]

    n_layers = len(DILATIONS)
    flops_per_row = 2 * (2 * CLASSES * HIDDEN
                         + n_layers * (2 * HIDDEN * 2 * HIDDEN
                                       + HIDDEN * (HIDDEN + SKIP_DIM))
                         + SKIP_DIM * SKIP_DIM + SKIP_DIM * CLASSES)
    weight_bytes = sum(int(np.prod(w.shape)) * w.dtype.itemsize
                       for w in weight_args)
    cost = pl.CostEstimate(
        flops=flops_per_row * B * T,
        transcendentals=2 * n_layers * HIDDEN * B * T,
        bytes_accessed=weight_bytes + B * T * 4 + B * T * CLASSES * 4,
    )

    # TODO(synk): in an autoregressive sampling loop, keep weights resident via
    # a cross-call prefetch (P10) instead of re-DMAing them every step.
    out_flat = pl.pallas_call(
        kernel,
        out_shape=jax.ShapeDtypeStruct((B * T, CLASSES), jnp.float32),
        grid=(nb,),
        in_specs=[pl.BlockSpec((M_BLK, 1), lambda b: (b, 0))] + weight_specs,
        out_specs=pl.BlockSpec((M_BLK, CLASSES), lambda b: (b, 0)),
        compiler_params=pltpu.CompilerParams(
            dimension_semantics=("parallel",)),     # megacore on v7x
        cost_estimate=cost,
    )(idx, *weight_args)

    # Valid rows per sequence are the first FINALOUT rows of each T-row block.
    out = out_flat.reshape(B, T, CLASSES)[:, :FINALOUT, :]
    # Back to the PyTorch NCL layout (B, classes, finalout).  If the consumer
    # accepts the lane-dense (B, finalout, classes) layout, skip this transpose.
    return jnp.transpose(out, (0, 2, 1))


# ---------------------------- pure-JAX reference -------------------------------
def wavenet_reference(y_indices, params):
    """f32 reference mirroring the PyTorch module's forward (per sequence)."""
    f32 = jnp.float32
    B = y_indices.shape[0]
    idx = y_indices.reshape(B, T)
    oh = jax.nn.one_hot(idx, CLASSES, dtype=f32)                       # (B,T,C)
    x0 = jnp.concatenate([oh[:, :-1], oh[:, 1:]], axis=-1)             # (B,T-1,2C)
    y = jnp.einsum("btk,kh->bth", x0, params["sw"].astype(f32)) + params["sb"]
    L = T - 1
    out = None
    for i, d in enumerate(DILATIONS):
        xin = jnp.concatenate([y[:, :L - d], y[:, d:L]], axis=-1)
        ia = (jnp.einsum("btk,kn->btn", xin, params["dw"][i].astype(f32))
              + params["db"][i])
        acts = jnp.tanh(ia[..., :HIDDEN]) * jax.nn.sigmoid(ia[..., HIDDEN:])
        ds = (jnp.einsum("bth,hn->btn", acts, params["dsw"][i].astype(f32))
              + params["dsb"][i])
        res, sk = ds[..., :HIDDEN], ds[..., HIDDEN:]
        L = L - d
        s = sk[:, L - FINALOUT:]
        out = s if i == 0 else out + s
        y = res + y[:, d:d + L]
    out = jax.nn.relu(out)
    out = jax.nn.relu(jnp.einsum("bts,sk->btk", out, params["e1w"].astype(f32)))
    out = jnp.einsum("bts,sc->btc", out, params["e2w"].astype(f32))
    return jnp.transpose(out, (0, 2, 1))                               # (B,C,F)


# ---------------------------- main ---------------------------------------------
if __name__ == "__main__":
    key = jax.random.PRNGKey(0)
    # module input: integer class ids (module signature is (1,1,T) per sequence;
    # we batch BATCH independent sequences into one launch).
    y_in = jax.random.randint(key, (BATCH, 1, T), 0, CLASSES, dtype=jnp.int32)

    params = init_params(seed=0)
    out = wavenet_forward(y_in, params)
    out = jax.block_until_ready(out)

    assert out.shape == (BATCH, CLASSES, FINALOUT), out.shape
    assert bool(jnp.all(jnp.isfinite(out)))

    # correctness vs. pure-JAX reference (bf16 weights, f32 math) — generous
    # tolerance covers the bf16 activation rounding inside the kernel.
    ref = wavenet_reference(y_in, params)
    err = float(jnp.max(jnp.abs(out - ref)))
    scale = float(jnp.max(jnp.abs(ref))) + 1e-6
    assert err <= 2e-2 + 2e-2 * scale, (err, scale)

    print("KERNEL_OK")
</pallas_src>

<mosaic_0001>
module attributes {stable_mosaic.version = 11 : i64} {
  func.func @kernel(%arg0: i32, %arg1: memref<192x1xi32, #tpu.memory_space<vmem>>, %arg2: memref<512x128xbf16, #tpu.memory_space<vmem>>, %arg3: memref<1x128xf32, #tpu.memory_space<vmem>>, %arg4: memref<3x256x256xbf16, #tpu.memory_space<vmem>>, %arg5: memref<3x1x256xf32, #tpu.memory_space<vmem>>, %arg6: memref<3x128x384xbf16, #tpu.memory_space<vmem>>, %arg7: memref<3x1x384xf32, #tpu.memory_space<vmem>>, %arg8: memref<256x256xbf16, #tpu.memory_space<vmem>>, %arg9: memref<256x256xbf16, #tpu.memory_space<vmem>>, %arg10: memref<192x256xf32, #tpu.memory_space<vmem>>) attributes {dimension_semantics = [#tpu.dimension_semantics<parallel>], iteration_bounds = array<i64: 2>, scalar_prefetch = 0 : i64, scratch_operands = 0 : i64, tpu.core_type = #tpu.core_type<tc>, window_params = [{transform_indices = @transform_0, window_bounds = array<i64: 192, 1>}, {pipeline_mode = #tpu.pipeline_mode<synchronous>, transform_indices = @transform_1, window_bounds = array<i64: 512, 128>}, {pipeline_mode = #tpu.pipeline_mode<synchronous>, transform_indices = @transform_2, window_bounds = array<i64: 1, 128>}, {pipeline_mode = #tpu.pipeline_mode<synchronous>, transform_indices = @transform_3, window_bounds = array<i64: 3, 256, 256>}, {pipeline_mode = #tpu.pipeline_mode<synchronous>, transform_indices = @transform_4, window_bounds = array<i64: 3, 1, 256>}, {pipeline_mode = #tpu.pipeline_mode<synchronous>, transform_indices = @transform_5, window_bounds = array<i64: 3, 128, 384>}, {pipeline_mode = #tpu.pipeline_mode<synchronous>, transform_indices = @transform_6, window_bounds = array<i64: 3, 1, 384>}, {pipeline_mode = #tpu.pipeline_mode<synchronous>, transform_indices = @transform_7, window_bounds = array<i64: 256, 256>}, {pipeline_mode = #tpu.pipeline_mode<synchronous>, transform_indices = @transform_8, window_bounds = array<i64: 256, 256>}, {transform_indices = @transform_9, window_bounds = array<i64: 192, 256>}]} {
    %0 = tpu.iota {dimensions = array<i32: 1>} : vector<192x256xi32>
    %c0 = arith.constant 0 : index
    %c0_0 = arith.constant 0 : index
    %1 = vector.load %arg1[%c0, %c0_0] : memref<192x1xi32, #tpu.memory_space<vmem>>, vector<192x1xi32>
    %2 = vector.broadcast %1 : vector<192x1xi32> to vector<192x256xi32>
    %3 = arith.cmpi eq, %0, %2 : vector<192x256xi32>
    %4 = arith.extui %3 : vector<192x256xi1> to vector<192x256xi32>
    %5 = arith.sitofp %4 : vector<192x256xi32> to vector<192x256xf32>
    %c191_i32 = arith.constant 191 : i32
    %6 = tpu.dynamic_rotate %5 by %c191_i32 dim 0 : vector<192x256xf32>, i32 -> vector<192x256xf32>
    %7 = tpu.concatenate %5, %6 in 1 : vector<192x256xf32>, vector<192x256xf32> -> vector<192x512xf32>
    %8 = arith.truncf %7 : vector<192x512xf32> to vector<192x512xbf16>
    %c0_1 = arith.constant 0 : index
    %c0_2 = arith.constant 0 : index
    %9 = vector.load %arg2[%c0_1, %c0_2] : memref<512x128xbf16, #tpu.memory_space<vmem>>, vector<512x128xbf16>
    %cst = arith.constant dense<0.000000e+00> : vector<192x128xf32>
    %10 = tpu.matmul %8, %9, %cst {dimension_numbers = #tpu.dot_dimension_numbers<[1], [0], [0], [1], [0, 0, 1, 1], [], []>} : vector<192x512xbf16>, vector<512x128xbf16>, vector<192x128xf32> -> vector<192x128xf32>
    %c0_3 = arith.constant 0 : index
    %c0_4 = arith.constant 0 : index
    %11 = vector.load %arg3[%c0_3, %c0_4] : memref<1x128xf32, #tpu.memory_space<vmem>>, vector<1x128xf32>
    %12 = vector.broadcast %11 : vector<1x128xf32> to vector<192x128xf32>
    %13 = arith.addf %10, %12 : vector<192x128xf32>
    %c191_i32_5 = arith.constant 191 : i32
    %14 = tpu.dynamic_rotate %13 by %c191_i32_5 dim 0 : vector<192x128xf32>, i32 -> vector<192x128xf32>
    %15 = tpu.concatenate %13, %14 in 1 : vector<192x128xf32>, vector<192x128xf32> -> vector<192x256xf32>
    %16 = arith.truncf %15 : vector<192x256xf32> to vector<192x256xbf16>
    %c0_6 = arith.constant 0 : index
    %c0_7 = arith.constant 0 : index
    %c0_8 = arith.constant 0 : index
    %17 = vector.load %arg4[%c0_6, %c0_7, %c0_8] : memref<3x256x256xbf16, #tpu.memory_space<vmem>>, vector<1x256x256xbf16>
    %18 = vector.shape_cast %17 : vector<1x256x256xbf16> to vector<256x256xbf16>
    %cst_9 = arith.constant dense<0.000000e+00> : vector<192x256xf32>
    %19 = tpu.matmul %16, %18, %cst_9 {dimension_numbers = #tpu.dot_dimension_numbers<[1], [0], [0], [1], [0, 0, 1, 1], [], []>} : vector<192x256xbf16>, vector<256x256xbf16>, vector<192x256xf32> -> vector<192x256xf32>
    %c0_10 = arith.constant 0 : index
    %c0_11 = arith.constant 0 : index
    %c0_12 = arith.constant 0 : index
    %20 = vector.load %arg5[%c0_10, %c0_11, %c0_12] : memref<3x1x256xf32, #tpu.memory_space<vmem>>, vector<1x1x256xf32>
    %21 = vector.shape_cast %20 : vector<1x1x256xf32> to vector<1x256xf32>
    %22 = vector.broadcast %21 : vector<1x256xf32> to vector<192x256xf32>
    %23 = arith.addf %19, %22 : vector<192x256xf32>
    %24 = vector.extract_strided_slice %23 {offsets = [0, 0], sizes = [192, 128], strides = [1, 1]} : vector<192x256xf32> to vector<192x128xf32>
    %25 = math.tanh %24 : vector<192x128xf32>
    %26 = vector.extract_strided_slice %23 {offsets = [0, 128], sizes = [192, 128], strides = [1, 1]} : vector<192x256xf32> to vector<192x128xf32>
    %27 = arith.negf %26 : vector<192x128xf32>
    %28 = math.exp %27 : vector<192x128xf32>
    %cst_13 = arith.constant 1.000000e+00 : f32
    %29 = vector.broadcast %cst_13 : f32 to vector<192x128xf32>
    %30 = arith.addf %29, %28 : vector<192x128xf32>
    %31 = arith.divf %29, %30 : vector<192x128xf32>
    %32 = arith.mulf %25, %31 : vector<192x128xf32>
    %33 = arith.truncf %32 : vector<192x128xf32> to vector<192x128xbf16>
    %c0_14 = arith.constant 0 : index
    %c0_15 = arith.constant 0 : index
    %c0_16 = arith.constant 0 : index
    %34 = vector.load %arg6[%c0_14, %c0_15, %c0_16] : memref<3x128x384xbf16, #tpu.memory_space<vmem>>, vector<1x128x384xbf16>
    %35 = vector.shape_cast %34 : vector<1x128x384xbf16> to vector<128x384xbf16>
    %cst_17 = arith.constant dense<0.000000e+00> : vector<192x384xf32>
    %36 = tpu.matmul %33, %35, %cst_17 {dimension_numbers = #tpu.dot_dimension_numbers<[1], [0], [0], [1], [0, 0, 1, 1], [], []>} : vector<192x128xbf16>, vector<128x384xbf16>, vector<192x384xf32> -> vector<192x384xf32>
    %c0_18 = arith.constant 0 : index
    %c0_19 = arith.constant 0 : index
    %c0_20 = arith.constant 0 : index
    %37 = vector.load %arg7[%c0_18, %c0_19, %c0_20] : memref<3x1x384xf32, #tpu.memory_space<vmem>>, vector<1x1x384xf32>
    %38 = vector.shape_cast %37 : vector<1x1x384xf32> to vector<1x384xf32>
    %39 = vector.broadcast %38 : vector<1x384xf32> to vector<192x384xf32>
    %40 = arith.addf %36, %39 : vector<192x384xf32>
    %41 = vector.extract_strided_slice %40 {offsets = [0, 0], sizes = [192, 128], strides = [1, 1]} : vector<192x384xf32> to vector<192x128xf32>
    %42 = vector.extract_strided_slice %40 {offsets = [0, 128], sizes = [192, 256], strides = [1, 1]} : vector<192x384xf32> to vector<192x256xf32>
    %c186_i32 = arith.constant 186 : i32
    %43 = tpu.dynamic_rotate %42 by %c186_i32 dim 0 : vector<192x256xf32>, i32 -> vector<192x256xf32>
    %44 = arith.addf %41, %14 : vector<192x128xf32>
    %c190_i32 = arith.constant 190 : i32
    %45 = tpu.dynamic_rotate %44 by %c190_i32 dim 0 : vector<192x128xf32>, i32 -> vector<192x128xf32>
    %46 = tpu.concatenate %44, %45 in 1 : vector<192x128xf32>, vector<192x128xf32> -> vector<192x256xf32>
    %47 = arith.truncf %46 : vector<192x256xf32> to vector<192x256xbf16>
    %c1 = arith.constant 1 : index
    %c0_21 = arith.constant 0 : index
    %c0_22 = arith.constant 0 : index
    %48 = vector.load %arg4[%c1, %c0_21, %c0_22] : memref<3x256x256xbf16, #tpu.memory_space<vmem>>, vector<1x256x256xbf16>
    %49 = vector.shape_cast %48 : vector<1x256x256xbf16> to vector<256x256xbf16>
    %cst_23 = arith.constant dense<0.000000e+00> : vector<192x256xf32>
    %50 = tpu.matmul %47, %49, %cst_23 {dimension_numbers = #tpu.dot_dimension_numbers<[1], [0], [0], [1], [0, 0, 1, 1], [], []>} : vector<192x256xbf16>, vector<256x256xbf16>, vector<192x256xf32> -> vector<192x256xf32>
    %c1_24 = arith.constant 1 : index
    %c0_25 = arith.constant 0 : index
    %c0_26 = arith.constant 0 : index
    %51 = vector.load %arg5[%c1_24, %c0_25, %c0_26] : memref<3x1x256xf32, #tpu.memory_space<vmem>>, vector<1x1x256xf32>
    %52 = vector.shape_cast %51 : vector<1x1x256xf32> to vector<1x256xf32>
    %53 = vector.broadcast %52 : vector<1x256xf32> to vector<192x256xf32>
    %54 = arith.addf %50, %53 : vector<192x256xf32>
    %55 = vector.extract_strided_slice %54 {offsets = [0, 0], sizes = [192, 128], strides = [1, 1]} : vector<192x256xf32> to vector<192x128xf32>
    %56 = math.tanh %55 : vector<192x128xf32>
    %57 = vector.extract_strided_slice %54 {offsets = [0, 128], sizes = [192, 128], strides = [1, 1]} : vector<192x256xf32> to vector<192x128xf32>
    %58 = arith.negf %57 : vector<192x128xf32>
    %59 = math.exp %58 : vector<192x128xf32>
    %cst_27 = arith.constant 1.000000e+00 : f32
    %60 = vector.broadcast %cst_27 : f32 to vector<192x128xf32>
    %61 = arith.addf %60, %59 : vector<192x128xf32>
    %62 = arith.divf %60, %61 : vector<192x128xf32>
    %63 = arith.mulf %56, %62 : vector<192x128xf32>
    %64 = arith.truncf %63 : vector<192x128xf32> to vector<192x128xbf16>
    %c1_28 = arith.constant 1 : index
    %c0_29 = arith.constant 0 : index
    %c0_30 = arith.constant 0 : index
    %65 = vector.load %arg6[%c1_28, %c0_29, %c0_30] : memref<3x128x384xbf16, #tpu.memory_space<vmem>>, vector<1x128x384xbf16>
    %66 = vector.shape_cast %65 : vector<1x128x384xbf16> to vector<128x384xbf16>
    %cst_31 = arith.constant dense<0.000000e+00> : vector<192x384xf32>
    %67 = tpu.matmul %64, %66, %cst_31 {dimension_numbers = #tpu.dot_dimension_numbers<[1], [0], [0], [1], [0, 0, 1, 1], [], []>} : vector<192x128xbf16>, vector<128x384xbf16>, vector<192x384xf32> -> vector<192x384xf32>
    %c1_32 = arith.constant 1 : index
    %c0_33 = arith.constant 0 : index
    %c0_34 = arith.constant 0 : index
    %68 = vector.load %arg7[%c1_32, %c0_33, %c0_34] : memref<3x1x384xf32, #tpu.memory_space<vmem>>, vector<1x1x384xf32>
    %69 = vector.shape_cast %68 : vector<1x1x384xf32> to vector<1x384xf32>
    %70 = vector.broadcast %69 : vector<1x384xf32> to vector<192x384xf32>
    %71 = arith.addf %67, %70 : vector<192x384xf32>
    %72 = vector.extract_strided_slice %71 {offsets = [0, 0], sizes = [192, 128], strides = [1, 1]} : vector<192x384xf32> to vector<192x128xf32>
    %73 = vector.extract_strided_slice %71 {offsets = [0, 128], sizes = [192, 256], strides = [1, 1]} : vector<192x384xf32> to vector<192x256xf32>
    %c188_i32 = arith.constant 188 : i32
    %74 = tpu.dynamic_rotate %73 by %c188_i32 dim 0 : vector<192x256xf32>, i32 -> vector<192x256xf32>
    %75 = arith.addf %43, %74 : vector<192x256xf32>
    %76 = arith.addf %72, %45 : vector<192x128xf32>
    %c188_i32_35 = arith.constant 188 : i32
    %77 = tpu.dynamic_rotate %76 by %c188_i32_35 dim 0 : vector<192x128xf32>, i32 -> vector<192x128xf32>
    %78 = tpu.concatenate %76, %77 in 1 : vector<192x128xf32>, vector<192x128xf32> -> vector<192x256xf32>
    %79 = arith.truncf %78 : vector<192x256xf32> to vector<192x256xbf16>
    %c2 = arith.constant 2 : index
    %c0_36 = arith.constant 0 : index
    %c0_37 = arith.constant 0 : index
    %80 = vector.load %arg4[%c2, %c0_36, %c0_37] : memref<3x256x256xbf16, #tpu.memory_space<vmem>>, vector<1x256x256xbf16>
    %81 = vector.shape_cast %80 : vector<1x256x256xbf16> to vector<256x256xbf16>
    %cst_38 = arith.constant dense<0.000000e+00> : vector<192x256xf32>
    %82 = tpu.matmul %79, %81, %cst_38 {dimension_numbers = #tpu.dot_dimension_numbers<[1], [0], [0], [1], [0, 0, 1, 1], [], []>} : vector<192x256xbf16>, vector<256x256xbf16>, vector<192x256xf32> -> vector<192x256xf32>
    %c2_39 = arith.constant 2 : index
    %c0_40 = arith.constant 0 : index
    %c0_41 = arith.constant 0 : index
    %83 = vector.load %arg5[%c2_39, %c0_40, %c0_41] : memref<3x1x256xf32, #tpu.memory_space<vmem>>, vector<1x1x256xf32>
    %84 = vector.shape_cast %83 : vector<1x1x256xf32> to vector<1x256xf32>
    %85 = vector.broadcast %84 : vector<1x256xf32> to vector<192x256xf32>
    %86 = arith.addf %82, %85 : vector<192x256xf32>
    %87 = vector.extract_strided_slice %86 {offsets = [0, 0], sizes = [192, 128], strides = [1, 1]} : vector<192x256xf32> to vector<192x128xf32>
    %88 = math.tanh %87 : vector<192x128xf32>
    %89 = vector.extract_strided_slice %86 {offsets = [0, 128], sizes = [192, 128], strides = [1, 1]} : vector<192x256xf32> to vector<192x128xf32>
    %90 = arith.negf %89 : vector<192x128xf32>
    %91 = math.exp %90 : vector<192x128xf32>
    %cst_42 = arith.constant 1.000000e+00 : f32
    %92 = vector.broadcast %cst_42 : f32 to vector<192x128xf32>
    %93 = arith.addf %92, %91 : vector<192x128xf32>
    %94 = arith.divf %92, %93 : vector<192x128xf32>
    %95 = arith.mulf %88, %94 : vector<192x128xf32>
    %96 = arith.truncf %95 : vector<192x128xf32> to vector<192x128xbf16>
    %c2_43 = arith.constant 2 : index
    %c0_44 = arith.constant 0 : index
    %c0_45 = arith.constant 0 : index
    %97 = vector.load %arg6[%c2_43, %c0_44, %c0_45] : memref<3x128x384xbf16, #tpu.memory_space<vmem>>, vector<1x128x384xbf16>
    %98 = vector.shape_cast %97 : vector<1x128x384xbf16> to vector<128x384xbf16>
    %cst_46 = arith.constant dense<0.000000e+00> : vector<192x384xf32>
    %99 = tpu.matmul %96, %98, %cst_46 {dimension_numbers = #tpu.dot_dimension_numbers<[1], [0], [0], [1], [0, 0, 1, 1], [], []>} : vector<192x128xbf16>, vector<128x384xbf16>, vector<192x384xf32> -> vector<192x384xf32>
    %c2_47 = arith.constant 2 : index
    %c0_48 = arith.constant 0 : index
    %c0_49 = arith.constant 0 : index
    %100 = vector.load %arg7[%c2_47, %c0_48, %c0_49] : memref<3x1x384xf32, #tpu.memory_space<vmem>>, vector<1x1x384xf32>
    %101 = vector.shape_cast %100 : vector<1x1x384xf32> to vector<1x384xf32>
    %102 = vector.broadcast %101 : vector<1x384xf32> to vector<192x384xf32>
    %103 = arith.addf %99, %102 : vector<192x384xf32>
    %104 = vector.extract_strided_slice %103 {offsets = [0, 128], sizes = [192, 256], strides = [1, 1]} : vector<192x384xf32> to vector<192x256xf32>
    %105 = arith.addf %75, %104 : vector<192x256xf32>
    %cst_50 = arith.constant 0.000000e+00 : f32
    %106 = vector.broadcast %cst_50 : f32 to vector<192x256xf32>
    %107 = arith.maximumf %105, %106 : vector<192x256xf32>
    %108 = arith.truncf %107 : vector<192x256xf32> to vector<192x256xbf16>
    %c0_51 = arith.constant 0 : index
    %c0_52 = arith.constant 0 : index
    %109 = vector.load %arg8[%c0_51, %c0_52] : memref<256x256xbf16, #tpu.memory_space<vmem>>, vector<256x256xbf16>
    %cst_53 = arith.constant dense<0.000000e+00> : vector<192x256xf32>
    %110 = tpu.matmul %108, %109, %cst_53 {dimension_numbers = #tpu.dot_dimension_numbers<[1], [0], [0], [1], [0, 0, 1, 1], [], []>} : vector<192x256xbf16>, vector<256x256xbf16>, vector<192x256xf32> -> vector<192x256xf32>
    %cst_54 = arith.constant 0.000000e+00 : f32
    %111 = vector.broadcast %cst_54 : f32 to vector<192x256xf32>
    %112 = arith.maximumf %110, %111 : vector<192x256xf32>
    %113 = arith.truncf %112 : vector<192x256xf32> to vector<192x256xbf16>
    %c0_55 = arith.constant 0 : index
    %c0_56 = arith.constant 0 : index
    %114 = vector.load %arg9[%c0_55, %c0_56] : memref<256x256xbf16, #tpu.memory_space<vmem>>, vector<256x256xbf16>
    %cst_57 = arith.constant dense<0.000000e+00> : vector<192x256xf32>
    %115 = tpu.matmul %113, %114, %cst_57 {dimension_numbers = #tpu.dot_dimension_numbers<[1], [0], [0], [1], [0, 0, 1, 1], [], []>} : vector<192x256xbf16>, vector<256x256xbf16>, vector<192x256xf32> -> vector<192x256xf32>
    %c0_58 = arith.constant 0 : index
    %c0_59 = arith.constant 0 : index
    %116 = vector.load %arg10[%c0_58, %c0_59] : memref<192x256xf32, #tpu.memory_space<vmem>>, vector<192x256xf32>
    tpu.vector_store %arg10[%c0_58, %c0_59], %115 {strides = array<i32>} : memref<192x256xf32, #tpu.memory_space<vmem>>, vector<192x256xf32>,
    return
  }
  func.func @transform_0(%arg0: i32) -> (i32, i32) {
    %c0_i32 = arith.constant 0 : i32
    %c0_i32_0 = arith.constant 0 : i32
    return %arg0, %c0_i32 : i32, i32
  }
  func.func @transform_1(%arg0: i32) -> (i32, i32) {
    %c0_i32 = arith.constant 0 : i32
    %c0_i32_0 = arith.constant 0 : i32
    %c0_i32_1 = arith.constant 0 : i32
    return %c0_i32, %c0_i32_0 : i32, i32
  }
  func.func @transform_2(%arg0: i32) -> (i32, i32) {
    %c0_i32 = arith.constant 0 : i32
    %c0_i32_0 = arith.constant 0 : i32
    %c0_i32_1 = arith.constant 0 : i32
    return %c0_i32, %c0_i32_0 : i32, i32
  }
  func.func @transform_3(%arg0: i32) -> (i32, i32, i32) {
    %c0_i32 = arith.constant 0 : i32
    %c0_i32_0 = arith.constant 0 : i32
    %c0_i32_1 = arith.constant 0 : i32
    %c0_i32_2 = arith.constant 0 : i32
    return %c0_i32, %c0_i32_0, %c0_i32_1 : i32, i32, i32
  }
  func.func @transform_4(%arg0: i32) -> (i32, i32, i32) {
    %c0_i32 = arith.constant 0 : i32
    %c0_i32_0 = arith.constant 0 : i32
    %c0_i32_1 = arith.constant 0 : i32
    %c0_i32_2 = arith.constant 0 : i32
    return %c0_i32, %c0_i32_0, %c0_i32_1 : i32, i32, i32
  }
  func.func @transform_5(%arg0: i32) -> (i32, i32, i32) {
    %c0_i32 = arith.constant 0 : i32
    %c0_i32_0 = arith.constant 0 : i32
    %c0_i32_1 = arith.constant 0 : i32
    %c0_i32_2 = arith.constant 0 : i32
    return %c0_i32, %c0_i32_0, %c0_i32_1 : i32, i32, i32
  }
  func.func @transform_6(%arg0: i32) -> (i32, i32, i32) {
    %c0_i32 = arith.constant 0 : i32
    %c0_i32_0 = arith.constant 0 : i32
    %c0_i32_1 = arith.constant 0 : i32
    %c0_i32_2 = arith.constant 0 : i32
    return %c0_i32, %c0_i32_0, %c0_i32_1 : i32, i32, i32
  }
  func.func @transform_7(%arg0: i32) -> (i32, i32) {
    %c0_i32 = arith.constant 0 : i32
    %c0_i32_0 = arith.constant 0 : i32
    %c0_i32_1 = arith.constant 0 : i32
    return %c0_i32, %c0_i32_0 : i32, i32
  }
  func.func @transform_8(%arg0: i32) -> (i32, i32) {
    %c0_i32 = arith.constant 0 : i32
    %c0_i32_0 = arith.constant 0 : i32
    %c0_i32_1 = arith.constant 0 : i32
    return %c0_i32, %c0_i32_0 : i32, i32
  }
  func.func @transform_9(%arg0: i32) -> (i32, i32) {
    %c0_i32 = arith.constant 0 : i32
    %c0_i32_0 = arith.constant 0 : i32
    return %arg0, %c0_i32 : i32, i32
  }
}

</mosaic_0001>

<bundles_post_ra>
// kernel: wavenet_forward.1
= control target key start
LH: loop header
LB: loop body
LE: loop exit
PB: predicated region body
PF: predicated region fallthrough
CT: control target
= control target key end

     0   :  { %14 = vsyncpa [#allocation3], 0  ;;  %s13941_s0 = inlined_call_operand.vmem [shape: s32[384,1], index: 0, kind: input, shape index: {}]   ;;  %s13942_s1 = inlined_call_operand.vmem [shape: bf16[512,128], index: 1, kind: input, shape index: {}]   ;;  %s13943_s2 = inlined_call_operand.vmem [shape: f32[1,128], index: 2, kind: input, shape index: {}]   ;;  %s13944_s3 = inlined_call_operand.hbm [shape: bf16[3,256,256], index: 3, kind: input, shape index: {}]   ;;  %s13945_s4 = inlined_call_operand.vmem [shape: f32[3,1,256], index: 4, kind: input, shape index: {}]   ;;  %s13946_s5 = inlined_call_operand.hbm [shape: bf16[3,128,384], index: 5, kind: input, shape index: {}]   ;;  %s13947_s6 = inlined_call_operand.vmem [shape: f32[3,1,384], index: 6, kind: input, shape index: {}]   ;;  %s13948_s7 = inlined_call_operand.hbm [shape: bf16[256,256], index: 7, kind: input, shape index: {}]   ;;  %s13949_s8 = inlined_call_operand.hbm [shape: bf16[256,256], index: 8, kind: input, shape index: {}]   ;;  %s13950_s9 = inlined_call_operand.vmem [shape: f32[384,256], index: 9, kind: output, shape index: {}]  }
   0x1   :  { %15 = vsyncpa [#allocation5], 0 }
   0x2   :  { %16 = vsyncpa [#allocation8], 0  ;;  %s9277_s30 = smov 0  }
   0x3 LB: > { %s281_s12 = sshll.u32 %s13946_s5, 4  ;;  %s7113_s13 = sadd.s32 4294967295, %s9214_s30   ;;  %s9214_s30 = sphi %s9277_s30, %s22_s30   ;;  %s282_s12 = int_to_ptr.hbm [resolvable:$true] %s281_s12 }
   0x4   : > { %p7115_p0 = scmp.ge.s32.totalorder %s9214_s30, 1  ;;  %p247_p1 = scmp.lt.s32.totalorder %s9214_s30, 3 }
   0x5   : > { %p9290_p2 = scmp.eq.s32.totalorder %s7113_s13, 0  ;;  %s9216_s16 = smov [#allocation4]  }
   0x6   : > { %p9294_p3 = pnand %p7115_p0, %p247_p1  ;;  %s283_s17 = sshll.u32 %s9216_s16, 4  ;;  %s284_s17 = int_to_ptr.vmem [resolvable:$true] %s283_s17 }
   0x7   : > { %s264_s20 = sshll.u32 %s13944_s3, 4  ;;  %s9217_s22 = smov [#allocation2]   ;;  %s265_s20 = int_to_ptr.hbm [resolvable:$true] %s264_s20 }
   0x8   : > { %p8600_p4 = pneg %p9294_p3  ;;  %s266_s23 = sshll.u32 %s9217_s22, 4  ;;  %s267_s23 = int_to_ptr.vmem [resolvable:$true] %s266_s23 }
   0x9   : > { %s9218_s24 = smov 192   ;;  %s9219_s25 = smov 12  }
   0xa   : > { %p9305_p5 = pnand %p9290_p2, %p8600_p4  ;;  %s298_s28 = sshll.u32 %s13948_s7, 4  ;;  %s299_s28 = int_to_ptr.hbm [resolvable:$true] %s298_s28 }
   0xb   : > { %s9220_s29 = smov 128   ;;  %s9221_s10 = smov 8  }
   0xc   : > { %8606 = dma.hbm_to_vmem [thread:$0]  (!%p9305_p5), %s282_s12, 9216, %s284_s17, [#allocation5], %s9218_s24, %s9218_s24, %s9219_s25  }
   0xd   : > { %8603 = dma.hbm_to_vmem [thread:$0]  (!%p9305_p5), %s265_s20, 12288, %s267_s23, [#allocation3], %s9220_s29, %s9220_s29, %s9221_s10  }
   0xe   : > { %s9222_s11 = smov [#allocation6]   ;;  %s312_s22 = sshll.u32 %s13949_s8, 4  ;;  %s313_s22 = int_to_ptr.hbm [resolvable:$true] %s312_s22 }
   0xf   : > { %s300_s16 = sshll.u32 %s9222_s11, 4  ;;  %s9223_s12 = smov [#allocation7]   ;;  %s301_s16 = int_to_ptr.vmem [resolvable:$true] %s300_s16 }
  0x10   : > { %8609 = dma.hbm_to_vmem [thread:$0]  (!%p9305_p5), %s299_s28, 4096, %s301_s16, [#allocation5], %s9220_s29, %s9220_s29, %s9221_s10  }
  0x11   : > { %s314_s17 = sshll.u32 %s9223_s12, 4  ;;  %339 = sbr.rel (%p9294_p3) target bundleno = 2006 (0x7d6), region = 56  ;;  %s315_s17 = int_to_ptr.vmem [resolvable:$true] %s314_s17 }
  0x12   : > { %8612 = dma.hbm_to_vmem [thread:$0]  (!%p9305_p5), %s313_s22, 4096, %s315_s17, [#allocation8], %s9220_s29, %s9220_s29, %s9221_s10  }
  0x16   : > { %9201 = dma.done.wait (%p9290_p2), [#allocation3], 12288  }
  0x17   : > { %9203 = vsyncadd (%p9290_p2), [#allocation3], 4294955008 }
  0x18   : > { %9205 = dma.done.wait (%p9290_p2), [#allocation5], 13312  }
  0x19   : > { %9207 = vsyncadd (%p9290_p2), [#allocation5], 4294953984 }
  0x1a   : > { %9209 = dma.done.wait (%p9290_p2), [#allocation8], 4096  }
  0x1b   : > { %9211 = vsyncadd (%p9290_p2), [#allocation8], 4294963200  ;;  %s392_s15 = smul.u32 24, %s7113_s13  ;;  %v9224_v0 = vmov 0   ;;  %v8335_v25 = vld [vmem:[%s13942_s1 + $0x38] sm:$0xff]  ;;  %v8334_v27 = vld [vmem:[%s13942_s1 + $0x30] sm:$0xff] }
  0x1c   : > { %8642 = vset.pattern.permute.xlu2 %v9224_v0  ;;  %8641 = vset.pattern.permute.xlu1 %v9224_v0  ;;  %v8343_v26 = vld [vmem:[%s13942_s1 + $0x78] sm:$0xff]  ;;  %v8342_v28 = vld [vmem:[%s13942_s1 + $0x70] sm:$0xff]  ;;  %v8333_v31 = vld [vmem:[%s13942_s1 + $0x28] sm:$0xff] }
  0x1d   : > { %8640 = vset.pattern.permute.xlu0 %v9224_v0  ;;  %p393_p6 = scmp.lt.s32.totalorder %s392_s15, 47  ;;  %1055 = vmatpush.bf16.msra.mxu0 %v8335_v25  ;;  %v8351_v29 = vld [vmem:[%s13942_s1 + $0xb8] sm:$0xff]  ;;  %v8341_v32 = vld [vmem:[%s13942_s1 + $0x68] sm:$0xff]  ;;  %v8350_v33 = vld [vmem:[%s13942_s1 + $0xb0] sm:$0xff] }
  0x1e   : > { %1124 = vmatpush.bf16.msra.mxu1 %v8343_v26  ;;  %v8359_v30 = vld [vmem:[%s13942_s1 + $0xf8] sm:$0xff]  ;;  %1193 = vmatpush.bf16.msra.mxu2 %v8351_v29  ;;  %v8358_v34 = vld [vmem:[%s13942_s1 + $0xf0] sm:$0xff]  ;;  %v8332_v35 = vld [vmem:[%s13942_s1 + $0x20] sm:$0xff]  ;;  %v9226_v26 = vmov 1.0|1.0  }
  0x1f   : > { %s14293_s15 = smov (!%p393_p6, %s392_s15), 47  ;;  %1262 = vmatpush.bf16.msra.mxu3 %v8359_v30  ;;  %v8340_v36 = vld [vmem:[%s13942_s1 + $0x60] sm:$0xff]  ;;  %v8349_v37 = vld [vmem:[%s13942_s1 + $0xa8] sm:$0xff]  ;;  %v8331_v39 = vld [vmem:[%s13942_s1 + $0x18] sm:$0xff] }
  0x20   : > { %s7126_s20 = sshll.u32 %s14293_s15, 3  ;;  %v8357_v38 = vld [vmem:[%s13942_s1 + $0xe8] sm:$0xff]  ;;  %v8339_v40 = vld [vmem:[%s13942_s1 + $0x58] sm:$0xff]  ;;  %v8348_v41 = vld [vmem:[%s13942_s1 + $0xa0] sm:$0xff]  ;;  %s8327_s25 = sshll.u32 %s14293_s15, 4 }
  0x21   : > { %s9345_s24 = scalar_lea.vmem %s13941_s0, %s7126_s20  ;;  %1056 = vmatpush.bf16.msra.mxu0 %v8334_v27  ;;  %v8356_v42 = vld [vmem:[%s13942_s1 + $0xe0] sm:$0xff]  ;;  %v8330_v43 = vld [vmem:[%s13942_s1 + $0x10] sm:$0xff]  ;;  %v8347_v45 = vld [vmem:[%s13942_s1 + $0x98] sm:$0xff]  ;;  %s13859_s28 = scalar_lea.vmem %s13950_s9, %s8327_s25 }
  0x22   : > { %v412_v1 = vld [vmem:[%s9345_s24 + $0x20] sm:$0xff]  ;;  %v410_v2 = vld [vmem:[%s9345_s24 + $0x10] sm:$0xff]  ;;  %v413_v4 = vld [vmem:[%s9345_s24 + $0x28] sm:$0xff]  ;;  %1125 = vmatpush.bf16.msra.mxu1 %v8342_v28  ;;  %1194 = vmatpush.bf16.msra.mxu2 %v8350_v33 }
  0x23   : > { %v408_v3 = vld [vmem:[%s9345_s24] sm:$0xff]  ;;  %445 = vperm.xlu2 %8642, %v412_v1   ;;  %439 = vperm.xlu1 %8641, %v410_v2   ;;  %v411_v5 = vld [vmem:[%s9345_s24 + $0x18] sm:$0xff]  ;;  %v409_v6 = vld [vmem:[%s9345_s24 + $0x8] sm:$0xff]  ;;  %v405_v2 = vlaneseq }
  0x24   : > { %433 = vperm.xlu0 %8640, %v408_v3   ;;  %v416_v7 = vld [vmem:[%s9345_s24 + $0x40] sm:$0xff]  ;;  %v415_v8 = vld [vmem:[%s9345_s24 + $0x38] sm:$0xff]  ;;  %v414_v9 = vld [vmem:[%s9345_s24 + $0x30] sm:$0xff]  ;;  %1263 = vmatpush.bf16.msra.mxu3 %v8358_v34 }
  0x25   : > { %v419_v10 = vld [vmem:[%s9345_s24 + $0x58] sm:$0xff]  ;;  %v418_v11 = vld [vmem:[%s9345_s24 + $0x50] sm:$0xff]  ;;  %v417_v12 = vld [vmem:[%s9345_s24 + $0x48] sm:$0xff]  ;;  %1057 = vmatpush.bf16.msra.mxu0 %v8333_v31  ;;  %v9467_v3 = vand.u32 127, %v405_v2 }
  0x26   : > { %v422_v13 = vld [vmem:[%s9345_s24 + $0x70] sm:$0xff]  ;;  %v421_v14 = vld [vmem:[%s9345_s24 + $0x68] sm:$0xff]  ;;  %v420_v15 = vld [vmem:[%s9345_s24 + $0x60] sm:$0xff]  ;;  %1126 = vmatpush.bf16.msra.mxu1 %v8341_v32  ;;  %1195 = vmatpush.bf16.msra.mxu2 %v8349_v37 }
  0x27   : > { %v425_v16 = vld [vmem:[%s9345_s24 + $0x88] sm:$0xff]  ;;  %v424_v17 = vld [vmem:[%s9345_s24 + $0x80] sm:$0xff]  ;;  %v423_v18 = vld [vmem:[%s9345_s24 + $0x78] sm:$0xff] }
  0x28   : > { %v428_v19 = vld [vmem:[%s9345_s24 + $0xa0] sm:$0xff]  ;;  %v427_v20 = vld [vmem:[%s9345_s24 + $0x98] sm:$0xff]  ;;  %v426_v21 = vld [vmem:[%s9345_s24 + $0x90] sm:$0xff]  ;;  %1264 = vmatpush.bf16.msra.mxu3 %v8357_v38 }
  0x29   : > { %v431_v22 = vld [vmem:[%s9345_s24 + $0xb8] sm:$0xff]  ;;  %v430_v23 = vld [vmem:[%s9345_s24 + $0xb0] sm:$0xff]  ;;  %v429_v24 = vld [vmem:[%s9345_s24 + $0xa8] sm:$0xff]  ;;  %1058 = vmatpush.bf16.msra.mxu0 %v8332_v35 }
  0x2a   : > { %1127 = vmatpush.bf16.msra.mxu1 %v8340_v36  ;;  %v8338_v44 = vld [vmem:[%s13942_s1 + $0x50] sm:$0xff]  ;;  %1196 = vmatpush.bf16.msra.mxu2 %v8348_v41  ;;  %v8355_v46 = vld [vmem:[%s13942_s1 + $0xd8] sm:$0xff]  ;;  %v8329_v47 = vld [vmem:[%s13942_s1 + $0x8] sm:$0xff] }
  0x2b   : > { %448 = vperm.xlu2 %8642, %v413_v4   ;;  %442 = vperm.xlu1 %8641, %v411_v5   ;;  %v8337_v48 = vld [vmem:[%s13942_s1 + $0x48] sm:$0xff]  ;;  %v8346_v49 = vld [vmem:[%s13942_s1 + $0x90] sm:$0xff]  ;;  %v8328_v51 = vld [vmem:[%s13942_s1] sm:$0xff]  ;;  %v9470_v5 = vadd.s32 128, %v9467_v3 }
  0x2c   : > { %436 = vperm.xlu0 %8640, %v409_v6   ;;  %1265 = vmatpush.bf16.msra.mxu3 %v8356_v42  ;;  %v8354_v50 = vld [vmem:[%s13942_s1 + $0xd0] sm:$0xff]  ;;  %v8336_v52 = vld [vmem:[%s13942_s1 + $0x40] sm:$0xff]  ;;  %v8345_v53 = vld [vmem:[%s13942_s1 + $0x88] sm:$0xff] }
  0x2d   : > { %1059 = vmatpush.bf16.msra.mxu0 %v8331_v39  ;;  %v8353_v54 = vld [vmem:[%s13942_s1 + $0xc8] sm:$0xff]  ;;  %v8344_v55 = vld [vmem:[%s13942_s1 + $0x80] sm:$0xff]  ;;  %v8374_v57 = vld [vmem:[#allocation2 + $0x74] sm:$0xf] }
  0x2e   : > { %1128 = vmatpush.bf16.msra.mxu1 %v8339_v40  ;;  %1197 = vmatpush.bf16.msra.mxu2 %v8347_v45  ;;  %v8352_v56 = vld [vmem:[%s13942_s1 + $0xc0] sm:$0xff]  ;;  %v7413_v58 = vld [vmem:[#allocation2 + $0x78] sm:$0xf0]  ;;  %v7411_v60 = vld [vmem:[#allocation2 + $0x70] sm:$0xf] }
  0x2f   : > { %v7416_v59 = vor.u32 %v8374_v57, %v7413_v58  ;;  %v8375_v61 = vld [vmem:[#allocation2 + $0x74] sm:$0xf0]  ;;  %v7475_v62 = vld [vmem:[#allocation2 + $0xf0] sm:$0xf]  ;;  %v7403_v33 = vld [vmem:[#allocation2 + $0x60] sm:$0xf] }
  0x30   : > { %1266 = vmatpush.bf16.msra.mxu3 %v8355_v46  ;;  %v7412_v63 = vor.u32 %v8375_v61, %v7411_v60  ;;  %v8391_v0 = vld [vmem:[#allocation2 + $0xf4] sm:$0xf0]  ;;  %v8373_v34 = vld [vmem:[#allocation2 + $0x64] sm:$0xf0]  ;;  %v7467_v35 = vld [vmem:[#allocation2 + $0xe0] sm:$0xf] }
  0x31   : > { %1060 = vmatpush.bf16.msra.mxu0 %v8330_v43  ;;  %v7476_v1 = vor.u32 %v8391_v0, %v7475_v62  ;;  %v8389_v36 = vld [vmem:[#allocation2 + $0xe4] sm:$0xf0]  ;;  %v7404_v41 = vor.u32 %v8373_v34, %v7403_v33  ;;  %v8370_v62 = vld [vmem:[#allocation2 + $0x54] sm:$0xf]  ;;  %v7461_v33 = vld [vmem:[#allocation2 + $0xd8] sm:$0xf0] }
  0x32   : > { %1129 = vmatpush.bf16.msra.mxu1 %v8338_v44  ;;  %1198 = vmatpush.bf16.msra.mxu2 %v8346_v49  ;;  %v7468_v42 = vor.u32 %v8389_v36, %v7467_v35  ;;  %v8368_v34 = vld [vmem:[#allocation2 + $0x44] sm:$0xf]  ;;  %v7389_v36 = vld [vmem:[#allocation2 + $0x48] sm:$0xf0] }
  0x33   : > { %457 = vperm.xlu2 %8642, %v416_v7   ;;  %454 = vperm.xlu1 %8641, %v415_v8   ;;  %v8390_v7 = vld [vmem:[#allocation2 + $0xf4] sm:$0xf]  ;;  %v7477_v8 = vld [vmem:[#allocation2 + $0xf8] sm:$0xf0] }
  0x34   : > { %451 = vperm.xlu0 %8640, %v414_v9   ;;  %1267 = vmatpush.bf16.msra.mxu3 %v8354_v50  ;;  %v7480_v9 = vor.u32 %v8390_v7, %v7477_v8  ;;  %v8387_v7 = vld [vmem:[#allocation2 + $0xd4] sm:$0xf0] }
  0x35   : > { %1061 = vmatpush.bf16.msra.mxu0 %v8329_v47 }
  0x36   : > { %1130 = vmatpush.bf16.msra.mxu1 %v8337_v48  ;;  %1199 = vmatpush.bf16.msra.mxu2 %v8345_v53 }
  0x38   : > { %1268 = vmatpush.bf16.msra.mxu3 %v8353_v54 }
  0x39   : > { %1062 = vmatpush.bf16.msra.mxu0 %v8328_v51  ;;  %v8388_v51 = vld [vmem:[#allocation2 + $0xe4] sm:$0xf] }
  0x3a   : > { %1131 = vmatpush.bf16.msra.mxu1 %v8336_v52  ;;  %1200 = vmatpush.bf16.msra.mxu2 %v8344_v55  ;;  %v7469_v52 = vld [vmem:[#allocation2 + $0xe8] sm:$0xf0] }
  0x3b   : > { %466 = vperm.xlu2 %8642, %v419_v10   ;;  %463 = vperm.xlu1 %8641, %v418_v11   ;;  %v8372_v10 = vld [vmem:[#allocation2 + $0x64] sm:$0xf]  ;;  %v7405_v11 = vld [vmem:[#allocation2 + $0x68] sm:$0xf0]  ;;  %v7472_v53 = vor.u32 %v8388_v51, %v7469_v52  ;;  %v8385_v51 = vld [vmem:[#allocation2 + $0xc4] sm:$0xf0] }
  0x3c   : > { %460 = vperm.xlu0 %8640, %v417_v12   ;;  %1269 = vmatpush.bf16.msra.mxu3 %v8352_v56  ;;  %v7408_v12 = vor.u32 %v8372_v10, %v7405_v11 }
  0x3d   : > { %1601 = vmatpush.bf16.msrb.mxu0 %v7412_v63  ;;  %v7397_v63 = vld [vmem:[#allocation2 + $0x58] sm:$0xf0] }
  0x3e   : > { %1739 = vmatpush.bf16.msrb.mxu2 %v7416_v59  ;;  %1670 = vmatpush.bf16.msrb.mxu1 %v7476_v1  ;;  %v7400_v0 = vor.u32 %v8370_v62, %v7397_v63  ;;  %v7395_v1 = vld [vmem:[#allocation2 + $0x50] sm:$0xf] }
  0x40   : > { %1808 = vmatpush.bf16.msrb.mxu3 %v7480_v9 }
  0x41   : > { %1602 = vmatpush.bf16.msrb.mxu0 %v7404_v41 }
  0x42   : > { %1740 = vmatpush.bf16.msrb.mxu2 %v7408_v12  ;;  %1671 = vmatpush.bf16.msrb.mxu1 %v7468_v42 }
  0x43   : > { %475 = vperm.xlu2 %8642, %v422_v13   ;;  %472 = vperm.xlu1 %8641, %v421_v14   ;;  %v9225_v14 = vmov 0.0  }
  0x44   : > { %469 = vperm.xlu0 %8640, %v420_v15   ;;  %1809 = vmatpush.bf16.msrb.mxu3 %v7472_v53 }
  0x46   : > { %1741 = vmatpush.bf16.msrb.mxu2 %v7400_v0 }
  0x4b   : > { %484 = vperm.xlu2 %8642, %v425_v16   ;;  %481 = vperm.xlu1 %8641, %v424_v17   ;;  %v9492_v17 = vshrl.u32 %v405_v2, 7  ;;  %v8371_v2 = vld [vmem:[#allocation2 + $0x54] sm:$0xf0] }
  0x4c   : > { %478 = vperm.xlu0 %8640, %v423_v18  }
  0x4d   : > { %vm698_vm7 = vcmp.lt.s32.totalorder %v9492_v17, 7 }
  0x53   : > { %493 = vperm.xlu2 %8642, %v428_v19   ;;  %490 = vperm.xlu1 %8641, %v427_v20  }
  0x54   : > { %487 = vperm.xlu0 %8640, %v426_v21  }
  0x5b   : > { %502 = vperm.xlu2 %8642, %v431_v22   ;;  %499 = vperm.xlu1 %8641, %v430_v23  }
  0x5c   : > { %496 = vperm.xlu0 %8640, %v429_v24  }
  0x7d   : > { %v9531_v40 = vpop.permute.xlu2 %445 }
  0x7e   : > { %vm512_vm9 = vcmp.eq.s32.totalorder %v9467_v3, %v9531_v40  ;;  %vm513_vm10 = vcmp.eq.s32.totalorder %v9470_v5, %v9531_v40 }
  0x7f   : > { %v7137_v43 = vsel %vm512_vm9, 1.0, %v9225_v14  ;;  %v7138_v44 = vsel %vm513_vm10, 1.0, %v9225_v14 }
  0x80   : > { %v656_v47 = vrot.slane %v7137_v43, 1  ;;  %v657_v48 = vrot.slane %v7138_v44, 1 }
  0x85   : > { %v449_v61 = vpop.permute.xlu2 %448 }
  0x86   : > { %vm514_vm15 = vcmp.eq.s32.totalorder %v9467_v3, %v449_v61 }
  0x87   : > { %v7139_v9 = vsel %vm514_vm15, 1.0, %v9225_v14 }
  0x95   : > { %v9472_v6 = vpop.permute.xlu1 %439 }
  0x96   : > { %v434_v4 = vpop.permute.xlu0 %433  ;;  %vm508_vm0 = vcmp.eq.s32.totalorder %v9467_v3, %v9472_v6  ;;  %vm509_vm1 = vcmp.eq.s32.totalorder %v9470_v5, %v9472_v6  ;;  %v7396_v6 = vor.u32 %v8371_v2, %v7395_v1 }
  0x97   : > { %vm504_vm2 = vcmp.eq.s32.totalorder %v9467_v3, %v434_v4  ;;  %vm505_vm3 = vcmp.eq.s32.totalorder %v9470_v5, %v434_v4  ;;  %v9484_v15 = vsel %vm508_vm0, 1.0, %v9225_v14  ;;  %v9490_v16 = vsel %vm509_vm1, 1.0, %v9225_v14  ;;  %v7459_v4 = vld [vmem:[#allocation2 + $0xd0] sm:$0xf] }
  0x98   : > { %v9497_v18 = vsel %vm504_vm2, 1.0, %v9225_v14  ;;  %v9502_v19 = vsel %vm505_vm3, 1.0, %v9225_v14  ;;  %v652_v20 = vrot.slane %v9484_v15, 1  ;;  %v653_v21 = vrot.slane %v9490_v16, 1  ;;  %1603 = vmatpush.bf16.msrb.mxu0 %v7396_v6 }
  0x99   : > { %v648_v27 = vrot.slane %v9497_v18, 1  ;;  %v649_v28 = vrot.slane %v9502_v19, 1  ;;  %v7460_v8 = vor.u32 %v8387_v7, %v7459_v4 }
  0x9b   : > { %1672 = vmatpush.bf16.msrb.mxu1 %v7460_v8 }
  0x9d   : > { %v443_v37 = vpop.permute.xlu1 %442 }
  0x9e   : > { %v437_v13 = vpop.permute.xlu0 %436  ;;  %vm510_vm11 = vcmp.eq.s32.totalorder %v9467_v3, %v443_v37  ;;  %vm511_vm12 = vcmp.eq.s32.totalorder %v9470_v5, %v443_v37  ;;  %v7392_v37 = vor.u32 %v8368_v34, %v7389_v36 }
  0x9f   : > { %vm506_vm4 = vcmp.eq.s32.totalorder %v9467_v3, %v437_v13  ;;  %vm507_vm5 = vcmp.eq.s32.totalorder %v9470_v5, %v437_v13  ;;  %v7135_v45 = vsel %vm510_vm11, 1.0, %v9225_v14  ;;  %v7136_v46 = vsel %vm511_vm12, 1.0, %v9225_v14  ;;  %vm7307_vm13 = vmpackc.low %vm510_vm11, %vm508_vm0 }
  0xa0   : > { %v7131_v22 = vsel %vm506_vm4, 1.0, %v9225_v14  ;;  %v7132_v23 = vsel %vm507_vm5, 1.0, %v9225_v14  ;;  %vm7305_vm6 = vmpackc.low %vm506_vm4, %vm504_vm2  ;;  %v654_v49 = vrot.slane %v7135_v45, 1  ;;  %v655_v50 = vrot.slane %v7136_v46, 1  ;;  %1742 = vmatpush.bf16.msrb.mxu2 %v7392_v37  ;;  %v7387_v46 = vld [vmem:[#allocation2 + $0x40] sm:$0xf] }
  0xa1   : > { %v650_v24 = vrot.slane %v7131_v22, 1  ;;  %v651_v25 = vrot.slane %v7132_v23, 1  ;;  %7306 = vmatmul.msk.bf16.vlgmr.msra.gmra.mxu0 %vm7305_vm6, %v9226_v26  ;;  %vm7329_vm8 = vmpackc.low %vm507_vm5, %vm505_vm3  ;;  %vm515_vm0 = vcmp.eq.s32.totalorder %v9470_v5, %v449_v61  ;;  %v658_v13 = vrot.slane %v7139_v9, 1  ;;  %v7453_v61 = vld [vmem:[#allocation2 + $0xc8] sm:$0xf0] }
  0xa2   : > { %7330 = vmatmul.msk.bf16.vlgmr.msra.gmra.mxu1 %vm7329_vm8, %v9226_v26  ;;  %vm7331_vm14 = vmpackc.low %vm511_vm12, %vm509_vm1  ;;  %v737_v54 = vsel %vm698_vm7, %v654_v49, %v656_v47  ;;  %v739_v55 = vsel %vm698_vm7, %v652_v20, %v654_v49  ;;  %v738_v56 = vsel %vm698_vm7, %v655_v50, %v657_v48  ;;  %v740_v57 = vsel %vm698_vm7, %v653_v21, %v655_v50 }
  0xa3   : > { %v741_v29 = vsel %vm698_vm7, %v650_v24, %v652_v20  ;;  %v743_v30 = vsel %vm698_vm7, %v648_v27, %v650_v24  ;;  %v742_v31 = vsel %vm698_vm7, %v651_v25, %v653_v21  ;;  %v744_v32 = vsel %vm698_vm7, %v649_v28, %v651_v25  ;;  %vm7309_vm3 = vmpackc.low %vm514_vm15, %vm512_vm9 }
  0xa4   : > { %v749_v38 = vpack.c.bf16 %v741_v29, %v743_v30  ;;  %v750_v39 = vpack.c.bf16 %v742_v31, %v744_v32  ;;  %v753_v59 = vpack.c.bf16 %v737_v54, %v739_v55  ;;  %v754_v60 = vpack.c.bf16 %v738_v56, %v740_v57  ;;  %vm7333_vm4 = vmpackc.low %vm515_vm0, %vm513_vm10  ;;  %v9611_v31 = vpop.permute.xlu2 %457  ;;  %v8386_v32 = vld [vmem:[#allocation2 + $0xd4] sm:$0xf] }
  0xa5   : > { %v7140_v10 = vsel %vm515_vm0, 1.0, %v9225_v14  ;;  %v735_v22 = vsel %vm698_vm7, %v656_v47, %v658_v13  ;;  %v455_v25 = vpop.permute.xlu1 %454  ;;  %vm520_vm5 = vcmp.eq.s32.totalorder %v9467_v3, %v9611_v31  ;;  %vm521_vm8 = vcmp.eq.s32.totalorder %v9470_v5, %v9611_v31  ;;  %v8369_v47 = vld [vmem:[#allocation2 + $0x44] sm:$0xf0] }
  0xa6   : > { %1201 = vmatmul.bf16.vlgmr.msra.gmra.mxu2 %v749_v38  ;;  %1270 = vmatmul.bf16.vlgmr.msra.gmra.mxu3 %v750_v39  ;;  %v9569_v58 = vpop.permute.xlu0 %451  ;;  %v659_v15 = vrot.slane %v7140_v10, 1  ;;  %vm518_vm6 = vcmp.eq.s32.totalorder %v9467_v3, %v455_v25  ;;  %vm519_vm9 = vcmp.eq.s32.totalorder %v9470_v5, %v455_v25  ;;  %v7464_v35 = vor.u32 %v8386_v32, %v7461_v33  ;;  %v7443_v25 = vld [vmem:[#allocation2 + $0xb0] sm:$0xf] }
  0xa7   : > { %vm516_vm1 = vcmp.eq.s32.totalorder %v9467_v3, %v9569_v58  ;;  %vm517_vm2 = vcmp.eq.s32.totalorder %v9470_v5, %v9569_v58  ;;  %v7145_v38 = vsel %vm520_vm5, 1.0, %v9225_v14  ;;  %v7143_v39 = vsel %vm518_vm6, 1.0, %v9225_v14 }
  0xa8   : > { %v7141_v11 = vsel %vm516_vm1, 1.0, %v9225_v14  ;;  %v7142_v12 = vsel %vm517_vm2, 1.0, %v9225_v14  ;;  %v736_v24 = vsel %vm698_vm7, %v657_v48, %v659_v15  ;;  %1810 = vmatpush.bf16.msrb.mxu3 %v7464_v35  ;;  %v7146_v40 = vsel %vm521_vm8, 1.0, %v9225_v14  ;;  %vm7311_vm10 = vmpackc.low %vm518_vm6, %vm516_vm1  ;;  %v7451_v48 = vld [vmem:[#allocation2 + $0xc0] sm:$0xf] }
  0xa9   : > { %v660_v16 = vrot.slane %v7141_v11, 1  ;;  %v661_v20 = vrot.slane %v7142_v12, 1  ;;  %v7144_v41 = vsel %vm519_vm9, 1.0, %v9225_v14  ;;  %v664_v42 = vrot.slane %v7145_v38, 1  ;;  %vm7335_vm11 = vmpackc.low %vm519_vm9, %vm517_vm2 }
  0xaa   : > { %v662_v43 = vrot.slane %v7143_v39, 1  ;;  %v665_v44 = vrot.slane %v7146_v40, 1  ;;  %v663_v45 = vrot.slane %v7144_v41, 1  ;;  %v7388_v50 = vor.u32 %v8369_v47, %v7387_v46 }
  0xab   : > { %v733_v21 = vsel %vm698_vm7, %v658_v13, %v660_v16  ;;  %v734_v23 = vsel %vm698_vm7, %v659_v15, %v661_v20  ;;  %v7452_v55 = vor.u32 %v8385_v51, %v7451_v48  ;;  %v8382_v48 = vld [vmem:[#allocation2 + $0xb4] sm:$0xf] }
  0xac   : > { %v757_v29 = vpack.c.bf16 %v733_v21, %v735_v22  ;;  %v758_v30 = vpack.c.bf16 %v734_v23, %v736_v24  ;;  %v729_v49 = vsel %vm698_vm7, %v662_v43, %v664_v42  ;;  %v731_v52 = vsel %vm698_vm7, %v660_v16, %v662_v43  ;;  %1604 = vmatpush.bf16.msrb.mxu0 %v7388_v50  ;;  %v7381_v21 = vld [vmem:[#allocation2 + $0x38] sm:$0xf0]  ;;  %v7379_v22 = vld [vmem:[#allocation2 + $0x30] sm:$0xf]  ;;  %v8367_v24 = vld [vmem:[#allocation2 + $0x34] sm:$0xf0] }
  0xad   : > { %v730_v53 = vsel %vm698_vm7, %v663_v45, %v665_v44  ;;  %v732_v54 = vsel %vm698_vm7, %v661_v20, %v663_v45  ;;  %v464_v56 = vpop.permute.xlu1 %463  ;;  %1673 = vmatpush.bf16.msrb.mxu1 %v7452_v55  ;;  %v761_v58 = vpack.c.bf16 %v729_v49, %v731_v52  ;;  %v8366_v20 = vld [vmem:[#allocation2 + $0x34] sm:$0xf]  ;;  %v7380_v31 = vor.u32 %v8367_v24, %v7379_v22  ;;  %v7445_v49 = vld [vmem:[#allocation2 + $0xb8] sm:$0xf0] }
  0xae   : > { %v461_v57 = vpop.permute.xlu0 %460  ;;  %vm524_vm12 = vcmp.eq.s32.totalorder %v9467_v3, %v464_v56  ;;  %v7384_v23 = vor.u32 %v8366_v20, %v7381_v21  ;;  %v7448_v51 = vor.u32 %v8382_v48, %v7445_v49 }
  0xaf   : > { %vm523_vm15 = vcmp.eq.s32.totalorder %v9470_v5, %v461_v57  ;;  %v7149_v63 = vsel %vm524_vm12, 1.0, %v9225_v14 }
  0xb0   : > { %v7148_v2 = vsel %vm523_vm15, 1.0, %v9225_v14  ;;  %v668_v4 = vrot.slane %v7149_v63, 1  ;;  %vm7337_vm1 = vmpackc.low %vm523_vm15, %vm521_vm8  ;;  %1743 = vmatpush.bf16.msrb.mxu2 %v7384_v23  ;;  %1605 = vmatpush.bf16.msrb.mxu0 %v7380_v31  ;;  %v7371_v63 = vld [vmem:[#allocation2 + $0x20] sm:$0xf]  ;;  %v7437_v31 = vld [vmem:[#allocation2 + $0xa8] sm:$0xf0] }
  0xb1   : > { %7308 = vmatmul.msk.bf16.gmra.mxu0 %vm7307_vm13, %v9226_v26  ;;  %vm525_vm13 = vcmp.eq.s32.totalorder %v9470_v5, %v464_v56  ;;  %v667_v8 = vrot.slane %v7148_v2, 1 }
  0xb2   : > { %7332 = vmatmul.msk.bf16.gmra.mxu1 %vm7331_vm14, %v9226_v26  ;;  %vm522_vm14 = vcmp.eq.s32.totalorder %v9467_v3, %v461_v57  ;;  %v7150_v0 = vsel %vm525_vm13, 1.0, %v9225_v14 }
  0xb3   : > { %v7147_v1 = vsel %vm522_vm14, 1.0, %v9225_v14  ;;  %v669_v6 = vrot.slane %v7150_v0, 1  ;;  %vm7313_vm0 = vmpackc.low %vm522_vm14, %vm520_vm5  ;;  %v728_v12 = vsel %vm698_vm7, %v665_v44, %v667_v8  ;;  %v8365_v0 = vld [vmem:[#allocation2 + $0x24] sm:$0xf0] }
  0xb4   : > { %v666_v7 = vrot.slane %v7147_v1, 1  ;;  %v7435_v1 = vld [vmem:[#allocation2 + $0xa0] sm:$0xf] }
  0xb5   : > { %v726_v11 = vsel %vm698_vm7, %v667_v8, %v669_v6  ;;  %v473_v43 = vpop.permute.xlu1 %472 }
  0xb6   : > { %1206 = vmatmul.bf16.gmra.mxu2 %v753_v59  ;;  %1275 = vmatmul.bf16.gmra.mxu3 %v754_v60  ;;  %v762_v59 = vpack.c.bf16 %v730_v53, %v732_v54  ;;  %v8384_v60 = vld [vmem:[#allocation2 + $0xc4] sm:$0xf]  ;;  %v725_v9 = vsel %vm698_vm7, %v666_v7, %v668_v4  ;;  %v727_v10 = vsel %vm698_vm7, %v664_v42, %v666_v7  ;;  %v470_v13 = vpop.permute.xlu0 %469 }
  0xb7   : > { %v7456_v62 = vor.u32 %v8384_v60, %v7453_v61  ;;  %v765_v15 = vpack.c.bf16 %v725_v9, %v727_v10  ;;  %v766_v16 = vpack.c.bf16 %v726_v11, %v728_v12  ;;  %vm528_vm2 = vcmp.eq.s32.totalorder %v9467_v3, %v470_v13  ;;  %v8364_v60 = vld [vmem:[#allocation2 + $0x24] sm:$0xf]  ;;  %v7373_v61 = vld [vmem:[#allocation2 + $0x28] sm:$0xf0] }
  0xb8   : > { %v7153_v33 = vsel %vm528_vm2, 1.0, %v9225_v14  ;;  %vm530_vm9 = vcmp.eq.s32.totalorder %v9467_v3, %v473_v43 }
  0xb9   : > { %1811 = vmatpush.bf16.msrb.mxu3 %v7456_v62  ;;  %v672_v37 = vrot.slane %v7153_v33, 1  ;;  %v7155_v52 = vsel %vm530_vm9, 1.0, %v9225_v14  ;;  %v7376_v62 = vor.u32 %v8364_v60, %v7373_v61  ;;  %v8379_v60 = vld [vmem:[#allocation2 + $0x94] sm:$0xf0] }
  0xba   : > { %v674_v56 = vrot.slane %v7155_v52, 1 }
  0xbb   : > { %1744 = vmatpush.bf16.msrb.mxu2 %v7376_v62 }
  0xbc   : > { %v719_v7 = vsel %vm698_vm7, %v672_v37, %v674_v56 }
  0xbd   : > { %1812 = vmatpush.bf16.msrb.mxu3 %v7448_v51  ;;  %v482_v11 = vpop.permute.xlu1 %481 }
  0xbe   : > { %v479_v12 = vpop.permute.xlu0 %478  ;;  %vm536_vm15 = vcmp.eq.s32.totalorder %v9467_v3, %v482_v11 }
  0xc1   : > { %7310 = vmatmul.msk.bf16.gmra.mxu0 %vm7309_vm3, %v9226_v26  ;;  %vm529_vm3 = vcmp.eq.s32.totalorder %v9470_v5, %v470_v13 }
  0xc2   : > { %7334 = vmatmul.msk.bf16.gmra.mxu1 %vm7333_vm4, %v9226_v26  ;;  %v7154_v34 = vsel %vm529_vm3, 1.0, %v9225_v14 }
  0xc3   : > { %v673_v38 = vrot.slane %v7154_v34, 1 }
  0xc6   : > { %1211 = vmatmul.bf16.gmra.mxu2 %v757_v29  ;;  %1280 = vmatmul.bf16.gmra.mxu3 %v758_v30  ;;  %v8383_v29 = vld [vmem:[#allocation2 + $0xb4] sm:$0xf0]  ;;  %v467_v30 = vpop.permute.xlu2 %466 }
  0xc7   : > { %v7444_v32 = vor.u32 %v8383_v29, %v7443_v25  ;;  %vm526_vm4 = vcmp.eq.s32.totalorder %v9467_v3, %v467_v30  ;;  %vm527_vm5 = vcmp.eq.s32.totalorder %v9470_v5, %v467_v30  ;;  %v8380_v30 = vld [vmem:[#allocation2 + $0xa4] sm:$0xf] }
  0xc8   : > { %v7151_v35 = vsel %vm526_vm4, 1.0, %v9225_v14  ;;  %v7152_v36 = vsel %vm527_vm5, 1.0, %v9225_v14  ;;  %vm7315_vm6 = vmpackc.low %vm526_vm4, %vm524_vm12 }
  0xc9   : > { %1674 = vmatpush.bf16.msrb.mxu1 %v7444_v32  ;;  %vm7339_vm8 = vmpackc.low %vm527_vm5, %vm525_vm13  ;;  %v670_v39 = vrot.slane %v7151_v35, 1  ;;  %v671_v40 = vrot.slane %v7152_v36, 1  ;;  %v7440_v32 = vor.u32 %v8380_v30, %v7437_v31 }
  0xca   : > { %vm7317_vm13 = vmpackc.low %vm530_vm9, %vm528_vm2  ;;  %vm535_vm2 = vcmp.eq.s32.totalorder %v9470_v5, %v479_v12 }
  0xcb   : > { %v721_v41 = vsel %vm698_vm7, %v670_v39, %v672_v37  ;;  %v722_v42 = vsel %vm698_vm7, %v671_v40, %v673_v38  ;;  %v723_v44 = vsel %vm698_vm7, %v668_v4, %v670_v39  ;;  %v724_v45 = vsel %vm698_vm7, %v669_v6, %v671_v40  ;;  %v8381_v6 = vld [vmem:[#allocation2 + $0xa4] sm:$0xf0]  ;;  %1813 = vmatpush.bf16.msrb.mxu3 %v7440_v32  ;;  %v9767_v37 = vpop.permute.xlu0 %487 }
  0xcc   : > { %v769_v46 = vpack.c.bf16 %v721_v41, %v723_v44  ;;  %v770_v47 = vpack.c.bf16 %v722_v42, %v724_v45  ;;  %v7372_v4 = vor.u32 %v8365_v0, %v7371_v63  ;;  %v7436_v10 = vor.u32 %v8381_v6, %v7435_v1  ;;  %v8362_v41 = vld [vmem:[#allocation2 + $0x14] sm:$0xf]  ;;  %v7365_v42 = vld [vmem:[#allocation2 + $0x18] sm:$0xf0]  ;;  %v491_v1 = vpop.permute.xlu1 %490 }
  0xcd   : > { %v7160_v22 = vsel %vm535_vm2, 1.0, %v9225_v14  ;;  %vm540_vm5 = vcmp.eq.s32.totalorder %v9467_v3, %v9767_v37 }
  0xce   : > { %v476_v50 = vpop.permute.xlu2 %475  ;;  %1606 = vmatpush.bf16.msrb.mxu0 %v7372_v4  ;;  %1675 = vmatpush.bf16.msrb.mxu1 %v7436_v10  ;;  %v679_v29 = vrot.slane %v7160_v22, 1  ;;  %v9779_v44 = vsel %vm540_vm5, 1.0, %v9225_v14 }
  0xcf   : > { %vm533_vm12 = vcmp.eq.s32.totalorder %v9470_v5, %v476_v50 }
  0xd0   : > { %v7158_v55 = vsel %vm533_vm12, 1.0, %v9225_v14  ;;  %vm7343_vm4 = vmpackc.low %vm535_vm2, %vm533_vm12  ;;  %vm542_vm12 = vcmp.eq.s32.totalorder %v9467_v3, %v491_v1 }
  0xd1   : > { %7312 = vmatmul.msk.bf16.gmra.mxu0 %vm7311_vm10, %v9226_v26  ;;  %vm531_vm10 = vcmp.eq.s32.totalorder %v9470_v5, %v473_v43  ;;  %v7368_v43 = vor.u32 %v8362_v41, %v7365_v42 }
  0xd2   : > { %7336 = vmatmul.msk.bf16.gmra.mxu1 %vm7335_vm11, %v9226_v26  ;;  %vm532_vm11 = vcmp.eq.s32.totalorder %v9467_v3, %v476_v50  ;;  %v7156_v53 = vsel %vm531_vm10, 1.0, %v9225_v14  ;;  %vm7341_vm14 = vmpackc.low %vm531_vm10, %vm529_vm3  ;;  %v684_v50 = vrot.slane %v9779_v44, 1 }
  0xd3   : > { %v7157_v54 = vsel %vm532_vm11, 1.0, %v9225_v14  ;;  %v675_v57 = vrot.slane %v7156_v53, 1  ;;  %1745 = vmatpush.bf16.msrb.mxu2 %v7368_v43  ;;  %v497_v41 = vpop.permute.xlu0 %496 }
  0xd5   : > { %v720_v9 = vsel %vm698_vm7, %v673_v38, %v675_v57 }
  0xd6   : > { %1216 = vmatmul.bf16.gmra.mxu2 %v761_v58  ;;  %1285 = vmatmul.bf16.gmra.mxu3 %v762_v59  ;;  %v676_v58 = vrot.slane %v7157_v54, 1  ;;  %v677_v59 = vrot.slane %v7158_v55, 1  ;;  %v485_v40 = vpop.permute.xlu2 %484  ;;  %v7363_v54 = vld [vmem:[#allocation2 + $0x10] sm:$0xf]  ;;  %v8363_v55 = vld [vmem:[#allocation2 + $0x14] sm:$0xf0] }
  0xd7   : > { %vm539_vm9 = vcmp.eq.s32.totalorder %v9470_v5, %v485_v40 }
  0xd8   : > { %v717_v2 = vsel %vm698_vm7, %v674_v56, %v676_v58  ;;  %v718_v8 = vsel %vm698_vm7, %v675_v57, %v677_v59  ;;  %v716_v36 = vsel %vm698_vm7, %v677_v59, %v679_v29  ;;  %v7164_v48 = vsel %vm539_vm9, 1.0, %v9225_v14  ;;  %v7427_v56 = vld [vmem:[#allocation2 + $0x90] sm:$0xf] }
  0xd9   : > { %v773_v13 = vpack.c.bf16 %v717_v2, %v719_v7  ;;  %v683_v53 = vrot.slane %v7164_v48, 1  ;;  %v7364_v59 = vor.u32 %v8363_v55, %v7363_v54  ;;  %v7428_v61 = vor.u32 %v8379_v60, %v7427_v56 }
  0xdb   : > { %1607 = vmatpush.bf16.msrb.mxu0 %v7364_v59  ;;  %1676 = vmatpush.bf16.msrb.mxu1 %v7428_v61 }
  0xde   : > { %v9813_v7 = vpop.permute.xlu2 %493 }
  0xe1   : > { %7314 = vmatmul.msk.bf16.gmra.mxu0 %vm7313_vm0, %v9226_v26  ;;  %vm537_vm0 = vcmp.eq.s32.totalorder %v9470_v5, %v482_v11 }
  0xe2   : > { %7338 = vmatmul.msk.bf16.gmra.mxu1 %vm7337_vm1, %v9226_v26  ;;  %vm534_vm1 = vcmp.eq.s32.totalorder %v9467_v3, %v479_v12  ;;  %v7162_v20 = vsel %vm537_vm0, 1.0, %v9225_v14 }
  0xe3   : > { %v7159_v21 = vsel %vm534_vm1, 1.0, %v9225_v14  ;;  %v681_v24 = vrot.slane %v7162_v20, 1  ;;  %vm7319_vm3 = vmpackc.low %vm534_vm1, %vm532_vm11 }
  0xe4   : > { %v678_v25 = vrot.slane %v7159_v21, 1  ;;  %vm7345_vm11 = vmpackc.low %vm539_vm9, %vm537_vm0 }
  0xe5   : > { %v714_v35 = vsel %vm698_vm7, %v679_v29, %v681_v24  ;;  %v712_v0 = vsel %vm698_vm7, %v681_v24, %v683_v53  ;;  %vm7323_vm0 = vmpackc.low %vm542_vm12, %vm540_vm5  ;;  %v7357_v29 = vld [vmem:[#allocation2 + $0x8] sm:$0xf0]  ;;  %vm547_vm5 = vcmp.eq.s32.totalorder %v9470_v5, %v497_v41 }
  0xe6   : > { %1221 = vmatmul.bf16.gmra.mxu2 %v765_v15  ;;  %1290 = vmatmul.bf16.gmra.mxu3 %v766_v16  ;;  %v774_v15 = vpack.c.bf16 %v718_v8, %v720_v9  ;;  %v7161_v16 = vsel %vm536_vm15, 1.0, %v9225_v14  ;;  %v715_v34 = vsel %vm698_vm7, %v676_v58, %v678_v25  ;;  %v778_v39 = vpack.c.bf16 %v714_v35, %v716_v36  ;;  %v8378_v8 = vld [vmem:[#allocation2 + $0x94] sm:$0xf]  ;;  %v7429_v9 = vld [vmem:[#allocation2 + $0x98] sm:$0xf0] }
  0xe7   : > { %v680_v23 = vrot.slane %v7161_v16, 1  ;;  %v7432_v10 = vor.u32 %v8378_v8, %v7429_v9 }
  0xe9   : > { %v713_v33 = vsel %vm698_vm7, %v678_v25, %v680_v23  ;;  %1814 = vmatpush.bf16.msrb.mxu3 %v7432_v10  ;;  %v8360_v25 = vld [vmem:[#allocation2 + $0x4] sm:$0xf] }
  0xea   : > { %v777_v38 = vpack.c.bf16 %v713_v33, %v715_v34  ;;  %v7360_v32 = vor.u32 %v8360_v25, %v7357_v29  ;;  %v503_v29 = vpop.permute.xlu2 %502 }
  0xeb   : > { %vm550_vm9 = vcmp.eq.s32.totalorder %v9467_v3, %v503_v29 }
  0xec   : > { %1746 = vmatpush.bf16.msrb.mxu2 %v7360_v32  ;;  %v9942_v32 = vld [vmem:[%s13943_s2] ss:$0 sm:$0xff] }
  0xf1   : > { %7316 = vmatmul.msk.bf16.gmra.mxu0 %vm7315_vm6, %v9226_v26  ;;  %vm541_vm6 = vcmp.eq.s32.totalorder %v9470_v5, %v9767_v37 }
  0xf2   : > { %7340 = vmatmul.msk.bf16.gmra.mxu1 %vm7339_vm8, %v9226_v26  ;;  %vm538_vm8 = vcmp.eq.s32.totalorder %v9467_v3, %v485_v40  ;;  %v9785_v45 = vsel %vm541_vm6, 1.0, %v9225_v14 }
  0xf3   : > { %v685_v51 = vrot.slane %v9785_v45, 1  ;;  %vm7321_vm10 = vmpackc.low %vm538_vm8, %vm536_vm15  ;;  %vm545_vm15 = vcmp.eq.s32.totalorder %v9470_v5, %v9813_v7  ;;  %v7355_v45 = vld [vmem:[#allocation2] sm:$0xf] }
  0xf4   : > { %v9843_v21 = vsel %vm545_vm15, 1.0, %v9225_v14 }
  0xf5   : > { %v710_v58 = vsel %vm698_vm7, %v683_v53, %v685_v51  ;;  %v689_v31 = vrot.slane %v9843_v21, 1 }
  0xf6   : > { %1226 = vmatmul.bf16.gmra.mxu2 %v769_v46  ;;  %1295 = vmatmul.bf16.gmra.mxu3 %v770_v47  ;;  %v7163_v47 = vsel %vm538_vm8, 1.0, %v9225_v14  ;;  %v782_v6 = vpack.c.bf16 %v710_v58, %v712_v0  ;;  %v7172_v58 = vsel %vm547_vm5, 1.0, %v9225_v14  ;;  %vm7349_vm8 = vmpackc.low %vm547_vm5, %vm545_vm15 }
  0xf7   : > { %v682_v52 = vrot.slane %v7163_v47, 1  ;;  %v8361_v47 = vld [vmem:[#allocation2 + $0x4] sm:$0xf0] }
  0xf8   : > { %v7356_v48 = vor.u32 %v8361_v47, %v7355_v45 }
  0xf9   : > { %v709_v57 = vsel %vm698_vm7, %v682_v52, %v684_v50  ;;  %v711_v63 = vsel %vm698_vm7, %v680_v23, %v682_v52 }
  0xfa   : > { %v781_v4 = vpack.c.bf16 %v709_v57, %v711_v63  ;;  %1608 = vmatpush.bf16.msrb.mxu0 %v7356_v48 }
 0x101   : > { %7318 = vmatmul.msk.bf16.gmra.mxu0 %vm7317_vm13, %v9226_v26  ;;  %vm543_vm13 = vcmp.eq.s32.totalorder %v9470_v5, %v491_v1  ;;  %v691_v1 = vrot.slane %v7172_v58, 1 }
 0x102   : > { %7342 = vmatmul.msk.bf16.gmra.mxu1 %vm7341_vm14, %v9226_v26  ;;  %vm544_vm14 = vcmp.eq.s32.totalorder %v9467_v3, %v9813_v7  ;;  %vm7347_vm1 = vmpackc.low %vm543_vm13, %vm541_vm6 }
 0x103   : > { %v9837_v20 = vsel %vm544_vm14, 1.0, %v9225_v14 }
 0x104   : > { %v688_v30 = vrot.slane %v9837_v20, 1  ;;  %v704_v20 = vsel %vm698_vm7, %v689_v31, %v691_v1 }
 0x106   : > { %1231 = vmatmul.bf16.gmra.mxu2 %v773_v13  ;;  %1300 = vmatmul.bf16.gmra.mxu3 %v774_v15  ;;  %v7167_v13 = vsel %vm542_vm12, 1.0, %v9225_v14  ;;  %v7168_v15 = vsel %vm543_vm13, 1.0, %v9225_v14 }
 0x107   : > { %v686_v23 = vrot.slane %v7167_v13, 1  ;;  %v687_v24 = vrot.slane %v7168_v15, 1 }
 0x109   : > { %v705_v35 = vsel %vm698_vm7, %v686_v23, %v688_v30  ;;  %v707_v36 = vsel %vm698_vm7, %v684_v50, %v686_v23  ;;  %v706_v37 = vsel %vm698_vm7, %v687_v24, %v689_v31  ;;  %v7419_v50 = vld [vmem:[#allocation2 + $0x80] sm:$0xf] }
 0x10a   : > { %v785_v43 = vpack.c.bf16 %v705_v35, %v707_v36  ;;  %v8415_v35 = vld [vmem:[#allocation4 + $0xb8] sm:$0xf0] }
 0x111   : > { %7320 = vmatmul.msk.bf16.gmra.mxu0 %vm7319_vm3, %v9226_v26 }
 0x112   : > { %7344 = vmatmul.msk.bf16.gmra.mxu1 %vm7343_vm4, %v9226_v26  ;;  %vm546_vm4 = vcmp.eq.s32.totalorder %v9467_v3, %v497_v41 }
 0x113   : > { %v7171_v57 = vsel %vm546_vm4, 1.0, %v9225_v14  ;;  %vm7325_vm6 = vmpackc.low %vm546_vm4, %vm544_vm14 }
 0x114   : > { %v690_v0 = vrot.slane %v7171_v57, 1 }
 0x116   : > { %1236 = vmatmul.bf16.gmra.mxu2 %v777_v38  ;;  %1305 = vmatmul.bf16.gmra.mxu3 %v778_v39  ;;  %v708_v38 = vsel %vm698_vm7, %v685_v51, %v687_v24  ;;  %v9873_v39 = vpop.permute.xlu1 %499  ;;  %v8377_v51 = vld [vmem:[#allocation2 + $0x84] sm:$0xf0]  ;;  %v703_v7 = vsel %vm698_vm7, %v688_v30, %v690_v0  ;;  %v7599_v30 = vld [vmem:[#allocation4 + $0xb0] sm:$0xf] }
 0x117   : > { %v786_v44 = vpack.c.bf16 %v706_v37, %v708_v38  ;;  %vm548_vm2 = vcmp.eq.s32.totalorder %v9467_v3, %v9873_v39  ;;  %vm549_vm3 = vcmp.eq.s32.totalorder %v9470_v5, %v9873_v39  ;;  %v7420_v52 = vor.u32 %v8377_v51, %v7419_v50  ;;  %v8414_v51 = vld [vmem:[#allocation4 + $0xb0] sm:$0xf0] }
 0x118   : > { %v9891_v55 = vsel %vm548_vm2, 1.0, %v9225_v14  ;;  %v9897_v56 = vsel %vm549_vm3, 1.0, %v9225_v14  ;;  %v7600_v36 = vor.u32 %v8415_v35, %v7599_v30  ;;  %v8412_v30 = vld [vmem:[#allocation4 + $0xa0] sm:$0xf0] }
 0x119   : > { %1677 = vmatpush.bf16.msrb.mxu1 %v7420_v52  ;;  %v692_v61 = vrot.slane %v9891_v55, 1  ;;  %v693_v63 = vrot.slane %v9897_v56, 1  ;;  %v8413_v55 = vld [vmem:[#allocation4 + $0xac] sm:$0xf]  ;;  %v7593_v56 = vld [vmem:[#allocation4 + $0xb4] sm:$0xf0] }
 0x11a   : > { %2699 = vmatpush.bf16.msra.mxu2 %v7600_v36 }
 0x11b   : > { %v701_v13 = vsel %vm698_vm7, %v690_v0, %v692_v61  ;;  %v702_v15 = vsel %vm698_vm7, %v691_v1, %v693_v63 }
 0x11c   : > { %v789_v24 = vpack.c.bf16 %v701_v13, %v703_v7  ;;  %v790_v25 = vpack.c.bf16 %v702_v15, %v704_v20 }
 0x11e   : > { %v9787_v46 = vpop.f32.mrf.mxu0 }
 0x11f   : > { %v9791_v49 = vpop.f32.mrf.mxu1 }
 0x121   : > { %7322 = vmatmul.msk.bf16.gmra.mxu0 %vm7321_vm10, %v9226_v26  ;;  %vm551_vm10 = vcmp.eq.s32.totalorder %v9470_v5, %v503_v29  ;;  %v7596_v5 = vor.u32 %v8413_v55, %v7593_v56  ;;  %v7587_v29 = vld [vmem:[#allocation4 + $0x98] sm:$0xf] }
 0x122   : > { %7346 = vmatmul.msk.bf16.gmra.mxu1 %vm7345_vm11, %v9226_v26  ;;  %v7176_v45 = vsel %vm551_vm10, 1.0, %v9225_v14  ;;  %vm7327_vm11 = vmpackc.low %vm550_vm9, %vm548_vm2  ;;  %v7588_v35 = vor.u32 %v8412_v30, %v7587_v29  ;;  %v7567_v29 = vld [vmem:[#allocation4 + $0x78] sm:$0xf]  ;;  %v8408_v30 = vld [vmem:[#allocation4 + $0x80] sm:$0xf0] }
 0x123   : > { %vm7351_vm12 = vmpackc.low %vm551_vm10, %vm549_vm3  ;;  %v695_v52 = vrot.slane %v7176_v45, 1  ;;  %2630 = vmatpush.bf16.msra.mxu1 %v7596_v5 }
 0x124   : > { %2700 = vmatpush.bf16.msra.mxu2 %v7588_v35  ;;  %v7568_v35 = vor.u32 %v8408_v30, %v7567_v29 }
 0x125   : > { %v700_v58 = vsel %vm698_vm7, %v693_v63, %v695_v52 }
 0x126   : > { %v9805_v62 = vpop.f32.mrf.mxu0  ;;  %1241 = vmatmul.bf16.gmra.mxu2 %v781_v4  ;;  %1310 = vmatmul.bf16.gmra.mxu3 %v782_v6  ;;  %v8376_v4 = vld [vmem:[#allocation2 + $0x84] sm:$0xf]  ;;  %v7421_v6 = vld [vmem:[#allocation2 + $0x88] sm:$0xf0] }
 0x127   : > { %v9811_v2 = vpop.f32.mrf.mxu1  ;;  %v7424_v8 = vor.u32 %v8376_v4, %v7421_v6  ;;  %v1067_v41 = vadd.f32 %v9942_v32, %v9805_v62 }
 0x129   : > { %v9821_v11 = vpop.f32.mrf.mxu2  ;;  %v9823_v12 = vpop.f32.mrf.mxu3  ;;  %1815 = vmatpush.bf16.msrb.mxu3 %v7424_v8  ;;  %v1136_v62 = vadd.f32 %v9811_v2, %v1067_v41 }
 0x12e   : > { %v9831_v16 = vpop.f32.mrf.mxu0 }
 0x12f   : > { %v9845_v22 = vpop.f32.mrf.mxu1  ;;  %v1070_v31 = vadd.f32 %v9942_v32, %v9831_v16  ;;  %v1065_v16 = vadd.f32 %v9942_v32, %v9787_v46 }
 0x131   : > { %7324 = vmatmul.msk.bf16.gmra.mxu0 %vm7323_vm0, %v9226_v26  ;;  %v9861_v33 = vpop.f32.mrf.mxu2  ;;  %v9863_v34 = vpop.f32.mrf.mxu3  ;;  %v1139_v47 = vadd.f32 %v9845_v22, %v1070_v31  ;;  %v1134_v3 = vadd.f32 %v9791_v49, %v1065_v16  ;;  %v7579_v16 = vld [vmem:[#allocation4 + $0x90] sm:$0xf] }
 0x132   : > { %7348 = vmatmul.msk.bf16.gmra.mxu1 %vm7347_vm1, %v9226_v26  ;;  %v1205_v57 = vadd.f32 %v9861_v33, %v1136_v62 }
 0x134   : > { %v1274_v63 = vadd.f32 %v9863_v34, %v1205_v57 }
 0x136   : > { %v9875_v40 = vpop.f32.mrf.mxu0  ;;  %1246 = vmatmul.bf16.gmra.mxu2 %v785_v43  ;;  %1315 = vmatmul.bf16.gmra.mxu3 %v786_v44  ;;  %v7175_v44 = vsel %vm550_vm9, 1.0, %v9225_v14  ;;  %v7591_v14 = vld [vmem:[#allocation4 + $0xa8] sm:$0xf]  ;;  %v1332_v18 = vrot.slane %v1274_v63, 1 }
 0x137   : > { %v9877_v42 = vpop.f32.mrf.mxu1  ;;  %v694_v46 = vrot.slane %v7175_v44, 1  ;;  %v7592_v22 = vor.u32 %v8414_v51, %v7591_v14  ;;  %v1072_v34 = vadd.f32 %v9942_v32, %v9875_v40 }
 0x139   : > { %v1207_v53 = vpop.f32.mrf.mxu2  ;;  %v9885_v54 = vpop.f32.mrf.mxu3  ;;  %2561 = vmatpush.bf16.msra.mxu0 %v7592_v22  ;;  %v745_v33 = vsel %vm698_vm7, %v694_v46, %v648_v27 }
 0x13a   : > { %v1208_v50 = vadd.f32 %v1207_v53, %v1139_v47  ;;  %v699_v53 = vsel %vm698_vm7, %v692_v61, %v694_v46  ;;  %v746_v61 = vsel %vm698_vm7, %v695_v52, %v649_v28  ;;  %v8411_v47 = vld [vmem:[#allocation4 + $0x98] sm:$0xf0] }
 0x13b   : > { %v7580_v62 = vor.u32 %v8411_v47, %v7579_v16 }
 0x13c   : > { %v9982_v0 = vadd.f32 %v9885_v54, %v1208_v50  ;;  %v794_v54 = vpack.c.bf16 %v746_v61, %v700_v58  ;;  %v7581_v50 = vld [vmem:[#allocation4 + $0x9c] sm:$0xf0] }
 0x13d   : > { %2562 = vmatpush.bf16.msra.mxu0 %v7580_v62 }
 0x13e   : > { %v9905_v59 = vpop.f32.mrf.mxu0  ;;  %v1333_v6 = vrot.slane %v9982_v0, 1 }
 0x13f   : > { %v9907_v60 = vpop.f32.mrf.mxu1  ;;  %v1075_v19 = vadd.f32 %v9942_v32, %v9905_v59 }
 0x140   : > { %v10008_v13 = vsel %vm698_vm7, %v1332_v18, %v1333_v6 }
 0x141   : > { %7326 = vmatmul.msk.bf16.gmra.mxu0 %vm7325_vm6, %v9226_v26  ;;  %v9923_v9 = vpop.f32.mrf.mxu2  ;;  %v9925_v10 = vpop.f32.mrf.mxu3  ;;  %v1144_v15 = vadd.f32 %v9907_v60, %v1075_v19 }
 0x142   : > { %7350 = vmatmul.msk.bf16.gmra.mxu1 %vm7349_vm8, %v9226_v26  ;;  %2563 = vmatpush.bf16.msra.mxu0 %v7568_v35 }
 0x146   : > { %v9935_v21 = vpop.f32.mrf.mxu0  ;;  %1251 = vmatmul.bf16.gmra.mxu2 %v789_v24  ;;  %1320 = vmatmul.bf16.gmra.mxu3 %v790_v25  ;;  %v1141_v24 = vadd.f32 %v9877_v42, %v1072_v34 }
 0x147   : > { %v9937_v23 = vpop.f32.mrf.mxu1 }
 0x148   : > { %v1210_v36 = vadd.f32 %v9923_v9, %v1141_v24  ;;  %v8410_v9 = vld [vmem:[#allocation4 + $0x94] sm:$0xf] }
 0x149   : > { %v1212_v37 = vpop.f32.mrf.mxu2  ;;  %v9948_v38 = vpop.f32.mrf.mxu3  ;;  %v7584_v46 = vor.u32 %v8410_v9, %v7581_v50 }
 0x14a   : > { %v1213_v25 = vadd.f32 %v1212_v37, %v1144_v15  ;;  %v1279_v45 = vadd.f32 %v9925_v10, %v1210_v36  ;;  %v1077_v10 = vadd.f32 %v9942_v32, %v9935_v21  ;;  %v8407_v36 = vld [vmem:[#allocation4 + $0x7c] sm:$0xf] }
 0x14b   : > { %2631 = vmatpush.bf16.msra.mxu1 %v7584_v46 }
 0x14c   : > { %v1282_v60 = vadd.f32 %v9948_v38, %v1213_v25  ;;  %v1334_v14 = vrot.slane %v1279_v45, 1  ;;  %v1381_v56 = vpack.c.bf16 %v1279_v45, %v9982_v0  ;;  %v1146_v21 = vadd.f32 %v9937_v23, %v1077_v10  ;;  %v7575_v23 = vld [vmem:[#allocation4 + $0x80] sm:$0xf] }
 0x14e   : > { %v9952_v43 = vpop.f32.mrf.mxu0  ;;  %v1335_v37 = vrot.slane %v1282_v60, 1 }
 0x14f   : > { %v9959_v48 = vpop.f32.mrf.mxu1  ;;  %v1080_v51 = vadd.f32 %v9942_v32, %v9952_v43  ;;  %v10048_v43 = vsel %vm698_vm7, %v1333_v6, %v1334_v14 }
 0x150   : > { %v10040_v22 = vsel %vm698_vm7, %v1334_v14, %v1335_v37 }
 0x151   : > { %7328 = vmatmul.msk.bf16.gmra.mxu0 %vm7327_vm11, %v9226_v26  ;;  %v9972_v39 = vpop.f32.mrf.mxu2  ;;  %v9974_v2 = vpop.f32.mrf.mxu3  ;;  %v1382_v5 = vpack.c.bf16 %v10040_v22, %v10048_v43 }
 0x152   : > { %7352 = vmatmul.msk.bf16.gmra.mxu1 %vm7351_vm12, %v9226_v26  ;;  %v1203_v26 = vadd.f32 %v9821_v11, %v1134_v3  ;;  %v793_v11 = vpack.c.bf16 %v745_v33, %v699_v53  ;;  %v1149_v3 = vadd.f32 %v9959_v48, %v1080_v51  ;;  %v1215_v58 = vadd.f32 %v9972_v39, %v1146_v21 }
 0x154   : > { %v9998_v4 = vadd.f32 %v9823_v12, %v1203_v26  ;;  %v1284_v61 = vadd.f32 %v9974_v2, %v1215_v58  ;;  %v8406_v58 = vld [vmem:[#allocation4 + $0x70] sm:$0xf0] }
 0x156   : > { %v9984_v49 = vpop.f32.mrf.mxu0  ;;  %1256 = vmatmul.bf16.gmra.mxu2 %v793_v11  ;;  %1325 = vmatmul.bf16.gmra.mxu3 %v794_v54  ;;  %v1331_v28 = vrot.slane %v9998_v4, 1  ;;  %v1379_v59 = vpack.c.bf16 %v1274_v63, %v9998_v4  ;;  %v8409_v54 = vld [vmem:[#allocation4 + $0x88] sm:$0xf0] }
 0x157   : > { %v9995_v1 = vpop.f32.mrf.mxu1  ;;  %v7576_v6 = vor.u32 %v8409_v54, %v7575_v23 }
 0x158   : > { %v10014_v7 = vsel %vm698_vm7, %v1331_v28, %v1332_v18  ;;  %v1336_v18 = vrot.slane %v1284_v61, 1 }
 0x159   : > { %v1217_v27 = vpop.f32.mrf.mxu2  ;;  %v1286_v8 = vpop.f32.mrf.mxu3  ;;  %v1380_v40 = vpack.c.bf16 %v10008_v13, %v10014_v7  ;;  %2701 = vmatpush.bf16.msra.mxu2 %v7576_v6 }
 0x15a   : > { %v1218_v53 = vadd.f32 %v1217_v27, %v1149_v3 }
 0x15c   : > { %v1287_v48 = vadd.f32 %v1286_v8, %v1218_v53  ;;  %v1082_v8 = vadd.f32 %v9942_v32, %v9984_v49  ;;  %v7563_v53 = vld [vmem:[#allocation4 + $0x68] sm:$0xf] }
 0x15e   : > { %v1084_v12 = vpop.f32.mrf.mxu0  ;;  %v1337_v11 = vrot.slane %v1287_v48, 1  ;;  %v1151_v49 = vadd.f32 %v9995_v1, %v1082_v8 }
 0x15f   : > { %v10018_v20 = vpop.f32.mrf.mxu1  ;;  %v1085_v39 = vadd.f32 %v9942_v32, %v1084_v12  ;;  %v10077_v12 = vsel %vm698_vm7, %v1335_v37, %v1336_v18 }
 0x160   : > { %v10068_v2 = vsel %vm698_vm7, %v1336_v18, %v1337_v11 }
 0x161   : > { %1609 = vmatmul.bf16.vlgmr.msrb.gmra.mxu0 %v1379_v59  ;;  %v10024_v31 = vpop.f32.mrf.mxu2  ;;  %v10026_v41 = vpop.f32.mrf.mxu3  ;;  %v1154_v15 = vadd.f32 %v10018_v20, %v1085_v39  ;;  %v1384_v24 = vpack.c.bf16 %v10068_v2, %v10077_v12  ;;  %v7555_v39 = vld [vmem:[#allocation4 + $0x60] sm:$0xf] }
 0x162   : > { %1678 = vmatmul.bf16.vlgmr.msrb.gmra.mxu1 %v1380_v40  ;;  %v1220_v20 = vadd.f32 %v10024_v31, %v1151_v49 }
 0x164   : > { %v1289_v1 = vadd.f32 %v10026_v41, %v1220_v20 }
 0x166   : > { %v10029_v44 = vpop.f32.mrf.mxu0  ;;  %1747 = vmatmul.bf16.vlgmr.msrb.gmra.mxu2 %v1379_v59  ;;  %1816 = vmatmul.bf16.vlgmr.msrb.gmra.mxu3 %v1380_v40  ;;  %v1383_v59 = vpack.c.bf16 %v1284_v61, %v1282_v60  ;;  %v7569_v60 = vld [vmem:[#allocation4 + $0x84] sm:$0xf0]  ;;  %v1338_v14 = vrot.slane %v1289_v1, 1  ;;  %v7564_v61 = vor.u32 %v8406_v58, %v7563_v53 }
 0x167   : > { %v10032_v42 = vpop.f32.mrf.mxu1  ;;  %v7572_v45 = vor.u32 %v8407_v36, %v7569_v60 }
 0x168   : > { %2702 = vmatpush.bf16.msra.mxu2 %v7564_v61 }
 0x169   : > { %v1222_v38 = vpop.f32.mrf.mxu2  ;;  %v1291_v52 = vpop.f32.mrf.mxu3  ;;  %2632 = vmatpush.bf16.msra.mxu1 %v7572_v45 }
 0x16a   : > { %v1223_v25 = vadd.f32 %v1222_v38, %v1154_v15  ;;  %v1087_v38 = vadd.f32 %v9942_v32, %v10029_v44 }
 0x16c   : > { %v1292_v47 = vadd.f32 %v1291_v52, %v1223_v25  ;;  %v1156_v21 = vadd.f32 %v10032_v42, %v1087_v38 }
 0x16e   : > { %v1089_v55 = vpop.f32.mrf.mxu0  ;;  %v1339_v50 = vrot.slane %v1292_v47, 1 }
 0x16f   : > { %v10044_v57 = vpop.f32.mrf.mxu1  ;;  %v1090_v31 = vadd.f32 %v9942_v32, %v1089_v55 }
 0x170   : > { %v10097_v52 = vsel %vm698_vm7, %v1338_v14, %v1339_v50 }
 0x171   : > { %1614 = vmatmul.bf16.gmra.mxu0 %v1381_v56  ;;  %v10054_v26 = vpop.f32.mrf.mxu2  ;;  %v10056_v0 = vpop.f32.mrf.mxu3  ;;  %v1159_v41 = vadd.f32 %v10044_v57, %v1090_v31 }
 0x172   : > { %1683 = vmatmul.bf16.gmra.mxu1 %v1382_v5 }
 0x176   : > { %v10058_v33 = vpop.f32.mrf.mxu0  ;;  %1752 = vmatmul.bf16.gmra.mxu2 %v1381_v56  ;;  %1821 = vmatmul.bf16.gmra.mxu3 %v1382_v5  ;;  %v1385_v56 = vpack.c.bf16 %v1289_v1, %v1287_v48  ;;  %v10104_v5 = vsel %vm698_vm7, %v1337_v11, %v1338_v14  ;;  %v1225_v48 = vadd.f32 %v10054_v26, %v1156_v21  ;;  %v7557_v26 = vld [vmem:[#allocation4 + $0x6c] sm:$0xf0] }
 0x177   : > { %v10061_v63 = vpop.f32.mrf.mxu1  ;;  %v1386_v55 = vpack.c.bf16 %v10097_v52, %v10104_v5 }
 0x178   : > { %v1294_v6 = vadd.f32 %v10056_v0, %v1225_v48  ;;  %v1092_v0 = vadd.f32 %v9942_v32, %v10058_v33 }
 0x179   : > { %v1227_v19 = vpop.f32.mrf.mxu2  ;;  %v1296_v27 = vpop.f32.mrf.mxu3 }
 0x17a   : > { %v1228_v44 = vadd.f32 %v1227_v19, %v1159_v41  ;;  %v8405_v19 = vld [vmem:[#allocation4 + $0x68] sm:$0xf0]  ;;  %v1340_v15 = vrot.slane %v1294_v6, 1  ;;  %v1387_v35 = vpack.c.bf16 %v1294_v6, %v1292_v47  ;;  %v1161_v33 = vadd.f32 %v10061_v63, %v1092_v0  ;;  %v7551_v63 = vld [vmem:[#allocation4 + $0x50] sm:$0xf] }
 0x17b   : > { %v7556_v8 = vor.u32 %v8405_v19, %v7555_v39  ;;  %v7543_v19 = vld [vmem:[#allocation4 + $0x48] sm:$0xf] }
 0x17c   : > { %v1297_v11 = vadd.f32 %v1296_v27, %v1228_v44 }
 0x17d   : > { %2564 = vmatpush.bf16.msra.mxu0 %v7556_v8  ;;  %v8402_v8 = vld [vmem:[#allocation4 + $0x50] sm:$0xf0] }
 0x17e   : > { %v10070_v34 = vpop.f32.mrf.mxu0  ;;  %v1341_v42 = vrot.slane %v1297_v11, 1 }
 0x17f   : > { %v10073_v40 = vpop.f32.mrf.mxu1 }
 0x180   : > { %v10125_v29 = vsel %vm698_vm7, %v1340_v15, %v1341_v42 }
 0x181   : > { %1619 = vmatmul.bf16.gmra.mxu0 %v1383_v59  ;;  %v10083_v16 = vpop.f32.mrf.mxu2  ;;  %v10085_v37 = vpop.f32.mrf.mxu3 }
 0x182   : > { %1688 = vmatmul.bf16.gmra.mxu1 %v1384_v24  ;;  %v1230_v1 = vadd.f32 %v10083_v16, %v1161_v33 }
 0x186   : > { %v10087_v62 = vpop.f32.mrf.mxu0  ;;  %1757 = vmatmul.bf16.gmra.mxu2 %v1383_v59  ;;  %1826 = vmatmul.bf16.gmra.mxu3 %v1384_v24  ;;  %v8404_v59 = vld [vmem:[#allocation4 + $0x64] sm:$0xf]  ;;  %v1095_v24 = vadd.f32 %v9942_v32, %v10070_v34  ;;  %v10132_v34 = vsel %vm698_vm7, %v1339_v50, %v1340_v15  ;;  %v1299_v50 = vadd.f32 %v10085_v37, %v1230_v1 }
 0x187   : > { %v10090_v9 = vpop.f32.mrf.mxu1  ;;  %v7560_v49 = vor.u32 %v8404_v59, %v7557_v26  ;;  %v1388_v20 = vpack.c.bf16 %v10125_v29, %v10132_v34  ;;  %v7544_v59 = vor.u32 %v8402_v8, %v7543_v19  ;;  %v7545_v26 = vld [vmem:[#allocation4 + $0x54] sm:$0xf0]  ;;  %v8398_v19 = vld [vmem:[#allocation4 + $0x34] sm:$0xf]  ;;  %v7533_v8 = vld [vmem:[#allocation4 + $0x3c] sm:$0xf0] }
 0x188   : > { %v1164_v36 = vadd.f32 %v10073_v40, %v1095_v24  ;;  %v1389_v58 = vpack.c.bf16 %v1299_v50, %v1297_v11  ;;  %v8401_v11 = vld [vmem:[#allocation4 + $0x4c] sm:$0xf] }
 0x189   : > { %v1232_v51 = vpop.f32.mrf.mxu2  ;;  %v1301_v46 = vpop.f32.mrf.mxu3  ;;  %2633 = vmatpush.bf16.msra.mxu1 %v7560_v49  ;;  %v7548_v15 = vor.u32 %v8401_v11, %v7545_v26  ;;  %2565 = vmatpush.bf16.msra.mxu0 %v7544_v59 }
 0x18a   : > { %v1233_v45 = vadd.f32 %v1232_v51, %v1164_v36  ;;  %v8403_v51 = vld [vmem:[#allocation4 + $0x58] sm:$0xf0] }
 0x18b   : > { %v7552_v41 = vor.u32 %v8403_v51, %v7551_v63 }
 0x18c   : > { %v1302_v40 = vadd.f32 %v1301_v46, %v1233_v45  ;;  %v1097_v46 = vadd.f32 %v9942_v32, %v10087_v62 }
 0x18d   : > { %2703 = vmatpush.bf16.msra.mxu2 %v7552_v41  ;;  %2634 = vmatpush.bf16.msra.mxu1 %v7548_v15 }
 0x18e   : > { %v1099_v10 = vpop.f32.mrf.mxu0  ;;  %v1166_v62 = vadd.f32 %v10090_v9, %v1097_v46 }
 0x18f   : > { %v10100_v3 = vpop.f32.mrf.mxu1  ;;  %v1100_v16 = vadd.f32 %v9942_v32, %v1099_v10 }
 0x191   : > { %1624 = vmatmul.bf16.gmra.mxu0 %v1385_v56  ;;  %v10110_v57 = vpop.f32.mrf.mxu2  ;;  %v10112_v23 = vpop.f32.mrf.mxu3  ;;  %v1169_v61 = vadd.f32 %v10100_v3, %v1100_v16  ;;  %v7539_v16 = vld [vmem:[#allocation4 + $0x38] sm:$0xf] }
 0x192   : > { %1693 = vmatmul.bf16.gmra.mxu1 %v1386_v55  ;;  %v1235_v3 = vadd.f32 %v10110_v57, %v1166_v62 }
 0x194   : > { %v1304_v9 = vadd.f32 %v10112_v23, %v1235_v3 }
 0x196   : > { %v10114_v54 = vpop.f32.mrf.mxu0  ;;  %1762 = vmatmul.bf16.gmra.mxu2 %v1385_v56  ;;  %1831 = vmatmul.bf16.gmra.mxu3 %v1386_v55  ;;  %v1343_v56 = vrot.slane %v1302_v40, 1  ;;  %v1342_v55 = vrot.slane %v1299_v50, 1  ;;  %v1344_v36 = vrot.slane %v1304_v9, 1  ;;  %v1391_v50 = vpack.c.bf16 %v1304_v9, %v1302_v40  ;;  %v8400_v40 = vld [vmem:[#allocation4 + $0x40] sm:$0xf0] }
 0x197   : > { %v10117_v18 = vpop.f32.mrf.mxu1  ;;  %v1102_v45 = vadd.f32 %v9942_v32, %v10114_v54 }
 0x198   : > { %v10152_v37 = vsel %vm698_vm7, %v1342_v55, %v1343_v56  ;;  %v10161_v10 = vsel %vm698_vm7, %v1341_v42, %v1342_v55  ;;  %v10188_v51 = vsel %vm698_vm7, %v1343_v56, %v1344_v36 }
 0x199   : > { %v1237_v27 = vpop.f32.mrf.mxu2  ;;  %v1306_v25 = vpop.f32.mrf.mxu3  ;;  %v1390_v6 = vpack.c.bf16 %v10152_v37, %v10161_v10  ;;  %v1171_v41 = vadd.f32 %v10117_v18, %v1102_v45 }
 0x19a   : > { %v1238_v39 = vadd.f32 %v1237_v27, %v1169_v61 }
 0x19c   : > { %v1307_v49 = vadd.f32 %v1306_v25, %v1238_v39  ;;  %v8399_v39 = vld [vmem:[#allocation4 + $0x38] sm:$0xf0] }
 0x19e   : > { %v1104_v30 = vpop.f32.mrf.mxu0 }
 0x19f   : > { %v10128_v60 = vpop.f32.mrf.mxu1  ;;  %v1105_v57 = vadd.f32 %v9942_v32, %v1104_v30 }
 0x1a1   : > { %1629 = vmatmul.bf16.gmra.mxu0 %v1387_v35  ;;  %v10138_v14 = vpop.f32.mrf.mxu2  ;;  %v10140_v47 = vpop.f32.mrf.mxu3  ;;  %v1174_v23 = vadd.f32 %v10128_v60, %v1105_v57 }
 0x1a2   : > { %1698 = vmatmul.bf16.gmra.mxu1 %v1388_v20  ;;  %v1240_v55 = vadd.f32 %v10138_v14, %v1171_v41 }
 0x1a4   : > { %v1309_v56 = vadd.f32 %v10140_v47, %v1240_v55 }
 0x1a6   : > { %v10142_v31 = vpop.f32.mrf.mxu0  ;;  %1767 = vmatmul.bf16.gmra.mxu2 %v1387_v35  ;;  %1836 = vmatmul.bf16.gmra.mxu3 %v1388_v20  ;;  %v1345_v35 = vrot.slane %v1307_v49, 1  ;;  %v1346_v59 = vrot.slane %v1309_v56, 1 }
 0x1a7   : > { %v10145_v38 = vpop.f32.mrf.mxu1  ;;  %v1107_v47 = vadd.f32 %v9942_v32, %v10142_v31 }
 0x1a8   : > { %v10181_v25 = vsel %vm698_vm7, %v1344_v36, %v1345_v35  ;;  %v1393_v36 = vpack.c.bf16 %v1309_v56, %v1307_v49 }
 0x1a9   : > { %v1242_v21 = vpop.f32.mrf.mxu2  ;;  %v1311_v44 = vpop.f32.mrf.mxu3  ;;  %v1392_v30 = vpack.c.bf16 %v10181_v25, %v10188_v51 }
 0x1aa   : > { %v1243_v54 = vadd.f32 %v1242_v21, %v1174_v23  ;;  %v7531_v21 = vld [vmem:[#allocation4 + $0x30] sm:$0xf]  ;;  %v1176_v23 = vadd.f32 %v10145_v38, %v1107_v47 }
 0x1ab   : > { %v7532_v14 = vor.u32 %v8399_v39, %v7531_v21 }
 0x1ac   : > { %v1312_v61 = vadd.f32 %v1311_v44, %v1243_v54  ;;  %v7536_v44 = vor.u32 %v8398_v19, %v7533_v8 }
 0x1ad   : > { %2566 = vmatpush.bf16.msra.mxu0 %v7532_v14 }
 0x1ae   : > { %v10154_v53 = vpop.f32.mrf.mxu0  ;;  %v1347_v18 = vrot.slane %v1312_v61, 1  ;;  %2635 = vmatpush.bf16.msra.mxu1 %v7536_v44 }
 0x1af   : > { %v10157_v48 = vpop.f32.mrf.mxu1  ;;  %v1110_v11 = vadd.f32 %v9942_v32, %v10154_v53  ;;  %v10212_v53 = vsel %vm698_vm7, %v1345_v35, %v1346_v59 }
 0x1b0   : > { %v10207_v15 = vsel %vm698_vm7, %v1346_v59, %v1347_v18 }
 0x1b1   : > { %1634 = vmatmul.bf16.gmra.mxu0 %v1389_v58  ;;  %v10167_v24 = vpop.f32.mrf.mxu2  ;;  %v10169_v42 = vpop.f32.mrf.mxu3  ;;  %v1179_v57 = vadd.f32 %v10157_v48, %v1110_v11 }
 0x1b2   : > { %1703 = vmatmul.bf16.gmra.mxu1 %v1390_v6 }
 0x1b6   : > { %v10171_v0 = vpop.f32.mrf.mxu0  ;;  %1772 = vmatmul.bf16.gmra.mxu2 %v1389_v58  ;;  %1841 = vmatmul.bf16.gmra.mxu3 %v1390_v6  ;;  %v7540_v58 = vor.u32 %v8400_v40, %v7539_v16 }
 0x1b7   : > { %v10174_v27 = vpop.f32.mrf.mxu1 }
 0x1b8   : > { %2704 = vmatpush.bf16.msra.mxu2 %v7540_v58 }
 0x1b9   : > { %v1247_v20 = vpop.f32.mrf.mxu2  ;;  %v1316_v33 = vpop.f32.mrf.mxu3 }
 0x1ba   : > { %v1248_v31 = vadd.f32 %v1247_v20, %v1179_v57 }
 0x1bc   : > { %v1317_v49 = vadd.f32 %v1316_v33, %v1248_v31 }
 0x1be   : > { %v1114_v1 = vpop.f32.mrf.mxu0  ;;  %v1349_v16 = vrot.slane %v1317_v49, 1 }
 0x1bf   : > { %v10184_v63 = vpop.f32.mrf.mxu1  ;;  %v1115_v38 = vadd.f32 %v9942_v32, %v1114_v1 }
 0x1c1   : > { %1639 = vmatmul.bf16.gmra.mxu0 %v1391_v50  ;;  %v1249_v46 = vpop.f32.mrf.mxu2  ;;  %v10194_v60 = vpop.f32.mrf.mxu3  ;;  %v1184_v21 = vadd.f32 %v10184_v63, %v1115_v38 }
 0x1c2   : > { %1708 = vmatmul.bf16.gmra.mxu1 %v1392_v30 }
 0x1c6   : > { %v10196_v6 = vpop.f32.mrf.mxu0  ;;  %1777 = vmatmul.bf16.gmra.mxu2 %v1391_v50  ;;  %1846 = vmatmul.bf16.gmra.mxu3 %v1392_v30  ;;  %v1394_v50 = vpack.c.bf16 %v10207_v15, %v10212_v53  ;;  %v1245_v30 = vadd.f32 %v10167_v24, %v1176_v23  ;;  %v1112_v24 = vadd.f32 %v9942_v32, %v10171_v0 }
 0x1c7   : > { %v10199_v62 = vpop.f32.mrf.mxu1 }
 0x1c8   : > { %v1314_v55 = vadd.f32 %v10169_v42, %v1245_v30  ;;  %v1181_v0 = vadd.f32 %v10174_v27, %v1112_v24  ;;  %v10258_v27 = vld [vmem:[%s13945_s4] sm:$0x3] }
 0x1c9   : > { %v1252_v26 = vpop.f32.mrf.mxu2  ;;  %v1321_v3 = vpop.f32.mrf.mxu3 }
 0x1ca   : > { %v1348_v40 = vrot.slane %v1314_v55, 1  ;;  %v1395_v42 = vpack.c.bf16 %v1314_v55, %v1312_v61  ;;  %v1253_v19 = vadd.f32 %v1252_v26, %v1184_v21  ;;  %v1250_v8 = vadd.f32 %v1249_v46, %v1181_v0  ;;  %v8397_v0 = vld [vmem:[#allocation4 + $0x28] sm:$0xf0] }
 0x1cb   : > { %v10262_v46 = vperm.slane %v10258_v27, 1 }
 0x1cc   : > { %v10230_v33 = vsel %vm698_vm7, %v1348_v40, %v1349_v16  ;;  %v10239_v14 = vsel %vm698_vm7, %v1347_v18, %v1348_v40  ;;  %v10248_v63 = vadd.f32 %v1321_v3, %v1253_v19  ;;  %v1319_v18 = vadd.f32 %v10194_v60, %v1250_v8 }
 0x1cd   : > { %v1396_v1 = vpack.c.bf16 %v10230_v33, %v10239_v14  ;;  %v1117_v60 = vadd.f32 %v9942_v32, %v10196_v6 }
 0x1ce   : > { %v1119_v9 = vpop.f32.mrf.mxu0  ;;  %v1351_v26 = vrot.slane %v10248_v63, 1  ;;  %v1350_v3 = vrot.slane %v1319_v18, 1  ;;  %v1397_v30 = vpack.c.bf16 %v1319_v18, %v1317_v49 }
 0x1cf   : > { %v1188_v45 = vpop.f32.mrf.mxu1  ;;  %v1120_v47 = vadd.f32 %v9942_v32, %v1119_v9  ;;  %v1186_v24 = vadd.f32 %v10199_v62, %v1117_v60 }
 0x1d0   : > { %v10272_v23 = vsel %vm698_vm7, %v1350_v3, %v1351_v26  ;;  %v10280_v9 = vsel %vm698_vm7, %v1349_v16, %v1350_v3  ;;  %v7519_v3 = vld [vmem:[#allocation4 + $0x18] sm:$0xf] }
 0x1d1   : > { %1644 = vmatmul.bf16.gmra.mxu0 %v1393_v36  ;;  %v1254_v41 = vpop.f32.mrf.mxu2  ;;  %v10218_v54 = vpop.f32.mrf.mxu3  ;;  %13992 = vst [vmem:[#allocation12_spill] sm:$0xff] %v10272_v23  ;;  %v1189_v55 = vadd.f32 %v1188_v45, %v1120_v47  ;;  %v1398_v6 = vpack.c.bf16 %v10272_v23, %v10280_v9  ;;  %v8396_v47 = vld [vmem:[#allocation4 + $0x20] sm:$0xf0] }
 0x1d2   : > { %1713 = vmatmul.bf16.gmra.mxu1 %v1394_v50  ;;  %v1255_v45 = vadd.f32 %v1254_v41, %v1186_v24 }
 0x1d4   : > { %v1324_v60 = vadd.f32 %v10218_v54, %v1255_v45 }
 0x1d6   : > { %v10220_v48 = vpop.f32.mrf.mxu0  ;;  %1782 = vmatmul.bf16.gmra.mxu2 %v1393_v36  ;;  %1851 = vmatmul.bf16.gmra.mxu3 %v1394_v50 }
 0x1d7   : > { %v10223_v35 = vpop.f32.mrf.mxu1 }
 0x1d9   : > { %v1257_v20 = vpop.f32.mrf.mxu2  ;;  %v1326_v58 = vpop.f32.mrf.mxu3 }
 0x1de   : > { %v10232_v56 = vpop.f32.mrf.mxu0 }
 0x1df   : > { %v10235_v39 = vpop.f32.mrf.mxu1 }
 0x1e1   : > { %1649 = vmatmul.bf16.gmra.mxu0 %v1395_v42  ;;  %v10244_v59 = vpop.f32.mrf.mxu2  ;;  %v10246_v61 = vpop.f32.mrf.mxu3 }
 0x1e2   : > { %1718 = vmatmul.bf16.gmra.mxu1 %v1396_v1 }
 0x1e6   : > { %v10250_v11 = vpop.f32.mrf.mxu0  ;;  %1787 = vmatmul.bf16.gmra.mxu2 %v1395_v42  ;;  %1856 = vmatmul.bf16.gmra.mxu3 %v1396_v1  ;;  %v1258_v42 = vadd.f32 %v1257_v20, %v1189_v55  ;;  %v7527_v1 = vld [vmem:[#allocation4 + $0x20] sm:$0xf]  ;;  %v7520_v20 = vor.u32 %v8396_v47, %v7519_v3  ;;  %v8393_v47 = vld [vmem:[#allocation4 + $0x8] sm:$0xf0] }
 0x1e7   : > { %v10253_v44 = vpop.f32.mrf.mxu1  ;;  %v7528_v49 = vor.u32 %v8397_v0, %v7527_v1  ;;  %v1122_v1 = vadd.f32 %v9942_v32, %v10220_v48  ;;  %v7507_v3 = vld [vmem:[#allocation4] sm:$0xf] }
 0x1e8   : > { %v10285_v18 = vadd.f32 %v1326_v58, %v1258_v42  ;;  %2567 = vmatpush.bf16.msra.mxu0 %v7520_v20 }
 0x1e9   : > { %v1748_v36 = vpop.f32.mrf.mxu2  ;;  %v1817_v57 = vpop.f32.mrf.mxu3  ;;  %2705 = vmatpush.bf16.msra.mxu2 %v7528_v49 }
 0x1ea   : > { %v1749_v50 = vadd.f32 %v1748_v36, %v10262_v46  ;;  %v8395_v36 = vld [vmem:[#allocation4 + $0x1c] sm:$0xf]  ;;  %v1353_v58 = vrot.slane %v10285_v18, 1 }
 0x1ec   : > { %v1818_v40 = vadd.f32 %v1817_v57, %v1749_v50  ;;  %v7521_v57 = vld [vmem:[#allocation4 + $0x24] sm:$0xf0] }
 0x1ed   : > { %v7524_v41 = vor.u32 %v8395_v36, %v7521_v57  ;;  %v8392_v36 = vld [vmem:[#allocation4 + $0x4] sm:$0xf] }
 0x1ee   : > { %v10274_v31 = vpop.f32.mrf.mxu0  ;;  %v7481_v21 = vmul.f32 -1.442695, %v1818_v40 }
 0x1ef   : > { %v10276_v38 = vpop.f32.mrf.mxu1  ;;  %2636 = vmatpush.bf16.msra.mxu1 %v7524_v41 }
 0x1f0   : > { %8644 = vpow2.f32 %v7481_v21  ;;  %v1352_v21 = vrot.slane %v1324_v60, 1 }
 0x1f1   : > { %1654 = vmatmul.bf16.gmra.mxu0 %v1397_v30  ;;  %v1750_v19 = vpop.f32.mrf.mxu2  ;;  %v1819_v8 = vpop.f32.mrf.mxu3 }
 0x1f2   : > { %1723 = vmatmul.bf16.gmra.mxu1 %v1398_v6  ;;  %v1751_v16 = vadd.f32 %v1750_v19, %v10262_v46  ;;  %v10303_v45 = vsel %vm698_vm7, %v1352_v21, %v1353_v58  ;;  %v1191_v19 = vadd.f32 %v10223_v35, %v1122_v1  ;;  %v7508_v35 = vor.u32 %v8393_v47, %v7507_v3  ;;  %v7515_v1 = vld [vmem:[#allocation4 + $0x8] sm:$0xf] }
 0x1f3   : > { %13993 = vst [vmem:[#allocation13_spill] sm:$0xff] %v10303_v45  ;;  %v10335_v47 = vperm.slane %v10258_v27, 0 }
 0x1f4   : > { %v1820_v50 = vadd.f32 %v1819_v8, %v1751_v16  ;;  %v10316_v8 = vsel %vm698_vm7, %v1351_v26, %v1352_v21  ;;  %v1260_v57 = vadd.f32 %v10244_v59, %v1191_v19  ;;  %2568 = vmatpush.bf16.msra.mxu0 %v7508_v35 }
 0x1f5   : > { %13994 = vst [vmem:[#allocation14_spill] sm:$0xff] %v10316_v8  ;;  %v1400_v16 = vpack.c.bf16 %v10303_v45, %v10316_v8  ;;  %v1611_v27 = vadd.f32 %v10232_v56, %v10335_v47  ;;  %v8429_v8 = vld [vmem:[#allocation2 + $0x164] sm:$0xf0] }
 0x1f6   : > { %v10288_v62 = vpop.f32.mrf.mxu0  ;;  %v8645_v40 = vpop.eup %8644  ;;  %v7482_v24 = vmul.f32 -1.442695, %v1820_v50  ;;  %1792 = vmatmul.bf16.gmra.mxu2 %v1397_v30  ;;  %1861 = vmatmul.bf16.gmra.mxu3 %v1398_v6  ;;  %v1399_v6 = vpack.c.bf16 %v1324_v60, %v10248_v63  ;;  %v7509_v50 = vld [vmem:[#allocation4 + $0xc] sm:$0xf0]  ;;  %v1329_v21 = vadd.f32 %v10246_v61, %v1260_v57 }
 0x1f7   : > { %v10291_v55 = vpop.f32.mrf.mxu1  ;;  %v10294_v42 = vadd.f32 1.0, %v8645_v40  ;;  %v7512_v63 = vor.u32 %v8392_v36, %v7509_v50 }
 0x1f8   : > { %8646 = vpow2.f32 %v7482_v24 }
 0x1f9   : > { %v1753_v54 = vpop.f32.mrf.mxu2  ;;  %v1822_v0 = vpop.f32.mrf.mxu3  ;;  %8648 = vrcp.f32 %v10294_v42  ;;  %2637 = vmatpush.bf16.msra.mxu1 %v7512_v63  ;;  %vm2002_vm0 = vweird.f32 %v10294_v42 }
 0x1fa   : > { %v1754_v49 = vadd.f32 %v1753_v54, %v10262_v46  ;;  %v8394_v54 = vld [vmem:[#allocation4 + $0x10] sm:$0xf0] }
 0x1fc   : > { %v1823_v32 = vadd.f32 %v1822_v0, %v1754_v49  ;;  %v7516_v49 = vor.u32 %v8394_v54, %v7515_v1  ;;  %v7660_v1 = vld [vmem:[#allocation2 + $0x170] sm:$0xf]  ;;  %v8431_v54 = vld [vmem:[#allocation2 + $0x174] sm:$0xf0] }
 0x1fe   : > { %v10306_v30 = vpop.f32.mrf.mxu0  ;;  %v8647_v20 = vpop.eup %8646  ;;  %v7483_v60 = vmul.f32 -1.442695, %v1823_v32  ;;  %2706 = vmatpush.bf16.msra.mxu2 %v7516_v49 }
 0x1ff   : > { %v10310_v48 = vpop.f32.mrf.mxu1  ;;  %v10321_v41 = vadd.f32 1.0, %v8647_v20  ;;  %v10323_v26 = vpop.eup %8648  ;;  %v1354_v20 = vrot.slane %v1329_v21, 1 }
 0x200   : > { %8650 = vpow2.f32 %v7483_v60  ;;  %v1998_v19 = vmul.f32 %v10323_v26, %v10294_v42  ;;  %v1613_v60 = vadd.f32 %v10250_v11, %v10335_v47  ;;  %vm2003_vm13 = vweird.f32 %v10323_v26 }
 0x201   : > { %1659 = vmatmul.bf16.gmra.mxu0 %v1399_v6  ;;  %8652 = vrcp.f32 %v10321_v41  ;;  %v1755_v40 = vpop.f32.mrf.mxu2  ;;  %v1824_v24 = vpop.f32.mrf.mxu3  ;;  %v10352_v11 = vsel %vm698_vm7, %v1353_v58, %v1354_v20  ;;  %vm2017_vm14 = vweird.f32 %v10321_v41  ;;  %vm10397_vm1 = vmor %vm2002_vm0, %vm2003_vm13 }
 0x202   : > { %1728 = vmatmul.bf16.gmra.mxu1 %v1400_v16  ;;  %v1756_v59 = vadd.f32 %v1755_v40, %v10262_v46  ;;  %v1999_v50 = vsub.f32 1.0, %v1998_v19  ;;  %13995 = vst [vmem:[#allocation15_spill] sm:$0xff] %v10352_v11  ;;  %v1682_v56 = vadd.f32 %v10253_v44, %v1613_v60  ;;  %v7661_v19 = vor.u32 %v8431_v54, %v7660_v1 }
 0x203   : > { %v1680_v44 = vadd.f32 %v10235_v39, %v1611_v27  ;;  %v2021_v39 = vand.u32 2147483647, %v10321_v41  ;;  %v2006_v1 = vand.u32 2147483647, %v10294_v42 }
 0x204   : > { %v1825_v32 = vadd.f32 %v1824_v24, %v1756_v59  ;;  %v2000_v58 = vmul.f32 %v10323_v26, %v1999_v50  ;;  %3162 = vmatpush.bf16.msra.mxu3 %v7661_v19 }
 0x205   : > { %vm2022_vm2 = vcmp.eq.f32.partialorder %v2021_v39, 8.507059e+37  ;;  %vm2007_vm3 = vcmp.eq.f32.partialorder %v2006_v1, 8.507059e+37 }
 0x206   : > { %v10328_v0 = vpop.f32.mrf.mxu0  ;;  %v8651_v36 = vpop.eup %8650  ;;  %v7484_v61 = vmul.f32 -1.442695, %v1825_v32  ;;  %1797 = vmatmul.bf16.gmra.mxu2 %v1399_v6  ;;  %1866 = vmatmul.bf16.gmra.mxu3 %v1400_v16  ;;  %v10358_v16 = vsel %vm698_vm7, %v1354_v20, %v1331_v28  ;;  %v1401_v32 = vpack.c.bf16 %v1329_v21, %v10285_v18  ;;  %v2023_v18 = vand.u32 2147483648, %v10321_v41 }
 0x207   : > { %v10332_v3 = vpop.f32.mrf.mxu1  ;;  %v10337_v57 = vpop.eup %8652  ;;  %v10341_v35 = vadd.f32 1.0, %v8651_v36  ;;  %13996 = vst [vmem:[#allocation16_spill] sm:$0xff] %v10358_v16  ;;  %v1402_v28 = vpack.c.bf16 %v10358_v16, %v10352_v11  ;;  %v2001_v50 = vadd.f32 %v10323_v26, %v2000_v58 }
 0x208   : > { %v2013_v63 = vmul.f32 %v10337_v57, %v10321_v41  ;;  %8654 = vpow2.f32 %v7484_v61  ;;  %vm2018_vm7 = vweird.f32 %v10337_v57  ;;  %v2024_v19 = vor.u32 1.1754944e-38, %v2023_v18 }
 0x209   : > { %v1758_v40 = vpop.f32.mrf.mxu2  ;;  %v1827_v24 = vpop.f32.mrf.mxu3  ;;  %8656 = vrcp.f32 %v10341_v35  ;;  %vm10384_vm15 = vmor %vm2017_vm14, %vm2018_vm7  ;;  %vm2032_vm8 = vweird.f32 %v10341_v35 }
 0x20a   : > { %v2014_v59 = vsub.f32 1.0, %v2013_v63  ;;  %v1759_v6 = vadd.f32 %v1758_v40, %v10262_v46  ;;  %8658 = vtanh.f32 %v1682_v56  ;;  %v2008_v40 = vand.u32 2147483648, %v10294_v42  ;;  %v8446_v56 = vld [vmem:[#allocation2 + $0x1f4] sm:$0xf] }
 0x20c   : > { %v2015_v36 = vmul.f32 %v10337_v57, %v2014_v59  ;;  %v1828_v4 = vadd.f32 %v1827_v24, %v1759_v6 }
 0x20e   : > { %v10362_v49 = vpop.f32.mrf.mxu0  ;;  %v8655_v20 = vpop.eup %8654  ;;  %v2016_v60 = vadd.f32 %v10337_v57, %v2015_v36  ;;  %v7485_v63 = vmul.f32 -1.442695, %v1828_v4 }
 0x20f   : > { %v10367_v61 = vpop.f32.mrf.mxu1  ;;  %v10376_v21 = vadd.f32 1.0, %v8655_v20  ;;  %v10381_v27 = vpop.eup %8656 }
 0x210   : > { %8660 = vpow2.f32 %v7485_v63  ;;  %v2020_v41 = vsel %vm10384_vm15, %v10337_v57, %v2016_v60  ;;  %v2028_v36 = vmul.f32 %v10381_v27, %v10341_v35  ;;  %v2005_v57 = vsel %vm10397_vm1, %v10323_v26, %v2001_v50  ;;  %v8659_v20 = vpop.eup %8658 }
 0x211   : > { %1664 = vmatmul.bf16.gmra.mxu0 %v1401_v32  ;;  %8662 = vrcp.f32 %v10376_v21  ;;  %v1760_v59 = vpop.f32.mrf.mxu2  ;;  %v1829_v6 = vpop.f32.mrf.mxu3  ;;  %v2025_v60 = vsel %vm2022_vm2, %v2024_v19, %v2020_v41  ;;  %v1616_v19 = vadd.f32 %v10274_v31, %v10335_v47  ;;  %v2053_v31 = vand.u32 2147483648, %v10376_v21 }
 0x212   : > { %1733 = vmatmul.bf16.gmra.mxu1 %v1402_v28  ;;  %v1761_v54 = vadd.f32 %v1760_v59, %v10262_v46  ;;  %8664 = vtanh.f32 %v1680_v44  ;;  %v2009_v44 = vor.u32 1.1754944e-38, %v2008_v40  ;;  %v1618_v59 = vadd.f32 %v10288_v62, %v10335_v47  ;;  %v7726_v62 = vld [vmem:[#allocation2 + $0x1f8] sm:$0xf0] }
 0x213   : > { %v2029_v16 = vsub.f32 1.0, %v2028_v36  ;;  %v2358_v50 = vmul.f32 %v8659_v20, %v2025_v60  ;;  %vm2033_vm5 = vweird.f32 %v10381_v27  ;;  %vm2047_vm6 = vweird.f32 %v10376_v21 }
 0x214   : > { %v1830_v42 = vadd.f32 %v1829_v6, %v1761_v54  ;;  %v2010_v54 = vsel %vm2007_vm3, %v2009_v44, %v2005_v57  ;;  %v1687_v36 = vadd.f32 %v10291_v55, %v1618_v59  ;;  %v7729_v57 = vor.u32 %v8446_v56, %v7726_v62  ;;  %v7724_v62 = vld [vmem:[#allocation2 + $0x1f0] sm:$0xf]  ;;  %vm10454_vm10 = vmor %vm2032_vm8, %vm2033_vm5 }
 0x215   : > { %v1685_v55 = vadd.f32 %v10276_v38, %v1616_v19  ;;  %v2036_v38 = vand.u32 2147483647, %v10341_v35 }
 0x216   : > { %v10401_v58 = vpop.f32.mrf.mxu0  ;;  %v8661_v63 = vpop.eup %8660  ;;  %v7486_v24 = vmul.f32 -1.442695, %v1830_v42  ;;  %1802 = vmatmul.bf16.gmra.mxu2 %v1401_v32  ;;  %1871 = vmatmul.bf16.gmra.mxu3 %v1402_v28 }
 0x217   : > { %v10405_v4 = vpop.f32.mrf.mxu1  ;;  %v10410_v18 = vpop.eup %8662  ;;  %v10414_v6 = vadd.f32 1.0, %v8661_v63  ;;  %v2030_v63 = vmul.f32 %v10381_v27, %v2029_v16  ;;  %3369 = vmatpush.bf16.msrb.mxu2 %v7729_v57  ;;  %vm2037_vm12 = vcmp.eq.f32.partialorder %v2036_v38, 8.507059e+37 }
 0x218   : > { %v2043_v26 = vmul.f32 %v10410_v18, %v10376_v21  ;;  %8666 = vpow2.f32 %v7486_v24  ;;  %v8665_v39 = vpop.eup %8664  ;;  %vm2048_vm4 = vweird.f32 %v10410_v18 }
 0x219   : > { %v1763_v40 = vpop.f32.mrf.mxu2  ;;  %v1832_v1 = vpop.f32.mrf.mxu3  ;;  %8668 = vrcp.f32 %v10414_v6  ;;  %v2357_v28 = vmul.f32 %v8665_v39, %v2010_v54  ;;  %vm10447_vm9 = vmor %vm2047_vm6, %vm2048_vm4  ;;  %vm2062_vm0 = vweird.f32 %v10414_v6 }
 0x21a   : > { %v2044_v41 = vsub.f32 1.0, %v2043_v26  ;;  %v1764_v32 = vadd.f32 %v1763_v40, %v10262_v46  ;;  %8670 = vtanh.f32 %v1687_v36  ;;  %v2051_v40 = vand.u32 2147483647, %v10376_v21  ;;  %v8447_v21 = vld [vmem:[#allocation2 + $0x1f4] sm:$0xf0] }
 0x21b   : > { %v2381_v60 = vpack.c.bf16 %v2358_v50, %v2357_v28  ;;  %v2031_v50 = vadd.f32 %v10381_v27, %v2030_v63  ;;  %v2054_v36 = vor.u32 1.1754944e-38, %v2053_v31  ;;  %v7725_v63 = vor.u32 %v8447_v21, %v7724_v62 }
 0x21c   : > { %v1833_v20 = vadd.f32 %v1832_v1, %v1764_v32  ;;  %v2045_v24 = vmul.f32 %v10410_v18, %v2044_v41  ;;  %v2038_v32 = vand.u32 2147483648, %v10341_v35  ;;  %vm2052_vm11 = vcmp.eq.f32.partialorder %v2051_v40, 8.507059e+37 }
 0x21d   : > { %v1623_v31 = vadd.f32 %v10328_v0, %v10335_v47  ;;  %3231 = vmatpush.bf16.msrb.mxu0 %v7725_v63  ;;  %v1621_v40 = vadd.f32 %v10306_v30, %v10335_v47 }
 0x21e   : > { %v10423_v42 = vpop.f32.mrf.mxu0  ;;  %v8667_v54 = vpop.eup %8666  ;;  %v7487_v26 = vmul.f32 -1.442695, %v1833_v20  ;;  %v2046_v39 = vadd.f32 %v10410_v18, %v2045_v24  ;;  %v8430_v24 = vld [vmem:[#allocation2 + $0x174] sm:$0xf]  ;;  %v2039_v28 = vor.u32 1.1754944e-38, %v2038_v32 }
 0x21f   : > { %v10425_v44 = vpop.f32.mrf.mxu1  ;;  %v10433_v59 = vadd.f32 1.0, %v8667_v54  ;;  %v10436_v16 = vpop.eup %8668  ;;  %v7662_v54 = vld [vmem:[#allocation2 + $0x178] sm:$0xf0] }
 0x220   : > { %8672 = vpow2.f32 %v7487_v26  ;;  %v2050_v35 = vsel %vm10447_vm9, %v10410_v18, %v2046_v39  ;;  %v2058_v57 = vmul.f32 %v10436_v16, %v10414_v6  ;;  %v7652_v26 = vld [vmem:[#allocation2 + $0x160] sm:$0xf]  ;;  %v7665_v45 = vor.u32 %v8430_v24, %v7662_v54  ;;  %v8671_v39 = vpop.eup %8670 }
 0x221   : > { %2569 = vmatmul.bf16.vlgmr.msra.gmra.mxu0 %v2381_v60  ;;  %8674 = vrcp.f32 %v10433_v59  ;;  %v1765_v1 = vpop.f32.mrf.mxu2  ;;  %v1834_v41 = vpop.f32.mrf.mxu3  ;;  %v2035_v18 = vsel %vm10454_vm10, %v10381_v27, %v2031_v50  ;;  %v2055_v62 = vsel %vm2052_vm11, %v2054_v36, %v2050_v35  ;;  %vm2063_vm13 = vweird.f32 %v10436_v16 }
 0x222   : > { %2638 = vmatmul.bf16.vlgmr.msra.gmra.mxu1 %v2381_v60  ;;  %v1766_v56 = vadd.f32 %v1765_v1, %v10262_v46  ;;  %8676 = vtanh.f32 %v1685_v55  ;;  %v7653_v55 = vor.u32 %v8429_v8, %v7652_v26  ;;  %v2040_v27 = vsel %vm2037_vm12, %v2039_v28, %v2035_v18  ;;  %vm10515_vm1 = vmor %vm2062_vm0, %vm2063_vm13 }
 0x223   : > { %3300 = vmatpush.bf16.msrb.mxu1 %v7665_v45  ;;  %v2360_v0 = vmul.f32 %v8671_v39, %v2055_v62  ;;  %v2083_v39 = vand.u32 2147483648, %v10433_v59  ;;  %vm2077_vm14 = vweird.f32 %v10433_v59  ;;  %v2068_v28 = vand.u32 2147483648, %v10414_v6 }
 0x224   : > { %v1835_v1 = vadd.f32 %v1834_v41, %v1766_v56  ;;  %v2059_v56 = vsub.f32 1.0, %v2058_v57  ;;  %3163 = vmatpush.bf16.msra.mxu3 %v7653_v55 }
 0x226   : > { %v10463_v20 = vpop.f32.mrf.mxu0  ;;  %v8673_v21 = vpop.eup %8672  ;;  %v7488_v23 = vmul.f32 -1.442695, %v1835_v1  ;;  %2707 = vmatmul.bf16.vlgmr.msra.gmra.mxu2 %v2381_v60  ;;  %v1692_v60 = vadd.f32 %v10332_v3, %v1623_v31  ;;  %v2060_v57 = vmul.f32 %v10436_v16, %v2059_v56  ;;  %v1690_v3 = vadd.f32 %v10310_v48, %v1621_v40  ;;  %v7718_v40 = vld [vmem:[#allocation2 + $0x1e8] sm:$0xf0] }
 0x227   : > { %v10465_v11 = vpop.f32.mrf.mxu1  ;;  %v10472_v41 = vpop.eup %8674  ;;  %v10474_v24 = vadd.f32 1.0, %v8673_v21  ;;  %v2081_v48 = vand.u32 2147483647, %v10433_v59 }
 0x228   : > { %v2073_v50 = vmul.f32 %v10472_v41, %v10433_v59  ;;  %8678 = vpow2.f32 %v7488_v23  ;;  %v8677_v8 = vpop.eup %8676  ;;  %vm2078_vm7 = vweird.f32 %v10472_v41  ;;  %v2061_v55 = vadd.f32 %v10436_v16, %v2060_v57 }
 0x229   : > { %v1768_v45 = vpop.f32.mrf.mxu2  ;;  %v1837_v38 = vpop.f32.mrf.mxu3  ;;  %v2359_v35 = vmul.f32 %v8677_v8, %v2040_v27  ;;  %8680 = vrcp.f32 %v10474_v24  ;;  %vm10500_vm15 = vmor %vm2077_vm14, %vm2078_vm7  ;;  %v8444_v8 = vld [vmem:[#allocation2 + $0x1e4] sm:$0xf]  ;;  %vm2082_vm2 = vcmp.eq.f32.partialorder %v2081_v48, 8.507059e+37  ;;  %vm2092_vm9 = vweird.f32 %v10474_v24 }
 0x22a   : > { %v2074_v32 = vsub.f32 1.0, %v2073_v50  ;;  %v1769_v19 = vadd.f32 %v1768_v45, %v10262_v46  ;;  %8682 = vtanh.f32 %v1692_v60  ;;  %v2066_v50 = vand.u32 2147483647, %v10414_v6 }
 0x22b   : > { %v2382_v54 = vpack.c.bf16 %v2360_v0, %v2359_v35  ;;  %v2084_v45 = vor.u32 1.1754944e-38, %v2083_v39  ;;  %v7721_v6 = vor.u32 %v8444_v8, %v7718_v40  ;;  %v7716_v8 = vld [vmem:[#allocation2 + $0x1e0] sm:$0xf] }
 0x22c   : > { %v1838_v23 = vadd.f32 %v1837_v38, %v1769_v19  ;;  %v2075_v30 = vmul.f32 %v10472_v41, %v2074_v32  ;;  %vm2067_vm3 = vcmp.eq.f32.partialorder %v2066_v50, 8.507059e+37 }
 0x22d   : > { %3370 = vmatpush.bf16.msrb.mxu2 %v7721_v6  ;;  %v8428_v6 = vld [vmem:[#allocation2 + $0x164] sm:$0xf] }
 0x22e   : > { %v10483_v36 = vpop.f32.mrf.mxu0  ;;  %v8679_v26 = vpop.eup %8678  ;;  %v7489_v1 = vmul.f32 -1.442695, %v1838_v23  ;;  %v2076_v18 = vadd.f32 %v10472_v41, %v2075_v30  ;;  %v2069_v23 = vor.u32 1.1754944e-38, %v2068_v28 }
 0x22f   : > { %v10486_v63 = vpop.f32.mrf.mxu1  ;;  %v10494_v31 = vadd.f32 1.0, %v8679_v26  ;;  %v10504_v21 = vpop.eup %8680 }
 0x230   : > { %8684 = vpow2.f32 %v7489_v1  ;;  %v2080_v59 = vsel %vm10500_vm15, %v10472_v41, %v2076_v18  ;;  %v8683_v38 = vpop.eup %8682  ;;  %v2065_v41 = vsel %vm10515_vm1, %v10436_v16, %v2061_v55  ;;  %v2088_v19 = vmul.f32 %v10504_v21, %v10474_v24 }
 0x231   : > { %2574 = vmatmul.bf16.gmra.mxu0 %v2382_v54  ;;  %8686 = vrcp.f32 %v10494_v31  ;;  %v1770_v56 = vpop.f32.mrf.mxu2  ;;  %v1839_v27 = vpop.f32.mrf.mxu3  ;;  %v2085_v30 = vsel %vm2082_vm2, %v2084_v45, %v2080_v59  ;;  %v2070_v1 = vsel %vm2067_vm3, %v2069_v23, %v2065_v41  ;;  %v1628_v16 = vadd.f32 %v10401_v58, %v10335_v47  ;;  %v8445_v58 = vld [vmem:[#allocation2 + $0x1e4] sm:$0xf0]  ;;  %v7654_v41 = vld [vmem:[#allocation2 + $0x168] sm:$0xf0] }
 0x232   : > { %2643 = vmatmul.bf16.gmra.mxu1 %v2382_v54  ;;  %8688 = vtanh.f32 %v1690_v3  ;;  %v1771_v0 = vadd.f32 %v1770_v56, %v10262_v46  ;;  %v2362_v55 = vmul.f32 %v8683_v38, %v2085_v30  ;;  %v2089_v62 = vsub.f32 1.0, %v2088_v19  ;;  %v7644_v19 = vld [vmem:[#allocation2 + $0x150] sm:$0xf]  ;;  %v8427_v30 = vld [vmem:[#allocation2 + $0x154] sm:$0xf0] }
 0x233   : > { %v1697_v40 = vadd.f32 %v10405_v4, %v1628_v16  ;;  %v7717_v38 = vor.u32 %v8445_v58, %v7716_v8  ;;  %v7645_v4 = vor.u32 %v8427_v30, %v7644_v19  ;;  %vm2093_vm5 = vweird.f32 %v10504_v21 }
 0x234   : > { %v1840_v35 = vadd.f32 %v1839_v27, %v1771_v0  ;;  %vm2107_vm6 = vweird.f32 %v10494_v31  ;;  %vm10577_vm10 = vmor %vm2092_vm9, %vm2093_vm5 }
 0x235   : > { %3232 = vmatpush.bf16.msrb.mxu0 %v7717_v38  ;;  %3164 = vmatpush.bf16.msra.mxu3 %v7645_v4 }
 0x236   : > { %v10519_v32 = vpop.f32.mrf.mxu0  ;;  %v8685_v3 = vpop.eup %8684  ;;  %v7490_v26 = vmul.f32 -1.442695, %v1840_v35  ;;  %2712 = vmatmul.bf16.gmra.mxu2 %v2382_v54  ;;  %v1626_v54 = vadd.f32 %v10362_v49, %v10335_v47  ;;  %v7657_v49 = vor.u32 %v8428_v6, %v7654_v41 }
 0x237   : > { %v10526_v57 = vpop.f32.mrf.mxu1  ;;  %v10528_v18 = vpop.eup %8686  ;;  %v10532_v39 = vadd.f32 1.0, %v8685_v3  ;;  %v2090_v3 = vmul.f32 %v10504_v21, %v2089_v62  ;;  %v2113_v62 = vand.u32 2147483648, %v10494_v31 }
 0x238   : > { %v8689_v48 = vpop.eup %8688  ;;  %v2103_v28 = vmul.f32 %v10528_v18, %v10494_v31  ;;  %8690 = vpow2.f32 %v7490_v26  ;;  %v1695_v16 = vadd.f32 %v10367_v61, %v1626_v54  ;;  %3301 = vmatpush.bf16.msrb.mxu1 %v7657_v49  ;;  %vm2108_vm4 = vweird.f32 %v10528_v18 }
 0x239   : > { %v1773_v56 = vpop.f32.mrf.mxu2  ;;  %v1842_v27 = vpop.f32.mrf.mxu3  ;;  %v2361_v50 = vmul.f32 %v8689_v48, %v2070_v1  ;;  %8692 = vrcp.f32 %v10532_v39  ;;  %v2111_v61 = vand.u32 2147483647, %v10494_v31  ;;  %vm10563_vm8 = vmor %vm2107_vm6, %vm2108_vm4  ;;  %v2096_v31 = vand.u32 2147483647, %v10474_v24 }
 0x23a   : > { %v2104_v59 = vsub.f32 1.0, %v2103_v28  ;;  %v1774_v0 = vadd.f32 %v1773_v56, %v10262_v46  ;;  %8694 = vtanh.f32 %v1697_v40  ;;  %v2091_v56 = vadd.f32 %v10504_v21, %v2090_v3 }
 0x23b   : > { %v2383_v45 = vpack.c.bf16 %v2362_v55, %v2361_v50  ;;  %v2114_v6 = vor.u32 1.1754944e-38, %v2113_v62  ;;  %vm2112_vm11 = vcmp.eq.f32.partialorder %v2111_v61, 8.507059e+37  ;;  %vm2097_vm12 = vcmp.eq.f32.partialorder %v2096_v31, 8.507059e+37 }
 0x23c   : > { %v1843_v35 = vadd.f32 %v1842_v27, %v1774_v0  ;;  %v2105_v26 = vmul.f32 %v10528_v18, %v2104_v59  ;;  %v2098_v59 = vand.u32 2147483648, %v10474_v24  ;;  %v2095_v24 = vsel %vm10577_vm10, %v10504_v21, %v2091_v56  ;;  %v8442_v0 = vld [vmem:[#allocation2 + $0x1d4] sm:$0xf] }
 0x23d   : > { %vm2122_vm15 = vweird.f32 %v10532_v39 }
 0x23e   : > { %v10541_v60 = vpop.f32.mrf.mxu0  ;;  %v8691_v1 = vpop.eup %8690  ;;  %v7491_v48 = vmul.f32 -1.442695, %v1843_v35  ;;  %v2106_v55 = vadd.f32 %v10528_v18, %v2105_v26  ;;  %v2099_v49 = vor.u32 1.1754944e-38, %v2098_v59 }
 0x23f   : > { %v10543_v23 = vpop.f32.mrf.mxu1  ;;  %v10550_v28 = vadd.f32 1.0, %v8691_v1  ;;  %v10557_v27 = vpop.eup %8692  ;;  %v1633_v1 = vadd.f32 %v10463_v20, %v10335_v47  ;;  %v7710_v20 = vld [vmem:[#allocation2 + $0x1d8] sm:$0xf0] }
 0x240   : > { %8696 = vpow2.f32 %v7491_v48  ;;  %v2110_v58 = vsel %vm10563_vm8, %v10528_v18, %v2106_v55  ;;  %v2118_v41 = vmul.f32 %v10557_v27, %v10532_v39  ;;  %v8695_v18 = vpop.eup %8694  ;;  %v2100_v48 = vsel %vm2097_vm12, %v2099_v49, %v2095_v24 }
 0x241   : > { %2579 = vmatmul.bf16.gmra.mxu0 %v2383_v45  ;;  %8698 = vrcp.f32 %v10550_v28  ;;  %v1775_v50 = vpop.f32.mrf.mxu2  ;;  %v1844_v54 = vpop.f32.mrf.mxu3  ;;  %v2115_v30 = vsel %vm2112_vm11, %v2114_v6, %v2110_v58  ;;  %v1702_v31 = vadd.f32 %v10465_v11, %v1633_v1  ;;  %v7713_v38 = vor.u32 %v8442_v0, %v7710_v20 }
 0x242   : > { %2648 = vmatmul.bf16.gmra.mxu1 %v2383_v45  ;;  %v1776_v8 = vadd.f32 %v1775_v50, %v10262_v46  ;;  %8700 = vtanh.f32 %v1695_v16  ;;  %v2119_v55 = vsub.f32 1.0, %v2118_v41  ;;  %v2364_v62 = vmul.f32 %v8695_v18, %v2115_v30 }
 0x243   : > { %3371 = vmatpush.bf16.msrb.mxu2 %v7713_v38  ;;  %v2143_v11 = vand.u32 2147483648, %v10550_v28  ;;  %vm2123_vm13 = vweird.f32 %v10557_v27  ;;  %vm2137_vm14 = vweird.f32 %v10550_v28  ;;  %v7646_v38 = vld [vmem:[#allocation2 + $0x158] sm:$0xf0] }
 0x244   : > { %v1845_v19 = vadd.f32 %v1844_v54, %v1776_v8  ;;  %v1631_v8 = vadd.f32 %v10423_v42, %v10335_v47  ;;  %v2120_v24 = vmul.f32 %v10557_v27, %v2119_v55  ;;  %v2141_v55 = vand.u32 2147483647, %v10550_v28  ;;  %vm10632_vm1 = vmor %vm2122_vm15, %vm2123_vm13 }
 0x246   : > { %v10573_v40 = vpop.f32.mrf.mxu0  ;;  %v8697_v3 = vpop.eup %8696  ;;  %v7492_v26 = vmul.f32 -1.442695, %v1845_v19  ;;  %2717 = vmatmul.bf16.gmra.mxu2 %v2383_v45  ;;  %v1700_v42 = vadd.f32 %v10425_v44, %v1631_v8  ;;  %v2126_v44 = vand.u32 2147483647, %v10532_v39  ;;  %vm2142_vm2 = vcmp.eq.f32.partialorder %v2141_v55, 8.507059e+37 }
 0x247   : > { %v10583_v35 = vpop.f32.mrf.mxu1  ;;  %v10588_v4 = vpop.eup %8698  ;;  %v10592_v16 = vadd.f32 1.0, %v8697_v3 }
 0x248   : > { %v2133_v21 = vmul.f32 %v10588_v4, %v10550_v28  ;;  %8702 = vpow2.f32 %v7492_v26  ;;  %v8701_v56 = vpop.eup %8700  ;;  %vm2138_vm7 = vweird.f32 %v10588_v4  ;;  %v8443_v28 = vld [vmem:[#allocation2 + $0x1d4] sm:$0xf0]  ;;  %vm2127_vm3 = vcmp.eq.f32.partialorder %v2126_v44, 8.507059e+37 }
 0x249   : > { %v1778_v61 = vpop.f32.mrf.mxu2  ;;  %v1847_v50 = vpop.f32.mrf.mxu3  ;;  %8704 = vrcp.f32 %v10592_v16  ;;  %v2363_v59 = vmul.f32 %v8701_v56, %v2100_v48  ;;  %v2121_v48 = vadd.f32 %v10557_v27, %v2120_v24  ;;  %v2128_v56 = vand.u32 2147483648, %v10532_v39  ;;  %vm10625_vm0 = vmor %vm2137_vm14, %vm2138_vm7 }
 0x24a   : > { %v2134_v54 = vsub.f32 1.0, %v2133_v21  ;;  %v1779_v45 = vadd.f32 %v1778_v61, %v10262_v46  ;;  %8706 = vtanh.f32 %v1702_v31  ;;  %v8426_v31 = vld [vmem:[#allocation2 + $0x154] sm:$0xf]  ;;  %vm2152_vm9 = vweird.f32 %v10592_v16 }
 0x24b   : > { %v2384_v19 = vpack.c.bf16 %v2364_v62, %v2363_v59  ;;  %v2144_v59 = vor.u32 1.1754944e-38, %v2143_v11  ;;  %v1638_v11 = vadd.f32 %v10519_v32, %v10335_v47 }
 0x24c   : > { %v1848_v6 = vadd.f32 %v1847_v50, %v1779_v45  ;;  %v2135_v18 = vmul.f32 %v10588_v4, %v2134_v54  ;;  %v7708_v54 = vld [vmem:[#allocation2 + $0x1d0] sm:$0xf] }
 0x24d   : > { %v7709_v8 = vor.u32 %v8443_v28, %v7708_v54 }
 0x24e   : > { %v10601_v58 = vpop.f32.mrf.mxu0  ;;  %v8703_v49 = vpop.eup %8702  ;;  %v7493_v30 = vmul.f32 -1.442695, %v1848_v6  ;;  %v2136_v3 = vadd.f32 %v10588_v4, %v2135_v18  ;;  %v7636_v6 = vld [vmem:[#allocation2 + $0x140] sm:$0xf] }
 0x24f   : > { %v10603_v41 = vpop.f32.mrf.mxu1  ;;  %v10611_v26 = vadd.f32 1.0, %v8703_v49  ;;  %v10614_v1 = vpop.eup %8704  ;;  %v7649_v49 = vor.u32 %v8426_v31, %v7646_v38  ;;  %3233 = vmatpush.bf16.msrb.mxu0 %v7709_v8 }
 0x250   : > { %8708 = vpow2.f32 %v7493_v30  ;;  %v2140_v39 = vsel %vm10625_vm0, %v10588_v4, %v2136_v3  ;;  %v2148_v0 = vmul.f32 %v10614_v1, %v10592_v16  ;;  %v8425_v30 = vld [vmem:[#allocation2 + $0x144] sm:$0xf0]  ;;  %v2125_v4 = vsel %vm10632_vm1, %v10557_v27, %v2121_v48  ;;  %v8707_v3 = vpop.eup %8706 }
 0x251   : > { %2584 = vmatmul.bf16.gmra.mxu0 %v2384_v19  ;;  %8710 = vrcp.f32 %v10611_v26  ;;  %v1780_v21 = vpop.f32.mrf.mxu2  ;;  %v1849_v62 = vpop.f32.mrf.mxu3  ;;  %v2145_v61 = vsel %vm2142_vm2, %v2144_v59, %v2140_v39  ;;  %3302 = vmatpush.bf16.msrb.mxu1 %v7649_v49  ;;  %vm2153_vm5 = vweird.f32 %v10614_v1  ;;  %vm2167_vm6 = vweird.f32 %v10611_v26 }
 0x252   : > { %2653 = vmatmul.bf16.gmra.mxu1 %v2384_v19  ;;  %v1781_v50 = vadd.f32 %v1780_v21, %v10262_v46  ;;  %8712 = vtanh.f32 %v1700_v42  ;;  %v7637_v42 = vor.u32 %v8425_v30, %v7636_v6  ;;  %v2129_v21 = vor.u32 1.1754944e-38, %v2128_v56  ;;  %vm10693_vm10 = vmor %vm2152_vm9, %vm2153_vm5 }
 0x253   : > { %v2366_v32 = vmul.f32 %v8707_v3, %v2145_v61  ;;  %v1636_v56 = vadd.f32 %v10483_v36, %v10335_v47  ;;  %v2158_v61 = vand.u32 2147483648, %v10592_v16 }
 0x254   : > { %v1850_v24 = vadd.f32 %v1849_v62, %v1781_v50  ;;  %v2149_v50 = vsub.f32 1.0, %v2148_v0  ;;  %3165 = vmatpush.bf16.msra.mxu3 %v7637_v42  ;;  %v2130_v27 = vsel %vm2127_vm3, %v2129_v21, %v2125_v4 }
 0x256   : > { %v10641_v20 = vpop.f32.mrf.mxu0  ;;  %v8709_v54 = vpop.eup %8708  ;;  %v7494_v28 = vmul.f32 -1.442695, %v1850_v24  ;;  %2722 = vmatmul.bf16.gmra.mxu2 %v2384_v19  ;;  %v1707_v19 = vadd.f32 %v10526_v57, %v1638_v11  ;;  %v2150_v38 = vmul.f32 %v10614_v1, %v2149_v50  ;;  %v1705_v57 = vadd.f32 %v10486_v63, %v1636_v56  ;;  %v7702_v56 = vld [vmem:[#allocation2 + $0x1c8] sm:$0xf0] }
 0x257   : > { %v10643_v18 = vpop.f32.mrf.mxu1  ;;  %v10650_v62 = vpop.eup %8710  ;;  %v10652_v31 = vadd.f32 1.0, %v8709_v54  ;;  %v2173_v11 = vand.u32 2147483648, %v10611_v26  ;;  %v2171_v63 = vand.u32 2147483647, %v10611_v26 }
 0x258   : > { %v2163_v48 = vmul.f32 %v10650_v62, %v10611_v26  ;;  %8714 = vpow2.f32 %v7494_v28  ;;  %v8713_v55 = vpop.eup %8712  ;;  %vm2168_vm4 = vweird.f32 %v10650_v62  ;;  %v2151_v21 = vadd.f32 %v10614_v1, %v2150_v38 }
 0x259   : > { %v1783_v45 = vpop.f32.mrf.mxu2  ;;  %v1852_v44 = vpop.f32.mrf.mxu3  ;;  %v2365_v0 = vmul.f32 %v8713_v55, %v2130_v27  ;;  %8716 = vrcp.f32 %v10652_v31  ;;  %vm10678_vm8 = vmor %vm2167_vm6, %vm2168_vm4  ;;  %v8440_v55 = vld [vmem:[#allocation2 + $0x1c4] sm:$0xf]  ;;  %vm2172_vm11 = vcmp.eq.f32.partialorder %v2171_v63, 8.507059e+37  ;;  %vm2182_vm0 = vweird.f32 %v10652_v31 }
 0x25a   : > { %v2164_v39 = vsub.f32 1.0, %v2163_v48  ;;  %v1784_v59 = vadd.f32 %v1783_v45, %v10262_v46  ;;  %8718 = vtanh.f32 %v1707_v19  ;;  %v2156_v48 = vand.u32 2147483647, %v10592_v16 }
 0x25b   : > { %v2385_v49 = vpack.c.bf16 %v2366_v32, %v2365_v0  ;;  %v2174_v45 = vor.u32 1.1754944e-38, %v2173_v11  ;;  %v7705_v16 = vor.u32 %v8440_v55, %v7702_v56  ;;  %v7700_v55 = vld [vmem:[#allocation2 + $0x1c0] sm:$0xf] }
 0x25c   : > { %v1853_v6 = vadd.f32 %v1852_v44, %v1784_v59  ;;  %v2165_v36 = vmul.f32 %v10650_v62, %v2164_v39  ;;  %vm2157_vm12 = vcmp.eq.f32.partialorder %v2156_v48, 8.507059e+37 }
 0x25d   : > { %3372 = vmatpush.bf16.msrb.mxu2 %v7705_v16  ;;  %v8424_v16 = vld [vmem:[#allocation2 + $0x144] sm:$0xf] }
 0x25e   : > { %v10661_v8 = vpop.f32.mrf.mxu0  ;;  %v8715_v30 = vpop.eup %8714  ;;  %v7495_v4 = vmul.f32 -1.442695, %v1853_v6  ;;  %v2166_v3 = vadd.f32 %v10650_v62, %v2165_v36  ;;  %v2159_v6 = vor.u32 1.1754944e-38, %v2158_v61 }
 0x25f   : > { %v10664_v24 = vpop.f32.mrf.mxu1  ;;  %v10672_v42 = vadd.f32 1.0, %v8715_v30  ;;  %v10682_v28 = vpop.eup %8716 }
 0x260   : > { %8720 = vpow2.f32 %v7495_v4  ;;  %v2170_v26 = vsel %vm10678_vm8, %v10650_v62, %v2166_v3  ;;  %v8719_v44 = vpop.eup %8718  ;;  %v2155_v62 = vsel %vm10693_vm10, %v10614_v1, %v2151_v21  ;;  %v2178_v59 = vmul.f32 %v10682_v28, %v10652_v31 }
 0x261   : > { %2589 = vmatmul.bf16.gmra.mxu0 %v2385_v49  ;;  %8722 = vrcp.f32 %v10672_v42  ;;  %v1785_v50 = vpop.f32.mrf.mxu2  ;;  %v1854_v27 = vpop.f32.mrf.mxu3  ;;  %v2175_v36 = vsel %vm2172_vm11, %v2174_v45, %v2170_v26  ;;  %v2160_v4 = vsel %vm2157_vm12, %v2159_v6, %v2155_v62  ;;  %v1643_v1 = vadd.f32 %v10573_v40, %v10335_v47  ;;  %v8441_v40 = vld [vmem:[#allocation2 + $0x1c4] sm:$0xf0]  ;;  %v7638_v62 = vld [vmem:[#allocation2 + $0x148] sm:$0xf0] }
 0x262   : > { %2658 = vmatmul.bf16.gmra.mxu1 %v2385_v49  ;;  %8724 = vtanh.f32 %v1705_v57  ;;  %v1786_v32 = vadd.f32 %v1785_v50, %v10262_v46  ;;  %v2368_v21 = vmul.f32 %v8719_v44, %v2175_v36  ;;  %v2179_v54 = vsub.f32 1.0, %v2178_v59  ;;  %v7628_v59 = vld [vmem:[#allocation2 + $0x130] sm:$0xf]  ;;  %v8423_v36 = vld [vmem:[#allocation2 + $0x134] sm:$0xf0] }
 0x263   : > { %v1712_v56 = vadd.f32 %v10583_v35, %v1643_v1  ;;  %v7701_v44 = vor.u32 %v8441_v40, %v7700_v55  ;;  %v7629_v35 = vor.u32 %v8423_v36, %v7628_v59  ;;  %vm2183_vm13 = vweird.f32 %v10682_v28 }
 0x264   : > { %v1855_v0 = vadd.f32 %v1854_v27, %v1786_v32  ;;  %vm2197_vm14 = vweird.f32 %v10672_v42  ;;  %vm10755_vm1 = vmor %vm2182_vm0, %vm2183_vm13 }
 0x265   : > { %3234 = vmatpush.bf16.msrb.mxu0 %v7701_v44  ;;  %3166 = vmatpush.bf16.msra.mxu3 %v7629_v35 }
 0x266   : > { %v10697_v39 = vpop.f32.mrf.mxu0  ;;  %v8721_v57 = vpop.eup %8720  ;;  %v7496_v30 = vmul.f32 -1.442695, %v1855_v0  ;;  %2727 = vmatmul.bf16.gmra.mxu2 %v2385_v49  ;;  %v1641_v49 = vadd.f32 %v10541_v60, %v10335_v47  ;;  %v7641_v60 = vor.u32 %v8424_v16, %v7638_v62 }
 0x267   : > { %v10704_v38 = vpop.f32.mrf.mxu1  ;;  %v10706_v3 = vpop.eup %8722  ;;  %v10710_v11 = vadd.f32 1.0, %v8721_v57  ;;  %v2180_v57 = vmul.f32 %v10682_v28, %v2179_v54  ;;  %v2203_v54 = vand.u32 2147483648, %v10672_v42 }
 0x268   : > { %v8725_v63 = vpop.eup %8724  ;;  %v2193_v61 = vmul.f32 %v10706_v3, %v10672_v42  ;;  %8726 = vpow2.f32 %v7496_v30  ;;  %v1710_v1 = vadd.f32 %v10543_v23, %v1641_v49  ;;  %3303 = vmatpush.bf16.msrb.mxu1 %v7641_v60  ;;  %vm2198_vm7 = vweird.f32 %v10706_v3 }
 0x269   : > { %v1788_v50 = vpop.f32.mrf.mxu2  ;;  %v1857_v27 = vpop.f32.mrf.mxu3  ;;  %v2367_v48 = vmul.f32 %v8725_v63, %v2160_v4  ;;  %8728 = vrcp.f32 %v10710_v11  ;;  %v2201_v23 = vand.u32 2147483647, %v10672_v42  ;;  %vm10741_vm15 = vmor %vm2197_vm14, %vm2198_vm7  ;;  %v2186_v42 = vand.u32 2147483647, %v10652_v31 }
 0x26a   : > { %v2194_v26 = vsub.f32 1.0, %v2193_v61  ;;  %v1789_v32 = vadd.f32 %v1788_v50, %v10262_v46  ;;  %8730 = vtanh.f32 %v1712_v56  ;;  %v2181_v50 = vadd.f32 %v10682_v28, %v2180_v57 }
 0x26b   : > { %v2386_v45 = vpack.c.bf16 %v2368_v21, %v2367_v48  ;;  %v2204_v16 = vor.u32 1.1754944e-38, %v2203_v54  ;;  %vm2202_vm2 = vcmp.eq.f32.partialorder %v2201_v23, 8.507059e+37  ;;  %vm2187_vm3 = vcmp.eq.f32.partialorder %v2186_v42, 8.507059e+37 }
 0x26c   : > { %v1858_v0 = vadd.f32 %v1857_v27, %v1789_v32  ;;  %v2195_v30 = vmul.f32 %v10706_v3, %v2194_v26  ;;  %v2188_v26 = vand.u32 2147483648, %v10652_v31  ;;  %v2185_v31 = vsel %vm10755_vm1, %v10682_v28, %v2181_v50  ;;  %v8438_v32 = vld [vmem:[#allocation2 + $0x1b4] sm:$0xf] }
 0x26d   : > { %vm2212_vm8 = vweird.f32 %v10710_v11 }
 0x26e   : > { %v10719_v19 = vpop.f32.mrf.mxu0  ;;  %v8727_v4 = vpop.eup %8726  ;;  %v7497_v63 = vmul.f32 -1.442695, %v1858_v0  ;;  %v2196_v21 = vadd.f32 %v10706_v3, %v2195_v30  ;;  %v2189_v60 = vor.u32 1.1754944e-38, %v2188_v26 }
 0x26f   : > { %v10721_v6 = vpop.f32.mrf.mxu1  ;;  %v10728_v61 = vadd.f32 1.0, %v8727_v4  ;;  %v10735_v27 = vpop.eup %8728  ;;  %v1648_v4 = vadd.f32 %v10641_v20, %v10335_v47  ;;  %v7694_v20 = vld [vmem:[#allocation2 + $0x1b8] sm:$0xf0] }
 0x270   : > { %8732 = vpow2.f32 %v7497_v63  ;;  %v2200_v40 = vsel %vm10741_vm15, %v10706_v3, %v2196_v21  ;;  %v2208_v62 = vmul.f32 %v10735_v27, %v10710_v11  ;;  %v8731_v3 = vpop.eup %8730  ;;  %v2190_v63 = vsel %vm2187_vm3, %v2189_v60, %v2185_v31 }
 0x271   : > { %2594 = vmatmul.bf16.gmra.mxu0 %v2386_v45  ;;  %8734 = vrcp.f32 %v10728_v61  ;;  %v1790_v48 = vpop.f32.mrf.mxu2  ;;  %v1859_v49 = vpop.f32.mrf.mxu3  ;;  %v2205_v36 = vsel %vm2202_vm2, %v2204_v16, %v2200_v40  ;;  %v1717_v42 = vadd.f32 %v10643_v18, %v1648_v4  ;;  %v7697_v44 = vor.u32 %v8438_v32, %v7694_v20 }
 0x272   : > { %2663 = vmatmul.bf16.gmra.mxu1 %v2386_v45  ;;  %v1791_v55 = vadd.f32 %v1790_v48, %v10262_v46  ;;  %8736 = vtanh.f32 %v1710_v1  ;;  %v2209_v21 = vsub.f32 1.0, %v2208_v62  ;;  %v2370_v54 = vmul.f32 %v8731_v3, %v2205_v36 }
 0x273   : > { %3373 = vmatpush.bf16.msrb.mxu2 %v7697_v44  ;;  %vm2213_vm5 = vweird.f32 %v10735_v27  ;;  %vm2227_vm6 = vweird.f32 %v10728_v61  ;;  %v7630_v44 = vld [vmem:[#allocation2 + $0x138] sm:$0xf0] }
 0x274   : > { %v1860_v59 = vadd.f32 %v1859_v49, %v1791_v55  ;;  %v1646_v55 = vadd.f32 %v10601_v58, %v10335_v47  ;;  %v2210_v31 = vmul.f32 %v10735_v27, %v2209_v21  ;;  %v2233_v58 = vand.u32 2147483648, %v10728_v61  ;;  %vm10810_vm10 = vmor %vm2212_vm8, %vm2213_vm5 }
 0x275   : > { %v2231_v21 = vand.u32 2147483647, %v10728_v61 }
 0x276   : > { %v10751_v56 = vpop.f32.mrf.mxu0  ;;  %v8733_v57 = vpop.eup %8732  ;;  %v7498_v30 = vmul.f32 -1.442695, %v1860_v59  ;;  %2732 = vmatmul.bf16.gmra.mxu2 %v2386_v45  ;;  %v1715_v18 = vadd.f32 %v10603_v41, %v1646_v55  ;;  %v2216_v41 = vand.u32 2147483647, %v10710_v11 }
 0x277   : > { %v10761_v0 = vpop.f32.mrf.mxu1  ;;  %v10766_v35 = vpop.eup %8734  ;;  %v10770_v1 = vadd.f32 1.0, %v8733_v57  ;;  %vm2232_vm11 = vcmp.eq.f32.partialorder %v2231_v21, 8.507059e+37 }
 0x278   : > { %v2223_v28 = vmul.f32 %v10766_v35, %v10728_v61  ;;  %8738 = vpow2.f32 %v7498_v30  ;;  %v8737_v50 = vpop.eup %8736  ;;  %vm2228_vm4 = vweird.f32 %v10766_v35  ;;  %v8439_v61 = vld [vmem:[#allocation2 + $0x1b4] sm:$0xf0]  ;;  %vm2217_vm12 = vcmp.eq.f32.partialorder %v2216_v41, 8.507059e+37 }
 0x279   : > { %v1793_v23 = vpop.f32.mrf.mxu2  ;;  %v1862_v48 = vpop.f32.mrf.mxu3  ;;  %8740 = vrcp.f32 %v10770_v1  ;;  %v2369_v26 = vmul.f32 %v8737_v50, %v2190_v63  ;;  %v2211_v63 = vadd.f32 %v10735_v27, %v2210_v31  ;;  %v2218_v50 = vand.u32 2147483648, %v10710_v11  ;;  %vm10803_vm9 = vmor %vm2227_vm6, %vm2228_vm4 }
 0x27a   : > { %v2224_v49 = vsub.f32 1.0, %v2223_v28  ;;  %v1794_v45 = vadd.f32 %v1793_v23, %v10262_v46  ;;  %8742 = vtanh.f32 %v1717_v42  ;;  %v8422_v42 = vld [vmem:[#allocation2 + $0x134] sm:$0xf]  ;;  %vm2242_vm0 = vweird.f32 %v10770_v1 }
 0x27b   : > { %v2387_v59 = vpack.c.bf16 %v2370_v54, %v2369_v26  ;;  %v2234_v26 = vor.u32 1.1754944e-38, %v2233_v58  ;;  %v1653_v58 = vadd.f32 %v10697_v39, %v10335_v47 }
 0x27c   : > { %v1863_v16 = vadd.f32 %v1862_v48, %v1794_v45  ;;  %v2225_v3 = vmul.f32 %v10766_v35, %v2224_v49  ;;  %v7692_v49 = vld [vmem:[#allocation2 + $0x1b0] sm:$0xf] }
 0x27d   : > { %v7693_v55 = vor.u32 %v8439_v61, %v7692_v49  ;;  %v1722_v41 = vadd.f32 %v10704_v38, %v1653_v58 }
 0x27e   : > { %v10779_v40 = vpop.f32.mrf.mxu0  ;;  %v8739_v60 = vpop.eup %8738  ;;  %v7499_v36 = vmul.f32 -1.442695, %v1863_v16  ;;  %v2226_v57 = vadd.f32 %v10766_v35, %v2225_v3  ;;  %v7620_v16 = vld [vmem:[#allocation2 + $0x120] sm:$0xf] }
 0x27f   : > { %v10781_v62 = vpop.f32.mrf.mxu1  ;;  %v10789_v30 = vadd.f32 1.0, %v8739_v60  ;;  %v10792_v4 = vpop.eup %8740  ;;  %v7633_v60 = vor.u32 %v8422_v42, %v7630_v44  ;;  %3235 = vmatpush.bf16.msrb.mxu0 %v7693_v55 }
 0x280   : > { %8744 = vpow2.f32 %v7499_v36  ;;  %v2230_v11 = vsel %vm10803_vm9, %v10766_v35, %v2226_v57  ;;  %v2238_v32 = vmul.f32 %v10792_v4, %v10770_v1  ;;  %v8421_v36 = vld [vmem:[#allocation2 + $0x124] sm:$0xf0]  ;;  %v2215_v35 = vsel %vm10810_vm10, %v10735_v27, %v2211_v63  ;;  %v8743_v57 = vpop.eup %8742  ;;  %v7612_v63 = vld [vmem:[#allocation2 + $0x110] sm:$0xf] }
 0x281   : > { %2599 = vmatmul.bf16.gmra.mxu0 %v2387_v59  ;;  %8746 = vrcp.f32 %v10789_v30  ;;  %v1795_v28 = vpop.f32.mrf.mxu2  ;;  %v1864_v54 = vpop.f32.mrf.mxu3  ;;  %v2235_v23 = vsel %vm2232_vm11, %v2234_v26, %v2230_v11  ;;  %3304 = vmatpush.bf16.msrb.mxu1 %v7633_v60  ;;  %vm2243_vm13 = vweird.f32 %v10792_v4  ;;  %vm2257_vm14 = vweird.f32 %v10789_v30 }
 0x282   : > { %2668 = vmatmul.bf16.gmra.mxu1 %v2387_v59  ;;  %v1796_v48 = vadd.f32 %v1795_v28, %v10262_v46  ;;  %8748 = vtanh.f32 %v1715_v18  ;;  %v7621_v18 = vor.u32 %v8421_v36, %v7620_v16  ;;  %v2219_v28 = vor.u32 1.1754944e-38, %v2218_v50  ;;  %v8419_v50 = vld [vmem:[#allocation2 + $0x114] sm:$0xf0]  ;;  %v7604_v36 = vld [vmem:[#allocation2 + $0x100] sm:$0xf]  ;;  %vm10873_vm1 = vmor %vm2242_vm0, %vm2243_vm13 }
 0x283   : > { %v2372_v21 = vmul.f32 %v8743_v57, %v2235_v23 }
 0x284   : > { %v1865_v31 = vadd.f32 %v1864_v54, %v1796_v48  ;;  %v2239_v48 = vsub.f32 1.0, %v2238_v32  ;;  %3167 = vmatpush.bf16.msra.mxu3 %v7621_v18  ;;  %v2220_v27 = vsel %vm2217_vm12, %v2219_v28, %v2215_v35  ;;  %v7613_v32 = vor.u32 %v8419_v50, %v7612_v63  ;;  %v8417_v35 = vld [vmem:[#allocation2 + $0x104] sm:$0xf0] }
 0x285   : > { %v7605_v28 = vor.u32 %v8417_v35, %v7604_v36 }
 0x286   : > { %v10819_v20 = vpop.f32.mrf.mxu0  ;;  %v8745_v49 = vpop.eup %8744  ;;  %v7500_v61 = vmul.f32 -1.442695, %v1865_v31  ;;  %2737 = vmatmul.bf16.gmra.mxu2 %v2387_v59  ;;  %v1651_v59 = vadd.f32 %v10661_v8, %v10335_v47  ;;  %v2240_v60 = vmul.f32 %v10792_v4, %v2239_v48  ;;  %v2263_v48 = vand.u32 2147483648, %v10789_v30 }
 0x287   : > { %v10821_v3 = vpop.f32.mrf.mxu1  ;;  %v10828_v54 = vpop.eup %8746  ;;  %v10830_v42 = vadd.f32 1.0, %v8745_v49 }
 0x288   : > { %v2253_v39 = vmul.f32 %v10828_v54, %v10789_v30  ;;  %8750 = vpow2.f32 %v7500_v61  ;;  %v8749_v45 = vpop.eup %8748  ;;  %3168 = vmatpush.bf16.msra.mxu3 %v7613_v32  ;;  %v1720_v18 = vadd.f32 %v10664_v24, %v1651_v59  ;;  %vm2258_vm7 = vweird.f32 %v10828_v54  ;;  %v7686_v32 = vld [vmem:[#allocation2 + $0x1a8] sm:$0xf0] }
 0x289   : > { %v1798_v11 = vpop.f32.mrf.mxu2  ;;  %v1867_v26 = vpop.f32.mrf.mxu3  ;;  %v2371_v16 = vmul.f32 %v8749_v45, %v2220_v27  ;;  %8752 = vrcp.f32 %v10830_v42  ;;  %v2241_v63 = vadd.f32 %v10792_v4, %v2240_v60  ;;  %v2261_v24 = vand.u32 2147483647, %v10789_v30  ;;  %vm10858_vm15 = vmor %vm2257_vm14, %vm2258_vm7 }
 0x28a   : > { %v2254_v55 = vsub.f32 1.0, %v2253_v39  ;;  %v1799_v44 = vadd.f32 %v1798_v11, %v10262_v46  ;;  %8754 = vtanh.f32 %v1722_v41  ;;  %v2248_v39 = vand.u32 2147483648, %v10770_v1 }
 0x28b   : > { %v2388_v38 = vpack.c.bf16 %v2372_v21, %v2371_v16  ;;  %v2246_v30 = vand.u32 2147483647, %v10770_v1  ;;  %vm2262_vm2 = vcmp.eq.f32.partialorder %v2261_v24, 8.507059e+37  ;;  %vm2272_vm8 = vweird.f32 %v10830_v42 }
 0x28c   : > { %v1868_v57 = vadd.f32 %v1867_v26, %v1799_v44  ;;  %v2255_v58 = vmul.f32 %v10828_v54, %v2254_v55  ;;  %3169 = vmatpush.bf16.msra.mxu3 %v7605_v28  ;;  %v8436_v26 = vld [vmem:[#allocation2 + $0x1a4] sm:$0xf]  ;;  %v2264_v44 = vor.u32 1.1754944e-38, %v2263_v48  ;;  %v8437_v55 = vld [vmem:[#allocation2 + $0x1a4] sm:$0xf0]  ;;  %vm2816_vm7 = vcmp.lt.s32.totalorder %v9492_v17, 2 }
 0x28d   : > { %v7689_v1 = vor.u32 %v8436_v26, %v7686_v32  ;;  %vm2247_vm3 = vcmp.eq.f32.partialorder %v2246_v30, 8.507059e+37  ;;  %v7684_v32 = vld [vmem:[#allocation2 + $0x1a0] sm:$0xf] }
 0x28e   : > { %v10839_v31 = vpop.f32.mrf.mxu0  ;;  %v8751_v23 = vpop.eup %8750  ;;  %v7501_v49 = vmul.f32 -1.442695, %v1868_v57  ;;  %v2256_v61 = vadd.f32 %v10828_v54, %v2255_v58  ;;  %v2249_v58 = vor.u32 1.1754944e-38, %v2248_v39 }
 0x28f   : > { %v10842_v8 = vpop.f32.mrf.mxu1  ;;  %v10850_v27 = vadd.f32 1.0, %v8751_v23  ;;  %v10862_v50 = vpop.eup %8752  ;;  %3374 = vmatpush.bf16.msrb.mxu2 %v7689_v1  ;;  %v1658_v23 = vadd.f32 %v10751_v56, %v10335_v47  ;;  %v10899_v56 = vld [vmem:[%s13947_s6] sm:$0x7]  ;;  %v8420_v1 = vld [vmem:[#allocation2 + $0x124] sm:$0xf] }
 0x290   : > { %8756 = vpow2.f32 %v7501_v49  ;;  %v2260_v41 = vsel %vm10858_vm15, %v10828_v54, %v2256_v61  ;;  %v8755_v16 = vpop.eup %8754  ;;  %v2245_v54 = vsel %vm10873_vm1, %v10792_v4, %v2241_v63  ;;  %v2268_v36 = vmul.f32 %v10862_v50, %v10830_v42 }
 0x291   : > { %2604 = vmatmul.bf16.gmra.mxu0 %v2388_v38  ;;  %8758 = vrcp.f32 %v10850_v27  ;;  %v1800_v45 = vpop.f32.mrf.mxu2  ;;  %v1869_v59 = vpop.f32.mrf.mxu3  ;;  %v2250_v61 = vsel %vm2247_vm3, %v2249_v58, %v2245_v54  ;;  %v7622_v54 = vld [vmem:[#allocation2 + $0x128] sm:$0xf0]  ;;  %vm2273_vm5 = vweird.f32 %v10862_v50  ;;  %vm2287_vm6 = vweird.f32 %v10850_v27 }
 0x292   : > { %2673 = vmatmul.bf16.gmra.mxu1 %v2388_v38  ;;  %8760 = vtanh.f32 %v1720_v18  ;;  %v1801_v11 = vadd.f32 %v1800_v45, %v10262_v46  ;;  %v2265_v18 = vsel %vm2262_vm2, %v2264_v44, %v2260_v41  ;;  %v2269_v21 = vsub.f32 1.0, %v2268_v36  ;;  %v8434_v36 = vld [vmem:[#allocation2 + $0x194] sm:$0xf]  ;;  %vm10946_vm10 = vmor %vm2272_vm8, %vm2273_vm5 }
 0x293   : > { %v2374_v63 = vmul.f32 %v8755_v16, %v2265_v18  ;;  %v1656_v45 = vadd.f32 %v10719_v19, %v10335_v47  ;;  %v1727_v41 = vadd.f32 %v10761_v0, %v1658_v23  ;;  %v7685_v19 = vor.u32 %v8437_v55, %v7684_v32  ;;  %v7678_v23 = vld [vmem:[#allocation2 + $0x198] sm:$0xf0] }
 0x294   : > { %v1870_v35 = vadd.f32 %v1869_v59, %v1801_v11  ;;  %v7625_v18 = vor.u32 %v8420_v1, %v7622_v54  ;;  %v2270_v0 = vmul.f32 %v10862_v50, %v2269_v21  ;;  %v7676_v21 = vld [vmem:[#allocation2 + $0x190] sm:$0xf]  ;;  %v2291_v55 = vand.u32 2147483647, %v10850_v27 }
 0x295   : > { %3236 = vmatpush.bf16.msrb.mxu0 %v7685_v19  ;;  %v2278_v1 = vand.u32 2147483648, %v10830_v42  ;;  %v10974_v54 = vperm.slane %v10899_v56, 1 }
 0x296   : > { %v10877_v60 = vpop.f32.mrf.mxu0  ;;  %v8757_v28 = vpop.eup %8756  ;;  %v7502_v49 = vmul.f32 -1.442695, %v1870_v35  ;;  %2742 = vmatmul.bf16.gmra.mxu2 %v2388_v38  ;;  %3305 = vmatpush.bf16.msrb.mxu1 %v7625_v18  ;;  %v2271_v32 = vadd.f32 %v10862_v50, %v2270_v0  ;;  %vm2292_vm11 = vcmp.eq.f32.partialorder %v2291_v55, 8.507059e+37 }
 0x297   : > { %v10884_v57 = vpop.f32.mrf.mxu1  ;;  %v10888_v48 = vpop.eup %8758  ;;  %v10890_v4 = vadd.f32 1.0, %v8757_v28 }
 0x298   : > { %v8761_v24 = vpop.eup %8760  ;;  %v2283_v39 = vmul.f32 %v10888_v48, %v10850_v27  ;;  %8762 = vpow2.f32 %v7502_v49  ;;  %v1725_v49 = vadd.f32 %v10721_v6, %v1656_v45  ;;  %vm2288_vm4 = vweird.f32 %v10888_v48 }
 0x299   : > { %v1803_v59 = vpop.f32.mrf.mxu2  ;;  %v1872_v30 = vpop.f32.mrf.mxu3  ;;  %v2373_v38 = vmul.f32 %v8761_v24, %v2250_v61  ;;  %8764 = vrcp.f32 %v10890_v4  ;;  %v10912_v61 = vperm.slane %v10899_v56, 0  ;;  %v2293_v6 = vand.u32 2147483648, %v10850_v27  ;;  %vm10932_vm9 = vmor %vm2287_vm6, %vm2288_vm4 }
 0x29a   : > { %v2284_v11 = vsub.f32 1.0, %v2283_v39  ;;  %v1804_v26 = vadd.f32 %v1803_v59, %v10262_v46  ;;  %8766 = vtanh.f32 %v1727_v41  ;;  %v8418_v41 = vld [vmem:[#allocation2 + $0x114] sm:$0xf]  ;;  %v2276_v27 = vand.u32 2147483647, %v10830_v42 }
 0x29b   : > { %v10904_v16 = vpack.c.bf16 %v2374_v63, %v2373_v38  ;;  %v7681_v63 = vor.u32 %v8434_v36, %v7678_v23  ;;  %vm2302_vm1 = vweird.f32 %v10890_v4 }
 0x29c   : > { %v1873_v35 = vadd.f32 %v1872_v30, %v1804_v26  ;;  %v2285_v28 = vmul.f32 %v10888_v48, %v2284_v11  ;;  %v8435_v30 = vld [vmem:[#allocation2 + $0x194] sm:$0xf0]  ;;  %v7614_v11 = vld [vmem:[#allocation2 + $0x118] sm:$0xf0]  ;;  %vm2277_vm12 = vcmp.eq.f32.partialorder %v2276_v27, 8.507059e+37 }
 0x29d   : > { %3375 = vmatpush.bf16.msrb.mxu2 %v7681_v63  ;;  %v7677_v45 = vor.u32 %v8435_v30, %v7676_v21  ;;  %v7617_v36 = vor.u32 %v8418_v41, %v7614_v11 }
 0x29e   : > { %v2570_v44 = vpop.f32.mrf.mxu0  ;;  %v8763_v24 = vpop.eup %8762  ;;  %v7503_v39 = vmul.f32 -1.442695, %v1873_v35  ;;  %v2286_v59 = vadd.f32 %v10888_v48, %v2285_v28 }
 0x29f   : > { %v10906_v58 = vpop.f32.mrf.mxu1  ;;  %v10917_v38 = vadd.f32 1.0, %v8763_v24  ;;  %v10922_v26 = vpop.eup %8764  ;;  %3237 = vmatpush.bf16.msrb.mxu0 %v7677_v45  ;;  %v2571_v35 = vadd.f32 %v2570_v44, %v10912_v61  ;;  %v2294_v44 = vor.u32 1.1754944e-38, %v2293_v6  ;;  %3306 = vmatpush.bf16.msrb.mxu1 %v7617_v36  ;;  %v1661_v36 = vadd.f32 %v10779_v40, %v10335_v47 }
 0x2a0   : > { %8768 = vpow2.f32 %v7503_v39  ;;  %v2290_v0 = vsel %vm10932_vm9, %v10888_v48, %v2286_v59  ;;  %v2298_v28 = vmul.f32 %v10922_v26, %v10890_v4  ;;  %v2275_v48 = vsel %vm10946_vm10, %v10862_v50, %v2271_v32 }
 0x2a1   : > { %2609 = vmatmul.bf16.gmra.mxu0 %v10904_v16  ;;  %8770 = vrcp.f32 %v10917_v38  ;;  %v1805_v19 = vpop.f32.mrf.mxu2  ;;  %v1874_v23 = vpop.f32.mrf.mxu3  ;;  %v2279_v59 = vor.u32 1.1754944e-38, %v2278_v1  ;;  %v2295_v30 = vsel %vm2292_vm11, %v2294_v44, %v2290_v0  ;;  %v10957_v41 = vadd.f32 %v2571_v35, %v10014_v7 }
 0x2a2   : > { %2678 = vmatmul.bf16.gmra.mxu1 %v10904_v16  ;;  %v1806_v18 = vadd.f32 %v1805_v19, %v10262_v46  ;;  %8772 = vtanh.f32 %v1725_v49  ;;  %v8767_v46 = vpop.eup %8766  ;;  %v1663_v49 = vadd.f32 %v10819_v20, %v10335_v47  ;;  %v2299_v50 = vsub.f32 1.0, %v2298_v28 }
 0x2a3   : > { %v2280_v55 = vsel %vm2277_vm12, %v2279_v59, %v2275_v48  ;;  %v2376_v1 = vmul.f32 %v8767_v46, %v2295_v30  ;;  %v1730_v46 = vadd.f32 %v10781_v62, %v1661_v36  ;;  %vm2303_vm14 = vweird.f32 %v10922_v26 }
 0x2a4   : > { %v1875_v42 = vadd.f32 %v1874_v23, %v1806_v18  ;;  %v1732_v35 = vadd.f32 %v10821_v3, %v1663_v49  ;;  %v2300_v24 = vmul.f32 %v10922_v26, %v2299_v50  ;;  %v2323_v49 = vand.u32 2147483648, %v10917_v38  ;;  %vm11033_vm2 = vmor %vm2302_vm1, %vm2303_vm14 }
 0x2a5   : > { %vm2317_vm15 = vweird.f32 %v10917_v38  ;;  %v2321_v62 = vand.u32 2147483647, %v10917_v38  ;;  %v2308_v50 = vand.u32 2147483648, %v10890_v4  ;;  %vm2913_vm14 = vcmp.lt.s32.totalorder %v9492_v17, 6 }
 0x2a6   : > { %v2572_v63 = vpop.f32.mrf.mxu0  ;;  %v8769_v45 = vpop.eup %8768  ;;  %v7504_v6 = vmul.f32 -1.442695, %v1875_v42  ;;  %2747 = vmatmul.bf16.gmra.mxu2 %v10904_v16  ;;  %v2301_v59 = vadd.f32 %v10922_v26, %v2300_v24 }
 0x2a7   : > { %v2573_v39 = vadd.f32 %v2572_v63, %v10912_v61  ;;  %v2641_v21 = vpop.f32.mrf.mxu1  ;;  %v10963_v19 = vpop.eup %8770  ;;  %v10965_v32 = vadd.f32 1.0, %v8769_v45  ;;  %vm2322_vm3 = vcmp.eq.f32.partialorder %v2321_v62, 8.507059e+37  ;;  %v8470_v62 = vld [vmem:[#allocation4 + $0x170] sm:$0xf0] }
 0x2a8   : > { %v2313_v20 = vmul.f32 %v10963_v19, %v10917_v38  ;;  %8774 = vpow2.f32 %v7504_v6  ;;  %v10984_v0 = vadd.f32 %v2641_v21, %v10974_v54  ;;  %vm2318_vm13 = vweird.f32 %v10963_v19  ;;  %v8432_v38 = vld [vmem:[#allocation2 + $0x184] sm:$0xf] }
 0x2a9   : > { %v10960_v11 = vadd.f32 %v2573_v39, %v10008_v13  ;;  %v8773_v13 = vpop.eup %8772  ;;  %v10976_v16 = vpop.f32.mrf.mxu2  ;;  %8776 = vrcp.f32 %v10965_v32  ;;  %vm11018_vm0 = vmor %vm2317_vm15, %vm2318_vm13  ;;  %vm2332_vm9 = vweird.f32 %v10965_v32 }
 0x2aa   : > { %v2314_v18 = vsub.f32 1.0, %v2313_v20  ;;  %v2375_v27 = vmul.f32 %v8773_v13, %v2280_v55  ;;  %8778 = vtanh.f32 %v1732_v35  ;;  %v13956_v21 = vrot.slane %v10984_v0, 6  ;;  %v7670_v20 = vld [vmem:[#allocation2 + $0x188] sm:$0xf0] }
 0x2ab   : > { %v10971_v7 = vpack.c.bf16 %v10960_v11, %v10957_v41  ;;  %v2306_v13 = vand.u32 2147483647, %v10890_v4  ;;  %v11029_v35 = vperm.slane %v10899_v56, 2  ;;  %v2305_v56 = vsel %vm11033_vm2, %v10922_v26, %v2301_v59  ;;  %v7841_v59 = vld [vmem:[#allocation4 + $0x168] sm:$0xf] }
 0x2ac   : > { %v2390_v63 = vpack.c.bf16 %v2376_v1, %v2375_v27  ;;  %v2315_v44 = vmul.f32 %v10963_v19, %v2314_v18  ;;  %v2309_v55 = vor.u32 1.1754944e-38, %v2308_v50 }
 0x2ad   : > { %3170 = vmatmul.bf16.vlgmr.msra.gmra.mxu3 %v10971_v7  ;;  %vm2307_vm4 = vcmp.eq.f32.partialorder %v2306_v13, 8.507059e+37  ;;  %v1668_v13 = vadd.f32 %v10877_v60, %v10335_v47 }
 0x2ae   : > { %v2575_v28 = vpop.f32.mrf.mxu0  ;;  %v8775_v3 = vpop.eup %8774  ;;  %v2316_v42 = vadd.f32 %v10963_v19, %v2315_v44 }
 0x2af   : > { %v2644_v23 = vpop.f32.mrf.mxu1  ;;  %v10995_v39 = vadd.f32 1.0, %v8775_v3  ;;  %v11004_v30 = vpop.eup %8776  ;;  %v2576_v1 = vadd.f32 %v2575_v28, %v10912_v61  ;;  %v2324_v28 = vor.u32 1.1754944e-38, %v2323_v49  ;;  %v7668_v3 = vld [vmem:[#allocation2 + $0x180] sm:$0xf] }
 0x2b0   : > { %v10990_v40 = vadd.f32 %v2644_v23, %v10974_v54  ;;  %v2320_v36 = vsel %vm11018_vm0, %v10963_v19, %v2316_v42  ;;  %v7673_v23 = vor.u32 %v8432_v38, %v7670_v20  ;;  %v8779_v24 = vpop.eup %8778  ;;  %v2328_v4 = vmul.f32 %v11004_v30, %v10965_v32  ;;  %v8416_v38 = vld [vmem:[#allocation2 + $0x104] sm:$0xf]  ;;  %v7606_v20 = vld [vmem:[#allocation2 + $0x108] sm:$0xf0] }
 0x2b1   : > { %2614 = vmatmul.bf16.gmra.mxu0 %v2390_v63  ;;  %8780 = vrcp.f32 %v10995_v39  ;;  %v2710_v6 = vpop.f32.mrf.mxu2  ;;  %v7609_v26 = vor.u32 %v8416_v38, %v7606_v20  ;;  %v1737_v20 = vadd.f32 %v10884_v57, %v1668_v13  ;;  %vm2333_vm6 = vweird.f32 %v11004_v30 }
 0x2b2   : > { %v13957_v48 = vrot.slane %v10990_v40, 6  ;;  %2683 = vmatmul.bf16.gmra.mxu1 %v2390_v63  ;;  %8782 = vtanh.f32 %v1730_v46  ;;  %v8433_v46 = vld [vmem:[#allocation2 + $0x184] sm:$0xf0]  ;;  %3376 = vmatpush.bf16.msrb.mxu2 %v7673_v23  ;;  %v11053_v50 = vadd.f32 %v2710_v6, %v11029_v35  ;;  %v7842_v23 = vor.u32 %v8470_v62, %v7841_v59  ;;  %vm11110_vm11 = vmor %vm2332_vm9, %vm2333_vm6 }
 0x2b3   : > { %v7669_v49 = vor.u32 %v8433_v46, %v7668_v3  ;;  %3307 = vmatpush.bf16.msrb.mxu1 %v7609_v26  ;;  %vm2347_vm8 = vweird.f32 %v10995_v39  ;;  %8784 = vtanh.f32 %v1737_v20 }
 0x2b4   : > { %v11013_v45 = vsel %vm2816_vm7, %v13956_v21, %v13957_v48  ;;  %v2325_v21 = vsel %vm2322_vm3, %v2324_v28, %v2320_v36  ;;  %v11045_v48 = vadd.f32 %v2576_v1, %v10048_v43  ;;  %v2310_v28 = vsel %vm2307_vm4, %v2309_v55, %v2305_v56  ;;  %4124 = vmatpush.bf16.msrb.mxu3 %v7842_v23 }
 0x2b5   : > { %3238 = vmatpush.bf16.msrb.mxu0 %v7669_v49  ;;  %v2351_v23 = vand.u32 2147483647, %v10995_v39 }
 0x2b6   : > { %v2577_v18 = vpop.f32.mrf.mxu0  ;;  %2752 = vmatmul.bf16.gmra.mxu2 %v2390_v63  ;;  %v2378_v63 = vmul.f32 %v8779_v24, %v2325_v21  ;;  %v1666_v21 = vadd.f32 %v10839_v31, %v10335_v47  ;;  %v13958_v24 = vrot.slane %v11053_v50, 6 }
 0x2b7   : > { %v2578_v44 = vadd.f32 %v2577_v18, %v10912_v61  ;;  %v2646_v19 = vpop.f32.mrf.mxu1  ;;  %v11050_v27 = vpop.eup %8780  ;;  %vm2352_vm12 = vcmp.eq.f32.partialorder %v2351_v23, 8.507059e+37 }
 0x2b8   : > { %v2647_v42 = vadd.f32 %v2646_v19, %v10974_v54  ;;  %v2329_v19 = vsub.f32 1.0, %v2328_v4  ;;  %v2343_v43 = vmul.f32 %v11050_v27, %v10995_v39  ;;  %v8783_v1 = vpop.eup %8782  ;;  %vm2348_vm5 = vweird.f32 %v11050_v27 }
 0x2b9   : > { %v11048_v18 = vadd.f32 %v2578_v44, %v10040_v22  ;;  %v2713_v6 = vpop.f32.mrf.mxu2  ;;  %v14041_v44 = vrot.slane %v10990_v40, 6  ;;  %v2377_v46 = vmul.f32 %v8783_v1, %v2310_v28  ;;  %v1735_v31 = vadd.f32 %v10842_v8, %v1666_v21  ;;  %vm11098_vm10 = vmor %vm2347_vm8, %vm2348_vm5 }
 0x2ba   : > { %v2774_v36 = vrot.slane %v2647_v42, 6  ;;  %v2344_v56 = vsub.f32 1.0, %v2343_v43  ;;  %v2714_v3 = vadd.f32 %v2713_v6, %v11029_v35  ;;  %v2330_v40 = vmul.f32 %v11004_v30, %v2329_v19 }
 0x2bb   : > { %v11059_v22 = vpack.c.bf16 %v11048_v18, %v11045_v48  ;;  %v2391_v49 = vpack.c.bf16 %v2378_v63, %v2377_v46  ;;  %v2353_v28 = vand.u32 2147483648, %v10995_v39  ;;  %v2338_v8 = vand.u32 2147483648, %v10965_v32 }
 0x2bc   : > { %v11067_v4 = vsel %vm2816_vm7, %v14041_v44, %v2774_v36  ;;  %v2773_v42 = vrot.slane %v2714_v3, 6  ;;  %v2345_v38 = vmul.f32 %v11050_v27, %v2344_v56  ;;  %v2331_v57 = vadd.f32 %v11004_v30, %v2330_v40 }
 0x2bd   : > { %3175 = vmatmul.bf16.gmra.mxu3 %v11059_v22  ;;  %v2336_v39 = vand.u32 2147483647, %v10965_v32  ;;  %8786 = vtanh.f32 %v1735_v31  ;;  %v2354_v56 = vor.u32 1.1754944e-38, %v2353_v28 }
 0x2be   : > { %v2580_v60 = vpop.f32.mrf.mxu0  ;;  %v11082_v59 = vsel %vm2816_vm7, %v13958_v24, %v2773_v42  ;;  %v2346_v47 = vadd.f32 %v11050_v27, %v2345_v38  ;;  %v2335_v32 = vsel %vm11110_vm11, %v11004_v30, %v2331_v57 }
 0x2bf   : > { %v2649_v55 = vpop.f32.mrf.mxu1  ;;  %v2581_v1 = vadd.f32 %v2580_v60, %v10912_v61  ;;  %v2339_v60 = vor.u32 1.1754944e-38, %v2338_v8  ;;  %vm2337_vm13 = vcmp.eq.f32.partialorder %v2336_v39, 8.507059e+37  ;;  %v8469_v39 = vld [vmem:[#allocation4 + $0x16c] sm:$0xf] }
 0x2c0   : > { %v2650_v26 = vadd.f32 %v2649_v55, %v10974_v54 }
 0x2c1   : > { %2619 = vmatmul.bf16.gmra.mxu0 %v2391_v49  ;;  %v2715_v43 = vpop.f32.mrf.mxu2  ;;  %v11120_v40 = vadd.f32 %v2581_v1, %v10077_v12  ;;  %v2340_v30 = vsel %vm2337_vm13, %v2339_v60, %v2335_v32  ;;  %v8471_v32 = vld [vmem:[#allocation4 + $0x178] sm:$0xf0] }
 0x2c2   : > { %v2776_v62 = vrot.slane %v2650_v26, 6  ;;  %2688 = vmatmul.bf16.gmra.mxu1 %v2391_v49  ;;  %v2716_v13 = vadd.f32 %v2715_v43, %v11029_v35  ;;  %v8785_v26 = vpop.eup %8784 }
 0x2c3   : > { %v8787_v57 = vpop.eup %8786 }
 0x2c4   : > { %v11094_v19 = vsel %vm2816_vm7, %v2774_v36, %v2776_v62  ;;  %v2350_v36 = vsel %vm11098_vm10, %v11050_v27, %v2346_v47  ;;  %v2775_v3 = vrot.slane %v2716_v13, 6 }
 0x2c5   : > { %v2355_v55 = vsel %vm2352_vm12, %v2354_v56, %v2350_v36  ;;  %v7843_v36 = vld [vmem:[#allocation4 + $0x174] sm:$0xf0]  ;;  %v8467_v56 = vld [vmem:[#allocation4 + $0x158] sm:$0xf0] }
 0x2c6   : > { %v2582_v6 = vpop.f32.mrf.mxu0  ;;  %2757 = vmatmul.bf16.gmra.mxu2 %v2391_v49  ;;  %v11127_v20 = vsel %vm2816_vm7, %v2773_v42, %v2775_v3  ;;  %v2380_v28 = vmul.f32 %v8785_v26, %v2355_v55  ;;  %v2379_v42 = vmul.f32 %v8787_v57, %v2340_v30  ;;  %v7846_v44 = vor.u32 %v8469_v39, %v7843_v36 }
 0x2c7   : > { %v2583_v46 = vadd.f32 %v2582_v6, %v10912_v61  ;;  %v2651_v21 = vpop.f32.mrf.mxu1 }
 0x2c8   : > { %v2652_v27 = vadd.f32 %v2651_v21, %v10974_v54  ;;  %v2392_v63 = vpack.c.bf16 %v2380_v28, %v2379_v42  ;;  %4193 = vmatpush.bf16.msra.mxu0 %v7846_v44 }
 0x2c9   : > { %v11123_v38 = vadd.f32 %v2583_v46, %v10068_v2  ;;  %v2718_v12 = vpop.f32.mrf.mxu2  ;;  %v7849_v46 = vld [vmem:[#allocation4 + $0x170] sm:$0xf] }
 0x2ca   : > { %v2778_v47 = vrot.slane %v2652_v27, 6  ;;  %v2719_v49 = vadd.f32 %v2718_v12, %v11029_v35  ;;  %v7850_v55 = vor.u32 %v8471_v32, %v7849_v46 }
 0x2cb   : > { %v11131_v31 = vpack.c.bf16 %v11123_v38, %v11120_v40 }
 0x2cc   : > { %v11135_v2 = vsel %vm2816_vm7, %v2776_v62, %v2778_v47  ;;  %v2777_v43 = vrot.slane %v2719_v49, 6  ;;  %v7829_v62 = vld [vmem:[#allocation4 + $0x150] sm:$0xf]  ;;  %4262 = vmatpush.bf16.msra.mxu1 %v7850_v55  ;;  %v2891_v49 = vrot.slane %v11045_v48, 2 }
 0x2cd   : > { %3180 = vmatmul.bf16.gmra.mxu3 %v11131_v31  ;;  %v7830_v21 = vor.u32 %v8467_v56, %v7829_v62 }
 0x2ce   : > { %v2585_v23 = vpop.f32.mrf.mxu0  ;;  %v11142_v13 = vsel %vm2816_vm7, %v2775_v3, %v2777_v43 }
 0x2cf   : > { %v2654_v8 = vpop.f32.mrf.mxu1  ;;  %v2586_v3 = vadd.f32 %v2585_v23, %v10912_v61  ;;  %4125 = vmatpush.bf16.msrb.mxu3 %v7830_v21 }
 0x2d0   : > { %v2655_v1 = vadd.f32 %v2654_v8, %v10974_v54 }
 0x2d1   : > { %2624 = vmatmul.bf16.gmra.mxu0 %v2392_v63  ;;  %v2720_v60 = vpop.f32.mrf.mxu2 }
 0x2d2   : > { %v2780_v6 = vrot.slane %v2655_v1, 6  ;;  %2693 = vmatmul.bf16.gmra.mxu1 %v2392_v63  ;;  %v2721_v26 = vadd.f32 %v2720_v60, %v11029_v35  ;;  %v2890_v1 = vrot.slane %v10960_v11, 2 }
 0x2d4   : > { %v11146_v27 = vsel %vm2816_vm7, %v2778_v47, %v2780_v6  ;;  %v2779_v28 = vrot.slane %v2721_v26, 6  ;;  %v11154_v47 = vadd.f32 %v2586_v3, %v10104_v5  ;;  %v13959_v5 = vrot.slane %v10957_v41, 2 }
 0x2d5   : > { %14046 = vst [vmem:[#allocation17_spill] sm:$0xff] %v11146_v27 }
 0x2d6   : > { %v2587_v30 = vpop.f32.mrf.mxu0  ;;  %2762 = vmatmul.bf16.gmra.mxu2 %v2392_v63  ;;  %v11161_v23 = vsel %vm2816_vm7, %v2777_v43, %v2779_v28  ;;  %v11184_v36 = vsel %vm2913_vm14, %v13959_v5, %v2890_v1  ;;  %v2892_v5 = vrot.slane %v11048_v18, 2 }
 0x2d7   : > { %v2588_v57 = vadd.f32 %v2587_v30, %v10912_v61  ;;  %v2656_v12 = vpop.f32.mrf.mxu1  ;;  %14047 = vst [vmem:[#allocation18_spill] sm:$0xff] %v11161_v23 }
 0x2d8   : > { %v2657_v42 = vadd.f32 %v2656_v12, %v10974_v54 }
 0x2d9   : > { %v11157_v8 = vadd.f32 %v2588_v57, %v10097_v52  ;;  %v11172_v52 = vsel %vm2913_vm14, %v2890_v1, %v2891_v49  ;;  %v2723_v63 = vpop.f32.mrf.mxu2  ;;  %v2893_v57 = vrot.slane %v11120_v40, 2  ;;  %v8466_v1 = vld [vmem:[#allocation4 + $0x154] sm:$0xf] }
 0x2da   : > { %v2782_v39 = vrot.slane %v2657_v42, 6  ;;  %v2724_v11 = vadd.f32 %v2723_v63, %v11029_v35  ;;  %v2939_v44 = vpack.c.bf16 %v11172_v52, %v11184_v36  ;;  %v7831_v63 = vld [vmem:[#allocation4 + $0x15c] sm:$0xf0] }
 0x2db   : > { %v11167_v48 = vpack.c.bf16 %v11157_v8, %v11154_v47 }
 0x2dc   : > { %v11176_v43 = vsel %vm2816_vm7, %v2780_v6, %v2782_v39  ;;  %v2781_v56 = vrot.slane %v2724_v11, 6  ;;  %v7834_v11 = vor.u32 %v8466_v1, %v7831_v63 }
 0x2dd   : > { %14048 = vst [vmem:[#allocation19_spill] sm:$0xff] %v11176_v43  ;;  %3185 = vmatmul.bf16.gmra.mxu3 %v11167_v48 }
 0x2de   : > { %v2590_v62 = vpop.f32.mrf.mxu0  ;;  %v11191_v6 = vsel %vm2816_vm7, %v2779_v28, %v2781_v56  ;;  %4194 = vmatpush.bf16.msra.mxu0 %v7834_v11 }
 0x2df   : > { %v2659_v46 = vpop.f32.mrf.mxu1  ;;  %14049 = vst [vmem:[#allocation20_spill] sm:$0xff] %v11191_v6  ;;  %v2591_v3 = vadd.f32 %v2590_v62, %v10912_v61 }
 0x2e0   : > { %v2660_v21 = vadd.f32 %v2659_v46, %v10974_v54  ;;  %v7817_v46 = vld [vmem:[#allocation4 + $0x138] sm:$0xf] }
 0x2e1   : > { %3239 = vmatmul.bf16.vlgmr.msrb.gmra.mxu0 %v2939_v44  ;;  %v2725_v55 = vpop.f32.mrf.mxu2  ;;  %v11204_v24 = vadd.f32 %v2591_v3, %v10132_v34  ;;  %v11232_v3 = vsel %vm2913_vm14, %v2891_v49, %v2892_v5 }
 0x2e2   : > { %v2784_v32 = vrot.slane %v2660_v21, 6  ;;  %3308 = vmatmul.bf16.vlgmr.msrb.gmra.mxu1 %v10971_v7  ;;  %v2726_v26 = vadd.f32 %v2725_v55, %v11029_v35  ;;  %v7837_v21 = vld [vmem:[#allocation4 + $0x158] sm:$0xf] }
 0x2e4   : > { %v11196_v60 = vsel %vm2816_vm7, %v2782_v39, %v2784_v32  ;;  %v2783_v12 = vrot.slane %v2726_v26, 6  ;;  %v8464_v39 = vld [vmem:[#allocation4 + $0x140] sm:$0xf0] }
 0x2e5   : > { %14050 = vst [vmem:[#allocation21_spill] sm:$0xff] %v11196_v60  ;;  %v7818_v55 = vor.u32 %v8464_v39, %v7817_v46  ;;  %v8468_v26 = vld [vmem:[#allocation4 + $0x160] sm:$0xf0] }
 0x2e6   : > { %v2592_v30 = vpop.f32.mrf.mxu0  ;;  %3377 = vmatmul.bf16.vlgmr.msrb.gmra.mxu2 %v2939_v44  ;;  %v7838_v1 = vor.u32 %v8468_v26, %v7837_v21 }
 0x2e7   : > { %v2593_v28 = vadd.f32 %v2592_v30, %v10912_v61  ;;  %v2661_v42 = vpop.f32.mrf.mxu1  ;;  %v11211_v30 = vsel %vm2816_vm7, %v2781_v56, %v2783_v12  ;;  %4126 = vmatpush.bf16.msrb.mxu3 %v7818_v55 }
 0x2e8   : > { %v2662_v7 = vadd.f32 %v2661_v42, %v10974_v54  ;;  %14051 = vst [vmem:[#allocation22_spill] sm:$0xff] %v11211_v30  ;;  %4263 = vmatpush.bf16.msra.mxu1 %v7838_v1 }
 0x2e9   : > { %v11207_v62 = vadd.f32 %v2593_v28, %v10125_v29  ;;  %v2728_v34 = vpop.f32.mrf.mxu2  ;;  %v11222_v29 = vsel %vm2913_vm14, %v2892_v5, %v2893_v57 }
 0x2ea   : > { %v2786_v42 = vrot.slane %v2662_v7, 6  ;;  %v2729_v18 = vadd.f32 %v2728_v34, %v11029_v35  ;;  %v2941_v11 = vpack.c.bf16 %v11222_v29, %v11232_v3 }
 0x2eb   : > { %v11216_v63 = vpack.c.bf16 %v11207_v62, %v11204_v24 }
 0x2ec   : > { %v11226_v44 = vsel %vm2816_vm7, %v2784_v32, %v2786_v42  ;;  %v2785_v28 = vrot.slane %v2729_v18, 6 }
 0x2ed   : > { %14052 = vst [vmem:[#allocation23_spill] sm:$0xff] %v11226_v44  ;;  %3190 = vmatmul.bf16.gmra.mxu3 %v11216_v63 }
 0x2ee   : > { %v2595_v56 = vpop.f32.mrf.mxu0  ;;  %v11239_v32 = vsel %vm2816_vm7, %v2783_v12, %v2785_v28  ;;  %v2895_v12 = vrot.slane %v11154_v47, 2 }
 0x2ef   : > { %v2664_v7 = vpop.f32.mrf.mxu1  ;;  %14053 = vst [vmem:[#allocation24_spill] sm:$0xff] %v11239_v32  ;;  %v2596_v5 = vadd.f32 %v2595_v56, %v10912_v61 }
 0x2f0   : > { %v2665_v46 = vadd.f32 %v2664_v7, %v10974_v54 }
 0x2f1   : > { %3244 = vmatmul.bf16.gmra.mxu0 %v2941_v11  ;;  %v2730_v49 = vpop.f32.mrf.mxu2 }
 0x2f2   : > { %v2788_v39 = vrot.slane %v2665_v46, 6  ;;  %3313 = vmatmul.bf16.gmra.mxu1 %v11059_v22  ;;  %v2731_v55 = vadd.f32 %v2730_v49, %v11029_v35  ;;  %v11252_v22 = vadd.f32 %v2596_v5, %v10161_v10  ;;  %v2894_v46 = vrot.slane %v11123_v38, 2 }
 0x2f4   : > { %v11244_v21 = vsel %vm2816_vm7, %v2786_v42, %v2788_v39  ;;  %v2787_v1 = vrot.slane %v2731_v55, 6  ;;  %v11268_v10 = vsel %vm2913_vm14, %v2894_v46, %v2895_v12  ;;  %v11280_v38 = vsel %vm2913_vm14, %v2893_v57, %v2894_v46  ;;  %v8461_v46 = vld [vmem:[#allocation4 + $0x128] sm:$0xf0] }
 0x2f5   : > { %14054 = vst [vmem:[#allocation25_spill] sm:$0xff] %v11244_v21 }
 0x2f6   : > { %v2597_v26 = vpop.f32.mrf.mxu0  ;;  %3382 = vmatmul.bf16.gmra.mxu2 %v2941_v11  ;;  %v11259_v56 = vsel %vm2816_vm7, %v2785_v28, %v2787_v1 }
 0x2f7   : > { %v2598_v34 = vadd.f32 %v2597_v26, %v10912_v61  ;;  %v2666_v18 = vpop.f32.mrf.mxu1  ;;  %14055 = vst [vmem:[#allocation26_spill] sm:$0xff] %v11259_v56  ;;  %v8465_v56 = vld [vmem:[#allocation4 + $0x148] sm:$0xf0] }
 0x2f8   : > { %v2667_v7 = vadd.f32 %v2666_v18, %v10974_v54 }
 0x2f9   : > { %v11255_v42 = vadd.f32 %v2598_v34, %v10152_v37  ;;  %v2733_v47 = vpop.f32.mrf.mxu2  ;;  %v2943_v34 = vpack.c.bf16 %v11268_v10, %v11280_v38 }
 0x2fa   : > { %v2790_v49 = vrot.slane %v2667_v7, 6  ;;  %v2734_v11 = vadd.f32 %v2733_v47, %v11029_v35  ;;  %v8463_v7 = vld [vmem:[#allocation4 + $0x13c] sm:$0xf]  ;;  %v7819_v47 = vld [vmem:[#allocation4 + $0x144] sm:$0xf0] }
 0x2fb   : > { %v11264_v55 = vpack.c.bf16 %v11255_v42, %v11252_v22  ;;  %v7822_v57 = vor.u32 %v8463_v7, %v7819_v47 }
 0x2fc   : > { %v11272_v37 = vsel %vm2816_vm7, %v2788_v39, %v2790_v49  ;;  %v2789_v5 = vrot.slane %v2734_v11, 6  ;;  %v7825_v11 = vld [vmem:[#allocation4 + $0x140] sm:$0xf] }
 0x2fd   : > { %14056 = vst [vmem:[#allocation27_spill] sm:$0xff] %v11272_v37  ;;  %3195 = vmatmul.bf16.gmra.mxu3 %v11264_v55  ;;  %v7805_v37 = vld [vmem:[#allocation4 + $0x120] sm:$0xf]  ;;  %4195 = vmatpush.bf16.msra.mxu0 %v7822_v57 }
 0x2fe   : > { %v2600_v28 = vpop.f32.mrf.mxu0  ;;  %v11287_v39 = vsel %vm2816_vm7, %v2787_v1, %v2789_v5  ;;  %v7806_v21 = vor.u32 %v8461_v46, %v7805_v37  ;;  %v7826_v1 = vor.u32 %v8465_v56, %v7825_v11  ;;  %v2897_v37 = vrot.slane %v11204_v24, 2 }
 0x2ff   : > { %v2669_v26 = vpop.f32.mrf.mxu1  ;;  %14057 = vst [vmem:[#allocation28_spill] sm:$0xff] %v11287_v39  ;;  %v2601_v39 = vadd.f32 %v2600_v28, %v10912_v61 }
 0x300   : > { %v2670_v18 = vadd.f32 %v2669_v26, %v10974_v54  ;;  %4127 = vmatpush.bf16.msrb.mxu3 %v7806_v21  ;;  %4264 = vmatpush.bf16.msra.mxu1 %v7826_v1 }
 0x301   : > { %3249 = vmatmul.bf16.gmra.mxu0 %v2943_v34  ;;  %v2735_v26 = vpop.f32.mrf.mxu2 }
 0x302   : > { %v2792_v40 = vrot.slane %v2670_v18, 6  ;;  %3318 = vmatmul.bf16.gmra.mxu1 %v11131_v31  ;;  %v2736_v32 = vadd.f32 %v2735_v26, %v11029_v35 }
 0x304   : > { %v11292_v44 = vsel %vm2816_vm7, %v2790_v49, %v2792_v40  ;;  %v2791_v31 = vrot.slane %v2736_v32, 6  ;;  %v11300_v49 = vadd.f32 %v2601_v39, %v10188_v51  ;;  %v2896_v32 = vrot.slane %v11157_v8, 2 }
 0x305   : > { %14058 = vst [vmem:[#allocation29_spill] sm:$0xff] %v11292_v44  ;;  %v7793_v44 = vld [vmem:[#allocation4 + $0x108] sm:$0xf] }
 0x306   : > { %v2602_v18 = vpop.f32.mrf.mxu0  ;;  %3387 = vmatmul.bf16.gmra.mxu2 %v2943_v34  ;;  %v11307_v21 = vsel %vm2816_vm7, %v2789_v5, %v2791_v31  ;;  %v11316_v51 = vsel %vm2913_vm14, %v2896_v32, %v2897_v37  ;;  %v11326_v8 = vsel %vm2913_vm14, %v2895_v12, %v2896_v32 }
 0x307   : > { %v2603_v7 = vadd.f32 %v2602_v18, %v10912_v61  ;;  %v2671_v47 = vpop.f32.mrf.mxu1  ;;  %14059 = vst [vmem:[#allocation30_spill] sm:$0xff] %v11307_v21  ;;  %v2945_v26 = vpack.c.bf16 %v11316_v51, %v11326_v8 }
 0x308   : > { %v2672_v46 = vadd.f32 %v2671_v47, %v10974_v54  ;;  %14060 = vst [vmem:[#allocation31_spill] sm:$0xff] %v11316_v51 }
 0x309   : > { %v11303_v56 = vadd.f32 %v2603_v7, %v10181_v25  ;;  %v2738_v24 = vpop.f32.mrf.mxu2  ;;  %14062 = vst [vmem:[#allocation33_spill] sm:$0xff] %v11326_v8 }
 0x30a   : > { %v2794_v28 = vrot.slane %v2672_v46, 6  ;;  %v2739_v34 = vadd.f32 %v2738_v24, %v11029_v35  ;;  %v2898_v24 = vrot.slane %v11207_v62, 2 }
 0x30b   : > { %v11312_v57 = vpack.c.bf16 %v11303_v56, %v11300_v49 }
 0x30c   : > { %v11320_v25 = vsel %vm2816_vm7, %v2792_v40, %v2794_v28  ;;  %v2793_v39 = vrot.slane %v2739_v34, 6 }
 0x30d   : > { %14061 = vst [vmem:[#allocation32_spill] sm:$0xff] %v11320_v25  ;;  %3200 = vmatmul.bf16.gmra.mxu3 %v11312_v57  ;;  %v8460_v25 = vld [vmem:[#allocation4 + $0x124] sm:$0xf] }
 0x30e   : > { %v2605_v5 = vpop.f32.mrf.mxu0  ;;  %v11333_v40 = vsel %vm2816_vm7, %v2791_v31, %v2793_v39 }
 0x30f   : > { %v2674_v11 = vpop.f32.mrf.mxu1  ;;  %14063 = vst [vmem:[#allocation34_spill] sm:$0xff] %v11333_v40  ;;  %v2606_v47 = vadd.f32 %v2605_v5, %v10912_v61 }
 0x310   : > { %v2675_v1 = vadd.f32 %v2674_v11, %v10974_v54 }
 0x311   : > { %3254 = vmatmul.bf16.gmra.mxu0 %v2945_v26  ;;  %v2740_v12 = vpop.f32.mrf.mxu2  ;;  %v11346_v21 = vadd.f32 %v2606_v47, %v10212_v53 }
 0x312   : > { %v2796_v18 = vrot.slane %v2675_v1, 6  ;;  %3323 = vmatmul.bf16.gmra.mxu1 %v11167_v48  ;;  %v2741_v46 = vadd.f32 %v2740_v12, %v11029_v35  ;;  %v7807_v1 = vld [vmem:[#allocation4 + $0x12c] sm:$0xf0] }
 0x313   : > { %v7810_v40 = vor.u32 %v8460_v25, %v7807_v1 }
 0x314   : > { %v11338_v7 = vsel %vm2816_vm7, %v2794_v28, %v2796_v18  ;;  %v2795_v34 = vrot.slane %v2741_v46, 6  ;;  %v8458_v28 = vld [vmem:[#allocation4 + $0x110] sm:$0xf0] }
 0x315   : > { %14064 = vst [vmem:[#allocation35_spill] sm:$0xff] %v11338_v7  ;;  %v7813_v7 = vld [vmem:[#allocation4 + $0x128] sm:$0xf]  ;;  %v7794_v12 = vor.u32 %v8458_v28, %v7793_v44  ;;  %v8462_v46 = vld [vmem:[#allocation4 + $0x130] sm:$0xf0]  ;;  %4196 = vmatpush.bf16.msra.mxu0 %v7810_v40  ;;  %v11374_v40 = vsel %vm2913_vm14, %v2897_v37, %v2898_v24 }
 0x316   : > { %v2607_v32 = vpop.f32.mrf.mxu0  ;;  %3392 = vmatmul.bf16.gmra.mxu2 %v2945_v26  ;;  %v7814_v25 = vor.u32 %v8462_v46, %v7813_v7  ;;  %14069 = vst [vmem:[#allocation39_spill] sm:$0xff] %v11374_v40 }
 0x317   : > { %v2608_v31 = vadd.f32 %v2607_v32, %v10912_v61  ;;  %v2676_v11 = vpop.f32.mrf.mxu1  ;;  %v11353_v32 = vsel %vm2816_vm7, %v2793_v39, %v2795_v34  ;;  %4128 = vmatpush.bf16.msrb.mxu3 %v7794_v12 }
 0x318   : > { %v2677_v48 = vadd.f32 %v2676_v11, %v10974_v54  ;;  %14065 = vst [vmem:[#allocation36_spill] sm:$0xff] %v11353_v32  ;;  %4265 = vmatpush.bf16.msra.mxu1 %v7814_v25 }
 0x319   : > { %v11349_v5 = vadd.f32 %v2608_v31, %v10207_v15  ;;  %v2743_v53 = vpop.f32.mrf.mxu2  ;;  %v14066_v15 = vrot.slane %v11252_v22, 2 }
 0x31a   : > { %v2798_v11 = vrot.slane %v2677_v48, 6  ;;  %v2744_v62 = vadd.f32 %v2743_v53, %v11029_v35 }
 0x31b   : > { %v11358_v1 = vpack.c.bf16 %v11349_v5, %v11346_v21  ;;  %v11364_v44 = vsel %vm2913_vm14, %v2898_v24, %v14066_v15 }
 0x31c   : > { %14067 = vst [vmem:[#allocation37_spill] sm:$0xff] %v11364_v44  ;;  %v11368_v39 = vsel %vm2816_vm7, %v2796_v18, %v2798_v11  ;;  %v2797_v7 = vrot.slane %v2744_v62, 6  ;;  %v2947_v31 = vpack.c.bf16 %v11364_v44, %v11374_v40  ;;  %v2904_v40 = vrot.slane %v11349_v5, 2 }
 0x31d   : > { %14068 = vst [vmem:[#allocation38_spill] sm:$0xff] %v11368_v39  ;;  %3205 = vmatmul.bf16.gmra.mxu3 %v11358_v1 }
 0x31e   : > { %v2610_v26 = vpop.f32.mrf.mxu0  ;;  %v11381_v18 = vsel %vm2816_vm7, %v2795_v34, %v2797_v7  ;;  %v2901_v34 = vrot.slane %v11300_v49, 2 }
 0x31f   : > { %v2679_v47 = vpop.f32.mrf.mxu1  ;;  %14070 = vst [vmem:[#allocation40_spill] sm:$0xff] %v11381_v18  ;;  %v2611_v24 = vadd.f32 %v2610_v26, %v10912_v61  ;;  %v8459_v18 = vld [vmem:[#allocation4 + $0x118] sm:$0xf0] }
 0x320   : > { %v2680_v48 = vadd.f32 %v2679_v47, %v10974_v54 }
 0x321   : > { %3259 = vmatmul.bf16.gmra.mxu0 %v2947_v31  ;;  %v2745_v37 = vpop.f32.mrf.mxu2 }
 0x322   : > { %v2800_v28 = vrot.slane %v2680_v48, 6  ;;  %3328 = vmatmul.bf16.gmra.mxu1 %v11216_v63  ;;  %v2746_v46 = vadd.f32 %v2745_v37, %v11029_v35  ;;  %v11394_v63 = vadd.f32 %v2611_v24, %v10239_v14  ;;  %v2900_v48 = vrot.slane %v11255_v42, 2 }
 0x323   : > { %v14075_v42 = vrot.slane %v11252_v22, 2  ;;  %v7795_v22 = vld [vmem:[#allocation4 + $0x114] sm:$0xf0] }
 0x324   : > { %v11386_v12 = vsel %vm2816_vm7, %v2798_v11, %v2800_v28  ;;  %v2799_v53 = vrot.slane %v2746_v46, 6  ;;  %v11410_v14 = vsel %vm2913_vm14, %v2900_v48, %v2901_v34 }
 0x325   : > { %14071 = vst [vmem:[#allocation41_spill] sm:$0xff] %v11386_v12  ;;  %v11422_v24 = vsel %vm2913_vm14, %v14075_v42, %v2900_v48  ;;  %v7781_v12 = vld [vmem:[#allocation4 + $0xf0] sm:$0xf] }
 0x326   : > { %v2612_v25 = vpop.f32.mrf.mxu0  ;;  %3397 = vmatmul.bf16.gmra.mxu2 %v2947_v31  ;;  %v11401_v26 = vsel %vm2816_vm7, %v2797_v7, %v2799_v53  ;;  %14073 = vst [vmem:[#allocation43_spill] sm:$0xff] %v11410_v14  ;;  %v7801_v42 = vld [vmem:[#allocation4 + $0x110] sm:$0xf] }
 0x327   : > { %v2613_v15 = vadd.f32 %v2612_v25, %v10912_v61  ;;  %v2681_v62 = vpop.f32.mrf.mxu1  ;;  %14072 = vst [vmem:[#allocation42_spill] sm:$0xff] %v11401_v26 }
 0x328   : > { %v2682_v47 = vadd.f32 %v2681_v62, %v10974_v54  ;;  %14076 = vst [vmem:[#allocation45_spill] sm:$0xff] %v11422_v24  ;;  %v2949_v62 = vpack.c.bf16 %v11410_v14, %v11422_v24  ;;  %v14086_v24 = vld [vmem:[#allocation14_spill] sm:$0xff] }
 0x329   : > { %v11397_v11 = vadd.f32 %v2613_v15, %v10230_v33  ;;  %v2748_v49 = vpop.f32.mrf.mxu2 }
 0x32a   : > { %v2802_v37 = vrot.slane %v2682_v47, 6  ;;  %v2749_v31 = vadd.f32 %v2748_v49, %v11029_v35 }
 0x32b   : > { %v11406_v46 = vpack.c.bf16 %v11397_v11, %v11394_v63 }
 0x32c   : > { %v11414_v33 = vsel %vm2816_vm7, %v2800_v28, %v2802_v37  ;;  %v2801_v25 = vrot.slane %v2749_v31, 6  ;;  %v8455_v31 = vld [vmem:[#allocation4 + $0xf8] sm:$0xf0] }
 0x32d   : > { %14074 = vst [vmem:[#allocation44_spill] sm:$0xff] %v11414_v33  ;;  %3210 = vmatmul.bf16.gmra.mxu3 %v11406_v46  ;;  %v8457_v33 = vld [vmem:[#allocation4 + $0x10c] sm:$0xf]  ;;  %v7782_v39 = vor.u32 %v8455_v31, %v7781_v12  ;;  %v13961_v12 = vrot.slane %v11346_v21, 2 }
 0x32e   : > { %v2615_v7 = vpop.f32.mrf.mxu0  ;;  %v11431_v49 = vsel %vm2816_vm7, %v2799_v53, %v2801_v25  ;;  %v7798_v48 = vor.u32 %v8457_v33, %v7795_v22  ;;  %v7802_v53 = vor.u32 %v8459_v18, %v7801_v42  ;;  %v14079_v18 = vld [vmem:[#allocation12_spill] sm:$0xff] }
 0x32f   : > { %v2684_v15 = vpop.f32.mrf.mxu1  ;;  %14077 = vst [vmem:[#allocation46_spill] sm:$0xff] %v11431_v49  ;;  %v2616_v49 = vadd.f32 %v2615_v7, %v10912_v61  ;;  %4129 = vmatpush.bf16.msrb.mxu3 %v7782_v39  ;;  %v2902_v39 = vrot.slane %v11303_v56, 2 }
 0x330   : > { %v2685_v47 = vadd.f32 %v2684_v15, %v10974_v54  ;;  %v11427_v28 = vpop.f32.mrf.mxu3  ;;  %4197 = vmatpush.bf16.msra.mxu0 %v7798_v48  ;;  %4266 = vmatpush.bf16.msra.mxu1 %v7802_v53 }
 0x331   : > { %3264 = vmatmul.bf16.gmra.mxu0 %v2949_v62  ;;  %v2750_v32 = vpop.f32.mrf.mxu2  ;;  %v11446_v48 = vadd.f32 %v2616_v49, %v10280_v9  ;;  %v11464_v9 = vsel %vm2913_vm14, %v2902_v39, %v13961_v12  ;;  %v11474_v49 = vsel %vm2913_vm14, %v2901_v34, %v2902_v39 }
 0x332   : > { %v2804_v26 = vrot.slane %v2685_v47, 6  ;;  %3333 = vmatmul.bf16.gmra.mxu1 %v11264_v55  ;;  %v2751_v14 = vadd.f32 %v2750_v32, %v11029_v35  ;;  %14081 = vst [vmem:[#allocation48_spill] sm:$0xff] %v11464_v9 }
 0x333   : > { %14083 = vst [vmem:[#allocation50_spill] sm:$0xff] %v11474_v49 }
 0x334   : > { %v11436_v15 = vsel %vm2816_vm7, %v2802_v37, %v2804_v26  ;;  %v2803_v55 = vrot.slane %v2751_v14, 6 }
 0x335   : > { %14078 = vst [vmem:[#allocation47_spill] sm:$0xff] %v11436_v15 }
 0x336   : > { %v2617_v47 = vpop.f32.mrf.mxu0  ;;  %3402 = vmatmul.bf16.gmra.mxu2 %v2949_v62  ;;  %v11453_v32 = vsel %vm2816_vm7, %v2801_v25, %v2803_v55 }
 0x337   : > { %v2618_v33 = vadd.f32 %v2617_v47, %v10912_v61  ;;  %v2686_v22 = vpop.f32.mrf.mxu1  ;;  %14080 = vst [vmem:[#allocation12_spill] sm:$0xff] %v11453_v32  ;;  %v8454_v32 = vld [vmem:[#allocation4 + $0xf4] sm:$0xf] }
 0x338   : > { %v2687_v31 = vadd.f32 %v2686_v22, %v10974_v54  ;;  %v11443_v37 = vpop.f32.mrf.mxu3  ;;  %v2951_v22 = vpack.c.bf16 %v11464_v9, %v11474_v49  ;;  %v7769_v49 = vld [vmem:[#allocation4 + $0xd8] sm:$0xf] }
 0x339   : > { %v11449_v7 = vadd.f32 %v2618_v33, %v14079_v18  ;;  %v2753_v53 = vpop.f32.mrf.mxu2 }
 0x33a   : > { %v2806_v14 = vrot.slane %v2687_v31, 6  ;;  %v2754_v25 = vadd.f32 %v2753_v53, %v11029_v35 }
 0x33b   : > { %v11458_v42 = vpack.c.bf16 %v11449_v7, %v11446_v48 }
 0x33c   : > { %v11468_v62 = vsel %vm2816_vm7, %v2804_v26, %v2806_v14  ;;  %v2805_v47 = vrot.slane %v2754_v25, 6 }
 0x33d   : > { %14082 = vst [vmem:[#allocation49_spill] sm:$0xff] %v11468_v62  ;;  %3215 = vmatmul.bf16.gmra.mxu3 %v11458_v42 }
 0x33e   : > { %v2620_v56 = vpop.f32.mrf.mxu0  ;;  %v11483_v26 = vsel %vm2816_vm7, %v2803_v55, %v2805_v47 }
 0x33f   : > { %v2689_v33 = vpop.f32.mrf.mxu1  ;;  %14084 = vst [vmem:[#allocation51_spill] sm:$0xff] %v11483_v26  ;;  %v2621_v25 = vadd.f32 %v2620_v56, %v10912_v61  ;;  %v14087_v56 = vld [vmem:[#allocation13_spill] sm:$0xff] }
 0x340   : > { %v2690_v31 = vadd.f32 %v2689_v33, %v10974_v54  ;;  %v11479_v18 = vpop.f32.mrf.mxu3 }
 0x341   : > { %3269 = vmatmul.bf16.gmra.mxu0 %v2951_v22  ;;  %v2755_v39 = vpop.f32.mrf.mxu2  ;;  %v11496_v44 = vadd.f32 %v2621_v25, %v14086_v24 }
 0x342   : > { %v2808_v53 = vrot.slane %v2690_v31, 6  ;;  %3338 = vmatmul.bf16.gmra.mxu1 %v11312_v57  ;;  %v2756_v12 = vadd.f32 %v2755_v39, %v11029_v35  ;;  %v7783_v31 = vld [vmem:[#allocation4 + $0xfc] sm:$0xf0] }
 0x343   : > { %v7786_v9 = vor.u32 %v8454_v32, %v7783_v31 }
 0x344   : > { %v11488_v34 = vsel %vm2816_vm7, %v2806_v14, %v2808_v53  ;;  %v2807_v15 = vrot.slane %v2756_v12, 6  ;;  %v8452_v14 = vld [vmem:[#allocation4 + $0xe0] sm:$0xf0] }
 0x345   : > { %14085 = vst [vmem:[#allocation52_spill] sm:$0xff] %v11488_v34  ;;  %v7789_v34 = vld [vmem:[#allocation4 + $0xf8] sm:$0xf]  ;;  %v7770_v62 = vor.u32 %v8452_v14, %v7769_v49  ;;  %v8456_v12 = vld [vmem:[#allocation4 + $0x100] sm:$0xf0]  ;;  %4198 = vmatpush.bf16.msra.mxu0 %v7786_v9  ;;  %v14089_v49 = vrot.slane %v11394_v63, 2 }
 0x346   : > { %v2622_v33 = vpop.f32.mrf.mxu0  ;;  %3407 = vmatmul.bf16.gmra.mxu2 %v2951_v22  ;;  %v7790_v31 = vor.u32 %v8456_v12, %v7789_v34  ;;  %v14092_v34 = vrot.slane %v11346_v21, 2 }
 0x347   : > { %v2623_v55 = vadd.f32 %v2622_v33, %v10912_v61  ;;  %v2691_v26 = vpop.f32.mrf.mxu1  ;;  %v11503_v33 = vsel %vm2816_vm7, %v2805_v47, %v2807_v15  ;;  %4130 = vmatpush.bf16.msrb.mxu3 %v7770_v62  ;;  %v11516_v22 = vsel %vm2913_vm14, %v2904_v40, %v14089_v49 }
 0x348   : > { %v2692_v57 = vadd.f32 %v2691_v26, %v10974_v54  ;;  %14088 = vst [vmem:[#allocation14_spill] sm:$0xff] %v11503_v33  ;;  %v11506_v32 = vpop.f32.mrf.mxu3  ;;  %4267 = vmatpush.bf16.msra.mxu1 %v7790_v31  ;;  %v11528_v62 = vsel %vm2913_vm14, %v14092_v34, %v2904_v40 }
 0x349   : > { %v11499_v39 = vadd.f32 %v2623_v55, %v14087_v56  ;;  %v2758_v25 = vpop.f32.mrf.mxu2  ;;  %14090 = vst [vmem:[#allocation13_spill] sm:$0xff] %v11516_v22  ;;  %v2953_v14 = vpack.c.bf16 %v11516_v22, %v11528_v62 }
 0x34a   : > { %v2810_v26 = vrot.slane %v2692_v57, 6  ;;  %v2759_v9 = vadd.f32 %v2758_v25, %v11029_v35  ;;  %14093 = vst [vmem:[#allocation54_spill] sm:$0xff] %v11528_v62 }
 0x34b   : > { %v11510_v24 = vpack.c.bf16 %v11499_v39, %v11496_v44 }
 0x34c   : > { %v11520_v5 = vsel %vm2816_vm7, %v2808_v53, %v2810_v26  ;;  %v2809_v55 = vrot.slane %v2759_v9, 6 }
 0x34d   : > { %14091 = vst [vmem:[#allocation53_spill] sm:$0xff] %v11520_v5  ;;  %3220 = vmatmul.bf16.gmra.mxu3 %v11510_v24  ;;  %v14097_v5 = vld [vmem:[#allocation15_spill] sm:$0xff] }
 0x34e   : > { %v2625_v47 = vpop.f32.mrf.mxu0  ;;  %v11535_v53 = vsel %vm2816_vm7, %v2807_v15, %v2809_v55 }
 0x34f   : > { %v2694_v57 = vpop.f32.mrf.mxu1  ;;  %14094 = vst [vmem:[#allocation55_spill] sm:$0xff] %v11535_v53  ;;  %v2626_v25 = vadd.f32 %v2625_v47, %v10912_v61 }
 0x350   : > { %v2695_v56 = vadd.f32 %v2694_v57, %v10974_v54  ;;  %v11542_v40 = vpop.f32.mrf.mxu3 }
 0x351   : > { %3274 = vmatmul.bf16.gmra.mxu0 %v2953_v14  ;;  %v2760_v31 = vpop.f32.mrf.mxu2 }
 0x352   : > { %v2812_v12 = vrot.slane %v2695_v56, 6  ;;  %3343 = vmatmul.bf16.gmra.mxu1 %v11358_v1  ;;  %v2761_v49 = vadd.f32 %v2760_v31, %v11029_v35  ;;  %v2907_v56 = vrot.slane %v11446_v48, 2  ;;  %v2906_v31 = vrot.slane %v11397_v11, 2 }
 0x354   : > { %v11540_v21 = vsel %vm2816_vm7, %v2810_v26, %v2812_v12  ;;  %v2811_v34 = vrot.slane %v2761_v49, 6  ;;  %v11552_v26 = vadd.f32 %v2626_v25, %v14097_v5  ;;  %v11569_v5 = vsel %vm2913_vm14, %v2906_v31, %v2907_v56 }
 0x355   : > { %14095 = vst [vmem:[#allocation56_spill] sm:$0xff] %v11540_v21  ;;  %v14098_v21 = vld [vmem:[#allocation16_spill] sm:$0xff]  ;;  %v14102_v25 = vrot.slane %v11394_v63, 2 }
 0x356   : > { %v2627_v9 = vpop.f32.mrf.mxu0  ;;  %3412 = vmatmul.bf16.gmra.mxu2 %v2953_v14  ;;  %v11559_v47 = vsel %vm2816_vm7, %v2809_v55, %v2811_v34  ;;  %14100 = vst [vmem:[#allocation16_spill] sm:$0xff] %v11569_v5  ;;  %v7601_v63 = vld [vmem:[%s13945_s4 + $0x2] sm:$0x3] }
 0x357   : > { %v2628_v15 = vadd.f32 %v2627_v9, %v10912_v61  ;;  %v2696_v57 = vpop.f32.mrf.mxu1  ;;  %14099 = vst [vmem:[#allocation15_spill] sm:$0xff] %v11559_v47  ;;  %v11587_v9 = vsel %vm2913_vm14, %v14102_v25, %v2906_v31 }
 0x358   : > { %v11549_v1 = vadd.f32 %v2696_v57, %v10974_v54  ;;  %v11579_v11 = vpop.f32.mrf.mxu3  ;;  %14103 = vst [vmem:[#allocation59_spill] sm:$0xff] %v11587_v9 }
 0x359   : > { %v11555_v53 = vadd.f32 %v2628_v15, %v14098_v21  ;;  %v2763_v49 = vpop.f32.mrf.mxu2 }
 0x35a   : > { %14096 = vst [vmem:[#allocation57_spill] sm:$0xff] %v11549_v1  ;;  %v13967_v61 = vrot.slane %v11549_v1, 6  ;;  %v2764_v55 = vadd.f32 %v2763_v49, %v11029_v35 }
 0x35b   : > { %v11565_v48 = vpack.c.bf16 %v11555_v53, %v11552_v26 }
 0x35c   : > { %v11575_v14 = vsel %vm2816_vm7, %v2812_v12, %v13967_v61  ;;  %v2813_v15 = vrot.slane %v2764_v55, 6  ;;  %v2955_v12 = vpack.c.bf16 %v11569_v5, %v11587_v9  ;;  %v11604_v55 = vperm.slane %v7601_v63, 1 }
 0x35d   : > { %14101 = vst [vmem:[#allocation58_spill] sm:$0xff] %v11575_v14  ;;  %3225 = vmatmul.bf16.gmra.mxu3 %v11565_v48 }
 0x35e   : > { %v11581_v21 = vpop.f32.mrf.mxu0  ;;  %v11593_v49 = vsel %vm2816_vm7, %v2811_v34, %v2813_v15  ;;  %v2909_v34 = vrot.slane %v11496_v44, 2 }
 0x35f   : > { %v3309_v57 = vpop.f32.mrf.mxu1  ;;  %14104 = vst [vmem:[#allocation60_spill] sm:$0xff] %v11593_v49 }
 0x360   : > { %v11608_v49 = vpop.f32.mrf.mxu3  ;;  %v3310_v47 = vadd.f32 %v3309_v57, %v11604_v55 }
 0x361   : > { %3279 = vmatmul.bf16.gmra.mxu0 %v2955_v12  ;;  %v2765_v61 = vpop.f32.mrf.mxu2 }
 0x362   : > { %3348 = vmatmul.bf16.gmra.mxu1 %v11406_v46  ;;  %v11597_v14 = vadd.f32 %v2765_v61, %v11029_v35  ;;  %v2908_v61 = vrot.slane %v11449_v7, 2 }
 0x364   : > { %14105 = vst [vmem:[#allocation61_spill] sm:$0xff] %v11597_v14  ;;  %v13973_v25 = vrot.slane %v11597_v14, 6  ;;  %v11620_v5 = vsel %vm2913_vm14, %v2908_v61, %v2909_v34 }
 0x365   : > { %14107 = vst [vmem:[#allocation63_spill] sm:$0xff] %v11620_v5 }
 0x366   : > { %v11602_v31 = vpop.f32.mrf.mxu0  ;;  %3417 = vmatmul.bf16.gmra.mxu2 %v2955_v12  ;;  %v11614_v46 = vsel %vm2816_vm7, %v2813_v15, %v13973_v25  ;;  %v11626_v12 = vsel %vm2913_vm14, %v2907_v56, %v2908_v61  ;;  %v7757_v25 = vld [vmem:[#allocation4 + $0xc0] sm:$0xf]  ;;  %v8449_v56 = vld [vmem:[#allocation4 + $0xc8] sm:$0xf0] }
 0x367   : > { %v3311_v1 = vpop.f32.mrf.mxu1  ;;  %14106 = vst [vmem:[#allocation62_spill] sm:$0xff] %v11614_v46  ;;  %v2957_v15 = vpack.c.bf16 %v11620_v5, %v11626_v12  ;;  %v7777_v61 = vld [vmem:[#allocation4 + $0xe0] sm:$0xf]  ;;  %v7758_v30 = vor.u32 %v8449_v56, %v7757_v25  ;;  %v11660_v56 = vperm.slane %v7601_v63, 0 }
 0x368   : > { %14108 = vst [vmem:[#allocation64_spill] sm:$0xff] %v11626_v12  ;;  %v11630_v7 = vpop.f32.mrf.mxu3  ;;  %v3312_v57 = vadd.f32 %v3311_v1, %v11604_v55 }
 0x369   : > { %v3378_v33 = vpop.f32.mrf.mxu2  ;;  %4131 = vmatpush.bf16.msrb.mxu3 %v7758_v30 }
 0x36a   : > { %v3379_v9 = vadd.f32 %v3378_v33, %v3310_v47  ;;  %v8451_v33 = vld [vmem:[#allocation4 + $0xdc] sm:$0xf]  ;;  %v7771_v47 = vld [vmem:[#allocation4 + $0xe4] sm:$0xf0] }
 0x36b   : > { %v7774_v62 = vor.u32 %v8451_v33, %v7771_v47  ;;  %v2910_v33 = vrot.slane %v11499_v39, 2 }
 0x36c   : > { %v7730_v14 = vmul.f32 -1.442695, %v3379_v9  ;;  %v8453_v9 = vld [vmem:[#allocation4 + $0xe8] sm:$0xf0] }
 0x36d   : > { %v7778_v43 = vor.u32 %v8453_v9, %v7777_v61  ;;  %4199 = vmatpush.bf16.msra.mxu0 %v7774_v62 }
 0x36e   : > { %v11622_v44 = vpop.f32.mrf.mxu0  ;;  %8788 = vpow2.f32 %v7730_v14 }
 0x36f   : > { %v3314_v22 = vpop.f32.mrf.mxu1  ;;  %4268 = vmatpush.bf16.msra.mxu1 %v7778_v43 }
 0x370   : > { %v3315_v25 = vadd.f32 %v3314_v22, %v11604_v55 }
 0x371   : > { %3284 = vmatmul.bf16.gmra.mxu0 %v2957_v15  ;;  %v3380_v46 = vpop.f32.mrf.mxu2 }
 0x372   : > { %3353 = vmatmul.bf16.gmra.mxu1 %v11458_v42  ;;  %v3381_v60 = vadd.f32 %v3380_v46, %v3312_v57  ;;  %v2911_v42 = vrot.slane %v11552_v26, 2  ;;  %v11642_v46 = vpop.f32.mrf.mxu3  ;;  %v11652_v26 = vsel %vm2913_vm14, %v2909_v34, %v2910_v33 }
 0x373   : > { %14110 = vst [vmem:[#allocation66_spill] sm:$0xff] %v11652_v26 }
 0x374   : > { %v8789_v14 = vpop.eup %8788  ;;  %v7731_v12 = vmul.f32 -1.442695, %v3381_v60  ;;  %v11646_v60 = vsel %vm2913_vm14, %v2910_v33, %v2911_v42 }
 0x375   : > { %v11637_v1 = vadd.f32 1.0, %v8789_v14  ;;  %14109 = vst [vmem:[#allocation65_spill] sm:$0xff] %v11646_v60  ;;  %v2959_v22 = vpack.c.bf16 %v11646_v60, %v11652_v26  ;;  %v2912_v14 = vrot.slane %v11555_v53, 2  ;;  %v3174_v60 = vadd.f32 %v11443_v37, %v11660_v56 }
 0x376   : > { %v11634_v5 = vpop.f32.mrf.mxu0  ;;  %8790 = vpow2.f32 %v7731_v12  ;;  %3422 = vmatmul.bf16.gmra.mxu2 %v2957_v15 }
 0x377   : > { %v3316_v6 = vpop.f32.mrf.mxu1  ;;  %8792 = vrcp.f32 %v11637_v1  ;;  %v11687_v37 = vsel %vm2913_vm14, %v2911_v42, %v2912_v14  ;;  %v3567_v42 = vand.u32 2147483647, %v11637_v1  ;;  %vm3563_vm0 = vweird.f32 %v11637_v1 }
 0x378   : > { %v3317_v9 = vadd.f32 %v3316_v6, %v11604_v55 }
 0x379   : > { %v3383_v62 = vpop.f32.mrf.mxu2  ;;  %vm3568_vm3 = vcmp.eq.f32.partialorder %v3567_v42, 8.507059e+37 }
 0x37a   : > { %v3384_v43 = vadd.f32 %v3383_v62, %v3315_v25  ;;  %v3172_v25 = vadd.f32 %v11427_v28, %v11660_v56  ;;  %v11673_v26 = vpop.f32.mrf.mxu3 }
 0x37c   : > { %v8791_v12 = vpop.eup %8790  ;;  %v7732_v39 = vmul.f32 -1.442695, %v3384_v43  ;;  %v8448_v43 = vld [vmem:[#allocation4 + $0xc4] sm:$0xf]  ;;  %v3241_v51 = vadd.f32 %v11581_v21, %v3172_v25 }
 0x37d   : > { %v11656_v57 = vpop.eup %8792  ;;  %v11658_v47 = vadd.f32 1.0, %v8791_v12  ;;  %v7759_v12 = vld [vmem:[#allocation4 + $0xcc] sm:$0xf0] }
 0x37e   : > { %v11648_v30 = vpop.f32.mrf.mxu0  ;;  %v3559_v61 = vmul.f32 %v11656_v57, %v11637_v1  ;;  %8794 = vpow2.f32 %v7732_v39  ;;  %v7765_v39 = vld [vmem:[#allocation4 + $0xc8] sm:$0xf]  ;;  %v7762_v6 = vor.u32 %v8448_v43, %v7759_v12  ;;  %v14111_v43 = vrot.slane %v10957_v41, 2 }
 0x37f   : > { %v3319_v15 = vpop.f32.mrf.mxu1  ;;  %8796 = vrcp.f32 %v11658_v47  ;;  %vm3564_vm15 = vweird.f32 %v11656_v57  ;;  %v3582_v41 = vand.u32 2147483647, %v11658_v47  ;;  %vm3578_vm4 = vweird.f32 %v11658_v47 }
 0x380   : > { %v3560_v34 = vsub.f32 1.0, %v3559_v61  ;;  %v8450_v61 = vld [vmem:[#allocation4 + $0xd0] sm:$0xf0]  ;;  %v11693_v12 = vsel %vm2913_vm14, %v2912_v14, %v14111_v43  ;;  %4200 = vmatpush.bf16.msra.mxu0 %v7762_v6  ;;  %v3320_v25 = vadd.f32 %v3319_v15, %v11604_v55  ;;  %vm11707_vm1 = vmor %vm3563_vm0, %vm3564_vm15  ;;  %v7974_v6 = vld [vmem:[#allocation2 + $0x2f0] sm:$0xf] }
 0x381   : > { %3289 = vmatmul.bf16.gmra.mxu0 %v2959_v22  ;;  %v3385_v33 = vpop.f32.mrf.mxu2  ;;  %14112 = vst [vmem:[#allocation67_spill] sm:$0xff] %v11693_v12  ;;  %vm3583_vm6 = vcmp.eq.f32.partialorder %v3582_v41, 8.507059e+37 }
 0x382   : > { %3358 = vmatmul.bf16.gmra.mxu1 %v11510_v24  ;;  %v3561_v63 = vmul.f32 %v11656_v57, %v3560_v34  ;;  %v3386_v62 = vadd.f32 %v3385_v33, %v3317_v9  ;;  %v7766_v34 = vor.u32 %v8450_v61, %v7765_v39  ;;  %v3243_v33 = vadd.f32 %v11602_v31, %v3174_v60 }
 0x383   : > { %v3569_v60 = vand.u32 2147483648, %v11637_v1  ;;  %v8503_v1 = vld [vmem:[#allocation2 + $0x2f4] sm:$0xf0] }
 0x384   : > { %v8795_v53 = vpop.eup %8794  ;;  %v7733_v8 = vmul.f32 -1.442695, %v3386_v62  ;;  %v3562_v21 = vadd.f32 %v11656_v57, %v3561_v63  ;;  %4269 = vmatpush.bf16.msra.mxu1 %v7766_v34  ;;  %v7910_v63 = vld [vmem:[#allocation2 + $0x270] sm:$0xf]  ;;  %v8487_v62 = vld [vmem:[#allocation2 + $0x274] sm:$0xf0]  ;;  %v7975_v34 = vor.u32 %v8503_v1, %v7974_v6 }
 0x385   : > { %v11680_v9 = vpop.eup %8796  ;;  %v11683_v27 = vadd.f32 1.0, %v8795_v53 }
 0x386   : > { %v11675_v24 = vpop.f32.mrf.mxu0  ;;  %v3574_v31 = vmul.f32 %v11680_v9, %v11658_v47  ;;  %8798 = vpow2.f32 %v7733_v8  ;;  %3427 = vmatmul.bf16.gmra.mxu2 %v2959_v22  ;;  %vm3579_vm2 = vweird.f32 %v11680_v9  ;;  %v3584_v22 = vand.u32 2147483648, %v11658_v47  ;;  %4841 = vmatpush.bf16.msra.mxu3 %v7975_v34 }
 0x387   : > { %v11678_v28 = vpop.f32.mrf.mxu1  ;;  %8800 = vrcp.f32 %v11683_v27  ;;  %v3566_v53 = vsel %vm11707_vm1, %v11656_v57, %v3562_v21  ;;  %vm11727_vm5 = vmor %vm3578_vm4, %vm3579_vm2  ;;  %vm3593_vm9 = vweird.f32 %v11683_v27 }
 0x388   : > { %8802 = vtanh.f32 %v3241_v51  ;;  %v3575_v14 = vsub.f32 1.0, %v3574_v31  ;;  %v7911_v51 = vor.u32 %v8487_v62, %v7910_v63  ;;  %v2961_v31 = vpack.c.bf16 %v11693_v12, %v11687_v37 }
 0x389   : > { %8804 = vtanh.f32 %v3243_v33  ;;  %v3388_v39 = vpop.f32.mrf.mxu2  ;;  %v3570_v33 = vor.u32 1.1754944e-38, %v3569_v60  ;;  %v3585_v21 = vor.u32 1.1754944e-38, %v3584_v22  ;;  %v11731_v60 = vpop.f32.mrf.mxu3  ;;  %v3177_v22 = vadd.f32 %v11479_v18, %v11660_v56 }
 0x38a   : > { %v3576_v61 = vmul.f32 %v11680_v9, %v3575_v14  ;;  %v3389_v15 = vadd.f32 %v3388_v39, %v3320_v25  ;;  %4772 = vmatpush.bf16.msra.mxu2 %v7911_v51  ;;  %v3179_v18 = vadd.f32 %v11506_v32, %v11660_v56 }
 0x38b   : > { %v3571_v42 = vsel %vm3568_vm3, %v3570_v33, %v3566_v53  ;;  %v3246_v34 = vadd.f32 %v11622_v44, %v3177_v22 }
 0x38c   : > { %v8799_v23 = vpop.eup %8798  ;;  %v3577_v63 = vadd.f32 %v11680_v9, %v3576_v61  ;;  %v7734_v14 = vmul.f32 -1.442695, %v3389_v15  ;;  %v3322_v61 = vadd.f32 %v11678_v28, %v11604_v55  ;;  %v3248_v28 = vadd.f32 %v11634_v5, %v3179_v18 }
 0x38d   : > { %v11723_v62 = vpop.eup %8800  ;;  %v11733_v8 = vadd.f32 1.0, %v8799_v23  ;;  %v3597_v5 = vand.u32 2147483647, %v11683_v27 }
 0x38e   : > { %v11717_v43 = vpop.f32.mrf.mxu0  ;;  %v8803_v39 = vpop.eup %8802  ;;  %v3589_v47 = vmul.f32 %v11723_v62, %v11683_v27  ;;  %8806 = vpow2.f32 %v7734_v14  ;;  %v3581_v51 = vsel %vm11727_vm5, %v11680_v9, %v3577_v63  ;;  %vm3594_vm8 = vweird.f32 %v11723_v62 }
 0x38f   : > { %v3324_v25 = vpop.f32.mrf.mxu1  ;;  %v8805_v6 = vpop.eup %8804  ;;  %8808 = vrcp.f32 %v11733_v8  ;;  %v3586_v23 = vsel %vm3583_vm6, %v3585_v21, %v3581_v51  ;;  %v3918_v15 = vmul.f32 %v8803_v39, %v3571_v42  ;;  %v3599_v51 = vand.u32 2147483648, %v11683_v27  ;;  %vm11765_vm10 = vmor %vm3593_vm9, %vm3594_vm8 }
 0x390   : > { %v3590_v1 = vsub.f32 1.0, %v3589_v47  ;;  %v3919_v53 = vmul.f32 %v8805_v6, %v3586_v23  ;;  %8810 = vtanh.f32 %v3246_v34  ;;  %v3325_v22 = vadd.f32 %v3324_v25, %v11604_v55 }
 0x391   : > { %3294 = vmatmul.bf16.gmra.mxu0 %v2961_v31  ;;  %v3390_v33 = vpop.f32.mrf.mxu2  ;;  %v11758_v32 = vpop.f32.mrf.mxu3  ;;  %v3600_v27 = vor.u32 1.1754944e-38, %v3599_v51  ;;  %vm3598_vm12 = vcmp.eq.f32.partialorder %v3597_v5, 8.507059e+37  ;;  %vm3608_vm13 = vweird.f32 %v11733_v8 }
 0x392   : > { %3363 = vmatmul.bf16.gmra.mxu1 %v11565_v48  ;;  %v3391_v9 = vadd.f32 %v3390_v33, %v3322_v61  ;;  %v3942_v41 = vpack.c.bf16 %v3919_v53, %v3918_v15  ;;  %v3591_v63 = vmul.f32 %v11723_v62, %v3590_v1  ;;  %v3612_v1 = vand.u32 2147483647, %v11733_v8 }
 0x393   : > { %v3614_v61 = vand.u32 2147483648, %v11733_v8 }
 0x394   : > { %v8807_v48 = vpop.eup %8806  ;;  %v7735_v57 = vmul.f32 -1.442695, %v3391_v9  ;;  %4132 = vmatmul.bf16.vlgmr.msrb.gmra.mxu3 %v3942_v41  ;;  %v3592_v39 = vadd.f32 %v11723_v62, %v3591_v63  ;;  %vm3613_vm15 = vcmp.eq.f32.partialorder %v3612_v1, 8.507059e+37 }
 0x395   : > { %v8809_v47 = vpop.eup %8808  ;;  %v11753_v42 = vadd.f32 1.0, %v8807_v48 }
 0x396   : > { %v11750_v14 = vpop.f32.mrf.mxu0  ;;  %v3604_v44 = vmul.f32 %v8809_v47, %v11733_v8  ;;  %8812 = vpow2.f32 %v7735_v57  ;;  %3432 = vmatmul.bf16.gmra.mxu2 %v2961_v31  ;;  %v3596_v53 = vsel %vm11765_vm10, %v11723_v62, %v3592_v39  ;;  %vm3609_vm11 = vweird.f32 %v8809_v47  ;;  %v8811_v34 = vpop.eup %8810 }
 0x397   : > { %v3326_v21 = vpop.f32.mrf.mxu1  ;;  %8814 = vrcp.f32 %v11753_v42  ;;  %vm3610_vm14 = vmor %vm3608_vm13, %vm3609_vm11  ;;  %v3615_v62 = vor.u32 1.1754944e-38, %v3614_v61  ;;  %vm3623_vm1 = vweird.f32 %v11753_v42 }
 0x398   : > { %v3605_v6 = vsub.f32 1.0, %v3604_v44  ;;  %8816 = vtanh.f32 %v3248_v28  ;;  %v3601_v44 = vsel %vm3598_vm12, %v3600_v27, %v3596_v53  ;;  %v7912_v53 = vld [vmem:[#allocation2 + $0x278] sm:$0xf0] }
 0x399   : > { %v3393_v23 = vpop.f32.mrf.mxu2  ;;  %v3920_v31 = vmul.f32 %v8811_v34, %v3601_v44  ;;  %v11788_v27 = vpop.f32.mrf.mxu3  ;;  %v3184_v34 = vadd.f32 %v11579_v11, %v11660_v56 }
 0x39a   : > { %v3394_v15 = vadd.f32 %v3393_v23, %v3325_v22  ;;  %v3606_v25 = vmul.f32 %v8809_v47, %v3605_v6  ;;  %v3182_v22 = vadd.f32 %v11542_v40, %v11660_v56  ;;  %v3327_v23 = vadd.f32 %v3326_v21, %v11604_v55  ;;  %v7966_v40 = vld [vmem:[#allocation2 + $0x2e0] sm:$0xf] }
 0x39c   : > { %v8813_v9 = vpop.eup %8812  ;;  %v7736_v63 = vmul.f32 -1.442695, %v3394_v15  ;;  %v3607_v48 = vadd.f32 %v8809_v47, %v3606_v25  ;;  %v8486_v15 = vld [vmem:[#allocation2 + $0x274] sm:$0xf]  ;;  %v3251_v25 = vadd.f32 %v11648_v30, %v3182_v22 }
 0x39d   : > { %v11777_v57 = vpop.eup %8814  ;;  %v11779_v28 = vadd.f32 1.0, %v8813_v9  ;;  %v7915_v1 = vor.u32 %v8486_v15, %v7912_v53  ;;  %v7902_v9 = vld [vmem:[#allocation2 + $0x260] sm:$0xf]  ;;  %v3629_v53 = vand.u32 2147483648, %v11753_v42 }
 0x39e   : > { %v11774_v33 = vpop.f32.mrf.mxu0  ;;  %v3619_v39 = vmul.f32 %v11777_v57, %v11753_v42  ;;  %8818 = vpow2.f32 %v7736_v63  ;;  %v3611_v51 = vsel %vm3610_vm14, %v8809_v47, %v3607_v48  ;;  %v8817_v6 = vpop.eup %8816  ;;  %v8485_v63 = vld [vmem:[#allocation2 + $0x264] sm:$0xf0]  ;;  %vm3624_vm0 = vweird.f32 %v11777_v57 }
 0x39f   : > { %v3329_v18 = vpop.f32.mrf.mxu1  ;;  %8820 = vrcp.f32 %v11779_v28  ;;  %v3616_v8 = vsel %vm3613_vm15, %v3615_v62, %v3611_v51  ;;  %v8501_v62 = vld [vmem:[#allocation2 + $0x2e4] sm:$0xf0]  ;;  %v7976_v51 = vld [vmem:[#allocation2 + $0x2f8] sm:$0xf0]  ;;  %4910 = vmatpush.bf16.msrb.mxu0 %v7915_v1  ;;  %vm11806_vm2 = vmor %vm3623_vm1, %vm3624_vm0  ;;  %vm3638_vm5 = vweird.f32 %v11779_v28 }
 0x3a0   : > { %v3620_v5 = vsub.f32 1.0, %v3619_v39  ;;  %v3921_v61 = vmul.f32 %v8817_v6, %v3616_v8  ;;  %v8502_v39 = vld [vmem:[#allocation2 + $0x2f4] sm:$0xf]  ;;  %v7967_v30 = vor.u32 %v8501_v62, %v7966_v40  ;;  %8822 = vtanh.f32 %v3251_v25 }
 0x3a1   : > { %4201 = vmatmul.bf16.vlgmr.msra.gmra.mxu0 %v3942_v41  ;;  %v3395_v47 = vpop.f32.mrf.mxu2  ;;  %v7979_v6 = vor.u32 %v8502_v39, %v7976_v51  ;;  %v3330_v25 = vadd.f32 %v3329_v18, %v11604_v55  ;;  %v3644_v40 = vand.u32 2147483648, %v11779_v28  ;;  %v11815_v39 = vpop.f32.mrf.mxu3  ;;  %v3630_v51 = vor.u32 1.1754944e-38, %v3629_v53 }
 0x3a2   : > { %4270 = vmatmul.bf16.vlgmr.msra.gmra.mxu1 %v3942_v41  ;;  %v3396_v48 = vadd.f32 %v3395_v47, %v3327_v23  ;;  %v3943_v12 = vpack.c.bf16 %v3921_v61, %v3920_v31  ;;  %v7903_v41 = vor.u32 %v8485_v63, %v7902_v9  ;;  %v3621_v21 = vmul.f32 %v11777_v57, %v3620_v5 }
 0x3a3   : > { %v3253_v31 = vadd.f32 %v11675_v24, %v3184_v34  ;;  %4842 = vmatpush.bf16.msra.mxu3 %v7967_v30  ;;  %4979 = vmatpush.bf16.msrb.mxu1 %v7979_v6  ;;  %v3627_v24 = vand.u32 2147483647, %v11753_v42  ;;  %v3642_v63 = vand.u32 2147483647, %v11779_v28 }
 0x3a4   : > { %v8819_v22 = vpop.eup %8818  ;;  %v7737_v8 = vmul.f32 -1.442695, %v3396_v48  ;;  %4137 = vmatmul.bf16.gmra.mxu3 %v3943_v12  ;;  %4773 = vmatpush.bf16.msra.mxu2 %v7903_v41  ;;  %v3622_v5 = vadd.f32 %v11777_v57, %v3621_v21 }
 0x3a5   : > { %v8821_v23 = vpop.eup %8820  ;;  %v11796_v61 = vadd.f32 1.0, %v8819_v22  ;;  %vm3628_vm4 = vcmp.eq.f32.partialorder %v3627_v24, 8.507059e+37  ;;  %vm3643_vm8 = vcmp.eq.f32.partialorder %v3642_v63, 8.507059e+37  ;;  %v3189_v63 = vadd.f32 %v11630_v7, %v11660_v56 }
 0x3a6   : > { %v11793_v44 = vpop.f32.mrf.mxu0  ;;  %v3634_v11 = vmul.f32 %v8821_v23, %v11779_v28  ;;  %8824 = vpow2.f32 %v7737_v8  ;;  %v3626_v41 = vsel %vm11806_vm2, %v11777_v57, %v3622_v5  ;;  %vm3639_vm3 = vweird.f32 %v8821_v23  ;;  %v8823_v62 = vpop.eup %8822 }
 0x3a7   : > { %v3331_v15 = vpop.f32.mrf.mxu1  ;;  %8826 = vrcp.f32 %v11796_v61  ;;  %v3631_v57 = vsel %vm3628_vm4, %v3630_v51, %v3626_v41  ;;  %vm3640_vm6 = vmor %vm3638_vm5, %vm3639_vm3  ;;  %vm3653_vm10 = vweird.f32 %v11796_v61 }
 0x3a8   : > { %v3635_v47 = vsub.f32 1.0, %v3634_v11  ;;  %8828 = vtanh.f32 %v3253_v31  ;;  %v3645_v31 = vor.u32 1.1754944e-38, %v3644_v40  ;;  %v3922_v24 = vmul.f32 %v8823_v62, %v3631_v57 }
 0x3a9   : > { %v3398_v1 = vpop.f32.mrf.mxu2  ;;  %v3187_v40 = vadd.f32 %v11608_v49, %v11660_v56  ;;  %v3258_v49 = vadd.f32 %v11750_v14, %v3189_v63  ;;  %v3657_v57 = vand.u32 2147483647, %v11796_v61  ;;  %v3659_v14 = vand.u32 2147483648, %v11796_v61 }
 0x3aa   : > { %v3399_v48 = vadd.f32 %v3398_v1, %v3330_v25  ;;  %v3636_v18 = vmul.f32 %v8821_v23, %v3635_v47  ;;  %v3332_v25 = vadd.f32 %v3331_v15, %v11604_v55 }
 0x3ab   : > { %v3256_v51 = vadd.f32 %v11717_v43, %v3187_v40  ;;  %v8483_v40 = vld [vmem:[#allocation2 + $0x254] sm:$0xf0]  ;;  %vm3658_vm13 = vcmp.eq.f32.partialorder %v3657_v57, 8.507059e+37 }
 0x3ac   : > { %v8825_v21 = vpop.eup %8824  ;;  %v7738_v34 = vmul.f32 -1.442695, %v3399_v48  ;;  %v3637_v6 = vadd.f32 %v8821_v23, %v3636_v18 }
 0x3ad   : > { %v11820_v22 = vpop.eup %8826  ;;  %v11822_v8 = vadd.f32 1.0, %v8825_v21 }
 0x3ae   : > { %v11817_v42 = vpop.f32.mrf.mxu0  ;;  %v3649_v11 = vmul.f32 %v11820_v22, %v11796_v61  ;;  %8830 = vpow2.f32 %v7738_v34  ;;  %v3641_v5 = vsel %vm3640_vm6, %v8821_v23, %v3637_v6  ;;  %v8829_v53 = vpop.eup %8828  ;;  %vm3654_vm9 = vweird.f32 %v11820_v22 }
 0x3af   : > { %v3334_v30 = vpop.f32.mrf.mxu1  ;;  %8832 = vrcp.f32 %v11822_v8  ;;  %v3646_v47 = vsel %vm3643_vm8, %v3645_v31, %v3641_v5  ;;  %v11844_v34 = vpop.f32.mrf.mxu3  ;;  %v3672_v31 = vand.u32 2147483647, %v11822_v8  ;;  %vm11858_vm11 = vmor %vm3653_vm10, %vm3654_vm9  ;;  %vm3668_vm14 = vweird.f32 %v11822_v8 }
 0x3b0   : > { %v3650_v28 = vsub.f32 1.0, %v3649_v11  ;;  %v3923_v1 = vmul.f32 %v8829_v53, %v3646_v47  ;;  %v3335_v5 = vadd.f32 %v3334_v30, %v11604_v55  ;;  %v8484_v53 = vld [vmem:[#allocation2 + $0x264] sm:$0xf]  ;;  %v7904_v47 = vld [vmem:[#allocation2 + $0x268] sm:$0xf0] }
 0x3b1   : > { %4206 = vmatmul.bf16.gmra.mxu0 %v3943_v12  ;;  %v3400_v9 = vpop.f32.mrf.mxu2  ;;  %vm3673_vm0 = vcmp.eq.f32.partialorder %v3672_v31, 8.507059e+37 }
 0x3b2   : > { %4275 = vmatmul.bf16.gmra.mxu1 %v3943_v12  ;;  %v3401_v48 = vadd.f32 %v3400_v9, %v3332_v25  ;;  %v11830_v41 = vpack.c.bf16 %v3923_v1, %v3922_v24  ;;  %v3651_v23 = vmul.f32 %v11820_v22, %v3650_v28  ;;  %v3674_v25 = vand.u32 2147483648, %v11822_v8  ;;  %v7894_v9 = vld [vmem:[#allocation2 + $0x250] sm:$0xf] }
 0x3b3   : > { %v7907_v1 = vor.u32 %v8484_v53, %v7904_v47  ;;  %v7895_v63 = vor.u32 %v8483_v40, %v7894_v9 }
 0x3b4   : > { %v8831_v12 = vpop.eup %8830  ;;  %v7739_v15 = vmul.f32 -1.442695, %v3401_v48  ;;  %4142 = vmatmul.bf16.gmra.mxu3 %v11830_v41  ;;  %v3652_v7 = vadd.f32 %v11820_v22, %v3651_v23  ;;  %v7958_v48 = vld [vmem:[#allocation2 + $0x2d0] sm:$0xf] }
 0x3b5   : > { %v11841_v21 = vpop.eup %8832  ;;  %v11846_v6 = vadd.f32 1.0, %v8831_v12  ;;  %v8499_v12 = vld [vmem:[#allocation2 + $0x2d4] sm:$0xf0]  ;;  %4911 = vmatpush.bf16.msrb.mxu0 %v7907_v1  ;;  %4774 = vmatpush.bf16.msra.mxu2 %v7895_v63  ;;  %v3675_v1 = vor.u32 1.1754944e-38, %v3674_v25 }
 0x3b6   : > { %v11835_v18 = vpop.f32.mrf.mxu0  ;;  %v3664_v43 = vmul.f32 %v11841_v21, %v11822_v8  ;;  %8834 = vpow2.f32 %v7739_v15  ;;  %v3656_v61 = vsel %vm11858_vm11, %v11820_v22, %v3652_v7  ;;  %vm3669_vm12 = vweird.f32 %v11841_v21  ;;  %v7968_v15 = vld [vmem:[#allocation2 + $0x2e8] sm:$0xf0] }
 0x3b7   : > { %v11839_v62 = vpop.f32.mrf.mxu1  ;;  %8836 = vrcp.f32 %v11846_v6  ;;  %v7959_v53 = vor.u32 %v8499_v12, %v7958_v48  ;;  %vm11878_vm15 = vmor %vm3668_vm14, %vm3669_vm12  ;;  %v3192_v48 = vadd.f32 %v11642_v46, %v11660_v56  ;;  %vm3683_vm2 = vweird.f32 %v11846_v6 }
 0x3b8   : > { %8838 = vtanh.f32 %v3256_v51  ;;  %v3665_v11 = vsub.f32 1.0, %v3664_v43  ;;  %v8500_v51 = vld [vmem:[#allocation2 + $0x2e4] sm:$0xf]  ;;  %v3337_v63 = vadd.f32 %v11839_v62, %v11604_v55 }
 0x3b9   : > { %8840 = vtanh.f32 %v3258_v49  ;;  %v3403_v24 = vpop.f32.mrf.mxu2  ;;  %v3660_v49 = vor.u32 1.1754944e-38, %v3659_v14  ;;  %v7971_v47 = vor.u32 %v8500_v51, %v7968_v15  ;;  %4843 = vmatpush.bf16.msra.mxu3 %v7959_v53  ;;  %v3194_v53 = vadd.f32 %v11673_v26, %v11660_v56 }
 0x3ba   : > { %v3404_v23 = vadd.f32 %v3403_v24, %v3335_v5  ;;  %v3666_v30 = vmul.f32 %v11841_v21, %v3665_v11  ;;  %v3689_v26 = vand.u32 2147483648, %v11846_v6 }
 0x3bb   : > { %v3661_v9 = vsel %vm3658_vm13, %v3660_v49, %v3656_v61  ;;  %4980 = vmatpush.bf16.msrb.mxu1 %v7971_v47  ;;  %v3263_v62 = vadd.f32 %v11793_v44, %v3194_v53  ;;  %v3687_v44 = vand.u32 2147483647, %v11846_v6 }
 0x3bc   : > { %v8835_v28 = vpop.eup %8834  ;;  %v7740_v22 = vmul.f32 -1.442695, %v3404_v23  ;;  %v3667_v5 = vadd.f32 %v11841_v21, %v3666_v30  ;;  %v11890_v23 = vpop.f32.mrf.mxu3 }
 0x3bd   : > { %v11872_v11 = vpop.eup %8836  ;;  %v11874_v24 = vadd.f32 1.0, %v8835_v28  ;;  %vm3688_vm5 = vcmp.eq.f32.partialorder %v3687_v44, 8.507059e+37 }
 0x3be   : > { %v11868_v43 = vpop.f32.mrf.mxu0  ;;  %v8839_v57 = vpop.eup %8838  ;;  %v3679_v40 = vmul.f32 %v11872_v11, %v11846_v6  ;;  %8842 = vpow2.f32 %v7740_v22  ;;  %v3671_v8 = vsel %vm11878_vm15, %v11841_v21, %v3667_v5  ;;  %v3261_v21 = vadd.f32 %v11774_v33, %v3192_v48 }
 0x3bf   : > { %v3339_v7 = vpop.f32.mrf.mxu1  ;;  %v8841_v61 = vpop.eup %8840  ;;  %8844 = vrcp.f32 %v11874_v24  ;;  %v3676_v25 = vsel %vm3673_vm0, %v3675_v1, %v3671_v8  ;;  %v3924_v12 = vmul.f32 %v8839_v57, %v3661_v9  ;;  %vm3684_vm1 = vweird.f32 %v11872_v11 }
 0x3c0   : > { %v3680_v30 = vsub.f32 1.0, %v3679_v40  ;;  %v3925_v51 = vmul.f32 %v8841_v61, %v3676_v25  ;;  %8846 = vtanh.f32 %v3261_v21  ;;  %v3340_v57 = vadd.f32 %v3339_v7, %v11604_v55  ;;  %vm11915_vm3 = vmor %vm3683_vm2, %vm3684_vm1  ;;  %v8482_v61 = vld [vmem:[#allocation2 + $0x254] sm:$0xf] }
 0x3c1   : > { %4211 = vmatmul.bf16.gmra.mxu0 %v11830_v41  ;;  %v3405_v31 = vpop.f32.mrf.mxu2  ;;  %v3702_v48 = vand.u32 2147483647, %v11874_v24  ;;  %v3704_v25 = vand.u32 2147483648, %v11874_v24  ;;  %vm3698_vm6 = vweird.f32 %v11874_v24 }
 0x3c2   : > { %4280 = vmatmul.bf16.gmra.mxu1 %v11830_v41  ;;  %v3406_v15 = vadd.f32 %v3405_v31, %v3337_v63  ;;  %v3945_v49 = vpack.c.bf16 %v3925_v51, %v3924_v12  ;;  %v3681_v46 = vmul.f32 %v11872_v11, %v3680_v30  ;;  %v3690_v51 = vor.u32 1.1754944e-38, %v3689_v26 }
 0x3c3   : > { %vm3703_vm9 = vcmp.eq.f32.partialorder %v3702_v48, 8.507059e+37  ;;  %v3197_v26 = vadd.f32 %v11731_v60, %v11660_v56  ;;  %v7886_v48 = vld [vmem:[#allocation2 + $0x240] sm:$0xf] }
 0x3c4   : > { %v8843_v41 = vpop.eup %8842  ;;  %v7741_v28 = vmul.f32 -1.442695, %v3406_v15  ;;  %4147 = vmatmul.bf16.gmra.mxu3 %v3945_v49  ;;  %v3682_v14 = vadd.f32 %v11872_v11, %v3681_v46  ;;  %v11913_v40 = vpop.f32.mrf.mxu3 }
 0x3c5   : > { %v8845_v5 = vpop.eup %8844  ;;  %v11903_v9 = vadd.f32 1.0, %v8843_v41 }
 0x3c6   : > { %v11900_v47 = vpop.f32.mrf.mxu0  ;;  %v3694_v33 = vmul.f32 %v8845_v5, %v11874_v24  ;;  %8848 = vpow2.f32 %v7741_v28  ;;  %v3686_v7 = vsel %vm11915_vm3, %v11872_v11, %v3682_v14  ;;  %vm3699_vm4 = vweird.f32 %v8845_v5  ;;  %v8847_v6 = vpop.eup %8846 }
 0x3c7   : > { %v3341_v22 = vpop.f32.mrf.mxu1  ;;  %8850 = vrcp.f32 %v11903_v9  ;;  %v3691_v28 = vsel %vm3688_vm5, %v3690_v51, %v3686_v7  ;;  %vm3700_vm8 = vmor %vm3698_vm6, %vm3699_vm4  ;;  %v3705_v11 = vor.u32 1.1754944e-38, %v3704_v25  ;;  %v7896_v25 = vld [vmem:[#allocation2 + $0x258] sm:$0xf0]  ;;  %v7950_v51 = vld [vmem:[#allocation2 + $0x2c0] sm:$0xf]  ;;  %vm3713_vm11 = vweird.f32 %v11903_v9 }
 0x3c8   : > { %v3695_v1 = vsub.f32 1.0, %v3694_v33  ;;  %8852 = vtanh.f32 %v3263_v62  ;;  %v3926_v44 = vmul.f32 %v8847_v6, %v3691_v28  ;;  %v3199_v6 = vadd.f32 %v11758_v32, %v11660_v56 }
 0x3c9   : > { %v3408_v8 = vpop.f32.mrf.mxu2 }
 0x3ca   : > { %v3409_v30 = vadd.f32 %v3408_v8, %v3340_v57  ;;  %v3696_v63 = vmul.f32 %v8845_v5, %v3695_v1  ;;  %v3342_v57 = vadd.f32 %v3341_v22, %v11604_v55 }
 0x3cc   : > { %v8849_v21 = vpop.eup %8848  ;;  %v7742_v31 = vmul.f32 -1.442695, %v3409_v30  ;;  %v3697_v46 = vadd.f32 %v8845_v5, %v3696_v63  ;;  %v3266_v30 = vadd.f32 %v11817_v42, %v3197_v26  ;;  %v8481_v63 = vld [vmem:[#allocation2 + $0x244] sm:$0xf0]  ;;  %v11943_v28 = vpop.f32.mrf.mxu3 }
 0x3cd   : > { %v11927_v53 = vpop.eup %8850  ;;  %v11929_v41 = vadd.f32 1.0, %v8849_v21 }
 0x3ce   : > { %v11924_v12 = vpop.f32.mrf.mxu0  ;;  %v3709_v62 = vmul.f32 %v11927_v53, %v11903_v9  ;;  %8854 = vpow2.f32 %v7742_v31  ;;  %v3701_v33 = vsel %vm3700_vm8, %v8845_v5, %v3697_v46  ;;  %v8853_v14 = vpop.eup %8852  ;;  %v7899_v5 = vor.u32 %v8482_v61, %v7896_v25  ;;  %v8498_v46 = vld [vmem:[#allocation2 + $0x2d4] sm:$0xf] }
 0x3cf   : > { %v3344_v15 = vpop.f32.mrf.mxu1  ;;  %8856 = vrcp.f32 %v11929_v41  ;;  %v3706_v24 = vsel %vm3703_vm9, %v3705_v11, %v3701_v33  ;;  %v7887_v31 = vor.u32 %v8481_v63, %v7886_v48  ;;  %v7960_v11 = vld [vmem:[#allocation2 + $0x2d8] sm:$0xf0]  ;;  %vm3714_vm10 = vweird.f32 %v11927_v53 }
 0x3d0   : > { %v3710_v1 = vsub.f32 1.0, %v3709_v62  ;;  %v3927_v8 = vmul.f32 %v8853_v14, %v3706_v24  ;;  %4912 = vmatpush.bf16.msrb.mxu0 %v7899_v5  ;;  %v7963_v33 = vor.u32 %v8498_v46, %v7960_v11  ;;  %8858 = vtanh.f32 %v3266_v30  ;;  %vm11959_vm12 = vmor %vm3713_vm11, %vm3714_vm10 }
 0x3d1   : > { %4216 = vmatmul.bf16.gmra.mxu0 %v3945_v49  ;;  %v3410_v7 = vpop.f32.mrf.mxu2  ;;  %4775 = vmatpush.bf16.msra.mxu2 %v7887_v31  ;;  %v3719_v61 = vand.u32 2147483648, %v11903_v9  ;;  %v3345_v30 = vadd.f32 %v3344_v15, %v11604_v55  ;;  %v3732_v48 = vand.u32 2147483647, %v11929_v41  ;;  %v3734_v63 = vand.u32 2147483648, %v11929_v41 }
 0x3d2   : > { %4285 = vmatmul.bf16.gmra.mxu1 %v3945_v49  ;;  %v3411_v21 = vadd.f32 %v3410_v7, %v3342_v57  ;;  %v11938_v60 = vpack.c.bf16 %v3927_v8, %v3926_v44  ;;  %v8497_v49 = vld [vmem:[#allocation2 + $0x2c4] sm:$0xf0]  ;;  %v3711_v22 = vmul.f32 %v11927_v53, %v3710_v1  ;;  %v3268_v1 = vadd.f32 %v11835_v18, %v3199_v6 }
 0x3d3   : > { %v7951_v62 = vor.u32 %v8497_v49, %v7950_v51  ;;  %4981 = vmatpush.bf16.msrb.mxu1 %v7963_v33  ;;  %v3717_v18 = vand.u32 2147483647, %v11903_v9  ;;  %v3720_v9 = vor.u32 1.1754944e-38, %v3719_v61  ;;  %vm3728_vm15 = vweird.f32 %v11929_v41 }
 0x3d4   : > { %v8855_v14 = vpop.eup %8854  ;;  %v7743_v26 = vmul.f32 -1.442695, %v3411_v21  ;;  %4152 = vmatmul.bf16.gmra.mxu3 %v11938_v60  ;;  %v3712_v8 = vadd.f32 %v11927_v53, %v3711_v22  ;;  %v11973_v33 = vpop.f32.mrf.mxu3  ;;  %vm3733_vm1 = vcmp.eq.f32.partialorder %v3732_v48, 8.507059e+37  ;;  %v3202_v5 = vadd.f32 %v11788_v27, %v11660_v56 }
 0x3d5   : > { %v8857_v57 = vpop.eup %8856  ;;  %v11949_v44 = vadd.f32 1.0, %v8855_v14  ;;  %4844 = vmatpush.bf16.msra.mxu3 %v7951_v62  ;;  %vm3718_vm14 = vcmp.eq.f32.partialorder %v3717_v18, 8.507059e+37  ;;  %v3204_v48 = vadd.f32 %v11815_v39, %v11660_v56 }
 0x3d6   : > { %v11945_v42 = vpop.f32.mrf.mxu0  ;;  %v3724_v32 = vmul.f32 %v8857_v57, %v11929_v41  ;;  %8860 = vpow2.f32 %v7743_v26  ;;  %v3716_v21 = vsel %vm11959_vm12, %v11927_v53, %v3712_v8  ;;  %vm3729_vm13 = vweird.f32 %v8857_v57  ;;  %v8859_v31 = vpop.eup %8858 }
 0x3d7   : > { %v3346_v24 = vpop.f32.mrf.mxu1  ;;  %8862 = vrcp.f32 %v11949_v44  ;;  %v3721_v53 = vsel %vm3718_vm14, %v3720_v9, %v3716_v21  ;;  %vm3730_vm0 = vmor %vm3728_vm15, %vm3729_vm13  ;;  %v3735_v26 = vor.u32 1.1754944e-38, %v3734_v63  ;;  %v3273_v27 = vadd.f32 %v11900_v47, %v3204_v48  ;;  %v8495_v48 = vld [vmem:[#allocation2 + $0x2b4] sm:$0xf0] }
 0x3d8   : > { %v3725_v25 = vsub.f32 1.0, %v3724_v32  ;;  %8864 = vtanh.f32 %v3268_v1  ;;  %vm3743_vm3 = vweird.f32 %v11949_v44  ;;  %v3749_v47 = vand.u32 2147483648, %v11949_v44 }
 0x3d9   : > { %v3413_v7 = vpop.f32.mrf.mxu2 }
 0x3da   : > { %v3414_v51 = vadd.f32 %v3413_v7, %v3345_v30  ;;  %v3726_v15 = vmul.f32 %v8857_v57, %v3725_v25  ;;  %v3347_v25 = vadd.f32 %v3346_v24, %v11604_v55  ;;  %v3928_v30 = vmul.f32 %v8859_v31, %v3721_v53 }
 0x3dc   : > { %v8861_v46 = vpop.eup %8860  ;;  %v7744_v11 = vmul.f32 -1.442695, %v3414_v51  ;;  %v3727_v6 = vadd.f32 %v8857_v57, %v3726_v15  ;;  %v3271_v15 = vadd.f32 %v11868_v43, %v3202_v5  ;;  %v12006_v43 = vpop.f32.mrf.mxu3  ;;  %v7942_v5 = vld [vmem:[#allocation2 + $0x2b0] sm:$0xf] }
 0x3dd   : > { %v11971_v62 = vpop.eup %8862  ;;  %v11975_v14 = vadd.f32 1.0, %v8861_v46 }
 0x3de   : > { %v11968_v49 = vpop.f32.mrf.mxu0  ;;  %v3739_v1 = vmul.f32 %v11971_v62, %v11949_v44  ;;  %8866 = vpow2.f32 %v7744_v11  ;;  %v3731_v32 = vsel %vm3730_vm0, %v8857_v57, %v3727_v6  ;;  %v8865_v8 = vpop.eup %8864  ;;  %vm3744_vm2 = vweird.f32 %v11971_v62 }
 0x3df   : > { %v3349_v22 = vpop.f32.mrf.mxu1  ;;  %8868 = vrcp.f32 %v11975_v14  ;;  %v3736_v41 = vsel %vm3733_vm1, %v3735_v26, %v3731_v32  ;;  %v3747_v6 = vand.u32 2147483647, %v11949_v44  ;;  %v3762_v53 = vand.u32 2147483647, %v11975_v14  ;;  %v8480_v32 = vld [vmem:[#allocation2 + $0x244] sm:$0xf]  ;;  %vm12013_vm4 = vmor %vm3743_vm3, %vm3744_vm2 }
 0x3e0   : > { %v3740_v61 = vsub.f32 1.0, %v3739_v1  ;;  %v3929_v18 = vmul.f32 %v8865_v8, %v3736_v41  ;;  %v3350_v1 = vadd.f32 %v3349_v22, %v11604_v55  ;;  %v7888_v8 = vld [vmem:[#allocation2 + $0x248] sm:$0xf0]  ;;  %vm3758_vm8 = vweird.f32 %v11975_v14 }
 0x3e1   : > { %4221 = vmatmul.bf16.gmra.mxu0 %v11938_v60  ;;  %v3415_v7 = vpop.f32.mrf.mxu2  ;;  %vm3748_vm6 = vcmp.eq.f32.partialorder %v3747_v6, 8.507059e+37  ;;  %vm3763_vm10 = vcmp.eq.f32.partialorder %v3762_v53, 8.507059e+37 }
 0x3e2   : > { %4290 = vmatmul.bf16.gmra.mxu1 %v11938_v60  ;;  %v3416_v63 = vadd.f32 %v3415_v7, %v3347_v25  ;;  %v11985_v51 = vpack.c.bf16 %v3929_v18, %v3928_v30  ;;  %v3741_v57 = vmul.f32 %v11971_v62, %v3740_v61  ;;  %v3764_v61 = vand.u32 2147483648, %v11975_v14  ;;  %v7878_v18 = vld [vmem:[#allocation2 + $0x230] sm:$0xf]  ;;  %v8479_v7 = vld [vmem:[#allocation2 + $0x234] sm:$0xf0] }
 0x3e3   : > { %v7891_v30 = vor.u32 %v8480_v32, %v7888_v8 }
 0x3e4   : > { %v8867_v60 = vpop.eup %8866  ;;  %v7745_v24 = vmul.f32 -1.442695, %v3416_v63  ;;  %4157 = vmatmul.bf16.gmra.mxu3 %v11985_v51  ;;  %v3742_v11 = vadd.f32 %v11971_v62, %v3741_v57  ;;  %v7879_v57 = vor.u32 %v8479_v7, %v7878_v18 }
 0x3e5   : > { %v11996_v9 = vpop.eup %8868  ;;  %v11999_v46 = vadd.f32 1.0, %v8867_v60  ;;  %v8496_v60 = vld [vmem:[#allocation2 + $0x2c4] sm:$0xf]  ;;  %4913 = vmatpush.bf16.msrb.mxu0 %v7891_v30 }
 0x3e6   : > { %v11990_v21 = vpop.f32.mrf.mxu0  ;;  %v3754_v39 = vmul.f32 %v11996_v9, %v11975_v14  ;;  %8870 = vpow2.f32 %v7745_v24  ;;  %v3746_v44 = vsel %vm12013_vm4, %v11971_v62, %v3742_v11  ;;  %vm3759_vm5 = vweird.f32 %v11996_v9  ;;  %4776 = vmatpush.bf16.msra.mxu2 %v7879_v57 }
 0x3e7   : > { %v11994_v31 = vpop.f32.mrf.mxu1  ;;  %8872 = vrcp.f32 %v11999_v46  ;;  %vm3760_vm9 = vmor %vm3758_vm8, %vm3759_vm5  ;;  %vm3773_vm12 = vweird.f32 %v11999_v46 }
 0x3e8   : > { %8874 = vtanh.f32 %v3271_v15  ;;  %v3755_v26 = vsub.f32 1.0, %v3754_v39  ;;  %v7952_v15 = vld [vmem:[#allocation2 + $0x2c8] sm:$0xf0]  ;;  %v7943_v39 = vor.u32 %v8495_v48, %v7942_v5  ;;  %v3352_v5 = vadd.f32 %v11994_v31, %v11604_v55  ;;  %v12044_v48 = vpop.f32.mrf.mxu3 }
 0x3e9   : > { %8876 = vtanh.f32 %v3273_v27  ;;  %v3418_v25 = vpop.f32.mrf.mxu2  ;;  %v3750_v27 = vor.u32 1.1754944e-38, %v3749_v47  ;;  %v7955_v32 = vor.u32 %v8496_v60, %v7952_v15  ;;  %v3765_v47 = vor.u32 1.1754944e-38, %v3764_v61 }
 0x3ea   : > { %v3419_v63 = vadd.f32 %v3418_v25, %v3350_v1  ;;  %v3756_v22 = vmul.f32 %v11996_v9, %v3755_v26  ;;  %4845 = vmatpush.bf16.msra.mxu3 %v7943_v39  ;;  %v3209_v15 = vadd.f32 %v11890_v23, %v11660_v56  ;;  %v3779_v23 = vand.u32 2147483648, %v11999_v46 }
 0x3eb   : > { %v3751_v25 = vsel %vm3748_vm6, %v3750_v27, %v3746_v44  ;;  %4982 = vmatpush.bf16.msrb.mxu1 %v7955_v32  ;;  %v3207_v44 = vadd.f32 %v11844_v34, %v11660_v56 }
 0x3ec   : > { %v8871_v8 = vpop.eup %8870  ;;  %v7746_v62 = vmul.f32 -1.442695, %v3419_v63  ;;  %v3757_v1 = vadd.f32 %v11996_v9, %v3756_v22 }
 0x3ed   : > { %v12027_v26 = vpop.eup %8872  ;;  %v12029_v41 = vadd.f32 1.0, %v8871_v8  ;;  %v3276_v57 = vadd.f32 %v11924_v12, %v3207_v44  ;;  %v3278_v12 = vadd.f32 %v11945_v42, %v3209_v15  ;;  %v3777_v42 = vand.u32 2147483647, %v11999_v46 }
 0x3ee   : > { %v12023_v24 = vpop.f32.mrf.mxu0  ;;  %v8875_v30 = vpop.eup %8874  ;;  %v3769_v6 = vmul.f32 %v12027_v26, %v11999_v46  ;;  %8878 = vpow2.f32 %v7746_v62  ;;  %v3761_v14 = vsel %vm3760_vm9, %v11996_v9, %v3757_v1  ;;  %vm3774_vm11 = vweird.f32 %v12027_v26 }
 0x3ef   : > { %v3354_v11 = vpop.f32.mrf.mxu1  ;;  %v8877_v18 = vpop.eup %8876  ;;  %8880 = vrcp.f32 %v12029_v41  ;;  %v3766_v61 = vsel %vm3763_vm10, %v3765_v47, %v3761_v14  ;;  %v3930_v63 = vmul.f32 %v8875_v30, %v3751_v25  ;;  %vm12062_vm13 = vmor %vm3773_vm12, %vm3774_vm11  ;;  %v3792_v14 = vand.u32 2147483647, %v12029_v41 }
 0x3f0   : > { %v3770_v7 = vsub.f32 1.0, %v3769_v6  ;;  %v3931_v22 = vmul.f32 %v8877_v18, %v3766_v61  ;;  %8882 = vtanh.f32 %v3276_v57  ;;  %v3355_v47 = vadd.f32 %v3354_v11, %v11604_v55 }
 0x3f1   : > { %4226 = vmatmul.bf16.gmra.mxu0 %v11985_v51  ;;  %v3420_v9 = vpop.f32.mrf.mxu2  ;;  %v3794_v18 = vand.u32 2147483648, %v12029_v41  ;;  %vm3778_vm15 = vcmp.eq.f32.partialorder %v3777_v42, 8.507059e+37  ;;  %vm3788_vm0 = vweird.f32 %v12029_v41  ;;  %vm3793_vm2 = vcmp.eq.f32.partialorder %v3792_v14, 8.507059e+37 }
 0x3f2   : > { %4295 = vmatmul.bf16.gmra.mxu1 %v11985_v51  ;;  %v3421_v53 = vadd.f32 %v3420_v9, %v3352_v5  ;;  %v3948_v60 = vpack.c.bf16 %v3931_v22, %v3930_v63  ;;  %v3771_v34 = vmul.f32 %v12027_v26, %v3770_v7  ;;  %v12071_v5 = vpop.f32.mrf.mxu3  ;;  %v3780_v63 = vor.u32 1.1754944e-38, %v3779_v23 }
 0x3f4   : > { %v8879_v27 = vpop.eup %8878  ;;  %v7747_v39 = vmul.f32 -1.442695, %v3421_v53  ;;  %4162 = vmatmul.bf16.gmra.mxu3 %v3948_v60  ;;  %v3772_v1 = vadd.f32 %v12027_v26, %v3771_v34 }
 0x3f5   : > { %v8881_v32 = vpop.eup %8880  ;;  %v12052_v8 = vadd.f32 1.0, %v8879_v27  ;;  %v3795_v27 = vor.u32 1.1754944e-38, %v3794_v18  ;;  %v8478_v18 = vld [vmem:[#allocation2 + $0x234] sm:$0xf] }
 0x3f6   : > { %v12049_v51 = vpop.f32.mrf.mxu0  ;;  %v3784_v62 = vmul.f32 %v8881_v32, %v12029_v41  ;;  %8884 = vpow2.f32 %v7747_v39  ;;  %v3776_v61 = vsel %vm12062_vm13, %v12027_v26, %v3772_v1  ;;  %vm3789_vm14 = vweird.f32 %v8881_v32  ;;  %v8883_v7 = vpop.eup %8882 }
 0x3f7   : > { %v3356_v31 = vpop.f32.mrf.mxu1  ;;  %8886 = vrcp.f32 %v12052_v8  ;;  %v3781_v26 = vsel %vm3778_vm15, %v3780_v63, %v3776_v61  ;;  %vm3790_vm1 = vmor %vm3788_vm0, %vm3789_vm14  ;;  %v3212_v1 = vadd.f32 %v11913_v40, %v11660_v56  ;;  %v7934_v63 = vld [vmem:[#allocation2 + $0x2a0] sm:$0xf]  ;;  %v8493_v40 = vld [vmem:[#allocation2 + $0x2a4] sm:$0xf0]  ;;  %vm3803_vm4 = vweird.f32 %v12052_v8 }
 0x3f8   : > { %v3785_v25 = vsub.f32 1.0, %v3784_v62  ;;  %8888 = vtanh.f32 %v3278_v12  ;;  %v3357_v41 = vadd.f32 %v3356_v31, %v11604_v55  ;;  %v7944_v31 = vld [vmem:[#allocation2 + $0x2b8] sm:$0xf0] }
 0x3f9   : > { %v3423_v30 = vpop.f32.mrf.mxu2 }
 0x3fa   : > { %v3424_v44 = vadd.f32 %v3423_v30, %v3355_v47  ;;  %v3786_v11 = vmul.f32 %v8881_v32, %v3785_v25  ;;  %v7870_v25 = vld [vmem:[#allocation2 + $0x220] sm:$0xf]  ;;  %v8477_v47 = vld [vmem:[#allocation2 + $0x224] sm:$0xf0]  ;;  %v3932_v30 = vmul.f32 %v8883_v7, %v3781_v26  ;;  %v3214_v7 = vadd.f32 %v11943_v28, %v11660_v56 }
 0x3fb   : > { %v7871_v61 = vor.u32 %v8477_v47, %v7870_v25  ;;  %v12097_v25 = vpop.f32.mrf.mxu3 }
 0x3fc   : > { %v8885_v22 = vpop.eup %8884  ;;  %v7748_v57 = vmul.f32 -1.442695, %v3424_v44  ;;  %v3787_v53 = vadd.f32 %v8881_v32, %v3786_v11  ;;  %v7880_v44 = vld [vmem:[#allocation2 + $0x238] sm:$0xf0]  ;;  %v3283_v47 = vadd.f32 %v11990_v21, %v3214_v7 }
 0x3fd   : > { %v12078_v34 = vpop.eup %8886  ;;  %v12080_v15 = vadd.f32 1.0, %v8885_v22  ;;  %v7883_v11 = vor.u32 %v8478_v18, %v7880_v44  ;;  %v8494_v22 = vld [vmem:[#allocation2 + $0x2b4] sm:$0xf]  ;;  %4777 = vmatpush.bf16.msra.mxu2 %v7871_v61  ;;  %v7854_v44 = vld [vmem:[#allocation2 + $0x200] sm:$0xf] }
 0x3fe   : > { %v12073_v46 = vpop.f32.mrf.mxu0  ;;  %v3799_v39 = vmul.f32 %v12078_v34, %v12052_v8  ;;  %8890 = vpow2.f32 %v7748_v57  ;;  %v3791_v12 = vsel %vm3790_vm1, %v8881_v32, %v3787_v53  ;;  %v8889_v62 = vpop.eup %8888  ;;  %v3281_v32 = vadd.f32 %v11968_v49, %v3212_v1  ;;  %v7862_v1 = vld [vmem:[#allocation2 + $0x210] sm:$0xf]  ;;  %v8473_v61 = vld [vmem:[#allocation2 + $0x204] sm:$0xf0] }
 0x3ff   : > { %v12075_v9 = vpop.f32.mrf.mxu1  ;;  %8892 = vrcp.f32 %v12080_v15  ;;  %v3796_v23 = vsel %vm3793_vm2, %v3795_v27, %v3791_v12  ;;  %4914 = vmatpush.bf16.msrb.mxu0 %v7883_v11  ;;  %v7947_v49 = vor.u32 %v8494_v22, %v7944_v31  ;;  %vm3804_vm3 = vweird.f32 %v12078_v34 }
 0x400   : > { %v3800_v42 = vsub.f32 1.0, %v3799_v39  ;;  %v3933_v6 = vmul.f32 %v8889_v62, %v3796_v23  ;;  %8894 = vtanh.f32 %v3281_v32  ;;  %v3360_v21 = vadd.f32 %v12075_v9, %v11604_v55  ;;  %vm12111_vm5 = vmor %vm3803_vm4, %vm3804_vm3 }
 0x401   : > { %4231 = vmatmul.bf16.gmra.mxu0 %v3948_v60  ;;  %v3425_v14 = vpop.f32.mrf.mxu2  ;;  %4983 = vmatpush.bf16.msrb.mxu1 %v7947_v49  ;;  %v3824_v22 = vand.u32 2147483648, %v12080_v15  ;;  %vm3818_vm9 = vweird.f32 %v12080_v15  ;;  %vm4379_vm4 = vcmp.lt.s32.totalorder %v9492_v17, 4 }
 0x402   : > { %4300 = vmatmul.bf16.gmra.mxu1 %v3948_v60  ;;  %v3426_v57 = vadd.f32 %v3425_v14, %v3357_v41  ;;  %v12089_v53 = vpack.c.bf16 %v3933_v6, %v3932_v30  ;;  %v7935_v60 = vor.u32 %v8493_v40, %v7934_v63  ;;  %v3801_v27 = vmul.f32 %v12078_v34, %v3800_v42  ;;  %v8475_v41 = vld [vmem:[#allocation2 + $0x214] sm:$0xf0] }
 0x403   : > { %v3809_v6 = vand.u32 2147483648, %v12052_v8  ;;  %v7863_v18 = vor.u32 %v8475_v41, %v7862_v1  ;;  %v3807_v14 = vand.u32 2147483647, %v12052_v8  ;;  %v3822_v40 = vand.u32 2147483647, %v12080_v15 }
 0x404   : > { %v8891_v39 = vpop.eup %8890  ;;  %v7749_v12 = vmul.f32 -1.442695, %v3426_v57  ;;  %4167 = vmatmul.bf16.gmra.mxu3 %v12089_v53  ;;  %v3802_v30 = vadd.f32 %v12078_v34, %v3801_v27  ;;  %v7855_v57 = vor.u32 %v8473_v61, %v7854_v44  ;;  %v12122_v27 = vadd.f32 %v10906_v58, %v10974_v54 }
 0x405   : > { %v8893_v23 = vpop.eup %8892  ;;  %v12100_v42 = vadd.f32 1.0, %v8891_v39  ;;  %4846 = vmatpush.bf16.msra.mxu3 %v7935_v60  ;;  %4778 = vmatpush.bf16.msra.mxu2 %v7863_v18  ;;  %v3810_v49 = vor.u32 1.1754944e-38, %v3809_v6  ;;  %vm3808_vm8 = vcmp.eq.f32.partialorder %v3807_v14, 8.507059e+37  ;;  %v3825_v54 = vor.u32 1.1754944e-38, %v3824_v22  ;;  %v12139_v18 = vpop.f32.mrf.mxu3 }
 0x406   : > { %v12094_v26 = vpop.f32.mrf.mxu0  ;;  %v3814_v28 = vmul.f32 %v8893_v23, %v12080_v15  ;;  %8896 = vpow2.f32 %v7749_v12  ;;  %v3806_v9 = vsel %vm12111_vm5, %v12078_v34, %v3802_v30  ;;  %vm3819_vm6 = vweird.f32 %v8893_v23  ;;  %v8895_v8 = vpop.eup %8894 }
 0x407   : > { %v3361_v62 = vpop.f32.mrf.mxu1  ;;  %8898 = vrcp.f32 %v12100_v42  ;;  %v12131_v34 = vadd.f32 %v10976_v16, %v11029_v35  ;;  %v3811_v58 = vsel %vm3808_vm8, %v3810_v49, %v3806_v9  ;;  %vm3820_vm10 = vmor %vm3818_vm9, %vm3819_vm6  ;;  %vm3823_vm11 = vcmp.eq.f32.partialorder %v3822_v40, 8.507059e+37 }
 0x408   : > { %v3815_v32 = vsub.f32 1.0, %v3814_v28  ;;  %8900 = vtanh.f32 %v3283_v47  ;;  %v3362_v44 = vadd.f32 %v3361_v62, %v11604_v55  ;;  %v3934_v61 = vmul.f32 %v8895_v8, %v3811_v58  ;;  %v12158_v62 = vld [vmem:[%s13947_s6 + $0x3] sm:$0x7] }
 0x409   : > { %v3428_v11 = vpop.f32.mrf.mxu2  ;;  %4779 = vmatpush.bf16.msra.mxu2 %v7855_v57  ;;  %v13984_v14 = vrot.slane %v12131_v34, 6  ;;  %v14136_v9 = vrot.slane %v11053_v50, 6  ;;  %v3222_v8 = vadd.f32 %v12044_v48, %v11660_v56  ;;  %vm3833_vm13 = vweird.f32 %v12100_v42 }
 0x40a   : > { %v3429_v60 = vadd.f32 %v3428_v11, %v3360_v21  ;;  %v3816_v31 = vmul.f32 %v8893_v23, %v3815_v32  ;;  %v13986_v21 = vrot.slane %v12122_v27, 6 }
 0x40c   : > { %v8897_v39 = vpop.eup %8896  ;;  %v7750_v12 = vmul.f32 -1.442695, %v3429_v60  ;;  %v3817_v41 = vadd.f32 %v8893_v23, %v3816_v31  ;;  %v14135_v60 = vrot.slane %v10984_v0, 6  ;;  %v12180_v0 = vadd.f32 %v12071_v5, %v11660_v56 }
 0x40d   : > { %v12127_v47 = vpop.eup %8898  ;;  %v12133_v28 = vadd.f32 1.0, %v8897_v39 }
 0x40e   : > { %v12124_v7 = vpop.f32.mrf.mxu0  ;;  %v3829_v30 = vmul.f32 %v12127_v47, %v12100_v42  ;;  %8902 = vpow2.f32 %v7750_v12  ;;  %v3821_v15 = vsel %vm3820_vm10, %v8893_v23, %v3817_v41  ;;  %v8901_v6 = vpop.eup %8900  ;;  %v3217_v23 = vadd.f32 %v11973_v33, %v11660_v56 }
 0x40f   : > { %v3364_v1 = vpop.f32.mrf.mxu1  ;;  %8904 = vrcp.f32 %v12133_v28  ;;  %v3826_v16 = vsel %vm3823_vm11, %v3825_v54, %v3821_v15  ;;  %v12166_v33 = vsel %vm2816_vm7, %v13986_v21, %v14135_v60  ;;  %vm3834_vm12 = vweird.f32 %v12127_v47  ;;  %v14184_v21 = vld [vmem:[#allocation40_spill] sm:$0xff] }
 0x410   : > { %v3830_v35 = vsub.f32 1.0, %v3829_v30  ;;  %v3935_v32 = vmul.f32 %v8901_v6, %v3826_v16  ;;  %v3286_v49 = vadd.f32 %v12023_v24, %v3217_v23  ;;  %v12196_v24 = vperm.slane %v12158_v62, 0  ;;  %vm12206_vm14 = vmor %vm3833_vm13, %vm3834_vm12 }
 0x411   : > { %4236 = vmatmul.bf16.gmra.mxu0 %v12089_v53  ;;  %v3430_v11 = vpop.f32.mrf.mxu2  ;;  %v3839_v30 = vand.u32 2147483648, %v12100_v42  ;;  %v3852_v15 = vand.u32 2147483647, %v12133_v28  ;;  %v3365_v16 = vadd.f32 %v3364_v1, %v11604_v55  ;;  %v7926_v1 = vld [vmem:[#allocation2 + $0x290] sm:$0xf]  ;;  %vm3848_vm1 = vweird.f32 %v12133_v28 }
 0x412   : > { %4305 = vmatmul.bf16.gmra.mxu1 %v12089_v53  ;;  %v3431_v63 = vadd.f32 %v3430_v11, %v3362_v44  ;;  %v12148_v40 = vpack.c.bf16 %v3935_v32, %v3934_v61  ;;  %v3831_v22 = vmul.f32 %v12127_v47, %v3830_v35  ;;  %v3219_v53 = vadd.f32 %v12006_v43, %v11660_v56  ;;  %v8476_v35 = vld [vmem:[#allocation2 + $0x224] sm:$0xf]  ;;  %v7872_v44 = vld [vmem:[#allocation2 + $0x228] sm:$0xf0] }
 0x413   : > { %v12174_v43 = vsel %vm2816_vm7, %v13984_v14, %v14136_v9  ;;  %v3854_v32 = vand.u32 2147483648, %v12133_v28  ;;  %v3291_v11 = vadd.f32 %v12073_v46, %v3222_v8  ;;  %v7875_v23 = vor.u32 %v8476_v35, %v7872_v44 }
 0x414   : > { %v8903_v31 = vpop.eup %8902  ;;  %v7751_v39 = vmul.f32 -1.442695, %v3431_v63  ;;  %4172 = vmatmul.bf16.gmra.mxu3 %v12148_v40  ;;  %v3288_v41 = vadd.f32 %v12049_v51, %v3219_v53  ;;  %v3832_v54 = vadd.f32 %v12127_v47, %v3831_v22  ;;  %v3837_v51 = vand.u32 2147483647, %v12100_v42  ;;  %v8491_v22 = vld [vmem:[#allocation2 + $0x294] sm:$0xf0] }
 0x415   : > { %v12186_v12 = vpop.eup %8904  ;;  %v12189_v58 = vadd.f32 1.0, %v8903_v31  ;;  %v8492_v53 = vld [vmem:[#allocation2 + $0x2a4] sm:$0xf]  ;;  %v7927_v31 = vor.u32 %v8491_v22, %v7926_v1  ;;  %4915 = vmatpush.bf16.msrb.mxu0 %v7875_v23  ;;  %v3840_v8 = vor.u32 1.1754944e-38, %v3839_v30  ;;  %vm12222_vm2 = vcmp.eq.f32.partialorder %v3852_v15, 8.507059e+37 }
 0x416   : > { %v12153_v57 = vpop.f32.mrf.mxu0  ;;  %v3844_v48 = vmul.f32 %v12186_v12, %v12133_v28  ;;  %8906 = vpow2.f32 %v7751_v39  ;;  %v3836_v63 = vsel %vm12206_vm14, %v12127_v47, %v3832_v54  ;;  %vm3849_vm15 = vweird.f32 %v12186_v12  ;;  %v8474_v28 = vld [vmem:[#allocation2 + $0x214] sm:$0xf]  ;;  %v7918_v22 = vld [vmem:[#allocation2 + $0x280] sm:$0xf] }
 0x417   : > { %v12184_v50 = vpop.f32.mrf.mxu1  ;;  %8908 = vrcp.f32 %v12189_v58  ;;  %v4133_v5 = vpop.f32.mrf.mxu3  ;;  %v12218_v39 = vperm.slane %v12158_v62, 1  ;;  %vm3838_vm0 = vcmp.eq.f32.partialorder %v3837_v51, 8.507059e+37  ;;  %4847 = vmatpush.bf16.msra.mxu3 %v7927_v31  ;;  %vm12233_vm3 = vmor %vm3848_vm1, %vm3849_vm15  ;;  %v12239_v23 = vadd.f32 %v12097_v25, %v11660_v56 }
 0x418   : > { %8910 = vtanh.f32 %v3286_v49  ;;  %v3845_v6 = vsub.f32 1.0, %v3844_v48  ;;  %v7936_v49 = vld [vmem:[#allocation2 + $0x2a8] sm:$0xf0]  ;;  %v4134_v51 = vadd.f32 %v4133_v5, %v12196_v24  ;;  %v3841_v30 = vsel %vm3838_vm0, %v3840_v8, %v3836_v63  ;;  %v7864_v63 = vld [vmem:[#allocation2 + $0x218] sm:$0xf0] }
 0x419   : > { %8912 = vtanh.f32 %v3288_v41  ;;  %v3433_v42 = vpop.f32.mrf.mxu2  ;;  %v7939_v41 = vor.u32 %v8492_v53, %v7936_v49  ;;  %v3367_v25 = vadd.f32 %v12184_v50, %v11604_v55  ;;  %v7867_v50 = vor.u32 %v8474_v28, %v7864_v63 }
 0x41a   : > { %v3434_v60 = vadd.f32 %v3433_v42, %v3365_v16  ;;  %v3846_v9 = vmul.f32 %v12186_v12, %v3845_v6  ;;  %v3855_v42 = vor.u32 1.1754944e-38, %v3854_v32  ;;  %v8489_v32 = vld [vmem:[#allocation2 + $0x284] sm:$0xf0]  ;;  %v12259_v55 = vadd.f32 %v4134_v51, %v11184_v36 }
 0x41b   : > { %4984 = vmatpush.bf16.msrb.mxu1 %v7939_v41  ;;  %v3869_v36 = vand.u32 2147483648, %v12189_v58  ;;  %4916 = vmatpush.bf16.msrb.mxu0 %v7867_v50  ;;  %vm3863_vm6 = vweird.f32 %v12189_v58 }
 0x41c   : > { %v8907_v48 = vpop.eup %8906  ;;  %v7752_v47 = vmul.f32 -1.442695, %v3434_v60  ;;  %v3847_v35 = vadd.f32 %v12186_v12, %v3846_v9  ;;  %v12251_v60 = vperm.slane %v12158_v62, 2 }
 0x41d   : > { %v12226_v16 = vpop.eup %8908  ;;  %v12228_v44 = vadd.f32 1.0, %v8907_v48  ;;  %v8490_v48 = vld [vmem:[#allocation2 + $0x294] sm:$0xf] }
 0x41e   : > { %v4202_v46 = vpop.f32.mrf.mxu0  ;;  %v8911_v15 = vpop.eup %8910  ;;  %v3859_v1 = vmul.f32 %v12226_v16, %v12189_v58  ;;  %8914 = vpow2.f32 %v7752_v47  ;;  %v3851_v5 = vsel %vm12233_vm3, %v12186_v12, %v3847_v35  ;;  %v7928_v47 = vld [vmem:[#allocation2 + $0x298] sm:$0xf0]  ;;  %v7919_v35 = vor.u32 %v8489_v32, %v7918_v22 }
 0x41f   : > { %v4271_v54 = vpop.f32.mrf.mxu1  ;;  %v8913_v53 = vpop.eup %8912  ;;  %8916 = vrcp.f32 %v12228_v44  ;;  %v3856_v31 = vsel %vm12222_vm2, %v3855_v42, %v3851_v5  ;;  %v3936_v8 = vmul.f32 %v8911_v15, %v3841_v30  ;;  %v3293_v30 = vadd.f32 %v12094_v26, %v12180_v0 }
 0x420   : > { %v4135_v9 = vpop.f32.mrf.mxu3  ;;  %v3860_v12 = vsub.f32 1.0, %v3859_v1  ;;  %v3937_v41 = vmul.f32 %v8913_v53, %v3856_v31  ;;  %8918 = vtanh.f32 %v3291_v11  ;;  %v12270_v15 = vadd.f32 %v4202_v46, %v12218_v39  ;;  %4848 = vmatpush.bf16.msra.mxu3 %v7919_v35 }
 0x421   : > { %4241 = vmatmul.bf16.gmra.mxu0 %v12148_v40  ;;  %v4136_v49 = vadd.f32 %v4135_v9, %v12196_v24  ;;  %v3435_v62 = vpop.f32.mrf.mxu2  ;;  %v7931_v51 = vor.u32 %v8490_v48, %v7928_v47  ;;  %vm3864_vm5 = vweird.f32 %v12226_v16  ;;  %v3870_v47 = vor.u32 1.1754944e-38, %v3869_v36 }
 0x422   : > { %4310 = vmatmul.bf16.gmra.mxu1 %v12148_v40  ;;  %v3436_v6 = vadd.f32 %v3435_v62, %v3367_v25  ;;  %v12264_v61 = vpack.c.bf16 %v3937_v41, %v3936_v8  ;;  %v3861_v42 = vmul.f32 %v12226_v16, %v3860_v12  ;;  %v13985_v9 = vrot.slane %v12270_v15, 4  ;;  %vm12302_vm8 = vmor %vm3863_vm6, %vm3864_vm5 }
 0x423   : > { %v12262_v40 = vadd.f32 %v4136_v49, %v11172_v52  ;;  %v12274_v52 = vadd.f32 %v4271_v54, %v12251_v60  ;;  %4985 = vmatpush.bf16.msrb.mxu1 %v7931_v51  ;;  %v3867_v49 = vand.u32 2147483647, %v12189_v58  ;;  %v3882_v50 = vand.u32 2147483647, %v12228_v44 }
 0x424   : > { %v8915_v28 = vpop.eup %8914  ;;  %v7753_v5 = vmul.f32 -1.442695, %v3436_v6  ;;  %4177 = vmatmul.bf16.gmra.mxu3 %v12264_v61  ;;  %v3862_v54 = vadd.f32 %v12226_v16, %v3861_v42  ;;  %v3884_v35 = vand.u32 2147483648, %v12228_v44  ;;  %vm3878_vm11 = vweird.f32 %v12228_v44 }
 0x425   : > { %v12278_v1 = vpack.c.bf16 %v12262_v40, %v12259_v55  ;;  %v8917_v46 = vpop.eup %8916  ;;  %v12284_v63 = vadd.f32 1.0, %v8915_v28  ;;  %v13983_v41 = vrot.slane %v12274_v52, 4  ;;  %vm3868_vm10 = vcmp.eq.f32.partialorder %v3867_v49, 8.507059e+37 }
 0x426   : > { %v4204_v11 = vpop.f32.mrf.mxu0  ;;  %v3874_v32 = vmul.f32 %v8917_v46, %v12228_v44  ;;  %8920 = vpow2.f32 %v7753_v5  ;;  %v8919_v25 = vpop.eup %8918  ;;  %v3866_v62 = vsel %vm12302_vm8, %v12226_v16, %v3862_v54  ;;  %vm3879_vm9 = vweird.f32 %v8917_v46 }
 0x427   : > { %v12282_v26 = vadd.f32 %v4204_v11, %v12218_v39  ;;  %v4273_v0 = vpop.f32.mrf.mxu1  ;;  %4780 = vmatmul.bf16.vlgmr.msra.gmra.mxu2 %v12278_v1  ;;  %8922 = vrcp.f32 %v12284_v63  ;;  %v3229_v16 = vadd.f32 %v12139_v18, %v11660_v56  ;;  %v3296_v11 = vadd.f32 %v12124_v7, %v12239_v23  ;;  %vm3880_vm12 = vmor %vm3878_vm11, %vm3879_vm9 }
 0x428   : > { %v12287_v22 = vadd.f32 %v4273_v0, %v12251_v60  ;;  %v4138_v12 = vpop.f32.mrf.mxu3  ;;  %8924 = vtanh.f32 %v3293_v30  ;;  %v3875_v8 = vsub.f32 1.0, %v3874_v32  ;;  %vm3883_vm13 = vcmp.eq.f32.partialorder %v3882_v50, 8.507059e+37 }
 0x429   : > { %v4333_v53 = vrot.slane %v12282_v26, 4  ;;  %v3871_v26 = vsel %vm3868_vm10, %v3870_v47, %v3866_v62  ;;  %v3885_v18 = vor.u32 1.1754944e-38, %v3884_v35  ;;  %v4139_v54 = vadd.f32 %v4138_v12, %v12196_v24 }
 0x42a   : > { %v4334_v31 = vrot.slane %v12287_v22, 4  ;;  %v3876_v6 = vmul.f32 %v8917_v46, %v3875_v8  ;;  %v3938_v47 = vmul.f32 %v8919_v25, %v3871_v26  ;;  %v7920_v26 = vld [vmem:[#allocation2 + $0x288] sm:$0xf0]  ;;  %vm3893_vm15 = vweird.f32 %v12284_v63 }
 0x42b   : > { %v4424_v58 = vsel %vm4379_vm4, %v13985_v9, %v4333_v53 }
 0x42c   : > { %v12316_v42 = vadd.f32 %v4424_v58, %v12166_v33  ;;  %v4425_v30 = vsel %vm4379_vm4, %v13983_v41, %v4334_v31  ;;  %v8921_v28 = vpop.eup %8920  ;;  %v3877_v0 = vadd.f32 %v8917_v46, %v3876_v6  ;;  %v3298_v58 = vadd.f32 %v12153_v57, %v3229_v16  ;;  %v7856_v16 = vld [vmem:[#allocation2 + $0x208] sm:$0xf0] }
 0x42d   : > { %v12327_v51 = vadd.f32 %v4425_v30, %v12174_v43  ;;  %v12333_v22 = vpop.eup %8922  ;;  %v12335_v56 = vadd.f32 1.0, %v8921_v28  ;;  %v12356_v6 = vadd.f32 %v4139_v54, %v11232_v3 }
 0x42e   : > { %v4207_v36 = vpop.f32.mrf.mxu0  ;;  %v8925_v43 = vpop.eup %8924  ;;  %v3889_v23 = vmul.f32 %v12333_v22, %v12284_v63  ;;  %v3881_v44 = vsel %vm3880_vm12, %v8917_v46, %v3877_v0  ;;  %vm3894_vm14 = vweird.f32 %v12333_v22 }
 0x42f   : > { %v12330_v33 = vadd.f32 %v4207_v36, %v12218_v39  ;;  %v4276_v5 = vpop.f32.mrf.mxu1  ;;  %8926 = vrcp.f32 %v12335_v56  ;;  %v3886_v48 = vsel %vm3883_vm13, %v3885_v18, %v3881_v44  ;;  %v8518_v18 = vld [vmem:[#allocation4 + $0x22c] sm:$0xf]  ;;  %v3899_v44 = vand.u32 2147483648, %v12284_v63  ;;  %vm12391_vm0 = vmor %vm3893_vm15, %vm3894_vm14 }
 0x430   : > { %v12338_v7 = vadd.f32 %v4276_v5, %v12251_v60  ;;  %v4140_v8 = vpop.f32.mrf.mxu3  ;;  %v3890_v62 = vsub.f32 1.0, %v3889_v23  ;;  %v3939_v35 = vmul.f32 %v8925_v43, %v3886_v48  ;;  %8928 = vtanh.f32 %v3296_v11  ;;  %v8488_v5 = vld [vmem:[#allocation2 + $0x284] sm:$0xf]  ;;  %v8061_v43 = vld [vmem:[#allocation4 + $0x234] sm:$0xf0] }
 0x431   : > { %v4335_v32 = vrot.slane %v12330_v33, 4  ;;  %4246 = vmatmul.bf16.gmra.mxu0 %v12264_v61  ;;  %v4141_v12 = vadd.f32 %v4140_v8, %v12196_v24  ;;  %8930 = vtanh.f32 %v3298_v58  ;;  %v7923_v8 = vor.u32 %v8488_v5, %v7920_v26 }
 0x432   : > { %v4336_v49 = vrot.slane %v12338_v7, 4  ;;  %4315 = vmatmul.bf16.gmra.mxu1 %v12264_v61  ;;  %v12361_v61 = vpack.c.bf16 %v3939_v35, %v3938_v47  ;;  %v3891_v25 = vmul.f32 %v12333_v22, %v3890_v62  ;;  %v8064_v48 = vor.u32 %v8518_v18, %v8061_v43  ;;  %v8067_v47 = vld [vmem:[#allocation4 + $0x230] sm:$0xf]  ;;  %v8519_v62 = vld [vmem:[#allocation4 + $0x238] sm:$0xf0] }
 0x433   : > { %v4422_v50 = vsel %vm4379_vm4, %v4333_v53, %v4335_v32  ;;  %v12359_v30 = vadd.f32 %v4141_v12, %v11222_v29  ;;  %v3897_v35 = vand.u32 2147483647, %v12284_v63  ;;  %v3912_v58 = vand.u32 2147483647, %v12335_v56  ;;  %4986 = vmatpush.bf16.msrb.mxu1 %v7923_v8 }
 0x434   : > { %v4423_v46 = vsel %vm4379_vm4, %v4334_v31, %v4336_v49  ;;  %v12365_v53 = vadd.f32 %v4422_v50, %v11013_v45  ;;  %4182 = vmatmul.bf16.gmra.mxu3 %v12361_v61  ;;  %v8472_v31 = vld [vmem:[#allocation2 + $0x204] sm:$0xf]  ;;  %5700 = vmatpush.bf16.msrb.mxu2 %v8064_v48  ;;  %vm3908_vm3 = vweird.f32 %v12335_v56 }
 0x435   : > { %v12368_v28 = vadd.f32 %v4423_v46, %v11082_v59  ;;  %v12376_v29 = vpack.c.bf16 %v12359_v30, %v12356_v6  ;;  %v8927_v33 = vpop.eup %8926  ;;  %v3892_v59 = vadd.f32 %v12333_v22, %v3891_v25  ;;  %v7859_v11 = vor.u32 %v8472_v31, %v7856_v16 }
 0x436   : > { %v4209_v36 = vpop.f32.mrf.mxu0  ;;  %v3904_v0 = vmul.f32 %v8927_v33, %v12335_v56  ;;  %v8068_v46 = vor.u32 %v8519_v62, %v8067_v47  ;;  %v8929_v31 = vpop.eup %8928  ;;  %vm3909_vm1 = vweird.f32 %v8927_v33  ;;  %vm3898_vm2 = vcmp.eq.f32.partialorder %v3897_v35, 8.507059e+37 }
 0x437   : > { %v12372_v3 = vadd.f32 %v4209_v36, %v12218_v39  ;;  %v4278_v57 = vpop.f32.mrf.mxu1  ;;  %4785 = vmatmul.bf16.gmra.mxu2 %v12376_v29  ;;  %4917 = vmatpush.bf16.msrb.mxu0 %v7859_v11  ;;  %v3896_v25 = vsel %vm12391_vm0, %v12333_v22, %v3892_v59  ;;  %v3914_v36 = vand.u32 2147483648, %v12335_v56  ;;  %v3900_v59 = vor.u32 1.1754944e-38, %v3899_v44  ;;  %v8931_v11 = vpop.eup %8930  ;;  %vm3910_vm5 = vmor %vm3908_vm3, %vm3909_vm1 }
 0x438   : > { %v12379_v45 = vadd.f32 %v4278_v57, %v12251_v60  ;;  %v4143_v54 = vpop.f32.mrf.mxu3  ;;  %v3905_v50 = vsub.f32 1.0, %v3904_v0  ;;  %5769 = vmatpush.bf16.msrb.mxu3 %v8068_v46  ;;  %vm3913_vm6 = vcmp.eq.f32.partialorder %v3912_v58, 8.507059e+37 }
 0x439   : > { %v4337_v7 = vrot.slane %v12372_v3, 4  ;;  %v3901_v0 = vsel %vm3898_vm2, %v3900_v59, %v3896_v25  ;;  %v3915_v18 = vor.u32 1.1754944e-38, %v3914_v36 }
 0x43a   : > { %v4338_v23 = vrot.slane %v12379_v45, 4  ;;  %v3906_v16 = vmul.f32 %v8927_v33, %v3905_v50  ;;  %v3940_v62 = vmul.f32 %v8929_v31, %v3901_v0  ;;  %v14147_v31 = vld [vmem:[#allocation18_spill] sm:$0xff] }
 0x43b   : > { %v4420_v3 = vsel %vm4379_vm4, %v4335_v32, %v4337_v7 }
 0x43c   : > { %v4421_v57 = vsel %vm4379_vm4, %v4336_v49, %v4338_v23  ;;  %v12406_v63 = vadd.f32 %v4420_v3, %v11067_v4  ;;  %v3907_v32 = vadd.f32 %v8927_v33, %v3906_v16  ;;  %v4144_v4 = vadd.f32 %v4143_v54, %v12196_v24 }
 0x43d   : > { %v12409_v45 = vadd.f32 %v4421_v57, %v11127_v20 }
 0x43e   : > { %v4212_v22 = vpop.f32.mrf.mxu0  ;;  %v3911_v20 = vsel %vm3910_vm5, %v8927_v33, %v3907_v32  ;;  %v12426_v33 = vadd.f32 %v4144_v4, %v11280_v38  ;;  %v8053_v32 = vld [vmem:[#allocation4 + $0x21c] sm:$0xf0]  ;;  %v8517_v4 = vld [vmem:[#allocation4 + $0x220] sm:$0xf0] }
 0x43f   : > { %v4213_v5 = vadd.f32 %v4212_v22, %v12218_v39  ;;  %v4281_v26 = vpop.f32.mrf.mxu1  ;;  %v3916_v48 = vsel %vm3913_vm6, %v3915_v18, %v3911_v20  ;;  %v4502_v22 = vrot.slane %v12356_v6, 4  ;;  %v8059_v18 = vld [vmem:[#allocation4 + $0x218] sm:$0xf]  ;;  %v13982_v6 = vrot.slane %v12259_v55, 4 }
 0x440   : > { %v4282_v49 = vadd.f32 %v4281_v26, %v12251_v60  ;;  %v4145_v8 = vpop.f32.mrf.mxu3  ;;  %v3941_v50 = vmul.f32 %v8931_v11, %v3916_v48  ;;  %v8516_v26 = vld [vmem:[#allocation4 + $0x214] sm:$0xf] }
 0x441   : > { %v4339_v43 = vrot.slane %v4213_v5, 4  ;;  %4251 = vmatmul.bf16.gmra.mxu0 %v12361_v61  ;;  %v4146_v47 = vadd.f32 %v4145_v8, %v12196_v24 }
 0x442   : > { %v4340_v44 = vrot.slane %v4282_v49, 4  ;;  %4320 = vmatmul.bf16.gmra.mxu1 %v12361_v61  ;;  %v3953_v61 = vpack.c.bf16 %v3941_v50, %v3940_v62  ;;  %v4501_v49 = vrot.slane %v12262_v40, 4 }
 0x443   : > { %v4418_v56 = vsel %vm4379_vm4, %v4337_v7, %v4339_v43  ;;  %v12429_v35 = vadd.f32 %v4146_v47, %v11268_v10 }
 0x444   : > { %v4419_v54 = vsel %vm4379_vm4, %v4338_v23, %v4340_v44  ;;  %v12423_v12 = vadd.f32 %v4418_v56, %v11094_v19  ;;  %4187 = vmatmul.bf16.gmra.mxu3 %v3953_v61  ;;  %v4545_v8 = vsel %vm4379_vm4, %v4501_v49, %v4502_v22  ;;  %v4546_v62 = vsel %vm4379_vm4, %v13982_v6, %v4501_v49  ;;  %v8513_v6 = vld [vmem:[#allocation4 + $0x1f0] sm:$0xf0] }
 0x445   : > { %v12432_v58 = vadd.f32 %v4419_v54, %v11142_v13  ;;  %v12437_v23 = vpack.c.bf16 %v12429_v35, %v12426_v33  ;;  %v14148_v54 = vld [vmem:[#allocation17_spill] sm:$0xff] }
 0x446   : > { %v4214_v7 = vpop.f32.mrf.mxu0 }
 0x447   : > { %v4215_v46 = vadd.f32 %v4214_v7, %v12218_v39  ;;  %v4283_v25 = vpop.f32.mrf.mxu1  ;;  %4790 = vmatmul.bf16.gmra.mxu2 %v12437_v23 }
 0x448   : > { %v4284_v19 = vadd.f32 %v4283_v25, %v12251_v60  ;;  %v4148_v36 = vpop.f32.mrf.mxu3 }
 0x449   : > { %v4341_v38 = vrot.slane %v4215_v46, 4  ;;  %v4549_v46 = vpack.c.bf16 %v4545_v8, %v4546_v62 }
 0x44a   : > { %v4342_v10 = vrot.slane %v4284_v19, 4  ;;  %v14150_v19 = vld [vmem:[#allocation31_spill] sm:$0xff] }
 0x44b   : > { %v4416_v13 = vsel %vm4379_vm4, %v4339_v43, %v4341_v38  ;;  %v4149_v43 = vadd.f32 %v4148_v36, %v12196_v24  ;;  %v14151_v36 = vld [vmem:[#allocation20_spill] sm:$0xff] }
 0x44c   : > { %v12444_v3 = vadd.f32 %v4416_v13, %v11135_v2  ;;  %v4417_v57 = vsel %vm4379_vm4, %v4340_v44, %v4342_v10  ;;  %v8056_v2 = vor.u32 %v8516_v26, %v8053_v32  ;;  %v8060_v44 = vor.u32 %v8517_v4, %v8059_v18  ;;  %v14153_v4 = vld [vmem:[#allocation22_spill] sm:$0xff] }
 0x44d   : > { %v12449_v16 = vadd.f32 %v4417_v57, %v14147_v31 }
 0x44e   : > { %v4217_v59 = vpop.f32.mrf.mxu0  ;;  %5701 = vmatpush.bf16.msrb.mxu2 %v8056_v2  ;;  %5770 = vmatpush.bf16.msrb.mxu3 %v8060_v44  ;;  %v4504_v44 = vrot.slane %v12426_v33, 4 }
 0x44f   : > { %v4218_v11 = vadd.f32 %v4217_v59, %v12218_v39  ;;  %v4286_v5 = vpop.f32.mrf.mxu1 }
 0x450   : > { %v4287_v0 = vadd.f32 %v4286_v5, %v12251_v60  ;;  %v4150_v56 = vpop.f32.mrf.mxu3 }
 0x451   : > { %v4343_v20 = vrot.slane %v4218_v11, 4  ;;  %4256 = vmatmul.bf16.gmra.mxu0 %v3953_v61  ;;  %v4151_v47 = vadd.f32 %v4150_v56, %v12196_v24 }
 0x452   : > { %v4344_v48 = vrot.slane %v4287_v0, 4  ;;  %4325 = vmatmul.bf16.gmra.mxu1 %v3953_v61  ;;  %v14149_v61 = vld [vmem:[#allocation33_spill] sm:$0xff]  ;;  %v14152_v0 = vld [vmem:[#allocation19_spill] sm:$0xff] }
 0x453   : > { %v4414_v40 = vsel %vm4379_vm4, %v4341_v38, %v4343_v20  ;;  %v12472_v25 = vadd.f32 %v4149_v43, %v14149_v61  ;;  %v12475_v38 = vadd.f32 %v4151_v47, %v14150_v19  ;;  %v4503_v47 = vrot.slane %v12359_v30, 4 }
 0x454   : > { %v4415_v50 = vsel %vm4379_vm4, %v4342_v10, %v4344_v48  ;;  %v12469_v7 = vadd.f32 %v4414_v40, %v14148_v54  ;;  %4849 = vmatmul.bf16.vlgmr.msra.gmra.mxu3 %v4549_v46 }
 0x455   : > { %v12478_v13 = vadd.f32 %v4415_v50, %v14151_v36  ;;  %v12483_v10 = vpack.c.bf16 %v12475_v38, %v12472_v25  ;;  %v4543_v61 = vsel %vm4379_vm4, %v4503_v47, %v4504_v44  ;;  %v4544_v36 = vsel %vm4379_vm4, %v4502_v22, %v4503_v47  ;;  %v8051_v47 = vld [vmem:[#allocation4 + $0x200] sm:$0xf] }
 0x456   : > { %v4219_v57 = vpop.f32.mrf.mxu0 }
 0x457   : > { %v4220_v31 = vadd.f32 %v4219_v57, %v12218_v39  ;;  %v4288_v59 = vpop.f32.mrf.mxu1  ;;  %4795 = vmatmul.bf16.gmra.mxu2 %v12483_v10  ;;  %v14154_v57 = vld [vmem:[#allocation21_spill] sm:$0xff] }
 0x458   : > { %v4289_v11 = vadd.f32 %v4288_v59, %v12251_v60  ;;  %v4153_v32 = vpop.f32.mrf.mxu3 }
 0x459   : > { %v4345_v5 = vrot.slane %v4220_v31, 4 }
 0x45a   : > { %v4346_v26 = vrot.slane %v4289_v11, 4 }
 0x45b   : > { %v4412_v49 = vsel %vm4379_vm4, %v4343_v20, %v4345_v5  ;;  %v4154_v20 = vadd.f32 %v4153_v32, %v12196_v24  ;;  %v4551_v32 = vpack.c.bf16 %v4543_v61, %v4544_v36 }
 0x45c   : > { %v12490_v2 = vadd.f32 %v4412_v49, %v14152_v0  ;;  %v4413_v18 = vsel %vm4379_vm4, %v4344_v48, %v4346_v26  ;;  %v14157_v49 = vld [vmem:[#allocation24_spill] sm:$0xff] }
 0x45d   : > { %v12495_v43 = vadd.f32 %v4413_v18, %v14153_v4  ;;  %v8514_v4 = vld [vmem:[#allocation4 + $0x1fc] sm:$0xf] }
 0x45e   : > { %v4222_v8 = vpop.f32.mrf.mxu0 }
 0x45f   : > { %v4223_v56 = vadd.f32 %v4222_v8, %v12218_v39  ;;  %v4291_v40 = vpop.f32.mrf.mxu1  ;;  %v8045_v8 = vld [vmem:[#allocation4 + $0x204] sm:$0xf0] }
 0x460   : > { %v4292_v62 = vadd.f32 %v4291_v40, %v12251_v60  ;;  %v4155_v48 = vpop.f32.mrf.mxu3  ;;  %v8048_v40 = vor.u32 %v8514_v4, %v8045_v8  ;;  %v4505_v4 = vrot.slane %v12429_v35, 4 }
 0x461   : > { %v4347_v50 = vrot.slane %v4223_v56, 4  ;;  %4918 = vmatmul.bf16.vlgmr.msrb.gmra.mxu0 %v12278_v1  ;;  %v4156_v19 = vadd.f32 %v4155_v48, %v12196_v24  ;;  %v14155_v1 = vld [vmem:[#allocation39_spill] sm:$0xff] }
 0x462   : > { %v4348_v54 = vrot.slane %v4292_v62, 4  ;;  %4987 = vmatmul.bf16.vlgmr.msrb.gmra.mxu1 %v4549_v46  ;;  %v12516_v59 = vadd.f32 %v4154_v20, %v14155_v1  ;;  %v14156_v46 = vld [vmem:[#allocation37_spill] sm:$0xff]  ;;  %5702 = vmatpush.bf16.msrb.mxu2 %v8048_v40  ;;  %v14159_v1 = vld [vmem:[#allocation26_spill] sm:$0xff] }
 0x463   : > { %v4410_v33 = vsel %vm4379_vm4, %v4345_v5, %v4347_v50  ;;  %v12519_v11 = vadd.f32 %v4156_v19, %v14156_v46  ;;  %v8515_v62 = vld [vmem:[#allocation4 + $0x208] sm:$0xf0] }
 0x464   : > { %v4411_v30 = vsel %vm4379_vm4, %v4346_v26, %v4348_v54  ;;  %v12513_v31 = vadd.f32 %v4410_v33, %v14154_v57  ;;  %4854 = vmatmul.bf16.gmra.mxu3 %v4551_v32  ;;  %v8052_v48 = vor.u32 %v8515_v62, %v8051_v47 }
 0x465   : > { %v12522_v5 = vadd.f32 %v4411_v30, %v14157_v49  ;;  %v12527_v22 = vpack.c.bf16 %v12519_v11, %v12516_v59  ;;  %v14158_v30 = vld [vmem:[#allocation23_spill] sm:$0xff]  ;;  %v4506_v49 = vrot.slane %v12472_v25, 4 }
 0x466   : > { %v4224_v0 = vpop.f32.mrf.mxu0  ;;  %5771 = vmatpush.bf16.msrb.mxu3 %v8052_v48  ;;  %v4542_v48 = vsel %vm4379_vm4, %v4504_v44, %v4505_v4 }
 0x467   : > { %v4225_v26 = vadd.f32 %v4224_v0, %v12218_v39  ;;  %v4293_v18 = vpop.f32.mrf.mxu1  ;;  %4800 = vmatmul.bf16.gmra.mxu2 %v12527_v22  ;;  %v4541_v47 = vsel %vm4379_vm4, %v4505_v4, %v4506_v49 }
 0x468   : > { %v4294_v56 = vadd.f32 %v4293_v18, %v12251_v60  ;;  %v4158_v33 = vpop.f32.mrf.mxu3 }
 0x469   : > { %v4349_v20 = vrot.slane %v4225_v26, 4 }
 0x46a   : > { %v4350_v61 = vrot.slane %v4294_v56, 4 }
 0x46b   : > { %v4408_v19 = vsel %vm4379_vm4, %v4347_v50, %v4349_v20  ;;  %v4159_v50 = vadd.f32 %v4158_v33, %v12196_v24  ;;  %v14161_v33 = vld [vmem:[#allocation25_spill] sm:$0xff] }
 0x46c   : > { %v12534_v36 = vadd.f32 %v4408_v19, %v14158_v30  ;;  %v4409_v57 = vsel %vm4379_vm4, %v4348_v54, %v4350_v61 }
 0x46d   : > { %v12539_v46 = vadd.f32 %v4409_v57, %v14159_v1  ;;  %v4553_v1 = vpack.c.bf16 %v4541_v47, %v4542_v48  ;;  %v14168_v48 = vld [vmem:[#allocation30_spill] sm:$0xff] }
 0x46e   : > { %v4227_v0 = vpop.f32.mrf.mxu0 }
 0x46f   : > { %14160 = vst [vmem:[#allocation18_spill] sm:$0xff] %v12539_v46  ;;  %v4228_v26 = vadd.f32 %v4227_v0, %v12218_v39  ;;  %v4296_v18 = vpop.f32.mrf.mxu1  ;;  %v14164_v0 = vld [vmem:[#allocation28_spill] sm:$0xff]  ;;  %v14233_v46 = vld [vmem:[#allocation62_spill] sm:$0xff] }
 0x470   : > { %v4297_v8 = vadd.f32 %v4296_v18, %v12251_v60  ;;  %v4160_v54 = vpop.f32.mrf.mxu3 }
 0x471   : > { %v4351_v56 = vrot.slane %v4228_v26, 4  ;;  %4923 = vmatmul.bf16.gmra.mxu0 %v12376_v29  ;;  %v4161_v62 = vadd.f32 %v4160_v54, %v12196_v24  ;;  %v14162_v29 = vld [vmem:[#allocation45_spill] sm:$0xff] }
 0x472   : > { %v4352_v40 = vrot.slane %v4297_v8, 4  ;;  %4992 = vmatmul.bf16.gmra.mxu1 %v4551_v32  ;;  %v12560_v30 = vadd.f32 %v4159_v50, %v14162_v29  ;;  %v14163_v32 = vld [vmem:[#allocation43_spill] sm:$0xff]  ;;  %v4508_v29 = vrot.slane %v12516_v59, 4 }
 0x473   : > { %v4406_v25 = vsel %vm4379_vm4, %v4349_v20, %v4351_v56  ;;  %v12563_v57 = vadd.f32 %v4161_v62, %v14163_v32 }
 0x474   : > { %v4407_v35 = vsel %vm4379_vm4, %v4350_v61, %v4352_v40  ;;  %v12557_v19 = vadd.f32 %v4406_v25, %v14161_v33  ;;  %4859 = vmatmul.bf16.gmra.mxu3 %v4553_v1  ;;  %v14166_v25 = vld [vmem:[#allocation27_spill] sm:$0xff] }
 0x475   : > { %v12566_v20 = vadd.f32 %v4407_v35, %v14164_v0  ;;  %v12571_v44 = vpack.c.bf16 %v12563_v57, %v12560_v30 }
 0x476   : > { %v4229_v26 = vpop.f32.mrf.mxu0 }
 0x477   : > { %14165 = vst [vmem:[#allocation17_spill] sm:$0xff] %v12566_v20  ;;  %v4230_v61 = vadd.f32 %v4229_v26, %v12218_v39  ;;  %v4298_v18 = vpop.f32.mrf.mxu1  ;;  %4805 = vmatmul.bf16.gmra.mxu2 %v12571_v44 }
 0x478   : > { %v4299_v4 = vadd.f32 %v4298_v18, %v12251_v60  ;;  %v4163_v54 = vpop.f32.mrf.mxu3  ;;  %v8037_v18 = vld [vmem:[#allocation4 + $0x1ec] sm:$0xf0] }
 0x479   : > { %v4353_v8 = vrot.slane %v4230_v61, 4  ;;  %v8512_v61 = vld [vmem:[#allocation4 + $0x1e4] sm:$0xf] }
 0x47a   : > { %v4354_v50 = vrot.slane %v4299_v4, 4  ;;  %v4507_v4 = vrot.slane %v12475_v38, 4 }
 0x47b   : > { %v4404_v47 = vsel %vm4379_vm4, %v4351_v56, %v4353_v8 }
 0x47c   : > { %v12578_v62 = vadd.f32 %v4404_v47, %v14166_v25  ;;  %v4405_v35 = vsel %vm4379_vm4, %v4352_v40, %v4354_v50  ;;  %v8040_v47 = vor.u32 %v8512_v61, %v8037_v18  ;;  %v8043_v25 = vld [vmem:[#allocation4 + $0x1e8] sm:$0xf]  ;;  %v4164_v40 = vadd.f32 %v4163_v54, %v12196_v24  ;;  %v14173_v18 = vld [vmem:[#allocation48_spill] sm:$0xff] }
 0x47d   : > { %v12583_v33 = vadd.f32 %v4405_v35, %v14168_v48  ;;  %v8044_v35 = vor.u32 %v8513_v6, %v8043_v25  ;;  %v14170_v6 = vld [vmem:[#allocation29_spill] sm:$0xff] }
 0x47e   : > { %14167 = vst [vmem:[#allocation33_spill] sm:$0xff] %v12578_v62  ;;  %v4232_v32 = vpop.f32.mrf.mxu0  ;;  %5703 = vmatpush.bf16.msrb.mxu2 %v8040_v47  ;;  %v14232_v62 = vld [vmem:[#allocation58_spill] sm:$0xff] }
 0x47f   : > { %14169 = vst [vmem:[#allocation31_spill] sm:$0xff] %v12583_v33  ;;  %v4233_v0 = vadd.f32 %v4232_v32, %v12218_v39  ;;  %v4301_v26 = vpop.f32.mrf.mxu1  ;;  %v4539_v32 = vsel %vm4379_vm4, %v4507_v4, %v4508_v29  ;;  %5772 = vmatpush.bf16.msrb.mxu3 %v8044_v35 }
 0x480   : > { %v4302_v56 = vadd.f32 %v4301_v26, %v12251_v60  ;;  %v4165_v48 = vpop.f32.mrf.mxu3 }
 0x481   : > { %v4355_v41 = vrot.slane %v4233_v0, 4  ;;  %4928 = vmatmul.bf16.gmra.mxu0 %v12437_v23  ;;  %v4166_v26 = vadd.f32 %v4165_v48, %v12196_v24  ;;  %v4540_v23 = vsel %vm4379_vm4, %v4506_v49, %v4507_v4 }
 0x482   : > { %v4356_v59 = vrot.slane %v4302_v56, 4  ;;  %4997 = vmatmul.bf16.gmra.mxu1 %v4553_v1  ;;  %v14172_v1 = vld [vmem:[#allocation50_spill] sm:$0xff]  ;;  %v4555_v47 = vpack.c.bf16 %v4539_v32, %v4540_v23 }
 0x483   : > { %v4402_v38 = vsel %vm4379_vm4, %v4353_v8, %v4355_v41  ;;  %v12604_v61 = vadd.f32 %v4164_v40, %v14172_v1  ;;  %v12607_v56 = vadd.f32 %v4166_v26, %v14173_v18  ;;  %v14174_v8 = vld [vmem:[#allocation34_spill] sm:$0xff]  ;;  %v14178_v1 = vld [vmem:[#allocation36_spill] sm:$0xff] }
 0x484   : > { %v4403_v54 = vsel %vm4379_vm4, %v4354_v50, %v4356_v59  ;;  %v12601_v0 = vadd.f32 %v4402_v38, %v14170_v6  ;;  %4864 = vmatmul.bf16.gmra.mxu3 %v4555_v47 }
 0x485   : > { %v12610_v25 = vadd.f32 %v4403_v54, %v14174_v8  ;;  %v12615_v49 = vpack.c.bf16 %v12607_v56, %v12604_v61  ;;  %v14176_v54 = vld [vmem:[#allocation32_spill] sm:$0xff]  ;;  %v4510_v8 = vrot.slane %v12560_v30, 4 }
 0x486   : > { %14171 = vst [vmem:[#allocation20_spill] sm:$0xff] %v12601_v0  ;;  %v4234_v35 = vpop.f32.mrf.mxu0 }
 0x487   : > { %14175 = vst [vmem:[#allocation19_spill] sm:$0xff] %v12610_v25  ;;  %v4235_v50 = vadd.f32 %v4234_v35, %v12218_v39  ;;  %v4303_v48 = vpop.f32.mrf.mxu1  ;;  %4810 = vmatmul.bf16.gmra.mxu2 %v12615_v49 }
 0x488   : > { %v4304_v4 = vadd.f32 %v4303_v48, %v12251_v60  ;;  %v4168_v26 = vpop.f32.mrf.mxu3 }
 0x489   : > { %v4357_v40 = vrot.slane %v4235_v50, 4 }
 0x48a   : > { %v4358_v38 = vrot.slane %v4304_v4, 4  ;;  %v4509_v4 = vrot.slane %v12519_v11, 4 }
 0x48b   : > { %v4400_v32 = vsel %vm4379_vm4, %v4355_v41, %v4357_v40  ;;  %v4169_v41 = vadd.f32 %v4168_v26, %v12196_v24 }
 0x48c   : > { %v12622_v23 = vadd.f32 %v4400_v32, %v14176_v54  ;;  %v4401_v6 = vsel %vm4379_vm4, %v4356_v59, %v4358_v38  ;;  %v4538_v26 = vsel %vm4379_vm4, %v4508_v29, %v4509_v4 }
 0x48d   : > { %v12627_v18 = vadd.f32 %v4401_v6, %v14178_v1  ;;  %v4537_v6 = vsel %vm4379_vm4, %v4509_v4, %v4510_v8  ;;  %v8510_v4 = vld [vmem:[#allocation4 + $0x1cc] sm:$0xf] }
 0x48e   : > { %14177 = vst [vmem:[#allocation22_spill] sm:$0xff] %v12622_v23  ;;  %v4237_v35 = vpop.f32.mrf.mxu0  ;;  %v4557_v9 = vpack.c.bf16 %v4537_v6, %v4538_v26 }
 0x48f   : > { %14179 = vst [vmem:[#allocation21_spill] sm:$0xff] %v12627_v18  ;;  %v4238_v50 = vadd.f32 %v4237_v35, %v12218_v39  ;;  %v4306_v48 = vpop.f32.mrf.mxu1  ;;  %v14180_v35 = vld [vmem:[#allocation35_spill] sm:$0xff] }
 0x490   : > { %v4307_v14 = vadd.f32 %v4306_v48, %v12251_v60  ;;  %v4170_v59 = vpop.f32.mrf.mxu3 }
 0x491   : > { %v4359_v32 = vrot.slane %v4238_v50, 4  ;;  %4933 = vmatmul.bf16.gmra.mxu0 %v12483_v10  ;;  %v4171_v1 = vadd.f32 %v4170_v59, %v12196_v24 }
 0x492   : > { %v4360_v54 = vrot.slane %v4307_v14, 4  ;;  %5002 = vmatmul.bf16.gmra.mxu1 %v4555_v47  ;;  %v14182_v14 = vld [vmem:[#allocation54_spill] sm:$0xff]  ;;  %v14183_v47 = vld [vmem:[#allocation13_spill] sm:$0xff] }
 0x493   : > { %v4398_v30 = vsel %vm4379_vm4, %v4357_v40, %v4359_v32  ;;  %v12648_v10 = vadd.f32 %v4169_v41, %v14182_v14  ;;  %v12651_v48 = vadd.f32 %v4171_v1, %v14183_v47  ;;  %v8035_v1 = vld [vmem:[#allocation4 + $0x1d0] sm:$0xf]  ;;  %v8511_v14 = vld [vmem:[#allocation4 + $0x1d8] sm:$0xf0] }
 0x494   : > { %v4399_v11 = vsel %vm4379_vm4, %v4358_v38, %v4360_v54  ;;  %v12645_v50 = vadd.f32 %v4398_v30, %v14180_v35  ;;  %4869 = vmatmul.bf16.gmra.mxu3 %v4557_v9  ;;  %v8029_v30 = vld [vmem:[#allocation4 + $0x1d4] sm:$0xf0] }
 0x495   : > { %v12654_v40 = vadd.f32 %v4399_v11, %v14184_v21  ;;  %v12659_v29 = vpack.c.bf16 %v12651_v48, %v12648_v10  ;;  %v8032_v35 = vor.u32 %v8510_v4, %v8029_v30  ;;  %v8036_v21 = vor.u32 %v8511_v14, %v8035_v1  ;;  %v14188_v4 = vld [vmem:[#allocation42_spill] sm:$0xff] }
 0x496   : > { %14181 = vst [vmem:[#allocation39_spill] sm:$0xff] %v12645_v50  ;;  %v4239_v59 = vpop.f32.mrf.mxu0 }
 0x497   : > { %14185 = vst [vmem:[#allocation37_spill] sm:$0xff] %v12654_v40  ;;  %v4240_v38 = vadd.f32 %v4239_v59, %v12218_v39  ;;  %v4308_v18 = vpop.f32.mrf.mxu1  ;;  %4815 = vmatmul.bf16.gmra.mxu2 %v12659_v29  ;;  %5773 = vmatpush.bf16.msrb.mxu3 %v8036_v21  ;;  %v14186_v59 = vld [vmem:[#allocation38_spill] sm:$0xff] }
 0x498   : > { %v4309_v41 = vadd.f32 %v4308_v18, %v12251_v60  ;;  %v4173_v26 = vpop.f32.mrf.mxu3  ;;  %5704 = vmatpush.bf16.msrb.mxu2 %v8032_v35  ;;  %v4511_v35 = vrot.slane %v12563_v57, 4 }
 0x499   : > { %v4361_v6 = vrot.slane %v4240_v38, 4  ;;  %v13987_v38 = vrot.slane %v12604_v61, 4 }
 0x49a   : > { %v4362_v11 = vrot.slane %v4309_v41, 4 }
 0x49b   : > { %v4396_v47 = vsel %vm4379_vm4, %v4359_v32, %v4361_v6  ;;  %v4174_v32 = vadd.f32 %v4173_v26, %v12196_v24  ;;  %v4536_v26 = vsel %vm4379_vm4, %v4510_v8, %v4511_v35 }
 0x49c   : > { %v12666_v40 = vadd.f32 %v4396_v47, %v14186_v59  ;;  %v4397_v18 = vsel %vm4379_vm4, %v4360_v54, %v4362_v11  ;;  %v4535_v59 = vsel %vm4379_vm4, %v4511_v35, %v13987_v38 }
 0x49d   : > { %v12671_v30 = vadd.f32 %v4397_v18, %v14188_v4  ;;  %v4559_v38 = vpack.c.bf16 %v4535_v59, %v4536_v26 }
 0x49e   : > { %14187 = vst [vmem:[#allocation24_spill] sm:$0xff] %v12666_v40  ;;  %v4242_v50 = vpop.f32.mrf.mxu0 }
 0x49f   : > { %14189 = vst [vmem:[#allocation23_spill] sm:$0xff] %v12671_v30  ;;  %v4243_v41 = vadd.f32 %v4242_v50, %v12218_v39  ;;  %v4311_v1 = vpop.f32.mrf.mxu1  ;;  %v14194_v30 = vld [vmem:[#allocation46_spill] sm:$0xff] }
 0x4a0   : > { %v4312_v14 = vadd.f32 %v4311_v1, %v12251_v60  ;;  %v4175_v54 = vpop.f32.mrf.mxu3  ;;  %v14193_v1 = vld [vmem:[#allocation16_spill] sm:$0xff] }
 0x4a1   : > { %v4363_v21 = vrot.slane %v4243_v41, 4  ;;  %4938 = vmatmul.bf16.gmra.mxu0 %v12527_v22  ;;  %v4176_v57 = vadd.f32 %v4175_v54, %v12196_v24  ;;  %v14190_v22 = vld [vmem:[#allocation41_spill] sm:$0xff] }
 0x4a2   : > { %v4364_v47 = vrot.slane %v4312_v14, 4  ;;  %5007 = vmatmul.bf16.gmra.mxu1 %v4557_v9  ;;  %v14192_v9 = vld [vmem:[#allocation59_spill] sm:$0xff] }
 0x4a3   : > { %v4394_v50 = vsel %vm4379_vm4, %v4361_v6, %v4363_v21  ;;  %v12694_v41 = vadd.f32 %v4174_v32, %v14192_v9  ;;  %v12697_v14 = vadd.f32 %v4176_v57, %v14193_v1  ;;  %v14198_v9 = vld [vmem:[#allocation12_spill] sm:$0xff] }
 0x4a4   : > { %v4395_v18 = vsel %vm4379_vm4, %v4362_v11, %v4364_v47  ;;  %v12691_v4 = vadd.f32 %v4394_v50, %v14190_v22  ;;  %4874 = vmatmul.bf16.gmra.mxu3 %v4559_v38 }
 0x4a5   : > { %v12700_v6 = vadd.f32 %v4395_v18, %v14194_v30  ;;  %v12705_v8 = vpack.c.bf16 %v12697_v14, %v12694_v41  ;;  %v14196_v18 = vld [vmem:[#allocation44_spill] sm:$0xff] }
 0x4a6   : > { %14191 = vst [vmem:[#allocation26_spill] sm:$0xff] %v12691_v4  ;;  %v4244_v54 = vpop.f32.mrf.mxu0  ;;  %v8021_v4 = vld [vmem:[#allocation4 + $0x1bc] sm:$0xf0] }
 0x4a7   : > { %14195 = vst [vmem:[#allocation25_spill] sm:$0xff] %v12700_v6  ;;  %v4245_v11 = vadd.f32 %v4244_v54, %v12218_v39  ;;  %v4313_v40 = vpop.f32.mrf.mxu1  ;;  %4820 = vmatmul.bf16.gmra.mxu2 %v12705_v8  ;;  %v8508_v6 = vld [vmem:[#allocation4 + $0x1b4] sm:$0xf] }
 0x4a8   : > { %v4314_v35 = vadd.f32 %v4313_v40, %v12251_v60  ;;  %v4178_v57 = vpop.f32.mrf.mxu3 }
 0x4a9   : > { %v4365_v32 = vrot.slane %v4245_v11, 4 }
 0x4aa   : > { %v4366_v50 = vrot.slane %v4314_v35, 4  ;;  %v12711_v59 = vpop.f32.mrf.mxu2 }
 0x4ab   : > { %v4392_v30 = vsel %vm4379_vm4, %v4363_v21, %v4365_v32  ;;  %v4513_v21 = vrot.slane %v12607_v56, 4 }
 0x4ac   : > { %v12714_v26 = vadd.f32 %v4392_v30, %v14196_v18  ;;  %v4393_v22 = vsel %vm4379_vm4, %v4364_v47, %v4366_v50  ;;  %v8024_v30 = vor.u32 %v8508_v6, %v8021_v4  ;;  %v8027_v18 = vld [vmem:[#allocation4 + $0x1b8] sm:$0xf]  ;;  %v4179_v47 = vadd.f32 %v4178_v57, %v12196_v24 }
 0x4ad   : > { %v12719_v1 = vadd.f32 %v4393_v22, %v14198_v9  ;;  %v14202_v57 = vld [vmem:[#allocation47_spill] sm:$0xff] }
 0x4ae   : > { %14197 = vst [vmem:[#allocation45_spill] sm:$0xff] %v12714_v26  ;;  %v4247_v54 = vpop.f32.mrf.mxu0  ;;  %v8509_v26 = vld [vmem:[#allocation4 + $0x1c0] sm:$0xf0]  ;;  %5705 = vmatpush.bf16.msrb.mxu2 %v8024_v30 }
 0x4af   : > { %14199 = vst [vmem:[#allocation43_spill] sm:$0xff] %v12719_v1  ;;  %v4248_v11 = vadd.f32 %v4247_v54, %v12218_v39  ;;  %v4316_v35 = vpop.f32.mrf.mxu1  ;;  %v8028_v22 = vor.u32 %v8509_v26, %v8027_v18  ;;  %v14200_v54 = vrot.slane %v12648_v10, 4  ;;  %v14206_v18 = vld [vmem:[#allocation51_spill] sm:$0xff] }
 0x4b0   : > { %v4317_v23 = vadd.f32 %v4316_v35, %v12251_v60  ;;  %v4180_v40 = vpop.f32.mrf.mxu3 }
 0x4b1   : > { %v4367_v25 = vrot.slane %v4248_v11, 4  ;;  %4943 = vmatmul.bf16.gmra.mxu0 %v12571_v44  ;;  %v4533_v1 = vsel %vm4379_vm4, %v4513_v21, %v14200_v54  ;;  %v4181_v4 = vadd.f32 %v4180_v40, %v12196_v24  ;;  %5774 = vmatpush.bf16.msrb.mxu3 %v8028_v22  ;;  %v14204_v11 = vld [vmem:[#allocation64_spill] sm:$0xff] }
 0x4b2   : > { %v4368_v9 = vrot.slane %v4317_v23, 4  ;;  %5012 = vmatmul.bf16.gmra.mxu1 %v4559_v38  ;;  %v12736_v44 = vpop.f32.mrf.mxu2  ;;  %v14201_v23 = vrot.slane %v12604_v61, 4  ;;  %v12746_v35 = vadd.f32 %v4179_v47, %v14204_v11 }
 0x4b3   : > { %v4390_v56 = vsel %vm4379_vm4, %v4365_v32, %v4367_v25  ;;  %v14205_v32 = vld [vmem:[#allocation63_spill] sm:$0xff] }
 0x4b4   : > { %v4391_v6 = vsel %vm4379_vm4, %v4366_v50, %v4368_v9  ;;  %v4534_v38 = vsel %vm4379_vm4, %v14201_v23, %v4513_v21  ;;  %v12743_v26 = vadd.f32 %v4390_v56, %v14202_v57  ;;  %v12749_v30 = vadd.f32 %v4181_v4, %v14205_v32  ;;  %v14210_v32 = vld [vmem:[#allocation14_spill] sm:$0xff] }
 0x4b5   : > { %v4561_v40 = vpack.c.bf16 %v4533_v1, %v4534_v38  ;;  %v12752_v22 = vadd.f32 %v4391_v6, %v14206_v18  ;;  %v14208_v38 = vld [vmem:[#allocation49_spill] sm:$0xff] }
 0x4b6   : > { %14203 = vst [vmem:[#allocation28_spill] sm:$0xff] %v12743_v26  ;;  %v4249_v50 = vpop.f32.mrf.mxu0  ;;  %v12757_v21 = vpack.c.bf16 %v12749_v30, %v12746_v35 }
 0x4b7   : > { %14207 = vst [vmem:[#allocation27_spill] sm:$0xff] %v12752_v22  ;;  %4879 = vmatmul.bf16.gmra.mxu3 %v4561_v40  ;;  %v4250_v61 = vadd.f32 %v4249_v50, %v12218_v39  ;;  %v4318_v54 = vpop.f32.mrf.mxu1  ;;  %v4516_v50 = vrot.slane %v12694_v41, 4  ;;  %v4515_v22 = vrot.slane %v12651_v48, 4 }
 0x4b8   : > { %v4319_v56 = vadd.f32 %v4318_v54, %v12251_v60  ;;  %4825 = vmatmul.bf16.gmra.mxu2 %v12757_v21  ;;  %v4183_v23 = vpop.f32.mrf.mxu3 }
 0x4b9   : > { %v4369_v47 = vrot.slane %v4250_v61, 4  ;;  %v4184_v26 = vadd.f32 %v4183_v23, %v12196_v24  ;;  %v14212_v23 = vrot.slane %v12648_v10, 4 }
 0x4ba   : > { %v4370_v4 = vrot.slane %v4319_v56, 4  ;;  %v12763_v6 = vpop.f32.mrf.mxu2 }
 0x4bb   : > { %v4388_v1 = vsel %vm4379_vm4, %v4367_v25, %v4369_v47 }
 0x4bc   : > { %v12766_v57 = vadd.f32 %v4388_v1, %v14208_v38  ;;  %v4389_v11 = vsel %vm4379_vm4, %v4368_v9, %v4370_v4 }
 0x4bd   : > { %v12771_v18 = vadd.f32 %v4389_v11, %v14210_v32  ;;  %v4531_v11 = vsel %vm4379_vm4, %v4515_v22, %v4516_v50 }
 0x4be   : > { %14209 = vst [vmem:[#allocation30_spill] sm:$0xff] %v12766_v57  ;;  %v4252_v61 = vpop.f32.mrf.mxu0  ;;  %v14217_v57 = vld [vmem:[#allocation55_spill] sm:$0xff] }
 0x4bf   : > { %14211 = vst [vmem:[#allocation29_spill] sm:$0xff] %v12771_v18  ;;  %v4253_v54 = vadd.f32 %v4252_v61, %v12218_v39  ;;  %v4321_v56 = vpop.f32.mrf.mxu1  ;;  %v14216_v18 = vld [vmem:[#allocation65_spill] sm:$0xff] }
 0x4c0   : > { %v4322_v25 = vadd.f32 %v4321_v56, %v12251_v60  ;;  %v4185_v9 = vpop.f32.mrf.mxu3  ;;  %v14215_v56 = vld [vmem:[#allocation66_spill] sm:$0xff] }
 0x4c1   : > { %v4371_v1 = vrot.slane %v4253_v54, 4  ;;  %4948 = vmatmul.bf16.gmra.mxu0 %v12615_v49  ;;  %v4186_v32 = vadd.f32 %v4185_v9, %v12196_v24  ;;  %v4532_v49 = vsel %vm4379_vm4, %v14212_v23, %v4515_v22  ;;  %v14213_v54 = vld [vmem:[#allocation52_spill] sm:$0xff] }
 0x4c2   : > { %v4372_v38 = vrot.slane %v4322_v25, 4  ;;  %5017 = vmatmul.bf16.gmra.mxu1 %v4561_v40  ;;  %v12786_v61 = vpop.f32.mrf.mxu2  ;;  %v12796_v25 = vadd.f32 %v4184_v26, %v14215_v56  ;;  %v4563_v9 = vpack.c.bf16 %v4531_v11, %v4532_v49 }
 0x4c3   : > { %v4386_v41 = vsel %vm4379_vm4, %v4369_v47, %v4371_v1  ;;  %v12799_v47 = vadd.f32 %v4186_v32, %v14216_v18 }
 0x4c4   : > { %v4387_v48 = vsel %vm4379_vm4, %v4370_v4, %v4372_v38  ;;  %v12793_v40 = vadd.f32 %v4386_v41, %v14213_v54  ;;  %v14221_v54 = vld [vmem:[#allocation15_spill] sm:$0xff] }
 0x4c5   : > { %v12802_v33 = vadd.f32 %v4387_v48, %v14217_v57  ;;  %v12807_v22 = vpack.c.bf16 %v12799_v47, %v12796_v25  ;;  %v14219_v48 = vld [vmem:[#allocation53_spill] sm:$0xff] }
 0x4c6   : > { %14214 = vst [vmem:[#allocation50_spill] sm:$0xff] %v12793_v40  ;;  %v4254_v4 = vpop.f32.mrf.mxu0 }
 0x4c7   : > { %14218 = vst [vmem:[#allocation48_spill] sm:$0xff] %v12802_v33  ;;  %4884 = vmatmul.bf16.gmra.mxu3 %v4563_v9  ;;  %v4255_v10 = vadd.f32 %v4254_v4, %v12218_v39  ;;  %v4323_v0 = vpop.f32.mrf.mxu1  ;;  %v4517_v33 = vrot.slane %v12697_v14, 4 }
 0x4c8   : > { %v4324_v41 = vadd.f32 %v4323_v0, %v12251_v60  ;;  %4830 = vmatmul.bf16.gmra.mxu2 %v12807_v22  ;;  %v4188_v32 = vpop.f32.mrf.mxu3  ;;  %v13988_v0 = vrot.slane %v12746_v35, 4 }
 0x4c9   : > { %v4373_v26 = vrot.slane %v4255_v10, 4  ;;  %v4189_v40 = vadd.f32 %v4188_v32, %v12196_v24 }
 0x4ca   : > { %v4374_v18 = vrot.slane %v4324_v41, 4  ;;  %v12813_v11 = vpop.f32.mrf.mxu2 }
 0x4cb   : > { %v4384_v57 = vsel %vm4379_vm4, %v4371_v1, %v4373_v26 }
 0x4cc   : > { %v12816_v23 = vadd.f32 %v4384_v57, %v14219_v48  ;;  %v4385_v49 = vsel %vm4379_vm4, %v4372_v38, %v4374_v18 }
 0x4cd   : > { %v12821_v56 = vadd.f32 %v4385_v49, %v14221_v54  ;;  %v4529_v49 = vsel %vm4379_vm4, %v4517_v33, %v13988_v0 }
 0x4ce   : > { %14220 = vst [vmem:[#allocation34_spill] sm:$0xff] %v12816_v23  ;;  %v4257_v4 = vpop.f32.mrf.mxu0 }
 0x4cf   : > { %14222 = vst [vmem:[#allocation32_spill] sm:$0xff] %v12821_v56  ;;  %v4258_v10 = vadd.f32 %v4257_v4, %v12218_v39  ;;  %v4326_v41 = vpop.f32.mrf.mxu1  ;;  %v14226_v56 = vld [vmem:[#allocation60_spill] sm:$0xff] }
 0x4d0   : > { %v4327_v1 = vadd.f32 %v4326_v41, %v12251_v60  ;;  %v4190_v38 = vpop.f32.mrf.mxu3  ;;  %v12846_v41 = vadd.f32 %v4189_v40, %v11687_v37  ;;  %v12863_v37 = vld [vmem:[%s13945_s4 + $0x4] sm:$0x3] }
 0x4d1   : > { %v4375_v57 = vrot.slane %v4258_v10, 4  ;;  %4953 = vmatmul.bf16.gmra.mxu0 %v12659_v29  ;;  %v4191_v14 = vadd.f32 %v4190_v38, %v12196_v24  ;;  %v4530_v29 = vsel %vm4379_vm4, %v4516_v50, %v4517_v33  ;;  %v14223_v10 = vld [vmem:[#allocation56_spill] sm:$0xff] }
 0x4d2   : > { %v4376_v48 = vrot.slane %v4327_v1, 4  ;;  %5022 = vmatmul.bf16.gmra.mxu1 %v4563_v9  ;;  %v12838_v32 = vpop.f32.mrf.mxu2  ;;  %v14225_v1 = vld [vmem:[#allocation67_spill] sm:$0xff] }
 0x4d3   : > { %v4382_v54 = vsel %vm4379_vm4, %v4373_v26, %v4375_v57  ;;  %v12849_v0 = vadd.f32 %v4191_v14, %v14225_v1  ;;  %v4565_v26 = vpack.c.bf16 %v4529_v49, %v4530_v29  ;;  %v8013_v14 = vld [vmem:[#allocation4 + $0x1a4] sm:$0xf0] }
 0x4d4   : > { %v4383_v4 = vsel %vm4379_vm4, %v4374_v18, %v4376_v48  ;;  %v12843_v9 = vadd.f32 %v4382_v54, %v14223_v10  ;;  %v8506_v54 = vld [vmem:[#allocation4 + $0x19c] sm:$0xf]  ;;  %v14229_v29 = vld [vmem:[#allocation57_spill] sm:$0xff] }
 0x4d5   : > { %v12852_v24 = vadd.f32 %v4383_v4, %v14226_v56  ;;  %v12857_v33 = vpack.c.bf16 %v12849_v0, %v12846_v41  ;;  %v8019_v4 = vld [vmem:[#allocation4 + $0x1a0] sm:$0xf]  ;;  %v14230_v10 = vrot.slane %v14229_v29, 6 }
 0x4d6   : > { %14224 = vst [vmem:[#allocation36_spill] sm:$0xff] %v12843_v9  ;;  %v4259_v38 = vpop.f32.mrf.mxu0  ;;  %v8507_v9 = vld [vmem:[#allocation4 + $0x1a8] sm:$0xf0] }
 0x4d7   : > { %14227 = vst [vmem:[#allocation35_spill] sm:$0xff] %v12852_v24  ;;  %4889 = vmatmul.bf16.gmra.mxu3 %v4565_v26  ;;  %v4260_v18 = vadd.f32 %v4259_v38, %v12218_v39  ;;  %v4328_v23 = vpop.f32.mrf.mxu1  ;;  %v12869_v39 = vperm.slane %v12863_v37, 1  ;;  %v14231_v38 = vrot.slane %v12270_v15, 4  ;;  %v8016_v24 = vor.u32 %v8506_v54, %v8013_v14  ;;  %v14235_v54 = vld [vmem:[#allocation61_spill] sm:$0xff] }
 0x4d8   : > { %v4329_v50 = vadd.f32 %v4328_v23, %v12251_v60  ;;  %4835 = vmatmul.bf16.gmra.mxu2 %v12857_v33  ;;  %v12866_v49 = vpop.f32.mrf.mxu3  ;;  %v14228_v23 = vrot.slane %v12122_v27, 6  ;;  %v8020_v29 = vor.u32 %v8507_v9, %v8019_v4  ;;  %v4520_v15 = vrot.slane %v12796_v25, 4 }
 0x4d9   : > { %v4377_v40 = vrot.slane %v4260_v18, 4  ;;  %5706 = vmatpush.bf16.msrb.mxu2 %v8016_v24  ;;  %v14236_v14 = vrot.slane %v14235_v54, 6  ;;  %v4519_v25 = vrot.slane %v12749_v30, 4 }
 0x4da   : > { %v4378_v56 = vrot.slane %v4329_v50, 4  ;;  %v2863_v1 = vsel %vm2816_vm7, %v14230_v10, %v14228_v23  ;;  %v12883_v50 = vpop.f32.mrf.mxu2  ;;  %5775 = vmatpush.bf16.msrb.mxu3 %v8020_v29 }
 0x4db   : > { %v4380_v60 = vsel %vm4379_vm4, %v4375_v57, %v4377_v40  ;;  %v4426_v18 = vsel %vm4379_vm4, %v4377_v40, %v14231_v38  ;;  %v14234_v40 = vrot.slane %v12131_v34, 6 }
 0x4dc   : > { %v12886_v20 = vadd.f32 %v4380_v60, %v14232_v62  ;;  %v12888_v57 = vadd.f32 %v4426_v18, %v2863_v1  ;;  %v4381_v27 = vsel %vm4379_vm4, %v4376_v48, %v4378_v56  ;;  %v14237_v60 = vrot.slane %v12274_v52, 4 }
 0x4dd   : > { %v12893_v23 = vadd.f32 %v4381_v27, %v14233_v46  ;;  %v2864_v62 = vsel %vm2816_vm7, %v14236_v14, %v14234_v40  ;;  %v4527_v52 = vsel %vm4379_vm4, %v4519_v25, %v4520_v15 }
 0x4de   : > { %v4919_v10 = vpop.f32.mrf.mxu0  ;;  %v4427_v48 = vsel %vm4379_vm4, %v4378_v56, %v14237_v60  ;;  %v14238_v56 = vrot.slane %v12746_v35, 4  ;;  %v4522_v35 = vrot.slane %v12846_v41, 4  ;;  %v12934_v41 = vperm.slane %v12863_v37, 0 }
 0x4df   : > { %v4920_v9 = vadd.f32 %v4919_v10, %v12869_v39  ;;  %v4988_v46 = vpop.f32.mrf.mxu1  ;;  %v12907_v4 = vadd.f32 %v4427_v48, %v2864_v62 }
 0x4e0   : > { %v12911_v34 = vpop.f32.mrf.mxu3  ;;  %v4528_v38 = vsel %vm4379_vm4, %v14238_v56, %v4519_v25  ;;  %v8011_v25 = vld [vmem:[#allocation4 + $0x188] sm:$0xf]  ;;  %v8505_v56 = vld [vmem:[#allocation4 + $0x190] sm:$0xf0] }
 0x4e1   : > { %v4989_v24 = vadd.f32 %v4988_v46, %v4920_v9  ;;  %4958 = vmatmul.bf16.gmra.mxu0 %v12705_v8  ;;  %v4567_v18 = vpack.c.bf16 %v4527_v52, %v4528_v38  ;;  %v8504_v9 = vld [vmem:[#allocation4 + $0x184] sm:$0xf]  ;;  %v8005_v46 = vld [vmem:[#allocation4 + $0x18c] sm:$0xf0] }
 0x4e2   : > { %5027 = vmatmul.bf16.gmra.mxu1 %v4565_v26  ;;  %v12919_v27 = vpop.f32.mrf.mxu2 }
 0x4e3   : > { %v7980_v1 = vmul.f32 -1.442695, %v4989_v24  ;;  %v4521_v24 = vrot.slane %v12799_v47, 4 }
 0x4e5   : > { %8932 = vpow2.f32 %v7980_v1  ;;  %v8008_v1 = vor.u32 %v8504_v9, %v8005_v46 }
 0x4e6   : > { %v4921_v30 = vpop.f32.mrf.mxu0 }
 0x4e7   : > { %4894 = vmatmul.bf16.gmra.mxu3 %v4567_v18  ;;  %v4922_v8 = vadd.f32 %v4921_v30, %v12869_v39  ;;  %v4990_v29 = vpop.f32.mrf.mxu1  ;;  %v8012_v30 = vor.u32 %v8505_v56, %v8011_v25  ;;  %5707 = vmatpush.bf16.msrb.mxu2 %v8008_v1  ;;  %v4784_v1 = vadd.f32 %v12736_v44, %v12934_v41  ;;  %v4523_v56 = vrot.slane %v12849_v0, 4 }
 0x4e8   : > { %v12922_v26 = vpop.f32.mrf.mxu3 }
 0x4e9   : > { %v4991_v10 = vadd.f32 %v4990_v29, %v4922_v8  ;;  %v4525_v29 = vsel %vm4379_vm4, %v4521_v24, %v4522_v35  ;;  %5776 = vmatpush.bf16.msrb.mxu3 %v8012_v30 }
 0x4ea   : > { %v12930_v52 = vpop.f32.mrf.mxu2 }
 0x4eb   : > { %v8933_v40 = vpop.eup %8932  ;;  %v7981_v54 = vmul.f32 -1.442695, %v4991_v10 }
 0x4ec   : > { %v12924_v14 = vadd.f32 1.0, %v8933_v40 }
 0x4ed   : > { %8934 = vpow2.f32 %v7981_v54 }
 0x4ee   : > { %8936 = vrcp.f32 %v12924_v14  ;;  %v4924_v62 = vpop.f32.mrf.mxu0  ;;  %v5179_v0 = vand.u32 2147483648, %v12924_v14  ;;  %vm5173_vm8 = vweird.f32 %v12924_v14 }
 0x4ef   : > { %v4925_v60 = vadd.f32 %v4924_v62, %v12869_v39  ;;  %v4993_v48 = vpop.f32.mrf.mxu1 }
 0x4f0   : > { %v12936_v8 = vpop.f32.mrf.mxu3 }
 0x4f1   : > { %v4994_v38 = vadd.f32 %v4993_v48, %v4925_v60  ;;  %4963 = vmatmul.bf16.gmra.mxu0 %v12757_v21  ;;  %v4526_v21 = vsel %vm4379_vm4, %v4520_v15, %v4521_v24 }
 0x4f2   : > { %5032 = vmatmul.bf16.gmra.mxu1 %v4567_v18  ;;  %v4569_v62 = vpack.c.bf16 %v4525_v29, %v4526_v21  ;;  %v4782_v18 = vadd.f32 %v12711_v59, %v12934_v41 }
 0x4f3   : > { %v8935_v10 = vpop.eup %8934  ;;  %v7982_v47 = vmul.f32 -1.442695, %v4994_v38  ;;  %v12957_v38 = vpop.f32.mrf.mxu2 }
 0x4f4   : > { %v12940_v40 = vpop.eup %8936  ;;  %v12942_v54 = vadd.f32 1.0, %v8935_v10  ;;  %v4851_v25 = vadd.f32 %v12866_v49, %v4782_v18  ;;  %v4524_v18 = vsel %vm4379_vm4, %v4522_v35, %v4523_v56 }
 0x4f5   : > { %v5169_v37 = vmul.f32 %v12940_v40, %v12924_v14  ;;  %8938 = vpow2.f32 %v7982_v47  ;;  %v4853_v47 = vadd.f32 %v12911_v34, %v4784_v1  ;;  %vm5174_vm7 = vweird.f32 %v12940_v40 }
 0x4f6   : > { %8940 = vrcp.f32 %v12942_v54  ;;  %v4926_v60 = vpop.f32.mrf.mxu0  ;;  %v5177_v34 = vand.u32 2147483647, %v12924_v14  ;;  %vm12974_vm9 = vmor %vm5173_vm8, %vm5174_vm7  ;;  %vm5188_vm12 = vweird.f32 %v12942_v54 }
 0x4f7   : > { %v5170_v48 = vsub.f32 1.0, %v5169_v37  ;;  %4899 = vmatmul.bf16.gmra.mxu3 %v4569_v62  ;;  %v4927_v9 = vadd.f32 %v4926_v60, %v12869_v39  ;;  %v4995_v46 = vpop.f32.mrf.mxu1  ;;  %8942 = vtanh.f32 %v4851_v25  ;;  %v5192_v25 = vand.u32 2147483647, %v12942_v54 }
 0x4f8   : > { %v12959_v59 = vpop.f32.mrf.mxu3  ;;  %vm5178_vm11 = vcmp.eq.f32.partialorder %v5177_v34, 8.507059e+37 }
 0x4f9   : > { %v5171_v15 = vmul.f32 %v12940_v40, %v5170_v48  ;;  %v4996_v24 = vadd.f32 %v4995_v46, %v4927_v9  ;;  %vm5193_vm13 = vcmp.eq.f32.partialorder %v5192_v25, 8.507059e+37  ;;  %v8550_v25 = vld [vmem:[#allocation6 + $0xf4] sm:$0xf] }
 0x4fb   : > { %v8939_v30 = vpop.eup %8938  ;;  %v7983_v29 = vmul.f32 -1.442695, %v4996_v24  ;;  %v5172_v49 = vadd.f32 %v12940_v40, %v5171_v15  ;;  %v5194_v15 = vand.u32 2147483648, %v12942_v54  ;;  %v14241_v24 = vrot.slane %v12259_v55, 4 }
 0x4fc   : > { %v8941_v10 = vpop.eup %8940  ;;  %v12962_v21 = vadd.f32 1.0, %v8939_v30 }
 0x4fd   : > { %v5184_v44 = vmul.f32 %v8941_v10, %v12942_v54  ;;  %8944 = vpow2.f32 %v7983_v29  ;;  %v4547_v35 = vsel %vm4379_vm4, %v4523_v56, %v14241_v24  ;;  %vm5189_vm10 = vweird.f32 %v8941_v10  ;;  %v8943_v29 = vpop.eup %8942 }
 0x4fe   : > { %8946 = vrcp.f32 %v12962_v21  ;;  %v4929_v37 = vpop.f32.mrf.mxu0  ;;  %v5176_v30 = vsel %vm12974_vm9, %v12940_v40, %v5172_v49  ;;  %vm5190_vm4 = vmor %vm5188_vm12, %vm5189_vm10  ;;  %v12997_v40 = vpack.c.bf16 %v4547_v35, %v4524_v18  ;;  %vm5203_vm15 = vweird.f32 %v12962_v21 }
 0x4ff   : > { %v5185_v60 = vsub.f32 1.0, %v5184_v44  ;;  %v4930_v48 = vadd.f32 %v4929_v37, %v12869_v39  ;;  %v4998_v9 = vpop.f32.mrf.mxu1  ;;  %8948 = vtanh.f32 %v4853_v47  ;;  %v5180_v47 = vor.u32 1.1754944e-38, %v5179_v0 }
 0x500   : > { %v12988_v44 = vpop.f32.mrf.mxu3 }
 0x501   : > { %v5186_v1 = vmul.f32 %v8941_v10, %v5185_v60  ;;  %v4999_v14 = vadd.f32 %v4998_v9, %v4930_v48  ;;  %4968 = vmatmul.bf16.gmra.mxu0 %v12807_v22  ;;  %v5195_v60 = vor.u32 1.1754944e-38, %v5194_v15  ;;  %v12995_v48 = vpop.f32.mrf.mxu2  ;;  %v5181_v49 = vsel %vm5178_vm11, %v5180_v47, %v5176_v30  ;;  %v8193_v47 = vld [vmem:[#allocation6 + $0xf8] sm:$0xf0] }
 0x502   : > { %5037 = vmatmul.bf16.gmra.mxu1 %v4569_v62  ;;  %v5528_v18 = vmul.f32 %v8943_v29, %v5181_v49  ;;  %v4787_v30 = vadd.f32 %v12763_v6, %v12934_v41 }
 0x503   : > { %v8945_v37 = vpop.eup %8944  ;;  %v5187_v55 = vadd.f32 %v8941_v10, %v5186_v1  ;;  %v7984_v17 = vmul.f32 -1.442695, %v4999_v14  ;;  %v8534_v1 = vld [vmem:[#allocation6 + $0x74] sm:$0xf]  ;;  %v8129_v14 = vld [vmem:[#allocation6 + $0x78] sm:$0xf0] }
 0x504   : > { %v12991_v56 = vpop.eup %8946  ;;  %v12993_v22 = vadd.f32 1.0, %v8945_v37  ;;  %v4856_v49 = vadd.f32 %v12922_v26, %v4787_v30  ;;  %v8127_v30 = vld [vmem:[#allocation6 + $0x70] sm:$0xf] }
 0x505   : > { %v5199_v62 = vmul.f32 %v12991_v56, %v12962_v21  ;;  %8950 = vpow2.f32 %v7984_v17  ;;  %v5191_v0 = vsel %vm5190_vm4, %v8941_v10, %v5187_v55  ;;  %v8949_v34 = vpop.eup %8948  ;;  %v8132_v10 = vor.u32 %v8534_v1, %v8129_v14 }
 0x506   : > { %8952 = vrcp.f32 %v12993_v22  ;;  %v4931_v54 = vpop.f32.mrf.mxu0  ;;  %v5196_v9 = vsel %vm5193_vm13, %v5195_v60, %v5191_v0  ;;  %v8196_v17 = vor.u32 %v8550_v25, %v8193_v47  ;;  %vm5204_vm14 = vweird.f32 %v12991_v56 }
 0x507   : > { %v5200_v46 = vsub.f32 1.0, %v5199_v62  ;;  %4904 = vmatmul.bf16.gmra.mxu3 %v12997_v40  ;;  %v4932_v15 = vadd.f32 %v4931_v54, %v12869_v39  ;;  %v5000_v24 = vpop.f32.mrf.mxu1  ;;  %v5529_v35 = vmul.f32 %v8949_v34, %v5196_v9  ;;  %v4789_v62 = vadd.f32 %v12786_v61, %v12934_v41  ;;  %6288 = vmatpush.bf16.msra.mxu2 %v8132_v10  ;;  %v8535_v10 = vld [vmem:[#allocation6 + $0x74] sm:$0xf0]  ;;  %vm13031_vm0 = vmor %vm5203_vm15, %vm5204_vm14 }
 0x508   : > { %v13011_v0 = vpop.f32.mrf.mxu3  ;;  %6357 = vmatpush.bf16.msra.mxu3 %v8196_v17  ;;  %v8128_v47 = vor.u32 %v8535_v10, %v8127_v30  ;;  %v8551_v17 = vld [vmem:[#allocation6 + $0xf4] sm:$0xf0]  ;;  %vm5218_vm3 = vweird.f32 %v12993_v22 }
 0x509   : > { %v5001_v37 = vadd.f32 %v5000_v24, %v4932_v15  ;;  %v13006_v55 = vpack.c.bf16 %v5529_v35, %v5528_v18  ;;  %v5201_v60 = vmul.f32 %v12991_v56, %v5200_v46  ;;  %v4858_v54 = vadd.f32 %v12936_v8, %v4789_v62  ;;  %v13023_v26 = vpop.f32.mrf.mxu2 }
 0x50a   : > { %v5207_v24 = vand.u32 2147483647, %v12962_v21  ;;  %v5209_v8 = vand.u32 2147483648, %v12962_v21  ;;  %v5222_v18 = vand.u32 2147483647, %v12993_v22  ;;  %6150 = vmatpush.bf16.msra.mxu0 %v8128_v47 }
 0x50b   : > { %v8951_v29 = vpop.eup %8950  ;;  %v7985_v34 = vmul.f32 -1.442695, %v5001_v37  ;;  %5708 = vmatmul.bf16.vlgmr.msrb.gmra.mxu2 %v13006_v55  ;;  %v5202_v46 = vadd.f32 %v12991_v56, %v5201_v60  ;;  %v8191_v37 = vld [vmem:[#allocation6 + $0xf0] sm:$0xf]  ;;  %v5224_v60 = vand.u32 2147483648, %v12993_v22 }
 0x50c   : > { %v8953_v6 = vpop.eup %8952  ;;  %v13016_v9 = vadd.f32 1.0, %v8951_v29  ;;  %v8192_v29 = vor.u32 %v8551_v17, %v8191_v37  ;;  %vm5208_vm2 = vcmp.eq.f32.partialorder %v5207_v24, 8.507059e+37  ;;  %vm5223_vm6 = vcmp.eq.f32.partialorder %v5222_v18, 8.507059e+37 }
 0x50d   : > { %v5214_v61 = vmul.f32 %v8953_v6, %v12993_v22  ;;  %8954 = vpow2.f32 %v7985_v34  ;;  %v5206_v21 = vsel %vm13031_vm0, %v12991_v56, %v5202_v46  ;;  %vm5219_vm1 = vweird.f32 %v8953_v6 }
 0x50e   : > { %8956 = vrcp.f32 %v13016_v9  ;;  %v4934_v15 = vpop.f32.mrf.mxu0  ;;  %6219 = vmatpush.bf16.msra.mxu1 %v8192_v29  ;;  %vm5220_vm5 = vmor %vm5218_vm3, %vm5219_vm1  ;;  %v4794_v29 = vadd.f32 %v12838_v32, %v12934_v41  ;;  %vm5233_vm8 = vweird.f32 %v13016_v9 }
 0x50f   : > { %8958 = vtanh.f32 %v4856_v49  ;;  %v5215_v35 = vsub.f32 1.0, %v5214_v61  ;;  %v4935_v1 = vadd.f32 %v4934_v15, %v12869_v39  ;;  %v5003_v14 = vpop.f32.mrf.mxu1 }
 0x510   : > { %8960 = vtanh.f32 %v4858_v54  ;;  %v13040_v34 = vpop.f32.mrf.mxu3  ;;  %v5210_v54 = vor.u32 1.1754944e-38, %v5209_v8 }
 0x511   : > { %v5004_v62 = vadd.f32 %v5003_v14, %v4935_v1  ;;  %4973 = vmatmul.bf16.gmra.mxu0 %v12857_v33  ;;  %v5216_v49 = vmul.f32 %v8953_v6, %v5215_v35  ;;  %v5225_v35 = vor.u32 1.1754944e-38, %v5224_v60  ;;  %v4792_v60 = vadd.f32 %v12813_v11, %v12934_v41 }
 0x512   : > { %5042 = vmatmul.bf16.gmra.mxu1 %v12997_v40  ;;  %v5211_v33 = vsel %vm5208_vm2, %v5210_v54, %v5206_v21  ;;  %v13053_v21 = vpop.f32.mrf.mxu2 }
 0x513   : > { %v8955_v61 = vpop.eup %8954  ;;  %v7986_v15 = vmul.f32 -1.442695, %v5004_v62  ;;  %v5217_v30 = vadd.f32 %v8953_v6, %v5216_v49  ;;  %v4861_v54 = vadd.f32 %v12959_v59, %v4792_v60  ;;  %v5237_v59 = vand.u32 2147483647, %v13016_v9 }
 0x514   : > { %v13044_v56 = vpop.eup %8956  ;;  %v13046_v46 = vadd.f32 1.0, %v8955_v61 }
 0x515   : > { %v8959_v1 = vpop.eup %8958  ;;  %v5229_v40 = vmul.f32 %v13044_v56, %v13016_v9  ;;  %8962 = vpow2.f32 %v7986_v15  ;;  %v5221_v8 = vsel %vm5220_vm5, %v8953_v6, %v5217_v30  ;;  %v4863_v30 = vadd.f32 %v12988_v44, %v4794_v29 }
 0x516   : > { %v8961_v14 = vpop.eup %8960  ;;  %8964 = vrcp.f32 %v13046_v46  ;;  %v4936_v24 = vpop.f32.mrf.mxu0  ;;  %v5226_v10 = vsel %vm5223_vm6, %v5225_v35, %v5221_v8  ;;  %v5530_v37 = vmul.f32 %v8959_v1, %v5211_v33  ;;  %vm5234_vm7 = vweird.f32 %v13044_v56 }
 0x517   : > { %v5230_v22 = vsub.f32 1.0, %v5229_v40  ;;  %5777 = vmatmul.bf16.vlgmr.msrb.gmra.mxu3 %v13006_v55  ;;  %v4937_v25 = vadd.f32 %v4936_v24, %v12869_v39  ;;  %v5005_v47 = vpop.f32.mrf.mxu1  ;;  %v5531_v17 = vmul.f32 %v8961_v14, %v5226_v10  ;;  %v5239_v1 = vand.u32 2147483648, %v13016_v9  ;;  %vm13078_vm9 = vmor %vm5233_vm8, %vm5234_vm7  ;;  %v8532_v10 = vld [vmem:[#allocation6 + $0x64] sm:$0xf] }
 0x518   : > { %v13062_v49 = vpop.f32.mrf.mxu3  ;;  %v5252_v44 = vand.u32 2147483647, %v13046_v46  ;;  %v5254_v9 = vand.u32 2147483648, %v13046_v46  ;;  %vm5238_vm11 = vcmp.eq.f32.partialorder %v5237_v59, 8.507059e+37  ;;  %vm5248_vm12 = vweird.f32 %v13046_v46 }
 0x519   : > { %v5006_v6 = vadd.f32 %v5005_v47, %v4937_v25  ;;  %v13057_v18 = vpack.c.bf16 %v5531_v17, %v5530_v37  ;;  %v5231_v62 = vmul.f32 %v13044_v56, %v5230_v22  ;;  %v8121_v22 = vld [vmem:[#allocation6 + $0x68] sm:$0xf0]  ;;  %v8548_v37 = vld [vmem:[#allocation6 + $0xe4] sm:$0xf] }
 0x51a   : > { %v8124_v47 = vor.u32 %v8532_v10, %v8121_v22  ;;  %v8185_v17 = vld [vmem:[#allocation6 + $0xe8] sm:$0xf0]  ;;  %v13086_v29 = vpop.f32.mrf.mxu2  ;;  %vm5253_vm13 = vcmp.eq.f32.partialorder %v5252_v44, 8.507059e+37 }
 0x51b   : > { %v8963_v55 = vpop.eup %8962  ;;  %v7987_v61 = vmul.f32 -1.442695, %v5006_v6  ;;  %5713 = vmatmul.bf16.gmra.mxu2 %v13057_v18  ;;  %v5232_v33 = vadd.f32 %v13044_v56, %v5231_v62  ;;  %v8188_v62 = vor.u32 %v8548_v37, %v8185_v17  ;;  %v8119_v17 = vld [vmem:[#allocation6 + $0x60] sm:$0xf] }
 0x51c   : > { %v8965_v15 = vpop.eup %8964  ;;  %v13067_v11 = vadd.f32 1.0, %v8963_v55  ;;  %6289 = vmatpush.bf16.msra.mxu2 %v8124_v47 }
 0x51d   : > { %v5244_v35 = vmul.f32 %v8965_v15, %v13046_v46  ;;  %8966 = vpow2.f32 %v7987_v61  ;;  %v5236_v25 = vsel %vm13078_vm9, %v13044_v56, %v5232_v33  ;;  %vm5249_vm10 = vweird.f32 %v8965_v15  ;;  %6358 = vmatpush.bf16.msra.mxu3 %v8188_v62  ;;  %v8549_v62 = vld [vmem:[#allocation6 + $0xe4] sm:$0xf0] }
 0x51e   : > { %8968 = vrcp.f32 %v13067_v11  ;;  %v4939_v32 = vpop.f32.mrf.mxu0  ;;  %vm5250_vm4 = vmor %vm5248_vm12, %vm5249_vm10  ;;  %v4797_v46 = vadd.f32 %v12883_v50, %v12934_v41  ;;  %vm5263_vm15 = vweird.f32 %v13067_v11 }
 0x51f   : > { %8970 = vtanh.f32 %v4861_v54  ;;  %v5245_v40 = vsub.f32 1.0, %v5244_v35  ;;  %v4940_v8 = vadd.f32 %v4939_v32, %v12869_v39  ;;  %v5008_v14 = vpop.f32.mrf.mxu1  ;;  %v5240_v54 = vor.u32 1.1754944e-38, %v5239_v1 }
 0x520   : > { %8972 = vtanh.f32 %v4863_v30  ;;  %v13088_v55 = vpop.f32.mrf.mxu3 }
 0x521   : > { %v5009_v60 = vadd.f32 %v5008_v14, %v4940_v8  ;;  %v5246_v6 = vmul.f32 %v8965_v15, %v5245_v40  ;;  %v5241_v32 = vsel %vm5238_vm11, %v5240_v54, %v5236_v25  ;;  %v5255_v40 = vor.u32 1.1754944e-38, %v5254_v9 }
 0x523   : > { %v8967_v61 = vpop.eup %8966  ;;  %v7988_v30 = vmul.f32 -1.442695, %v5009_v60  ;;  %v5247_v35 = vadd.f32 %v8965_v15, %v5246_v6  ;;  %v8533_v60 = vld [vmem:[#allocation6 + $0x64] sm:$0xf0]  ;;  %v8183_v6 = vld [vmem:[#allocation6 + $0xe0] sm:$0xf] }
 0x524   : > { %v13091_v56 = vpop.eup %8968  ;;  %v13093_v33 = vadd.f32 1.0, %v8967_v61  ;;  %v8120_v44 = vor.u32 %v8533_v60, %v8119_v17  ;;  %v8184_v61 = vor.u32 %v8549_v62, %v8183_v6 }
 0x525   : > { %v8971_v8 = vpop.eup %8970  ;;  %v5259_v1 = vmul.f32 %v13091_v56, %v13067_v11  ;;  %8974 = vpow2.f32 %v7988_v30  ;;  %v5251_v14 = vsel %vm5250_vm4, %v8965_v15, %v5247_v35  ;;  %v4866_v15 = vadd.f32 %v13011_v0, %v4797_v46 }
 0x526   : > { %v8973_v59 = vpop.eup %8972  ;;  %8976 = vrcp.f32 %v13093_v33  ;;  %v4941_v24 = vpop.f32.mrf.mxu0  ;;  %v5256_v10 = vsel %vm5253_vm13, %v5255_v40, %v5251_v14  ;;  %v5532_v47 = vmul.f32 %v8971_v8, %v5241_v32  ;;  %6151 = vmatpush.bf16.msra.mxu0 %v8120_v44  ;;  %6220 = vmatpush.bf16.msra.mxu1 %v8184_v61  ;;  %vm5264_vm14 = vweird.f32 %v13091_v56 }
 0x527   : > { %v5260_v22 = vsub.f32 1.0, %v5259_v1  ;;  %5782 = vmatmul.bf16.gmra.mxu3 %v13057_v18  ;;  %v4942_v25 = vadd.f32 %v4941_v24, %v12869_v39  ;;  %v5010_v9 = vpop.f32.mrf.mxu1  ;;  %v5533_v37 = vmul.f32 %v8973_v59, %v5256_v10  ;;  %v4799_v18 = vadd.f32 %v12919_v27, %v12934_v41  ;;  %v13110_v1 = vpop.f32.mrf.mxu2  ;;  %vm13122_vm0 = vmor %vm5263_vm15, %vm5264_vm14 }
 0x528   : > { %v13107_v35 = vpop.f32.mrf.mxu3  ;;  %8978 = vtanh.f32 %v4866_v15  ;;  %v5269_v24 = vand.u32 2147483648, %v13067_v11  ;;  %vm5278_vm3 = vweird.f32 %v13093_v33 }
 0x529   : > { %v5011_v50 = vadd.f32 %v5010_v9, %v4942_v25  ;;  %v5554_v54 = vpack.c.bf16 %v5533_v37, %v5532_v47  ;;  %v5261_v30 = vmul.f32 %v13091_v56, %v5260_v22  ;;  %v4868_v0 = vadd.f32 %v13040_v34, %v4799_v18  ;;  %v8530_v9 = vld [vmem:[#allocation6 + $0x54] sm:$0xf] }
 0x52a   : > { %v5267_v25 = vand.u32 2147483647, %v13067_v11  ;;  %v5282_v47 = vand.u32 2147483647, %v13093_v33  ;;  %v5284_v37 = vand.u32 2147483648, %v13093_v33  ;;  %v5270_v11 = vor.u32 1.1754944e-38, %v5269_v24 }
 0x52b   : > { %v8975_v32 = vpop.eup %8974  ;;  %v7989_v40 = vmul.f32 -1.442695, %v5011_v50  ;;  %5718 = vmatmul.bf16.gmra.mxu2 %v5554_v54  ;;  %v5262_v27 = vadd.f32 %v13091_v56, %v5261_v30 }
 0x52c   : > { %v8977_v8 = vpop.eup %8976  ;;  %v13112_v14 = vadd.f32 1.0, %v8975_v32  ;;  %vm5268_vm2 = vcmp.eq.f32.partialorder %v5267_v25, 8.507059e+37  ;;  %vm5283_vm6 = vcmp.eq.f32.partialorder %v5282_v47, 8.507059e+37 }
 0x52d   : > { %v5274_v59 = vmul.f32 %v8977_v8, %v13093_v33  ;;  %8980 = vpow2.f32 %v7989_v40  ;;  %v5266_v60 = vsel %vm13122_vm0, %v13091_v56, %v5262_v27  ;;  %vm5279_vm1 = vweird.f32 %v8977_v8 }
 0x52e   : > { %8982 = vrcp.f32 %v13112_v14  ;;  %v4944_v46 = vpop.f32.mrf.mxu0  ;;  %v8979_v44 = vpop.eup %8978  ;;  %v5271_v32 = vsel %vm5268_vm2, %v5270_v11, %v5266_v60  ;;  %vm5280_vm5 = vmor %vm5278_vm3, %vm5279_vm1  ;;  %v5285_v40 = vor.u32 1.1754944e-38, %v5284_v37  ;;  %v8113_v37 = vld [vmem:[#allocation6 + $0x58] sm:$0xf0]  ;;  %vm5293_vm8 = vweird.f32 %v13112_v14 }
 0x52f   : > { %v5275_v10 = vsub.f32 1.0, %v5274_v59  ;;  %v4945_v22 = vadd.f32 %v4944_v46, %v12869_v39  ;;  %v5013_v34 = vpop.f32.mrf.mxu1  ;;  %8984 = vtanh.f32 %v4868_v0  ;;  %v13140_v27 = vpop.f32.mrf.mxu2  ;;  %v8116_v47 = vor.u32 %v8530_v9, %v8113_v37  ;;  %v8177_v60 = vld [vmem:[#allocation6 + $0xd8] sm:$0xf0] }
 0x530   : > { %v13131_v6 = vpop.f32.mrf.mxu3 }
 0x531   : > { %v5014_v17 = vadd.f32 %v5013_v34, %v4945_v22  ;;  %v5276_v15 = vmul.f32 %v8977_v8, %v5275_v10  ;;  %v5534_v34 = vmul.f32 %v8979_v44, %v5271_v32  ;;  %6290 = vmatpush.bf16.msra.mxu2 %v8116_v47  ;;  %v8547_v47 = vld [vmem:[#allocation6 + $0xd4] sm:$0xf0] }
 0x533   : > { %v8981_v62 = vpop.eup %8980  ;;  %v7990_v50 = vmul.f32 -1.442695, %v5014_v17  ;;  %v5277_v61 = vadd.f32 %v8977_v8, %v5276_v15  ;;  %v8546_v17 = vld [vmem:[#allocation6 + $0xd4] sm:$0xf] }
 0x534   : > { %v13134_v30 = vpop.eup %8982  ;;  %v13136_v18 = vadd.f32 1.0, %v8981_v62  ;;  %v8180_v62 = vor.u32 %v8546_v17, %v8177_v60 }
 0x535   : > { %v5289_v56 = vmul.f32 %v13134_v30, %v13112_v14  ;;  %8986 = vpow2.f32 %v7990_v50  ;;  %v5281_v0 = vsel %vm5280_vm5, %v8977_v8, %v5277_v61  ;;  %v8985_v59 = vpop.eup %8984  ;;  %v4802_v8 = vadd.f32 %v12930_v52, %v12934_v41 }
 0x536   : > { %8988 = vrcp.f32 %v13136_v18  ;;  %v4946_v46 = vpop.f32.mrf.mxu0  ;;  %v5286_v33 = vsel %vm5283_vm6, %v5285_v40, %v5281_v0  ;;  %6359 = vmatpush.bf16.msra.mxu3 %v8180_v62  ;;  %vm5294_vm7 = vweird.f32 %v13134_v30  ;;  %v5314_v60 = vand.u32 2147483648, %v13136_v18 }
 0x537   : > { %v5290_v24 = vsub.f32 1.0, %v5289_v56  ;;  %5787 = vmatmul.bf16.gmra.mxu3 %v5554_v54  ;;  %v4947_v10 = vadd.f32 %v4946_v46, %v12869_v39  ;;  %v5015_v22 = vpop.f32.mrf.mxu1  ;;  %v5535_v25 = vmul.f32 %v8985_v59, %v5286_v33  ;;  %v4804_v54 = vadd.f32 %v12957_v38, %v12934_v41  ;;  %vm13169_vm9 = vmor %vm5293_vm8, %vm5294_vm7  ;;  %v13173_v37 = vpop.f32.mrf.mxu2 }
 0x538   : > { %v4871_v32 = vadd.f32 %v13062_v49, %v4802_v8  ;;  %v5297_v46 = vand.u32 2147483647, %v13112_v14  ;;  %v5299_v33 = vand.u32 2147483648, %v13112_v14  ;;  %v8175_v14 = vld [vmem:[#allocation6 + $0xd0] sm:$0xf]  ;;  %vm5308_vm12 = vweird.f32 %v13136_v18 }
 0x539   : > { %v5016_v15 = vadd.f32 %v5015_v22, %v4947_v10  ;;  %v13146_v11 = vpack.c.bf16 %v5535_v25, %v5534_v34  ;;  %v5291_v50 = vmul.f32 %v13134_v30, %v5290_v24  ;;  %v4873_v56 = vadd.f32 %v13088_v55, %v4804_v54  ;;  %v8111_v34 = vld [vmem:[#allocation6 + $0x50] sm:$0xf]  ;;  %v8531_v25 = vld [vmem:[#allocation6 + $0x54] sm:$0xf0] }
 0x53a   : > { %v13151_v61 = vpop.f32.mrf.mxu3  ;;  %v5312_v55 = vand.u32 2147483647, %v13136_v18  ;;  %v8112_v8 = vor.u32 %v8531_v25, %v8111_v34  ;;  %v8176_v62 = vor.u32 %v8547_v47, %v8175_v14  ;;  %vm5298_vm11 = vcmp.eq.f32.partialorder %v5297_v46, 8.507059e+37 }
 0x53b   : > { %v8987_v44 = vpop.eup %8986  ;;  %v7991_v40 = vmul.f32 -1.442695, %v5016_v15  ;;  %5723 = vmatmul.bf16.gmra.mxu2 %v13146_v11  ;;  %v5292_v59 = vadd.f32 %v13134_v30, %v5291_v50  ;;  %v4807_v47 = vadd.f32 %v12995_v48, %v12934_v41 }
 0x53c   : > { %v8989_v52 = vpop.eup %8988  ;;  %v13156_v0 = vadd.f32 1.0, %v8987_v44  ;;  %6152 = vmatpush.bf16.msra.mxu0 %v8112_v8  ;;  %v5300_v44 = vor.u32 1.1754944e-38, %v5299_v33  ;;  %6221 = vmatpush.bf16.msra.mxu1 %v8176_v62  ;;  %vm5313_vm13 = vcmp.eq.f32.partialorder %v5312_v55, 8.507059e+37  ;;  %v4809_v55 = vadd.f32 %v13023_v26, %v12934_v41 }
 0x53d   : > { %v5304_v38 = vmul.f32 %v8989_v52, %v13136_v18  ;;  %8990 = vpow2.f32 %v7991_v40  ;;  %v5296_v17 = vsel %vm13169_vm9, %v13134_v30, %v5292_v59  ;;  %vm5309_vm10 = vweird.f32 %v8989_v52 }
 0x53e   : > { %8992 = vrcp.f32 %v13156_v0  ;;  %v4949_v49 = vpop.f32.mrf.mxu0  ;;  %v5301_v59 = vsel %vm5298_vm11, %v5300_v44, %v5296_v17  ;;  %vm5310_vm4 = vmor %vm5308_vm12, %vm5309_vm10  ;;  %v4878_v48 = vadd.f32 %v13131_v6, %v4809_v55  ;;  %vm5323_vm15 = vweird.f32 %v13156_v0 }
 0x53f   : > { %8994 = vtanh.f32 %v4871_v32  ;;  %v5305_v24 = vsub.f32 1.0, %v5304_v38  ;;  %v4950_v10 = vadd.f32 %v4949_v49, %v12869_v39  ;;  %v5018_v22 = vpop.f32.mrf.mxu1  ;;  %v5315_v49 = vor.u32 1.1754944e-38, %v5314_v60 }
 0x540   : > { %8996 = vtanh.f32 %v4873_v56 }
 0x541   : > { %v5019_v15 = vadd.f32 %v5018_v22, %v4950_v10  ;;  %v5306_v50 = vmul.f32 %v8989_v52, %v5305_v24 }
 0x542   : > { %v13179_v54 = vpop.f32.mrf.mxu3 }
 0x543   : > { %v8991_v32 = vpop.eup %8990  ;;  %v7992_v40 = vmul.f32 -1.442695, %v5019_v15  ;;  %v5307_v56 = vadd.f32 %v8989_v52, %v5306_v50  ;;  %v13198_v15 = vpop.f32.mrf.mxu2  ;;  %v4876_v50 = vadd.f32 %v13107_v35, %v4807_v47 }
 0x544   : > { %v13182_v38 = vpop.eup %8992  ;;  %v13184_v30 = vadd.f32 1.0, %v8991_v32 }
 0x545   : > { %v8995_v24 = vpop.eup %8994  ;;  %v5319_v10 = vmul.f32 %v13182_v38, %v13156_v0  ;;  %8998 = vpow2.f32 %v7992_v40  ;;  %v5311_v33 = vsel %vm5310_vm4, %v8989_v52, %v5307_v56  ;;  %vm5324_vm14 = vweird.f32 %v13182_v38 }
 0x546   : > { %v8997_v22 = vpop.eup %8996  ;;  %9000 = vrcp.f32 %v13184_v30  ;;  %v4951_v46 = vpop.f32.mrf.mxu0  ;;  %v5316_v34 = vsel %vm5313_vm13, %v5315_v49, %v5311_v33  ;;  %v5536_v8 = vmul.f32 %v8995_v24, %v5301_v59  ;;  %v5327_v59 = vand.u32 2147483647, %v13156_v0  ;;  %vm13216_vm0 = vmor %vm5323_vm15, %vm5324_vm14 }
 0x547   : > { %v5320_v18 = vsub.f32 1.0, %v5319_v10  ;;  %5792 = vmatmul.bf16.gmra.mxu3 %v13146_v11  ;;  %v4952_v25 = vadd.f32 %v4951_v46, %v12869_v39  ;;  %v5020_v9 = vpop.f32.mrf.mxu1  ;;  %v5537_v14 = vmul.f32 %v8997_v22, %v5316_v34  ;;  %v5329_v49 = vand.u32 2147483648, %v13156_v0  ;;  %v8528_v46 = vld [vmem:[#allocation6 + $0x44] sm:$0xf]  ;;  %v8105_v34 = vld [vmem:[#allocation6 + $0x48] sm:$0xf0] }
 0x548   : > { %v5342_v6 = vand.u32 2147483647, %v13184_v30  ;;  %v5344_v0 = vand.u32 2147483648, %v13184_v30  ;;  %vm5328_vm2 = vcmp.eq.f32.partialorder %v5327_v59, 8.507059e+37  ;;  %vm5338_vm3 = vweird.f32 %v13184_v30 }
 0x549   : > { %v5021_v17 = vadd.f32 %v5020_v9, %v4952_v25  ;;  %v13193_v60 = vpack.c.bf16 %v5537_v14, %v5536_v8  ;;  %v5321_v52 = vmul.f32 %v13182_v38, %v5320_v18  ;;  %v8108_v25 = vor.u32 %v8528_v46, %v8105_v34  ;;  %v8544_v9 = vld [vmem:[#allocation6 + $0xc4] sm:$0xf]  ;;  %v8169_v8 = vld [vmem:[#allocation6 + $0xc8] sm:$0xf0] }
 0x54a   : > { %v13200_v62 = vpop.f32.mrf.mxu3  ;;  %v5330_v55 = vor.u32 1.1754944e-38, %v5329_v49  ;;  %vm5343_vm6 = vcmp.eq.f32.partialorder %v5342_v6, 8.507059e+37 }
 0x54b   : > { %v8999_v11 = vpop.eup %8998  ;;  %v7993_v44 = vmul.f32 -1.442695, %v5021_v17  ;;  %5728 = vmatmul.bf16.gmra.mxu2 %v13193_v60  ;;  %v5322_v56 = vadd.f32 %v13182_v38, %v5321_v52  ;;  %v8172_v17 = vor.u32 %v8544_v9, %v8169_v8  ;;  %v8103_v9 = vld [vmem:[#allocation6 + $0x40] sm:$0xf]  ;;  %v8529_v8 = vld [vmem:[#allocation6 + $0x44] sm:$0xf0] }
 0x54c   : > { %v9001_v32 = vpop.eup %9000  ;;  %v13205_v40 = vadd.f32 1.0, %v8999_v11  ;;  %6291 = vmatpush.bf16.msra.mxu2 %v8108_v25  ;;  %v8104_v6 = vor.u32 %v8529_v8, %v8103_v9 }
 0x54d   : > { %v5334_v26 = vmul.f32 %v9001_v32, %v13184_v30  ;;  %9002 = vpow2.f32 %v7993_v44  ;;  %v5326_v18 = vsel %vm13216_vm0, %v13182_v38, %v5322_v56  ;;  %vm5339_vm1 = vweird.f32 %v9001_v32  ;;  %6360 = vmatpush.bf16.msra.mxu3 %v8172_v17 }
 0x54e   : > { %9004 = vrcp.f32 %v13205_v40  ;;  %v4954_v35 = vpop.f32.mrf.mxu0  ;;  %vm5340_vm5 = vmor %vm5338_vm3, %vm5339_vm1  ;;  %v4812_v30 = vadd.f32 %v13053_v21, %v12934_v41  ;;  %6153 = vmatpush.bf16.msra.mxu0 %v8104_v6  ;;  %vm5353_vm8 = vweird.f32 %v13205_v40 }
 0x54f   : > { %9006 = vtanh.f32 %v4876_v50  ;;  %v5335_v24 = vsub.f32 1.0, %v5334_v26  ;;  %v4955_v10 = vadd.f32 %v4954_v35, %v12869_v39  ;;  %v5023_v33 = vpop.f32.mrf.mxu1  ;;  %v5331_v26 = vsel %vm5328_vm2, %v5330_v55, %v5326_v18 }
 0x550   : > { %9008 = vtanh.f32 %v4878_v48  ;;  %v13229_v48 = vpop.f32.mrf.mxu2  ;;  %v5345_v35 = vor.u32 1.1754944e-38, %v5344_v0 }
 0x551   : > { %v5024_v14 = vadd.f32 %v5023_v33, %v4955_v10  ;;  %v5336_v47 = vmul.f32 %v9001_v32, %v5335_v24 }
 0x552   : > { %v13224_v52 = vpop.f32.mrf.mxu3 }
 0x553   : > { %v9003_v11 = vpop.eup %9002  ;;  %v7994_v50 = vmul.f32 -1.442695, %v5024_v14  ;;  %v5337_v44 = vadd.f32 %v9001_v32, %v5336_v47  ;;  %v8167_v14 = vld [vmem:[#allocation6 + $0xc0] sm:$0xf]  ;;  %v8545_v47 = vld [vmem:[#allocation6 + $0xc4] sm:$0xf0] }
 0x554   : > { %v13227_v38 = vpop.eup %9004  ;;  %v13231_v56 = vadd.f32 1.0, %v9003_v11  ;;  %v8168_v55 = vor.u32 %v8545_v47, %v8167_v14 }
 0x555   : > { %v9007_v24 = vpop.eup %9006  ;;  %v5349_v49 = vmul.f32 %v13227_v38, %v13205_v40  ;;  %9010 = vpow2.f32 %v7994_v50  ;;  %v5341_v59 = vsel %vm5340_vm5, %v9001_v32, %v5337_v44  ;;  %v4881_v32 = vadd.f32 %v13151_v61, %v4812_v30 }
 0x556   : > { %v9009_v10 = vpop.eup %9008  ;;  %9012 = vrcp.f32 %v13231_v56  ;;  %v4956_v33 = vpop.f32.mrf.mxu0  ;;  %v5346_v22 = vsel %vm5343_vm6, %v5345_v35, %v5341_v59  ;;  %v5538_v0 = vmul.f32 %v9007_v24, %v5331_v26  ;;  %6222 = vmatpush.bf16.msra.mxu1 %v8168_v55  ;;  %vm5354_vm7 = vweird.f32 %v13227_v38 }
 0x557   : > { %v5350_v46 = vsub.f32 1.0, %v5349_v49  ;;  %5797 = vmatmul.bf16.gmra.mxu3 %v13193_v60  ;;  %v4957_v34 = vadd.f32 %v4956_v33, %v12869_v39  ;;  %v5025_v18 = vpop.f32.mrf.mxu1  ;;  %v5539_v25 = vmul.f32 %v9009_v10, %v5346_v22  ;;  %v4814_v60 = vadd.f32 %v13086_v29, %v12934_v41  ;;  %vm13260_vm9 = vmor %vm5353_vm8, %vm5354_vm7 }
 0x558   : > { %9014 = vtanh.f32 %v4881_v32  ;;  %v13253_v29 = vpop.f32.mrf.mxu2  ;;  %v5359_v30 = vand.u32 2147483648, %v13205_v40  ;;  %vm5368_vm12 = vweird.f32 %v13231_v56 }
 0x559   : > { %v5026_v21 = vadd.f32 %v5025_v18, %v4957_v34  ;;  %v5557_v17 = vpack.c.bf16 %v5539_v25, %v5538_v0  ;;  %v5351_v11 = vmul.f32 %v13227_v38, %v5350_v46  ;;  %v4883_v61 = vadd.f32 %v13179_v54, %v4814_v60 }
 0x55a   : > { %v13245_v50 = vpop.f32.mrf.mxu3  ;;  %v5357_v46 = vand.u32 2147483647, %v13205_v40  ;;  %v5372_v18 = vand.u32 2147483647, %v13231_v56  ;;  %v5374_v0 = vand.u32 2147483648, %v13231_v56  ;;  %v5360_v40 = vor.u32 1.1754944e-38, %v5359_v30 }
 0x55b   : > { %v9011_v44 = vpop.eup %9010  ;;  %v7995_v26 = vmul.f32 -1.442695, %v5026_v21  ;;  %5733 = vmatmul.bf16.gmra.mxu2 %v5557_v17  ;;  %v5352_v59 = vadd.f32 %v13227_v38, %v5351_v11  ;;  %v4817_v34 = vadd.f32 %v13110_v1, %v12934_v41 }
 0x55c   : > { %v9013_v35 = vpop.eup %9012  ;;  %v13248_v24 = vadd.f32 1.0, %v9011_v44  ;;  %vm5358_vm11 = vcmp.eq.f32.partialorder %v5357_v46, 8.507059e+37  ;;  %v5375_v44 = vor.u32 1.1754944e-38, %v5374_v0  ;;  %vm5373_vm13 = vcmp.eq.f32.partialorder %v5372_v18, 8.507059e+37  ;;  %v8097_v46 = vld [vmem:[#allocation6 + $0x38] sm:$0xf0] }
 0x55d   : > { %v5364_v49 = vmul.f32 %v9013_v35, %v13231_v56  ;;  %9016 = vpow2.f32 %v7995_v26  ;;  %v5356_v9 = vsel %vm13260_vm9, %v13227_v38, %v5352_v59  ;;  %vm5369_vm10 = vweird.f32 %v9013_v35  ;;  %v8542_v18 = vld [vmem:[#allocation6 + $0xb4] sm:$0xf] }
 0x55e   : > { %9018 = vrcp.f32 %v13248_v24  ;;  %v4959_v10 = vpop.f32.mrf.mxu0  ;;  %v9015_v32 = vpop.eup %9014  ;;  %v5361_v60 = vsel %vm5358_vm11, %v5360_v40, %v5356_v9  ;;  %vm5370_vm4 = vmor %vm5368_vm12, %vm5369_vm10  ;;  %v4886_v1 = vadd.f32 %v13200_v62, %v4817_v34  ;;  %vm5383_vm15 = vweird.f32 %v13248_v24  ;;  %v8543_v34 = vld [vmem:[#allocation6 + $0xb4] sm:$0xf0] }
 0x55f   : > { %v5365_v33 = vsub.f32 1.0, %v5364_v49  ;;  %v4960_v22 = vadd.f32 %v4959_v10, %v12869_v39  ;;  %v5028_v54 = vpop.f32.mrf.mxu1  ;;  %9020 = vtanh.f32 %v4883_v61 }
 0x560   : > { %v13282_v0 = vpop.f32.mrf.mxu2 }
 0x561   : > { %v5029_v25 = vadd.f32 %v5028_v54, %v4960_v22  ;;  %v5366_v8 = vmul.f32 %v9013_v35, %v5365_v33  ;;  %v5540_v33 = vmul.f32 %v9015_v32, %v5361_v60  ;;  %v8526_v54 = vld [vmem:[#allocation6 + $0x34] sm:$0xf]  ;;  %v4819_v32 = vadd.f32 %v13140_v27, %v12934_v41 }
 0x562   : > { %v13269_v6 = vpop.f32.mrf.mxu3 }
 0x563   : > { %v9017_v14 = vpop.eup %9016  ;;  %v7996_v47 = vmul.f32 -1.442695, %v5029_v25  ;;  %v5367_v21 = vadd.f32 %v9013_v35, %v5366_v8  ;;  %v8161_v25 = vld [vmem:[#allocation6 + $0xb8] sm:$0xf0] }
 0x564   : > { %v13272_v55 = vpop.eup %9018  ;;  %v13274_v11 = vadd.f32 1.0, %v9017_v14  ;;  %v8164_v40 = vor.u32 %v8542_v18, %v8161_v25 }
 0x565   : > { %v5379_v38 = vmul.f32 %v13272_v55, %v13248_v24  ;;  %9022 = vpow2.f32 %v7996_v47  ;;  %v5371_v26 = vsel %vm5370_vm4, %v9013_v35, %v5367_v21  ;;  %v9021_v61 = vpop.eup %9020  ;;  %v8100_v35 = vor.u32 %v8526_v54, %v8097_v46  ;;  %v8159_v46 = vld [vmem:[#allocation6 + $0xb0] sm:$0xf] }
 0x566   : > { %9024 = vrcp.f32 %v13274_v11  ;;  %v4961_v49 = vpop.f32.mrf.mxu0  ;;  %v5376_v59 = vsel %vm5373_vm13, %v5375_v44, %v5371_v26  ;;  %6361 = vmatpush.bf16.msra.mxu3 %v8164_v40  ;;  %v4888_v44 = vadd.f32 %v13224_v52, %v4819_v32  ;;  %vm5384_vm14 = vweird.f32 %v13272_v55 }
 0x567   : > { %v5380_v10 = vsub.f32 1.0, %v5379_v38  ;;  %5802 = vmatmul.bf16.gmra.mxu3 %v5557_v17  ;;  %v4962_v56 = vadd.f32 %v4961_v49, %v12869_v39  ;;  %v5030_v30 = vpop.f32.mrf.mxu1  ;;  %v5541_v22 = vmul.f32 %v9021_v61, %v5376_v59  ;;  %6292 = vmatpush.bf16.msra.mxu2 %v8100_v35  ;;  %v5387_v61 = vand.u32 2147483647, %v13248_v24  ;;  %vm13307_vm0 = vmor %vm5383_vm15, %vm5384_vm14 }
 0x568   : > { %v5389_v49 = vand.u32 2147483648, %v13248_v24  ;;  %v5402_v52 = vand.u32 2147483647, %v13274_v11  ;;  %v5404_v35 = vand.u32 2147483648, %v13274_v11  ;;  %v8160_v25 = vor.u32 %v8543_v34, %v8159_v46  ;;  %v13315_v40 = vpop.f32.mrf.mxu2 }
 0x569   : > { %v5031_v9 = vadd.f32 %v5030_v30, %v4962_v56  ;;  %v13284_v8 = vpack.c.bf16 %v5541_v22, %v5540_v33  ;;  %v5381_v17 = vmul.f32 %v13272_v55, %v5380_v10  ;;  %v8095_v30 = vld [vmem:[#allocation6 + $0x30] sm:$0xf]  ;;  %v8527_v33 = vld [vmem:[#allocation6 + $0x34] sm:$0xf0]  ;;  %vm5388_vm2 = vcmp.eq.f32.partialorder %v5387_v61, 8.507059e+37 }
 0x56a   : > { %v13289_v14 = vpop.f32.mrf.mxu3  ;;  %v8096_v54 = vor.u32 %v8527_v33, %v8095_v30  ;;  %v5390_v32 = vor.u32 1.1754944e-38, %v5389_v49  ;;  %6223 = vmatpush.bf16.msra.mxu1 %v8160_v25  ;;  %vm5398_vm3 = vweird.f32 %v13274_v11  ;;  %vm5403_vm6 = vcmp.eq.f32.partialorder %v5402_v52, 8.507059e+37 }
 0x56b   : > { %v9023_v47 = vpop.eup %9022  ;;  %v7997_v21 = vmul.f32 -1.442695, %v5031_v9  ;;  %5738 = vmatmul.bf16.gmra.mxu2 %v13284_v8  ;;  %v5382_v26 = vadd.f32 %v13272_v55, %v5381_v17  ;;  %v4822_v46 = vadd.f32 %v13173_v37, %v12934_v41  ;;  %v8525_v37 = vld [vmem:[#allocation6 + $0x24] sm:$0xf0] }
 0x56c   : > { %v9025_v60 = vpop.eup %9024  ;;  %v13294_v38 = vadd.f32 1.0, %v9023_v47  ;;  %6154 = vmatpush.bf16.msra.mxu0 %v8096_v54 }
 0x56d   : > { %v5394_v27 = vmul.f32 %v9025_v60, %v13274_v11  ;;  %9026 = vpow2.f32 %v7997_v21  ;;  %v5386_v24 = vsel %vm13307_vm0, %v13272_v55, %v5382_v26  ;;  %vm5399_vm1 = vweird.f32 %v9025_v60 }
 0x56e   : > { %9028 = vrcp.f32 %v13294_v38  ;;  %v4964_v62 = vpop.f32.mrf.mxu0  ;;  %v5391_v26 = vsel %vm5388_vm2, %v5390_v32, %v5386_v24  ;;  %vm5400_vm5 = vmor %vm5398_vm3, %vm5399_vm1  ;;  %v8087_v32 = vld [vmem:[#allocation6 + $0x20] sm:$0xf]  ;;  %vm5413_vm8 = vweird.f32 %v13294_v38 }
 0x56f   : > { %9030 = vtanh.f32 %v4886_v1  ;;  %v5395_v59 = vsub.f32 1.0, %v5394_v27  ;;  %v4965_v10 = vadd.f32 %v4964_v62, %v12869_v39  ;;  %v5033_v56 = vpop.f32.mrf.mxu1  ;;  %v5405_v27 = vor.u32 1.1754944e-38, %v5404_v35 }
 0x570   : > { %9032 = vtanh.f32 %v4888_v44 }
 0x571   : > { %v5034_v18 = vadd.f32 %v5033_v56, %v4965_v10  ;;  %v5396_v9 = vmul.f32 %v9025_v60, %v5395_v59 }
 0x572   : > { %v13317_v17 = vpop.f32.mrf.mxu3 }
 0x573   : > { %v9027_v47 = vpop.eup %9026  ;;  %v7998_v1 = vmul.f32 -1.442695, %v5034_v18  ;;  %v5397_v21 = vadd.f32 %v9025_v60, %v5396_v9 }
 0x574   : > { %v13320_v55 = vpop.eup %9028  ;;  %v13322_v44 = vadd.f32 1.0, %v9027_v47 }
 0x575   : > { %v9031_v62 = vpop.eup %9030  ;;  %v5409_v59 = vmul.f32 %v13320_v55, %v13294_v38  ;;  %9034 = vpow2.f32 %v7998_v1  ;;  %v5401_v49 = vsel %vm5400_vm5, %v9025_v60, %v5397_v21  ;;  %v4824_v60 = vadd.f32 %v13198_v15, %v12934_v41  ;;  %v13343_v15 = vpop.f32.mrf.mxu2 }
 0x576   : > { %v9033_v10 = vpop.eup %9032  ;;  %9036 = vrcp.f32 %v13322_v44  ;;  %v4966_v61 = vpop.f32.mrf.mxu0  ;;  %v5406_v56 = vsel %vm5403_vm6, %v5405_v27, %v5401_v49  ;;  %v5542_v22 = vmul.f32 %v9031_v62, %v5391_v26  ;;  %vm5414_vm7 = vweird.f32 %v13320_v55 }
 0x577   : > { %v5410_v11 = vsub.f32 1.0, %v5409_v59  ;;  %5807 = vmatmul.bf16.gmra.mxu3 %v13284_v8  ;;  %v4967_v30 = vadd.f32 %v4966_v61, %v12869_v39  ;;  %v5035_v33 = vpop.f32.mrf.mxu1  ;;  %v5543_v54 = vmul.f32 %v9033_v10, %v5406_v56  ;;  %v4891_v8 = vadd.f32 %v13245_v50, %v4822_v46  ;;  %vm13359_vm9 = vmor %vm5413_vm8, %vm5414_vm7  ;;  %v8153_v46 = vld [vmem:[#allocation6 + $0xa8] sm:$0xf0] }
 0x578   : > { %v4893_v25 = vadd.f32 %v13269_v6, %v4824_v60  ;;  %v8088_v26 = vor.u32 %v8525_v37, %v8087_v32  ;;  %v5417_v27 = vand.u32 2147483647, %v13294_v38  ;;  %v5419_v62 = vand.u32 2147483648, %v13294_v38 }
 0x579   : > { %v5036_v52 = vadd.f32 %v5035_v33, %v4967_v30  ;;  %v13333_v34 = vpack.c.bf16 %v5543_v54, %v5542_v22  ;;  %v5411_v24 = vmul.f32 %v13320_v55, %v5410_v11  ;;  %v5432_v59 = vand.u32 2147483647, %v13322_v44  ;;  %v8524_v11 = vld [vmem:[#allocation6 + $0x24] sm:$0xf]  ;;  %v8089_v30 = vld [vmem:[#allocation6 + $0x28] sm:$0xf0] }
 0x57a   : > { %v13336_v35 = vpop.f32.mrf.mxu3  ;;  %6155 = vmatpush.bf16.msra.mxu0 %v8088_v26  ;;  %v5434_v33 = vand.u32 2147483648, %v13322_v44  ;;  %v8092_v22 = vor.u32 %v8524_v11, %v8089_v30  ;;  %v8540_v54 = vld [vmem:[#allocation6 + $0xa4] sm:$0xf]  ;;  %vm5418_vm11 = vcmp.eq.f32.partialorder %v5417_v27, 8.507059e+37  ;;  %vm5428_vm12 = vweird.f32 %v13322_v44  ;;  %v8071_v30 = vld [vmem:[#allocation6] sm:$0xf] }
 0x57b   : > { %v9035_v18 = vpop.eup %9034  ;;  %v7999_v9 = vmul.f32 -1.442695, %v5036_v52  ;;  %5743 = vmatmul.bf16.gmra.mxu2 %v13333_v34  ;;  %v5412_v21 = vadd.f32 %v13320_v55, %v5411_v24  ;;  %v8156_v24 = vor.u32 %v8540_v54, %v8153_v46  ;;  %vm13373_vm4 = vcmp.eq.f32.partialorder %v5432_v59, 8.507059e+37 }
 0x57c   : > { %v13341_v47 = vpop.eup %9036  ;;  %v13345_v1 = vadd.f32 1.0, %v9035_v18  ;;  %v8079_v18 = vld [vmem:[#allocation6 + $0x10] sm:$0xf]  ;;  %6293 = vmatpush.bf16.msra.mxu2 %v8092_v22  ;;  %v4829_v26 = vadd.f32 %v13253_v29, %v12934_v41 }
 0x57d   : > { %v5424_v50 = vmul.f32 %v13341_v47, %v13322_v44  ;;  %9038 = vpow2.f32 %v7999_v9  ;;  %v5416_v38 = vsel %vm13359_vm9, %v13320_v55, %v5412_v21  ;;  %vm5429_vm10 = vweird.f32 %v13341_v47  ;;  %6362 = vmatpush.bf16.msra.mxu3 %v8156_v24  ;;  %v13392_v54 = vpop.f32.mrf.mxu2 }
 0x57e   : > { %9040 = vrcp.f32 %v13345_v1  ;;  %v4969_v6 = vpop.f32.mrf.mxu0  ;;  %vm13383_vm13 = vmor %vm5428_vm12, %vm5429_vm10  ;;  %vm5443_vm15 = vweird.f32 %v13345_v1 }
 0x57f   : > { %9042 = vtanh.f32 %v4891_v8  ;;  %v5425_v49 = vsub.f32 1.0, %v5424_v50  ;;  %v4970_v10 = vadd.f32 %v4969_v6, %v12869_v39  ;;  %v5038_v61 = vpop.f32.mrf.mxu1  ;;  %v8523_v8 = vld [vmem:[#allocation6 + $0x14] sm:$0xf0] }
 0x580   : > { %9044 = vtanh.f32 %v4893_v25  ;;  %v5420_v25 = vor.u32 1.1754944e-38, %v5419_v62  ;;  %v8080_v32 = vor.u32 %v8523_v8, %v8079_v18  ;;  %v5435_v62 = vor.u32 1.1754944e-38, %v5434_v33 }
 0x581   : > { %v5039_v60 = vadd.f32 %v5038_v61, %v4970_v10  ;;  %v5426_v52 = vmul.f32 %v13341_v47, %v5425_v49  ;;  %v8151_v10 = vld [vmem:[#allocation6 + $0xa0] sm:$0xf]  ;;  %v8541_v61 = vld [vmem:[#allocation6 + $0xa4] sm:$0xf0] }
 0x582   : > { %v13369_v9 = vpop.f32.mrf.mxu3  ;;  %v5421_v49 = vsel %vm5418_vm11, %v5420_v25, %v5416_v38  ;;  %6156 = vmatpush.bf16.msra.mxu0 %v8080_v32  ;;  %v8152_v11 = vor.u32 %v8541_v61, %v8151_v10  ;;  %v8521_v38 = vld [vmem:[#allocation6 + $0x4] sm:$0xf0]  ;;  %v8143_v25 = vld [vmem:[#allocation6 + $0x90] sm:$0xf]  ;;  %v4827_v32 = vadd.f32 %v13229_v48, %v12934_v41 }
 0x583   : > { %v9039_v55 = vpop.eup %9038  ;;  %v8000_v37 = vmul.f32 -1.442695, %v5039_v60  ;;  %v5427_v21 = vadd.f32 %v13341_v47, %v5426_v52  ;;  %v8072_v8 = vor.u32 %v8521_v38, %v8071_v30  ;;  %v13413_v48 = vld [vmem:[%s13947_s6 + $0x6] sm:$0x7]  ;;  %v5449_v38 = vand.u32 2147483648, %v13345_v1 }
 0x584   : > { %v13377_v50 = vpop.eup %9040  ;;  %v13379_v6 = vadd.f32 1.0, %v9039_v55  ;;  %6224 = vmatpush.bf16.msra.mxu1 %v8152_v11  ;;  %v4896_v10 = vadd.f32 %v13289_v14, %v4827_v32  ;;  %v8135_v11 = vld [vmem:[#allocation6 + $0x80] sm:$0xf]  ;;  %v8537_v30 = vld [vmem:[#allocation6 + $0x84] sm:$0xf0] }
 0x585   : > { %v9043_v44 = vpop.eup %9042  ;;  %v5439_v59 = vmul.f32 %v13377_v50, %v13345_v1  ;;  %9046 = vpow2.f32 %v8000_v37  ;;  %v5431_v56 = vsel %vm13383_vm13, %v13341_v47, %v5427_v21  ;;  %v8539_v21 = vld [vmem:[#allocation6 + $0x94] sm:$0xf0]  ;;  %vm5444_vm14 = vweird.f32 %v13377_v50 }
 0x586   : > { %v9045_v22 = vpop.eup %9044  ;;  %9048 = vrcp.f32 %v13379_v6  ;;  %v4971_v33 = vpop.f32.mrf.mxu0  ;;  %v5436_v46 = vsel %vm13373_vm4, %v5435_v62, %v5431_v56  ;;  %v5544_v18 = vmul.f32 %v9043_v44, %v5421_v49  ;;  %6157 = vmatpush.bf16.msra.mxu0 %v8072_v8  ;;  %v8144_v49 = vor.u32 %v8539_v21, %v8143_v25  ;;  %v8522_v8 = vld [vmem:[#allocation6 + $0x14] sm:$0xf]  ;;  %v8081_v25 = vld [vmem:[#allocation6 + $0x18] sm:$0xf0]  ;;  %vm13436_vm0 = vmor %vm5443_vm15, %vm5444_vm14 }
 0x587   : > { %v5440_v60 = vsub.f32 1.0, %v5439_v59  ;;  %5812 = vmatmul.bf16.gmra.mxu3 %v13333_v34  ;;  %v4972_v52 = vadd.f32 %v4971_v33, %v12869_v39  ;;  %v5040_v24 = vpop.f32.mrf.mxu1  ;;  %v5545_v47 = vmul.f32 %v9045_v22, %v5436_v46  ;;  %v5447_v44 = vand.u32 2147483647, %v13345_v1  ;;  %v8538_v21 = vld [vmem:[#allocation6 + $0x94] sm:$0xf] }
 0x588   : > { %v4898_v59 = vadd.f32 %v13317_v17, %v4829_v26  ;;  %6225 = vmatpush.bf16.msra.mxu1 %v8144_v49  ;;  %v5462_v17 = vand.u32 2147483647, %v13379_v6  ;;  %v5464_v32 = vand.u32 2147483648, %v13379_v6  ;;  %v8145_v26 = vld [vmem:[#allocation6 + $0x98] sm:$0xf0]  ;;  %v4832_v1 = vadd.f32 %v13282_v0, %v12934_v41 }
 0x589   : > { %v5041_v55 = vadd.f32 %v5040_v24, %v4972_v52  ;;  %v13401_v37 = vpack.c.bf16 %v5545_v47, %v5544_v18  ;;  %v5441_v34 = vmul.f32 %v13377_v50, %v5440_v60  ;;  %v8136_v60 = vor.u32 %v8537_v30, %v8135_v11 }
 0x58a   : > { %v13405_v27 = vpop.f32.mrf.mxu3  ;;  %v13430_v47 = vperm.slane %v13413_v48, 1  ;;  %v5450_v11 = vor.u32 1.1754944e-38, %v5449_v38  ;;  %vm5458_vm2 = vweird.f32 %v13379_v6  ;;  %vm5448_vm3 = vcmp.eq.f32.partialorder %v5447_v44, 8.507059e+37 }
 0x58b   : > { %v9047_v62 = vpop.eup %9046  ;;  %v8001_v61 = vmul.f32 -1.442695, %v5041_v55  ;;  %5748 = vmatmul.bf16.gmra.mxu2 %v13401_v37  ;;  %v5442_v46 = vadd.f32 %v13377_v50, %v5441_v34  ;;  %v8084_v55 = vor.u32 %v8522_v8, %v8081_v25  ;;  %vm5463_vm6 = vcmp.eq.f32.partialorder %v5462_v17, 8.507059e+37 }
 0x58c   : > { %v13416_v29 = vpop.eup %9048  ;;  %v13419_v56 = vadd.f32 1.0, %v9047_v62  ;;  %6226 = vmatpush.bf16.msra.mxu1 %v8136_v60 }
 0x58d   : > { %v5454_v14 = vmul.f32 %v13416_v29, %v13379_v6  ;;  %9050 = vpow2.f32 %v8001_v61  ;;  %vm5459_vm1 = vweird.f32 %v13416_v29  ;;  %6294 = vmatpush.bf16.msra.mxu2 %v8084_v55 }
 0x58e   : > { %9052 = vrcp.f32 %v13419_v56  ;;  %v4974_v22 = vpop.f32.mrf.mxu0  ;;  %v5709_v33 = vpop.f32.mrf.mxu2  ;;  %vm5460_vm5 = vmor %vm5458_vm2, %vm5459_vm1  ;;  %vm5473_vm8 = vweird.f32 %v13419_v56 }
 0x58f   : > { %9054 = vtanh.f32 %v4896_v10  ;;  %v5455_v52 = vsub.f32 1.0, %v5454_v14  ;;  %v4975_v24 = vadd.f32 %v4974_v22, %v12869_v39  ;;  %v5043_v18 = vpop.f32.mrf.mxu1  ;;  %v8148_v10 = vor.u32 %v8538_v21, %v8145_v26 }
 0x590   : > { %9056 = vtanh.f32 %v4898_v59  ;;  %v5446_v59 = vsel %vm13436_vm0, %v13377_v50, %v5442_v46  ;;  %v5710_v22 = vadd.f32 %v5709_v33, %v13430_v47  ;;  %v5465_v50 = vor.u32 1.1754944e-38, %v5464_v32 }
 0x591   : > { %v5044_v34 = vadd.f32 %v5043_v18, %v4975_v24  ;;  %v5456_v62 = vmul.f32 %v13416_v29, %v5455_v52  ;;  %6363 = vmatpush.bf16.msra.mxu3 %v8148_v10  ;;  %v5451_v33 = vsel %vm5448_vm3, %v5450_v11, %v5446_v59  ;;  %v4901_v18 = vadd.f32 %v13336_v35, %v4832_v1 }
 0x592   : > { %v13444_v61 = vpop.f32.mrf.mxu3  ;;  %v5838_v17 = vadd.f32 %v5710_v22, %v12316_v42  ;;  %v13471_v10 = vperm.slane %v13413_v48, 2  ;;  %v5479_v48 = vand.u32 2147483648, %v13419_v56 }
 0x593   : > { %v9051_v30 = vpop.eup %9050  ;;  %v8002_v14 = vmul.f32 -1.442695, %v5044_v34  ;;  %v5457_v60 = vadd.f32 %v13416_v29, %v5456_v62 }
 0x594   : > { %v13452_v52 = vpop.eup %9052  ;;  %v13454_v0 = vadd.f32 1.0, %v9051_v30  ;;  %v5886_v11 = vmax.f32 %v5838_v17, 0.0  ;;  %v8536_v17 = vld [vmem:[#allocation6 + $0x84] sm:$0xf] }
 0x595   : > { %v9055_v38 = vpop.eup %9054  ;;  %v5469_v46 = vmul.f32 %v13452_v52, %v13419_v56  ;;  %9058 = vpow2.f32 %v8002_v14  ;;  %v5461_v24 = vsel %vm5460_vm5, %v13416_v29, %v5457_v60  ;;  %v4834_v29 = vadd.f32 %v13315_v40, %v12934_v41 }
 0x596   : > { %v9057_v6 = vpop.eup %9056  ;;  %9060 = vrcp.f32 %v13454_v0  ;;  %v4976_v8 = vpop.f32.mrf.mxu0  ;;  %v5466_v25 = vsel %vm5463_vm6, %v5465_v50, %v5461_v24  ;;  %v5546_v34 = vmul.f32 %v9055_v38, %v5451_v33  ;;  %vm5474_vm7 = vweird.f32 %v13452_v52 }
 0x597   : > { %v5711_v44 = vpop.f32.mrf.mxu2  ;;  %v5470_v55 = vsub.f32 1.0, %v5469_v46  ;;  %5817 = vmatmul.bf16.gmra.mxu3 %v13401_v37  ;;  %v4977_v32 = vadd.f32 %v4976_v8, %v12869_v39  ;;  %v5045_v26 = vpop.f32.mrf.mxu1  ;;  %v5547_v35 = vmul.f32 %v9057_v6, %v5466_v25  ;;  %9062 = vtanh.f32 %v4901_v18  ;;  %vm13491_vm9 = vmor %vm5473_vm8, %vm5474_vm7  ;;  %v8520_v6 = vld [vmem:[#allocation6 + $0x4] sm:$0xf]  ;;  %v8073_v18 = vld [vmem:[#allocation6 + $0x8] sm:$0xf0] }
 0x598   : > { %v5712_v21 = vadd.f32 %v5711_v44, %v13430_v47  ;;  %v4903_v59 = vadd.f32 %v13369_v9, %v4834_v29  ;;  %v5477_v46 = vand.u32 2147483647, %v13419_v56  ;;  %v5492_v25 = vand.u32 2147483647, %v13454_v0 }
 0x599   : > { %v5046_v49 = vadd.f32 %v5045_v26, %v4977_v32  ;;  %v5471_v42 = vmul.f32 %v13452_v52, %v5470_v55  ;;  %v13474_v1 = vpack.c.bf16 %v5547_v35, %v5546_v34  ;;  %v5494_v55 = vand.u32 2147483648, %v13454_v0  ;;  %v8137_v26 = vld [vmem:[#allocation6 + $0x88] sm:$0xf0] }
 0x59a   : > { %v5840_v62 = vadd.f32 %v5712_v21, %v12365_v53  ;;  %v5778_v37 = vpop.f32.mrf.mxu3  ;;  %v8076_v56 = vor.u32 %v8520_v6, %v8073_v18  ;;  %v5480_v21 = vor.u32 1.1754944e-38, %v5479_v48  ;;  %vm5478_vm11 = vcmp.eq.f32.partialorder %v5477_v46, 8.507059e+37 }
 0x59b   : > { %v9059_v39 = vpop.eup %9058  ;;  %v8003_v40 = vmul.f32 -1.442695, %v5046_v49  ;;  %5753 = vmatmul.bf16.gmra.mxu2 %v13474_v1  ;;  %v5472_v53 = vadd.f32 %v13452_v52, %v5471_v42  ;;  %v5779_v9 = vadd.f32 %v5778_v37, %v13471_v10  ;;  %v8140_v49 = vor.u32 %v8536_v17, %v8137_v26 }
 0x59c   : > { %v5888_v30 = vmax.f32 %v5840_v62, 0.0  ;;  %v9061_v14 = vpop.eup %9060  ;;  %v13477_v22 = vadd.f32 1.0, %v9059_v39  ;;  %6295 = vmatpush.bf16.msra.mxu2 %v8076_v56  ;;  %vm5488_vm12 = vweird.f32 %v13454_v0  ;;  %vm5493_vm13 = vcmp.eq.f32.partialorder %v5492_v25, 8.507059e+37 }
 0x59d   : > { %v5484_v60 = vmul.f32 %v9061_v14, %v13454_v0  ;;  %9064 = vpow2.f32 %v8003_v40  ;;  %v9063_v8 = vpop.eup %9062  ;;  %v5476_v44 = vsel %vm13491_vm9, %v13452_v52, %v5472_v53  ;;  %v5839_v32 = vadd.f32 %v5779_v9, %v12327_v51  ;;  %6364 = vmatpush.bf16.msra.mxu3 %v8140_v49 }
 0x59e   : > { %v13484_v50 = vpack.c.bf16 %v5888_v30, %v5886_v11  ;;  %9066 = vrcp.f32 %v13477_v22  ;;  %vm5489_vm10 = vweird.f32 %v9061_v14  ;;  %v5481_v42 = vsel %vm5478_vm11, %v5480_v21, %v5476_v44 }
 0x59f   : > { %v5714_v38 = vpop.f32.mrf.mxu2  ;;  %9068 = vtanh.f32 %v4903_v59  ;;  %v5485_v33 = vsub.f32 1.0, %v5484_v60  ;;  %vm5490_vm4 = vmor %vm5488_vm12, %vm5489_vm10  ;;  %v5495_v59 = vor.u32 1.1754944e-38, %v5494_v55  ;;  %v5887_v30 = vmax.f32 %v5839_v32, 0.0 }
 0x5a0   : > { %6158 = vmatmul.bf16.vlgmr.msra.gmra.mxu0 %v13484_v50  ;;  %v5715_v34 = vadd.f32 %v5714_v38, %v13430_v47  ;;  %v5548_v38 = vmul.f32 %v9063_v8, %v5481_v42  ;;  %v4837_v18 = vadd.f32 %v13343_v15, %v12934_v41  ;;  %v4839_v8 = vadd.f32 %v13392_v54, %v12934_v41 }
 0x5a1   : > { %v5486_v29 = vmul.f32 %v9061_v14, %v5485_v33  ;;  %v5509_v41 = vand.u32 2147483648, %v13477_v22  ;;  %vm5503_vm15 = vweird.f32 %v13477_v22 }
 0x5a2   : > { %v5780_v35 = vpop.f32.mrf.mxu3  ;;  %v5842_v0 = vadd.f32 %v5715_v34, %v12406_v63  ;;  %v4906_v55 = vadd.f32 %v13405_v27, %v4837_v18  ;;  %v4908_v15 = vadd.f32 %v13444_v61, %v4839_v8 }
 0x5a3   : > { %v9065_v62 = vpop.eup %9064  ;;  %v5781_v52 = vadd.f32 %v5780_v35, %v13471_v10  ;;  %v5487_v37 = vadd.f32 %v9061_v14, %v5486_v29  ;;  %v5507_v29 = vand.u32 2147483647, %v13477_v22  ;;  %v5510_v35 = vor.u32 1.1754944e-38, %v5509_v41  ;;  %v8319_v41 = vld [vmem:[#allocation7 + $0xf0] sm:$0xf] }
 0x5a4   : > { %v13504_v39 = vpop.eup %9066  ;;  %v13506_v51 = vadd.f32 1.0, %v9065_v62 }
 0x5a5   : > { %v9069_v11 = vpop.eup %9068  ;;  %v5499_v40 = vmul.f32 %v13504_v39, %v13477_v22  ;;  %v5841_v53 = vadd.f32 %v5781_v52, %v12368_v28  ;;  %v5491_v48 = vsel %vm5490_vm4, %v9061_v14, %v5487_v37  ;;  %vm5504_vm14 = vweird.f32 %v13504_v39 }
 0x5a6   : > { %9070 = vrcp.f32 %v13506_v51  ;;  %v5496_v9 = vsel %vm5493_vm13, %v5495_v59, %v5491_v48  ;;  %vm5505_vm0 = vmor %vm5503_vm15, %vm5504_vm14  ;;  %v5524_v34 = vand.u32 2147483648, %v13506_v51  ;;  %v5522_v62 = vand.u32 2147483647, %v13506_v51 }
 0x5a7   : > { %v5716_v60 = vpop.f32.mrf.mxu2  ;;  %v5500_v46 = vsub.f32 1.0, %v5499_v40  ;;  %v5889_v33 = vmax.f32 %v5841_v53, 0.0  ;;  %5822 = vmatmul.bf16.gmra.mxu3 %v13474_v1  ;;  %v5549_v6 = vmul.f32 %v9069_v11, %v5496_v9  ;;  %v5890_v1 = vmax.f32 %v5842_v0, 0.0 }
 0x5a8   : > { %v5717_v24 = vadd.f32 %v5716_v60, %v13430_v47  ;;  %9072 = vtanh.f32 %v4906_v55  ;;  %vm5508_vm2 = vcmp.eq.f32.partialorder %v5507_v29, 8.507059e+37  ;;  %vm5518_vm3 = vweird.f32 %v13506_v51 }
 0x5a9   : > { %v13517_v44 = vpack.c.bf16 %v5889_v33, %v5887_v30  ;;  %v5562_v14 = vpack.c.bf16 %v5549_v6, %v5548_v38  ;;  %v5501_v63 = vmul.f32 %v13504_v39, %v5500_v46  ;;  %9074 = vtanh.f32 %v4908_v15  ;;  %v8257_v6 = vld [vmem:[#allocation7 + $0x78] sm:$0xf0] }
 0x5aa   : > { %v5844_v28 = vadd.f32 %v5717_v24, %v12423_v12  ;;  %v5783_v25 = vpop.f32.mrf.mxu3  ;;  %vm5523_vm6 = vcmp.eq.f32.partialorder %v5522_v62, 8.507059e+37  ;;  %v8566_v24 = vld [vmem:[#allocation7 + $0x74] sm:$0xf] }
 0x5ab   : > { %6227 = vmatmul.bf16.vlgmr.msra.gmra.mxu1 %v13517_v44  ;;  %5758 = vmatmul.bf16.gmra.mxu2 %v5562_v14  ;;  %v5502_v32 = vadd.f32 %v13504_v39, %v5501_v63  ;;  %v5784_v54 = vadd.f32 %v5783_v25, %v13471_v10  ;;  %v8260_v18 = vor.u32 %v8566_v24, %v8257_v6  ;;  %v8321_v63 = vld [vmem:[#allocation7 + $0xf8] sm:$0xf0] }
 0x5ac   : > { %v5892_v56 = vmax.f32 %v5844_v28, 0.0  ;;  %v9071_v17 = vpop.eup %9070  ;;  %v8582_v28 = vld [vmem:[#allocation7 + $0xf4] sm:$0xf] }
 0x5ad   : > { %v5514_v12 = vmul.f32 %v9071_v17, %v13506_v51  ;;  %v5506_v26 = vsel %vm5505_vm0, %v13504_v39, %v5502_v32  ;;  %vm5519_vm1 = vweird.f32 %v9071_v17  ;;  %v5843_v52 = vadd.f32 %v5784_v54, %v12409_v45  ;;  %6828 = vmatpush.bf16.msrb.mxu2 %v8260_v18  ;;  %v8567_v32 = vld [vmem:[#allocation7 + $0x74] sm:$0xf0] }
 0x5ae   : > { %v13529_v21 = vpack.c.bf16 %v5892_v56, %v5890_v1  ;;  %v5511_v59 = vsel %vm5508_vm2, %v5510_v35, %v5506_v26  ;;  %vm5520_vm5 = vmor %vm5518_vm3, %vm5519_vm1  ;;  %v5525_v39 = vor.u32 1.1754944e-38, %v5524_v34  ;;  %v9073_v40 = vpop.eup %9072  ;;  %v8324_v55 = vor.u32 %v8582_v28, %v8321_v63  ;;  %v8583_v54 = vld [vmem:[#allocation7 + $0xf4] sm:$0xf0]  ;;  %v8247_v28 = vld [vmem:[#allocation7 + $0x60] sm:$0xf] }
 0x5af   : > { %v5719_v27 = vpop.f32.mrf.mxu2  ;;  %v5515_v61 = vsub.f32 1.0, %v5514_v12  ;;  %v9075_v48 = vpop.eup %9074  ;;  %v5891_v0 = vmax.f32 %v5843_v52, 0.0  ;;  %v5550_v9 = vmul.f32 %v9073_v40, %v5511_v59  ;;  %v8565_v63 = vld [vmem:[#allocation7 + $0x64] sm:$0xf0] }
 0x5b0   : > { %6163 = vmatmul.bf16.gmra.mxu0 %v13529_v21  ;;  %v5720_v22 = vadd.f32 %v5719_v27, %v13430_v47  ;;  %6897 = vmatpush.bf16.msrb.mxu3 %v8324_v55  ;;  %v8320_v27 = vor.u32 %v8583_v54, %v8319_v41  ;;  %v14267_v54 = vld [vmem:[#allocation17_spill] sm:$0xff] }
 0x5b1   : > { %v5516_v49 = vmul.f32 %v9071_v17, %v5515_v61 }
 0x5b2   : > { %v5785_v42 = vpop.f32.mrf.mxu3  ;;  %v5846_v51 = vadd.f32 %v5720_v22, %v12444_v3  ;;  %6759 = vmatpush.bf16.msrb.mxu1 %v8320_v27 }
 0x5b3   : > { %v5786_v37 = vadd.f32 %v5785_v42, %v13471_v10  ;;  %v5517_v11 = vadd.f32 %v9071_v17, %v5516_v49 }
 0x5b4   : > { %v5894_v56 = vmax.f32 %v5846_v51, 0.0 }
 0x5b5   : > { %v5845_v30 = vadd.f32 %v5786_v37, %v12432_v58  ;;  %v5521_v53 = vsel %vm5520_vm5, %v9071_v17, %v5517_v11 }
 0x5b6   : > { %v5526_v60 = vsel %vm5523_vm6, %v5525_v39, %v5521_v53  ;;  %v8249_v53 = vld [vmem:[#allocation7 + $0x68] sm:$0xf0] }
 0x5b7   : > { %v5721_v45 = vpop.f32.mrf.mxu2  ;;  %v5893_v38 = vmax.f32 %v5845_v30, 0.0  ;;  %5827 = vmatmul.bf16.gmra.mxu3 %v5562_v14  ;;  %v5551_v33 = vmul.f32 %v9075_v48, %v5526_v60  ;;  %v8564_v30 = vld [vmem:[#allocation7 + $0x64] sm:$0xf] }
 0x5b8   : > { %v5722_v46 = vadd.f32 %v5721_v45, %v13430_v47  ;;  %v8252_v48 = vor.u32 %v8564_v30, %v8249_v53 }
 0x5b9   : > { %v13547_v8 = vpack.c.bf16 %v5893_v38, %v5891_v0  ;;  %v5563_v25 = vpack.c.bf16 %v5551_v33, %v5550_v9  ;;  %v8313_v0 = vld [vmem:[#allocation7 + $0xe8] sm:$0xf0] }
 0x5ba   : > { %v5848_v58 = vadd.f32 %v5722_v46, %v12469_v7  ;;  %v5788_v1 = vpop.f32.mrf.mxu3  ;;  %v8255_v7 = vld [vmem:[#allocation7 + $0x70] sm:$0xf]  ;;  %6829 = vmatpush.bf16.msrb.mxu2 %v8252_v48 }
 0x5bb   : > { %6232 = vmatmul.bf16.gmra.mxu1 %v13547_v8  ;;  %5763 = vmatmul.bf16.gmra.mxu2 %v5563_v25  ;;  %v5789_v15 = vadd.f32 %v5788_v1, %v13471_v10  ;;  %v8256_v12 = vor.u32 %v8567_v32, %v8255_v7  ;;  %v14266_v7 = vld [vmem:[#allocation18_spill] sm:$0xff] }
 0x5bc   : > { %v5896_v3 = vmax.f32 %v5848_v58, 0.0  ;;  %v8248_v58 = vor.u32 %v8565_v63, %v8247_v28  ;;  %v14272_v63 = vld [vmem:[#allocation22_spill] sm:$0xff] }
 0x5bd   : > { %6690 = vmatpush.bf16.msrb.mxu0 %v8256_v12  ;;  %v5847_v61 = vadd.f32 %v5789_v15, %v12449_v16 }
 0x5be   : > { %v13550_v14 = vpack.c.bf16 %v5896_v3, %v5894_v56 }
 0x5bf   : > { %v5724_v17 = vpop.f32.mrf.mxu2  ;;  %v5895_v62 = vmax.f32 %v5847_v61, 0.0 }
 0x5c0   : > { %6168 = vmatmul.bf16.gmra.mxu0 %v13550_v14  ;;  %v5725_v26 = vadd.f32 %v5724_v17, %v13430_v47 }
 0x5c1   : > { %6691 = vmatpush.bf16.msrb.mxu0 %v8248_v58 }
 0x5c2   : > { %v5790_v29 = vpop.f32.mrf.mxu3  ;;  %v5850_v52 = vadd.f32 %v5725_v26, %v12490_v2 }
 0x5c3   : > { %v5791_v34 = vadd.f32 %v5790_v29, %v13471_v10 }
 0x5c4   : > { %v5898_v11 = vmax.f32 %v5850_v52, 0.0 }
 0x5c5   : > { %v5849_v35 = vadd.f32 %v5791_v34, %v12478_v13 }
 0x5c7   : > { %v5726_v49 = vpop.f32.mrf.mxu2  ;;  %v5897_v42 = vmax.f32 %v5849_v35, 0.0  ;;  %5832 = vmatmul.bf16.gmra.mxu3 %v5563_v25  ;;  %v8581_v25 = vld [vmem:[#allocation7 + $0xe4] sm:$0xf0] }
 0x5c8   : > { %v5727_v22 = vadd.f32 %v5726_v49, %v13430_v47  ;;  %v8562_v49 = vld [vmem:[#allocation7 + $0x54] sm:$0xf] }
 0x5c9   : > { %v13561_v59 = vpack.c.bf16 %v5897_v42, %v5895_v62  ;;  %v8241_v62 = vld [vmem:[#allocation7 + $0x58] sm:$0xf0]  ;;  %v8578_v42 = vld [vmem:[#allocation7 + $0xd4] sm:$0xf] }
 0x5ca   : > { %v5852_v37 = vadd.f32 %v5727_v22, %v12513_v31  ;;  %v5793_v16 = vpop.f32.mrf.mxu3  ;;  %v8580_v31 = vld [vmem:[#allocation7 + $0xe4] sm:$0xf]  ;;  %v8244_v52 = vor.u32 %v8562_v49, %v8241_v62  ;;  %v8305_v22 = vld [vmem:[#allocation7 + $0xd8] sm:$0xf0] }
 0x5cb   : > { %6237 = vmatmul.bf16.gmra.mxu1 %v13561_v59  ;;  %6296 = vmatmul.bf16.vlgmr.msra.gmra.mxu2 %v13484_v50  ;;  %v5794_v2 = vadd.f32 %v5793_v16, %v13471_v10  ;;  %v8316_v45 = vor.u32 %v8580_v31, %v8313_v0  ;;  %v8239_v31 = vld [vmem:[#allocation7 + $0x50] sm:$0xf]  ;;  %v8563_v0 = vld [vmem:[#allocation7 + $0x54] sm:$0xf0] }
 0x5cc   : > { %v5900_v39 = vmax.f32 %v5852_v37, 0.0  ;;  %v14269_v37 = vld [vmem:[#allocation20_spill] sm:$0xff]  ;;  %6830 = vmatpush.bf16.msrb.mxu2 %v8244_v52 }
 0x5cd   : > { %v5851_v9 = vadd.f32 %v5794_v2, %v12495_v43  ;;  %6898 = vmatpush.bf16.msrb.mxu3 %v8316_v45  ;;  %v8311_v43 = vld [vmem:[#allocation7 + $0xe0] sm:$0xf]  ;;  %v8240_v45 = vor.u32 %v8563_v0, %v8239_v31 }
 0x5ce   : > { %v13565_v13 = vpack.c.bf16 %v5900_v39, %v5898_v11  ;;  %v8312_v56 = vor.u32 %v8581_v25, %v8311_v43  ;;  %v8308_v39 = vor.u32 %v8578_v42, %v8305_v22  ;;  %v14276_v52 = vld [vmem:[#allocation24_spill] sm:$0xff] }
 0x5cf   : > { %v5729_v40 = vpop.f32.mrf.mxu2  ;;  %v5899_v33 = vmax.f32 %v5851_v9, 0.0  ;;  %v8579_v9 = vld [vmem:[#allocation7 + $0xd4] sm:$0xf0]  ;;  %6692 = vmatpush.bf16.msrb.mxu0 %v8240_v45 }
 0x5d0   : > { %6173 = vmatmul.bf16.gmra.mxu0 %v13565_v13  ;;  %v5730_v51 = vadd.f32 %v5729_v40, %v13430_v47  ;;  %6760 = vmatpush.bf16.msrb.mxu1 %v8312_v56 }
 0x5d1   : > { %6899 = vmatpush.bf16.msrb.mxu3 %v8308_v39  ;;  %v8561_v39 = vld [vmem:[#allocation7 + $0x44] sm:$0xf0] }
 0x5d2   : > { %v5795_v60 = vpop.f32.mrf.mxu3  ;;  %v5854_v24 = vadd.f32 %v5730_v51, %v12534_v36 }
 0x5d3   : > { %v5796_v50 = vadd.f32 %v5795_v60, %v13471_v10  ;;  %v8303_v60 = vld [vmem:[#allocation7 + $0xd0] sm:$0xf] }
 0x5d4   : > { %v5902_v3 = vmax.f32 %v5854_v24, 0.0  ;;  %v8304_v51 = vor.u32 %v8579_v9, %v8303_v60  ;;  %v14271_v24 = vld [vmem:[#allocation19_spill] sm:$0xff] }
 0x5d5   : > { %v5853_v38 = vadd.f32 %v5796_v50, %v12522_v5 }
 0x5d6   : > { %6761 = vmatpush.bf16.msrb.mxu1 %v8304_v51 }
 0x5d7   : > { %v5731_v46 = vpop.f32.mrf.mxu2  ;;  %v5901_v6 = vmax.f32 %v5853_v38, 0.0  ;;  %6365 = vmatmul.bf16.vlgmr.msra.gmra.mxu3 %v13517_v44  ;;  %v14270_v38 = vld [vmem:[#allocation31_spill] sm:$0xff] }
 0x5d8   : > { %v5732_v18 = vadd.f32 %v5731_v46, %v13430_v47 }
 0x5d9   : > { %v13577_v1 = vpack.c.bf16 %v5901_v6, %v5899_v33 }
 0x5da   : > { %v5856_v55 = vadd.f32 %v5732_v18, %v12557_v19  ;;  %v5798_v5 = vpop.f32.mrf.mxu3 }
 0x5db   : > { %6242 = vmatmul.bf16.gmra.mxu1 %v13577_v1  ;;  %6301 = vmatmul.bf16.gmra.mxu2 %v13529_v21  ;;  %v5799_v15 = vadd.f32 %v5798_v5, %v13471_v10  ;;  %v14268_v21 = vld [vmem:[#allocation33_spill] sm:$0xff] }
 0x5dc   : > { %v5904_v17 = vmax.f32 %v5856_v55, 0.0  ;;  %v14273_v55 = vld [vmem:[#allocation39_spill] sm:$0xff] }
 0x5dd   : > { %v5855_v32 = vadd.f32 %v5799_v15, %v14266_v7 }
 0x5de   : > { %v13581_v36 = vpack.c.bf16 %v5904_v17, %v5902_v3 }
 0x5df   : > { %v5734_v44 = vpop.f32.mrf.mxu2  ;;  %v5903_v61 = vmax.f32 %v5855_v32, 0.0  ;;  %v8233_v32 = vld [vmem:[#allocation7 + $0x48] sm:$0xf0] }
 0x5e0   : > { %6178 = vmatmul.bf16.gmra.mxu0 %v13581_v36  ;;  %v5735_v12 = vadd.f32 %v5734_v44, %v13430_v47 }
 0x5e2   : > { %v5800_v19 = vpop.f32.mrf.mxu3  ;;  %v5858_v26 = vadd.f32 %v5735_v12, %v14268_v21 }
 0x5e3   : > { %v5801_v41 = vadd.f32 %v5800_v19, %v13471_v10 }
 0x5e4   : > { %v5906_v2 = vmax.f32 %v5858_v26, 0.0 }
 0x5e5   : > { %v5857_v27 = vadd.f32 %v5801_v41, %v14267_v54  ;;  %v8576_v41 = vld [vmem:[#allocation7 + $0xc4] sm:$0xf]  ;;  %v8297_v54 = vld [vmem:[#allocation7 + $0xc8] sm:$0xf0] }
 0x5e7   : > { %v5736_v29 = vpop.f32.mrf.mxu2  ;;  %v5905_v34 = vmax.f32 %v5857_v27, 0.0  ;;  %6370 = vmatmul.bf16.gmra.mxu3 %v13547_v8  ;;  %v8300_v27 = vor.u32 %v8576_v41, %v8297_v54 }
 0x5e8   : > { %v5737_v35 = vadd.f32 %v5736_v29, %v13430_v47 }
 0x5e9   : > { %v13593_v11 = vpack.c.bf16 %v5905_v34, %v5903_v61  ;;  %v14274_v61 = vld [vmem:[#allocation21_spill] sm:$0xff]  ;;  %6900 = vmatpush.bf16.msrb.mxu3 %v8300_v27 }
 0x5ea   : > { %v5860_v16 = vadd.f32 %v5737_v35, %v14269_v37  ;;  %v5803_v40 = vpop.f32.mrf.mxu3  ;;  %v14275_v34 = vld [vmem:[#allocation37_spill] sm:$0xff] }
 0x5eb   : > { %6247 = vmatmul.bf16.gmra.mxu1 %v13593_v11  ;;  %6306 = vmatmul.bf16.gmra.mxu2 %v13550_v14  ;;  %v5804_v48 = vadd.f32 %v5803_v40, %v13471_v10 }
 0x5ec   : > { %v5908_v30 = vmax.f32 %v5860_v16, 0.0  ;;  %v8231_v16 = vld [vmem:[#allocation7 + $0x40] sm:$0xf] }
 0x5ed   : > { %v5859_v46 = vadd.f32 %v5804_v48, %v14270_v38  ;;  %v8232_v40 = vor.u32 %v8561_v39, %v8231_v16  ;;  %v14283_v16 = vld [vmem:[#allocation27_spill] sm:$0xff] }
 0x5ee   : > { %v13597_v8 = vpack.c.bf16 %v5908_v30, %v5906_v2  ;;  %v8295_v2 = vld [vmem:[#allocation7 + $0xc0] sm:$0xf]  ;;  %v8577_v30 = vld [vmem:[#allocation7 + $0xc4] sm:$0xf0] }
 0x5ef   : > { %v5739_v53 = vpop.f32.mrf.mxu2  ;;  %v5907_v28 = vmax.f32 %v5859_v46, 0.0  ;;  %v8296_v0 = vor.u32 %v8577_v30, %v8295_v2  ;;  %6693 = vmatpush.bf16.msrb.mxu0 %v8232_v40  ;;  %v14278_v46 = vld [vmem:[#allocation23_spill] sm:$0xff] }
 0x5f0   : > { %6183 = vmatmul.bf16.gmra.mxu0 %v13597_v8  ;;  %v5740_v33 = vadd.f32 %v5739_v53, %v13430_v47  ;;  %v14277_v53 = vld [vmem:[#allocation26_spill] sm:$0xff] }
 0x5f1   : > { %6762 = vmatpush.bf16.msrb.mxu1 %v8296_v0 }
 0x5f2   : > { %v5805_v50 = vpop.f32.mrf.mxu3  ;;  %v5862_v58 = vadd.f32 %v5740_v33, %v14272_v63 }
 0x5f3   : > { %v5806_v14 = vadd.f32 %v5805_v50, %v13471_v10 }
 0x5f4   : > { %v5910_v17 = vmax.f32 %v5862_v58, 0.0 }
 0x5f5   : > { %v5861_v6 = vadd.f32 %v5806_v14, %v14271_v24 }
 0x5f7   : > { %v5741_v18 = vpop.f32.mrf.mxu2  ;;  %v5909_v43 = vmax.f32 %v5861_v6, 0.0  ;;  %6375 = vmatmul.bf16.gmra.mxu3 %v13561_v59  ;;  %v8560_v59 = vld [vmem:[#allocation7 + $0x44] sm:$0xf]  ;;  %v14279_v6 = vld [vmem:[#allocation25_spill] sm:$0xff] }
 0x5f8   : > { %v5742_v25 = vadd.f32 %v5741_v18, %v13430_v47  ;;  %v8236_v12 = vor.u32 %v8560_v59, %v8233_v32 }
 0x5f9   : > { %v13609_v5 = vpack.c.bf16 %v5909_v43, %v5907_v28 }
 0x5fa   : > { %v5864_v56 = vadd.f32 %v5742_v25, %v14273_v55  ;;  %v5808_v3 = vpop.f32.mrf.mxu3  ;;  %6831 = vmatpush.bf16.msrb.mxu2 %v8236_v12  ;;  %v8558_v55 = vld [vmem:[#allocation7 + $0x34] sm:$0xf] }
 0x5fb   : > { %6252 = vmatmul.bf16.gmra.mxu1 %v13609_v5  ;;  %6311 = vmatmul.bf16.gmra.mxu2 %v13565_v13  ;;  %v5809_v7 = vadd.f32 %v5808_v3, %v13471_v10 }
 0x5fc   : > { %v5912_v44 = vmax.f32 %v5864_v56, 0.0  ;;  %v8225_v56 = vld [vmem:[#allocation7 + $0x38] sm:$0xf0] }
 0x5fd   : > { %v5863_v21 = vadd.f32 %v5809_v7, %v14274_v61  ;;  %v8228_v3 = vor.u32 %v8558_v55, %v8225_v56 }
 0x5fe   : > { %v13613_v15 = vpack.c.bf16 %v5912_v44, %v5910_v17  ;;  %v8574_v17 = vld [vmem:[#allocation7 + $0xb4] sm:$0xf]  ;;  %v8289_v44 = vld [vmem:[#allocation7 + $0xb8] sm:$0xf0] }
 0x5ff   : > { %v5744_v19 = vpop.f32.mrf.mxu2  ;;  %v5911_v62 = vmax.f32 %v5863_v21, 0.0  ;;  %v8292_v32 = vor.u32 %v8574_v17, %v8289_v44  ;;  %6832 = vmatpush.bf16.msrb.mxu2 %v8228_v3  ;;  %v8223_v21 = vld [vmem:[#allocation7 + $0x30] sm:$0xf]  ;;  %v14287_v44 = vld [vmem:[#allocation48_spill] sm:$0xff] }
 0x600   : > { %6188 = vmatmul.bf16.gmra.mxu0 %v13613_v15  ;;  %v5745_v26 = vadd.f32 %v5744_v19, %v13430_v47  ;;  %v14281_v19 = vld [vmem:[#allocation28_spill] sm:$0xff] }
 0x601   : > { %6901 = vmatpush.bf16.msrb.mxu3 %v8292_v32 }
 0x602   : > { %v5810_v29 = vpop.f32.mrf.mxu3  ;;  %v5866_v42 = vadd.f32 %v5745_v26, %v14276_v52  ;;  %v8559_v26 = vld [vmem:[#allocation7 + $0x34] sm:$0xf0] }
 0x603   : > { %v5811_v13 = vadd.f32 %v5810_v29, %v13471_v10  ;;  %v14282_v52 = vld [vmem:[#allocation43_spill] sm:$0xff] }
 0x604   : > { %v5914_v60 = vmax.f32 %v5866_v42, 0.0 }
 0x605   : > { %v5865_v35 = vadd.f32 %v5811_v13, %v14275_v34  ;;  %v8224_v13 = vor.u32 %v8559_v26, %v8223_v21  ;;  %v8287_v34 = vld [vmem:[#allocation7 + $0xb0] sm:$0xf] }
 0x607   : > { %v5746_v49 = vpop.f32.mrf.mxu2  ;;  %v5913_v22 = vmax.f32 %v5865_v35, 0.0  ;;  %6380 = vmatmul.bf16.gmra.mxu3 %v13577_v1  ;;  %v8575_v35 = vld [vmem:[#allocation7 + $0xb4] sm:$0xf0]  ;;  %6694 = vmatpush.bf16.msrb.mxu0 %v8224_v13 }
 0x608   : > { %v5747_v37 = vadd.f32 %v5746_v49, %v13430_v47  ;;  %v8288_v49 = vor.u32 %v8575_v35, %v8287_v34  ;;  %v8279_v34 = vld [vmem:[#allocation7 + $0xa0] sm:$0xf]  ;;  %v8573_v35 = vld [vmem:[#allocation7 + $0xa4] sm:$0xf0] }
 0x609   : > { %v13625_v31 = vpack.c.bf16 %v5913_v22, %v5911_v62 }
 0x60a   : > { %v5868_v48 = vadd.f32 %v5747_v37, %v14277_v53  ;;  %v5813_v45 = vpop.f32.mrf.mxu3  ;;  %6763 = vmatpush.bf16.msrb.mxu1 %v8288_v49  ;;  %v14284_v53 = vld [vmem:[#allocation30_spill] sm:$0xff] }
 0x60b   : > { %6257 = vmatmul.bf16.gmra.mxu1 %v13625_v31  ;;  %6316 = vmatmul.bf16.gmra.mxu2 %v13581_v36  ;;  %v5814_v50 = vadd.f32 %v5813_v45, %v13471_v10  ;;  %v14280_v36 = vld [vmem:[#allocation45_spill] sm:$0xff] }
 0x60c   : > { %v5916_v9 = vmax.f32 %v5868_v48, 0.0 }
 0x60d   : > { %v5867_v33 = vadd.f32 %v5814_v50, %v14278_v46 }
 0x60e   : > { %v13629_v1 = vpack.c.bf16 %v5916_v9, %v5914_v60  ;;  %v14285_v9 = vld [vmem:[#allocation50_spill] sm:$0xff] }
 0x60f   : > { %v5749_v51 = vpop.f32.mrf.mxu2  ;;  %v5915_v63 = vmax.f32 %v5867_v33, 0.0 }
 0x610   : > { %6193 = vmatmul.bf16.gmra.mxu0 %v13629_v1  ;;  %v5750_v14 = vadd.f32 %v5749_v51, %v13430_v47 }
 0x612   : > { %v5815_v38 = vpop.f32.mrf.mxu3  ;;  %v5870_v58 = vadd.f32 %v5750_v14, %v14280_v36  ;;  %v8572_v36 = vld [vmem:[#allocation7 + $0xa4] sm:$0xf] }
 0x613   : > { %v5816_v24 = vadd.f32 %v5815_v38, %v13471_v10 }
 0x614   : > { %v5918_v41 = vmax.f32 %v5870_v58, 0.0  ;;  %v8281_v58 = vld [vmem:[#allocation7 + $0xa8] sm:$0xf0] }
 0x615   : > { %v5869_v18 = vadd.f32 %v5816_v24, %v14279_v6  ;;  %v8556_v6 = vld [vmem:[#allocation7 + $0x24] sm:$0xf] }
 0x617   : > { %v5751_v28 = vpop.f32.mrf.mxu2  ;;  %v5917_v43 = vmax.f32 %v5869_v18, 0.0  ;;  %6385 = vmatmul.bf16.gmra.mxu3 %v13593_v11  ;;  %v8217_v18 = vld [vmem:[#allocation7 + $0x28] sm:$0xf0] }
 0x618   : > { %v5752_v25 = vadd.f32 %v5751_v28, %v13430_v47 }
 0x619   : > { %v13641_v59 = vpack.c.bf16 %v5917_v43, %v5915_v63  ;;  %v8220_v63 = vor.u32 %v8556_v6, %v8217_v18  ;;  %v8284_v43 = vor.u32 %v8572_v36, %v8281_v58  ;;  %v14291_v18 = vld [vmem:[#allocation35_spill] sm:$0xff] }
 0x61a   : > { %v5872_v7 = vadd.f32 %v5752_v25, %v14281_v19  ;;  %v5818_v12 = vpop.f32.mrf.mxu3 }
 0x61b   : > { %6262 = vmatmul.bf16.gmra.mxu1 %v13641_v59  ;;  %6321 = vmatmul.bf16.gmra.mxu2 %v13597_v8  ;;  %v5819_v29 = vadd.f32 %v5818_v12, %v13471_v10 }
 0x61c   : > { %v5920_v54 = vmax.f32 %v5872_v7, 0.0  ;;  %6833 = vmatpush.bf16.msrb.mxu2 %v8220_v63  ;;  %6902 = vmatpush.bf16.msrb.mxu3 %v8284_v43 }
 0x61d   : > { %v13645_v11 = vpop.f32.mrf.mxu0  ;;  %v5871_v42 = vadd.f32 %v5819_v29, %v14282_v52  ;;  %v14288_v29 = vld [vmem:[#allocation34_spill] sm:$0xff]  ;;  %v14289_v52 = vld [vmem:[#allocation36_spill] sm:$0xff] }
 0x61e   : > { %v13647_v27 = vpack.c.bf16 %v5920_v54, %v5918_v41  ;;  %v8215_v41 = vld [vmem:[#allocation7 + $0x20] sm:$0xf]  ;;  %v8557_v54 = vld [vmem:[#allocation7 + $0x24] sm:$0xf0] }
 0x61f   : > { %v5754_v61 = vpop.f32.mrf.mxu2  ;;  %v5919_v40 = vmax.f32 %v5871_v42, 0.0  ;;  %v8216_v13 = vor.u32 %v8557_v54, %v8215_v41  ;;  %v8273_v54 = vld [vmem:[#allocation7 + $0x98] sm:$0xf0] }
 0x620   : > { %6198 = vmatmul.bf16.gmra.mxu0 %v13647_v27  ;;  %v5755_v22 = vadd.f32 %v5754_v61, %v13430_v47 }
 0x621   : > { %6695 = vmatpush.bf16.msrb.mxu0 %v8216_v13 }
 0x622   : > { %v5820_v62 = vpop.f32.mrf.mxu3  ;;  %v5874_v48 = vadd.f32 %v5755_v22, %v14284_v53  ;;  %v8199_v53 = vld [vmem:[#allocation7] sm:$0xf] }
 0x623   : > { %v5821_v8 = vadd.f32 %v5820_v62, %v13471_v10  ;;  %v8280_v62 = vor.u32 %v8573_v35, %v8279_v34 }
 0x624   : > { %v5922_v38 = vmax.f32 %v5874_v48, 0.0  ;;  %v8553_v48 = vld [vmem:[#allocation7 + $0x4] sm:$0xf0] }
 0x625   : > { %v13654_v37 = vpop.f32.mrf.mxu0  ;;  %v5873_v39 = vadd.f32 %v5821_v8, %v14283_v16  ;;  %6764 = vmatpush.bf16.msrb.mxu1 %v8280_v62 }
 0x627   : > { %v5921_v2 = vmax.f32 %v5873_v39, 0.0  ;;  %6390 = vmatmul.bf16.gmra.mxu3 %v13609_v5  ;;  %v5756_v30 = vpop.f32.mrf.mxu2  ;;  %v8207_v39 = vld [vmem:[#allocation7 + $0x10] sm:$0xf] }
 0x628   : > { %v13659_v0 = vpop.f32.mrf.mxu1  ;;  %v5757_v45 = vadd.f32 %v5756_v30, %v13430_v47 }
 0x629   : > { %v13662_v60 = vpack.c.bf16 %v5921_v2, %v5919_v40  ;;  %v8555_v40 = vld [vmem:[#allocation7 + $0x14] sm:$0xf0] }
 0x62a   : > { %v5876_v51 = vadd.f32 %v5757_v45, %v14285_v9  ;;  %v5823_v50 = vpop.f32.mrf.mxu3  ;;  %v8208_v30 = vor.u32 %v8555_v40, %v8207_v39 }
 0x62b   : > { %6267 = vmatmul.bf16.gmra.mxu1 %v13662_v60  ;;  %6326 = vmatmul.bf16.gmra.mxu2 %v13613_v15  ;;  %v5824_v14 = vadd.f32 %v5823_v50, %v13471_v10  ;;  %v14286_v15 = vld [vmem:[#allocation29_spill] sm:$0xff]  ;;  %v8200_v50 = vor.u32 %v8553_v48, %v8199_v53 }
 0x62c   : > { %v5924_v46 = vmax.f32 %v5876_v51, 0.0  ;;  %6696 = vmatpush.bf16.msrb.mxu0 %v8208_v30 }
 0x62d   : > { %v13667_v33 = vpop.f32.mrf.mxu0  ;;  %v5875_v55 = vadd.f32 %v5824_v14, %v14286_v15  ;;  %v8571_v15 = vld [vmem:[#allocation7 + $0x94] sm:$0xf0] }
 0x62e   : > { %v13669_v5 = vpack.c.bf16 %v5924_v46, %v5922_v38  ;;  %v14290_v38 = vld [vmem:[#allocation32_spill] sm:$0xff] }
 0x62f   : > { %v5759_v24 = vpop.f32.mrf.mxu2  ;;  %v5923_v7 = vmax.f32 %v5875_v55, 0.0 }
 0x630   : > { %v13672_v28 = vpop.f32.mrf.mxu1  ;;  %6203 = vmatmul.bf16.gmra.mxu0 %v13669_v5  ;;  %v5760_v3 = vadd.f32 %v5759_v24, %v13430_v47 }
 0x631   : > { %6697 = vmatpush.bf16.msrb.mxu0 %v8200_v50  ;;  %v6231_v40 = vadd.f32 %v13672_v28, %v13654_v37  ;;  %v8552_v28 = vld [vmem:[#allocation7 + $0x4] sm:$0xf] }
 0x632   : > { %v5825_v25 = vpop.f32.mrf.mxu3  ;;  %v5878_v61 = vadd.f32 %v5760_v3, %v14288_v29 }
 0x633   : > { %v5826_v56 = vadd.f32 %v5825_v25, %v13471_v10  ;;  %v8271_v25 = vld [vmem:[#allocation7 + $0x90] sm:$0xf] }
 0x635   : > { %v13678_v17 = vpop.f32.mrf.mxu0  ;;  %v5877_v19 = vadd.f32 %v5826_v56, %v14287_v44  ;;  %v8272_v44 = vor.u32 %v8571_v15, %v8271_v25 }
 0x637   : > { %v5925_v32 = vmax.f32 %v5877_v19, 0.0  ;;  %6395 = vmatmul.bf16.gmra.mxu3 %v13625_v31  ;;  %v5761_v12 = vpop.f32.mrf.mxu2  ;;  %v5926_v31 = vmax.f32 %v5878_v61, 0.0  ;;  %v8554_v19 = vld [vmem:[#allocation7 + $0x14] sm:$0xf]  ;;  %6765 = vmatpush.bf16.msrb.mxu1 %v8272_v44 }
 0x638   : > { %v13683_v21 = vpop.f32.mrf.mxu1  ;;  %v5762_v26 = vadd.f32 %v5761_v12, %v13430_v47 }
 0x639   : > { %v13686_v49 = vpack.c.bf16 %v5925_v32, %v5923_v7  ;;  %v8209_v7 = vld [vmem:[#allocation7 + $0x18] sm:$0xf0]  ;;  %v8570_v32 = vld [vmem:[#allocation7 + $0x94] sm:$0xf] }
 0x63a   : > { %v5880_v42 = vadd.f32 %v5762_v26, %v14289_v52  ;;  %v5828_v8 = vpop.f32.mrf.mxu3  ;;  %v8212_v41 = vor.u32 %v8554_v19, %v8209_v7  ;;  %v8276_v61 = vor.u32 %v8570_v32, %v8273_v54  ;;  %v8569_v26 = vld [vmem:[#allocation7 + $0x84] sm:$0xf0] }
 0x63b   : > { %6272 = vmatmul.bf16.gmra.mxu1 %v13686_v49  ;;  %6331 = vmatmul.bf16.gmra.mxu2 %v13629_v1  ;;  %v5829_v45 = vadd.f32 %v5828_v8, %v13471_v10 }
 0x63c   : > { %v5928_v22 = vmax.f32 %v5880_v42, 0.0  ;;  %6834 = vmatpush.bf16.msrb.mxu2 %v8212_v41  ;;  %6903 = vmatpush.bf16.msrb.mxu3 %v8276_v61 }
 0x63d   : > { %v13691_v16 = vpop.f32.mrf.mxu0  ;;  %v5879_v46 = vadd.f32 %v5829_v45, %v14290_v38  ;;  %v6229_v45 = vadd.f32 %v13659_v0, %v13645_v11  ;;  %v8265_v11 = vld [vmem:[#allocation7 + $0x88] sm:$0xf0] }
 0x63e   : > { %v13693_v2 = vpack.c.bf16 %v5928_v22, %v5926_v31 }
 0x63f   : > { %v5764_v9 = vpop.f32.mrf.mxu2  ;;  %v5927_v36 = vmax.f32 %v5879_v46, 0.0  ;;  %v8568_v46 = vld [vmem:[#allocation7 + $0x84] sm:$0xf] }
 0x640   : > { %v13696_v51 = vpop.f32.mrf.mxu1  ;;  %6208 = vmatmul.bf16.gmra.mxu0 %v13693_v2  ;;  %v5765_v24 = vadd.f32 %v5764_v9, %v13430_v47 }
 0x642   : > { %v5830_v1 = vpop.f32.mrf.mxu3  ;;  %v5882_v55 = vadd.f32 %v5765_v24, %v12886_v20  ;;  %v8263_v20 = vld [vmem:[#allocation7 + $0x80] sm:$0xf] }
 0x643   : > { %v5831_v14 = vadd.f32 %v5830_v1, %v13471_v10  ;;  %v8264_v35 = vor.u32 %v8569_v26, %v8263_v20  ;;  %v8201_v1 = vld [vmem:[#allocation7 + $0x8] sm:$0xf0] }
 0x644   : > { %v5930_v13 = vmax.f32 %v5882_v55, 0.0  ;;  %v8204_v38 = vor.u32 %v8552_v28, %v8201_v1  ;;  %v6234_v55 = vadd.f32 %v13683_v21, %v13667_v33 }
 0x645   : > { %v13702_v6 = vpop.f32.mrf.mxu0  ;;  %v5881_v63 = vadd.f32 %v5831_v14, %v14291_v18  ;;  %6766 = vmatpush.bf16.msrb.mxu1 %v8264_v35  ;;  %v8268_v14 = vor.u32 %v8568_v46, %v8265_v11 }
 0x646   : > { %6835 = vmatpush.bf16.msrb.mxu2 %v8204_v38  ;;  %v6430_v32 = vmax.f32 %v6234_v55, 0.0 }
 0x647   : > { %v5929_v58 = vmax.f32 %v5881_v63, 0.0  ;;  %6400 = vmatmul.bf16.gmra.mxu3 %v13641_v59  ;;  %v5766_v43 = vpop.f32.mrf.mxu2 }
 0x648   : > { %v13707_v56 = vpop.f32.mrf.mxu1  ;;  %v5767_v3 = vadd.f32 %v5766_v43, %v13430_v47  ;;  %6904 = vmatpush.bf16.msrb.mxu3 %v8268_v14  ;;  %v6236_v43 = vadd.f32 %v13696_v51, %v13678_v17 }
 0x649   : > { %v13710_v12 = vpack.c.bf16 %v5929_v58, %v5927_v36  ;;  %v6239_v26 = vadd.f32 %v13707_v56, %v13691_v16 }
 0x64a   : > { %v5884_v29 = vadd.f32 %v5767_v3, %v12888_v57  ;;  %v5833_v59 = vpop.f32.mrf.mxu3  ;;  %v6432_v19 = vmax.f32 %v6236_v43, 0.0 }
 0x64b   : > { %6277 = vmatmul.bf16.gmra.mxu1 %v13710_v12  ;;  %6336 = vmatmul.bf16.gmra.mxu2 %v13647_v27  ;;  %v5834_v57 = vadd.f32 %v5833_v59, %v13471_v10 }
 0x64c   : > { %v5932_v47 = vmax.f32 %v5884_v29, 0.0  ;;  %v13754_v54 = vpack.c.bf16 %v6432_v19, %v6430_v32 }
 0x64d   : > { %v13715_v34 = vpop.f32.mrf.mxu0  ;;  %v5883_v31 = vadd.f32 %v5834_v57, %v12893_v23 }
 0x64e   : > { %v13717_v62 = vpack.c.bf16 %v5932_v47, %v5930_v13 }
 0x64f   : > { %v6297_v52 = vpop.f32.mrf.mxu2  ;;  %v5931_v30 = vmax.f32 %v5883_v31, 0.0 }
 0x650   : > { %v6240_v42 = vpop.f32.mrf.mxu1  ;;  %6213 = vmatmul.bf16.gmra.mxu0 %v13717_v62 }
 0x651   : > { %v6241_v61 = vadd.f32 %v6240_v42, %v13702_v6 }
 0x652   : > { %v5835_v8 = vpop.f32.mrf.mxu3 }
 0x653   : > { %v5836_v22 = vadd.f32 %v5835_v8, %v13471_v10  ;;  %v6428_v10 = vmax.f32 %v6231_v40, 0.0  ;;  %v6436_v35 = vmax.f32 %v6241_v61, 0.0 }
 0x655   : > { %v13723_v39 = vpop.f32.mrf.mxu0  ;;  %v5885_v27 = vadd.f32 %v5836_v22, %v12907_v4  ;;  %v6426_v4 = vmax.f32 %v6229_v45, 0.0 }
 0x657   : > { %v5933_v53 = vmax.f32 %v5885_v27, 0.0  ;;  %6405 = vmatmul.bf16.gmra.mxu3 %v13662_v60  ;;  %v6299_v48 = vpop.f32.mrf.mxu2  ;;  %v13739_v60 = vpack.c.bf16 %v6428_v10, %v6426_v4 }
 0x658   : > { %v13731_v9 = vpop.f32.mrf.mxu1 }
 0x659   : > { %v13733_v23 = vpack.c.bf16 %v5933_v53, %v5931_v30  ;;  %v6244_v53 = vadd.f32 %v13731_v9, %v13715_v34 }
 0x65a   : > { %v6366_v50 = vpop.f32.mrf.mxu3 }
 0x65b   : > { %6282 = vmatmul.bf16.gmra.mxu1 %v13733_v23  ;;  %6341 = vmatmul.bf16.gmra.mxu2 %v13669_v5  ;;  %v6367_v63 = vadd.f32 %v6366_v50, %v6297_v52  ;;  %v6434_v52 = vmax.f32 %v6239_v26, 0.0  ;;  %v6438_v4 = vmax.f32 %v6244_v53, 0.0 }
 0x65d   : > { %v13737_v37 = vpop.f32.mrf.mxu0  ;;  %v6427_v25 = vmax.f32 %v6367_v63, 0.0  ;;  %v13768_v31 = vpack.c.bf16 %v6436_v35, %v6434_v52 }
 0x65f   : > { %v6302_v0 = vpop.f32.mrf.mxu2 }
 0x660   : > { %v6245_v24 = vpop.f32.mrf.mxu1  ;;  %6698 = vmatmul.bf16.vlgmr.msrb.gmra.mxu0 %v13739_v60 }
 0x661   : > { %v6246_v40 = vadd.f32 %v6245_v24, %v13723_v39 }
 0x662   : > { %v6368_v18 = vpop.f32.mrf.mxu3 }
 0x663   : > { %v6369_v36 = vadd.f32 %v6368_v18, %v6299_v48  ;;  %v6440_v10 = vmax.f32 %v6246_v40, 0.0 }
 0x665   : > { %v13742_v5 = vpop.f32.mrf.mxu0  ;;  %v6429_v58 = vmax.f32 %v6369_v36, 0.0  ;;  %v13782_v1 = vpack.c.bf16 %v6440_v10, %v6438_v4 }
 0x667   : > { %6410 = vmatmul.bf16.gmra.mxu3 %v13686_v49  ;;  %v6304_v15 = vpop.f32.mrf.mxu2  ;;  %v6475_v44 = vpack.c.bf16 %v6429_v58, %v6427_v25 }
 0x668   : > { %v13749_v3 = vpop.f32.mrf.mxu1 }
 0x66a   : > { %v6371_v7 = vpop.f32.mrf.mxu3 }
 0x66b   : > { %6767 = vmatmul.bf16.vlgmr.msrb.gmra.mxu1 %v6475_v44  ;;  %6346 = vmatmul.bf16.gmra.mxu2 %v13693_v2  ;;  %v6372_v29 = vadd.f32 %v6371_v7, %v6302_v0 }
 0x66d   : > { %v13752_v41 = vpop.f32.mrf.mxu0  ;;  %v6431_v20 = vmax.f32 %v6372_v29, 0.0 }
 0x66f   : > { %v6307_v17 = vpop.f32.mrf.mxu2 }
 0x670   : > { %v6250_v51 = vpop.f32.mrf.mxu1  ;;  %6703 = vmatmul.bf16.gmra.mxu0 %v13754_v54 }
 0x671   : > { %v6251_v0 = vadd.f32 %v6250_v51, %v13742_v5 }
 0x672   : > { %v6373_v49 = vpop.f32.mrf.mxu3 }
 0x673   : > { %v6374_v33 = vadd.f32 %v6373_v49, %v6304_v15  ;;  %v6444_v36 = vmax.f32 %v6251_v0, 0.0 }
 0x675   : > { %v13757_v21 = vpop.f32.mrf.mxu0  ;;  %v6433_v59 = vmax.f32 %v6374_v33, 0.0 }
 0x677   : > { %6415 = vmatmul.bf16.gmra.mxu3 %v13710_v12  ;;  %v6309_v2 = vpop.f32.mrf.mxu2  ;;  %v6477_v47 = vpack.c.bf16 %v6433_v59, %v6431_v20 }
 0x678   : > { %v13763_v13 = vpop.f32.mrf.mxu1 }
 0x67a   : > { %v6376_v57 = vpop.f32.mrf.mxu3 }
 0x67b   : > { %6772 = vmatmul.bf16.gmra.mxu1 %v6477_v47  ;;  %6351 = vmatmul.bf16.gmra.mxu2 %v13717_v62  ;;  %v6377_v22 = vadd.f32 %v6376_v57, %v6307_v17 }
 0x67d   : > { %v13766_v8 = vpop.f32.mrf.mxu0  ;;  %v6435_v30 = vmax.f32 %v6377_v22, 0.0 }
 0x67f   : > { %v6312_v6 = vpop.f32.mrf.mxu2 }
 0x680   : > { %v6255_v42 = vpop.f32.mrf.mxu1  ;;  %6708 = vmatmul.bf16.gmra.mxu0 %v13768_v31 }
 0x681   : > { %v6256_v32 = vadd.f32 %v6255_v42, %v13757_v21 }
 0x682   : > { %v6378_v12 = vpop.f32.mrf.mxu3 }
 0x683   : > { %v6379_v16 = vadd.f32 %v6378_v12, %v6309_v2  ;;  %v6448_v33 = vmax.f32 %v6256_v32, 0.0 }
 0x685   : > { %v13771_v56 = vpop.f32.mrf.mxu0  ;;  %v6437_v27 = vmax.f32 %v6379_v16, 0.0 }
 0x687   : > { %6420 = vmatmul.bf16.gmra.mxu3 %v13733_v23  ;;  %v6314_v62 = vpop.f32.mrf.mxu2  ;;  %v6479_v45 = vpack.c.bf16 %v6437_v27, %v6435_v30 }
 0x688   : > { %v13777_v48 = vpop.f32.mrf.mxu1 }
 0x68a   : > { %v6381_v50 = vpop.f32.mrf.mxu3 }
 0x68b   : > { %6777 = vmatmul.bf16.gmra.mxu1 %v6479_v45  ;;  %6836 = vmatmul.bf16.vlgmr.msrb.gmra.mxu2 %v13739_v60  ;;  %v6382_v46 = vadd.f32 %v6381_v50, %v6312_v6  ;;  %v6249_v60 = vadd.f32 %v13749_v3, %v13737_v37 }
 0x68d   : > { %v13780_v28 = vpop.f32.mrf.mxu0  ;;  %v6439_v14 = vmax.f32 %v6382_v46, 0.0  ;;  %v6442_v43 = vmax.f32 %v6249_v60, 0.0 }
 0x68f   : > { %v6317_v39 = vpop.f32.mrf.mxu2  ;;  %v13795_v15 = vpack.c.bf16 %v6444_v36, %v6442_v43 }
 0x690   : > { %v6260_v38 = vpop.f32.mrf.mxu1  ;;  %6713 = vmatmul.bf16.gmra.mxu0 %v13782_v1 }
 0x691   : > { %v6261_v52 = vadd.f32 %v6260_v38, %v13771_v56 }
 0x692   : > { %v6383_v23 = vpop.f32.mrf.mxu3 }
 0x693   : > { %v6384_v34 = vadd.f32 %v6383_v23, %v6314_v62  ;;  %v6452_v16 = vmax.f32 %v6261_v52, 0.0 }
 0x695   : > { %v13785_v9 = vpop.f32.mrf.mxu0  ;;  %v6441_v11 = vmax.f32 %v6384_v34, 0.0 }
 0x697   : > { %6905 = vmatmul.bf16.vlgmr.msrb.gmra.mxu3 %v6475_v44  ;;  %v6319_v24 = vpop.f32.mrf.mxu2  ;;  %v6481_v63 = vpack.c.bf16 %v6441_v11, %v6439_v14 }
 0x698   : > { %v13790_v18 = vpop.f32.mrf.mxu1 }
 0x69a   : > { %v6386_v58 = vpop.f32.mrf.mxu3 }
 0x69b   : > { %6782 = vmatmul.bf16.gmra.mxu1 %v6481_v63  ;;  %6841 = vmatmul.bf16.gmra.mxu2 %v13754_v54  ;;  %v6387_v19 = vadd.f32 %v6386_v58, %v6317_v39  ;;  %v6254_v54 = vadd.f32 %v13763_v13, %v13752_v41 }
 0x69d   : > { %v13793_v25 = vpop.f32.mrf.mxu0  ;;  %v6443_v17 = vmax.f32 %v6387_v19, 0.0  ;;  %v6446_v61 = vmax.f32 %v6254_v54, 0.0 }
 0x69f   : > { %v6322_v5 = vpop.f32.mrf.mxu2  ;;  %v13808_v2 = vpack.c.bf16 %v6448_v33, %v6446_v61 }
 0x6a0   : > { %v6265_v55 = vpop.f32.mrf.mxu1  ;;  %6718 = vmatmul.bf16.gmra.mxu0 %v13795_v15 }
 0x6a1   : > { %v6266_v4 = vadd.f32 %v6265_v55, %v13785_v9 }
 0x6a2   : > { %v6388_v44 = vpop.f32.mrf.mxu3 }
 0x6a3   : > { %v6389_v37 = vadd.f32 %v6388_v44, %v6319_v24  ;;  %v6456_v34 = vmax.f32 %v6266_v4, 0.0 }
 0x6a5   : > { %v13798_v3 = vpop.f32.mrf.mxu0  ;;  %v6445_v7 = vmax.f32 %v6389_v37, 0.0 }
 0x6a7   : > { %6910 = vmatmul.bf16.gmra.mxu3 %v6477_v47  ;;  %v6324_v51 = vpop.f32.mrf.mxu2  ;;  %v6483_v29 = vpack.c.bf16 %v6445_v7, %v6443_v17 }
 0x6a8   : > { %v13803_v49 = vpop.f32.mrf.mxu1 }
 0x6aa   : > { %v6391_v59 = vpop.f32.mrf.mxu3 }
 0x6ab   : > { %6787 = vmatmul.bf16.gmra.mxu1 %v6483_v29  ;;  %6846 = vmatmul.bf16.gmra.mxu2 %v13768_v31  ;;  %v6392_v35 = vadd.f32 %v6391_v59, %v6322_v5  ;;  %v6259_v31 = vadd.f32 %v13777_v48, %v13766_v8 }
 0x6ad   : > { %v13806_v20 = vpop.f32.mrf.mxu0  ;;  %v6447_v6 = vmax.f32 %v6392_v35, 0.0  ;;  %v6450_v40 = vmax.f32 %v6259_v31, 0.0 }
 0x6af   : > { %v6327_v21 = vpop.f32.mrf.mxu2  ;;  %v13821_v62 = vpack.c.bf16 %v6452_v16, %v6450_v40 }
 0x6b0   : > { %v6270_v26 = vpop.f32.mrf.mxu1  ;;  %6723 = vmatmul.bf16.gmra.mxu0 %v13808_v2 }
 0x6b1   : > { %v6271_v43 = vadd.f32 %v6270_v26, %v13798_v3 }
 0x6b2   : > { %v6393_v47 = vpop.f32.mrf.mxu3 }
 0x6b3   : > { %v6394_v41 = vadd.f32 %v6393_v47, %v6324_v51  ;;  %v6460_v37 = vmax.f32 %v6271_v43, 0.0 }
 0x6b5   : > { %v6449_v13 = vmax.f32 %v6394_v41, 0.0  ;;  %v13811_v57 = vpop.f32.mrf.mxu0 }
 0x6b7   : > { %6915 = vmatmul.bf16.gmra.mxu3 %v6479_v45  ;;  %v6329_v42 = vpop.f32.mrf.mxu2  ;;  %v6485_v22 = vpack.c.bf16 %v6449_v13, %v6447_v6 }
 0x6b8   : > { %v13816_v12 = vpop.f32.mrf.mxu1 }
 0x6ba   : > { %v6396_v27 = vpop.f32.mrf.mxu3 }
 0x6bb   : > { %6792 = vmatmul.bf16.gmra.mxu1 %v6485_v22  ;;  %6851 = vmatmul.bf16.gmra.mxu2 %v13782_v1  ;;  %v6397_v10 = vadd.f32 %v6396_v27, %v6327_v21  ;;  %v6264_v1 = vadd.f32 %v13790_v18, %v13780_v28 }
 0x6bd   : > { %v13819_v30 = vpop.f32.mrf.mxu0  ;;  %v6451_v39 = vmax.f32 %v6397_v10, 0.0  ;;  %v6454_v0 = vmax.f32 %v6264_v1, 0.0 }
 0x6bf   : > { %v6332_v56 = vpop.f32.mrf.mxu2  ;;  %v13837_v9 = vpack.c.bf16 %v6456_v34, %v6454_v0 }
 0x6c0   : > { %v6275_v53 = vpop.f32.mrf.mxu1  ;;  %6728 = vmatmul.bf16.gmra.mxu0 %v13821_v62 }
 0x6c1   : > { %v6276_v61 = vadd.f32 %v6275_v53, %v13811_v57 }
 0x6c2   : > { %v6398_v45 = vpop.f32.mrf.mxu3 }
 0x6c3   : > { %v6399_v8 = vadd.f32 %v6398_v45, %v6329_v42  ;;  %v6464_v13 = vmax.f32 %v6276_v61, 0.0 }
 0x6c5   : > { %v6453_v48 = vmax.f32 %v6399_v8, 0.0  ;;  %v13824_v50 = vpop.f32.mrf.mxu0 }
 0x6c7   : > { %6920 = vmatmul.bf16.gmra.mxu3 %v6481_v63  ;;  %v6334_v38 = vpop.f32.mrf.mxu2  ;;  %v13831_v46 = vpack.c.bf16 %v6453_v48, %v6451_v39 }
 0x6c8   : > { %v13829_v23 = vpop.f32.mrf.mxu1 }
 0x6c9   : > { %v6279_v10 = vadd.f32 %v13829_v23, %v13819_v30 }
 0x6ca   : > { %v6401_v11 = vpop.f32.mrf.mxu3 }
 0x6cb   : > { %6797 = vmatmul.bf16.gmra.mxu1 %v13831_v46  ;;  %6856 = vmatmul.bf16.gmra.mxu2 %v13795_v15  ;;  %v6402_v18 = vadd.f32 %v6401_v11, %v6332_v56  ;;  %v6269_v15 = vadd.f32 %v13803_v49, %v13793_v25  ;;  %v6466_v1 = vmax.f32 %v6279_v10, 0.0 }
 0x6cd   : > { %v13835_v14 = vpop.f32.mrf.mxu0  ;;  %v6455_v5 = vmax.f32 %v6402_v18, 0.0  ;;  %v6458_v32 = vmax.f32 %v6269_v15, 0.0 }
 0x6cf   : > { %v6337_v24 = vpop.f32.mrf.mxu2  ;;  %v13851_v3 = vpack.c.bf16 %v6460_v37, %v6458_v32 }
 0x6d0   : > { %v6280_v60 = vpop.f32.mrf.mxu1  ;;  %6733 = vmatmul.bf16.gmra.mxu0 %v13837_v9 }
 0x6d1   : > { %v6281_v53 = vadd.f32 %v6280_v60, %v13824_v50 }
 0x6d2   : > { %v6403_v28 = vpop.f32.mrf.mxu3 }
 0x6d3   : > { %v6404_v63 = vadd.f32 %v6403_v28, %v6334_v38  ;;  %v6468_v39 = vmax.f32 %v6281_v53, 0.0 }
 0x6d5   : > { %v6457_v36 = vmax.f32 %v6404_v63, 0.0  ;;  %v13840_v58 = vpop.f32.mrf.mxu0  ;;  %v13881_v34 = vpack.c.bf16 %v6468_v39, %v6466_v1 }
 0x6d7   : > { %6925 = vmatmul.bf16.gmra.mxu3 %v6483_v29  ;;  %v6339_v55 = vpop.f32.mrf.mxu2  ;;  %v13847_v19 = vpack.c.bf16 %v6457_v36, %v6455_v5 }
 0x6d8   : > { %v13845_v44 = vpop.f32.mrf.mxu1 }
 0x6d9   : > { %v6284_v36 = vadd.f32 %v13845_v44, %v13835_v14 }
 0x6da   : > { %v6406_v7 = vpop.f32.mrf.mxu3 }
 0x6db   : > { %6802 = vmatmul.bf16.gmra.mxu1 %v13847_v19  ;;  %6861 = vmatmul.bf16.gmra.mxu2 %v13808_v2  ;;  %v6407_v49 = vadd.f32 %v6406_v7, %v6337_v24  ;;  %v6274_v2 = vadd.f32 %v13816_v12, %v13806_v20  ;;  %v6470_v7 = vmax.f32 %v6284_v36, 0.0 }
 0x6dd   : > { %v6699_v17 = vpop.f32.mrf.mxu0  ;;  %v6459_v21 = vmax.f32 %v6407_v49, 0.0  ;;  %v6462_v57 = vmax.f32 %v6274_v2, 0.0 }
 0x6df   : > { %v6342_v51 = vpop.f32.mrf.mxu2  ;;  %v13868_v42 = vpack.c.bf16 %v6464_v13, %v6462_v57 }
 0x6e0   : > { %v6285_v54 = vpop.f32.mrf.mxu1  ;;  %6738 = vmatmul.bf16.gmra.mxu0 %v13851_v3 }
 0x6e1   : > { %v6286_v18 = vadd.f32 %v6285_v54, %v13840_v58 }
 0x6e2   : > { %v6408_v25 = vpop.f32.mrf.mxu3 }
 0x6e3   : > { %v6409_v29 = vadd.f32 %v6408_v25, %v6339_v55  ;;  %v6472_v15 = vmax.f32 %v6286_v18, 0.0 }
 0x6e5   : > { %v6461_v33 = vmax.f32 %v6409_v29, 0.0  ;;  %v6701_v59 = vpop.f32.mrf.mxu0  ;;  %v6496_v58 = vpack.c.bf16 %v6472_v15, %v6470_v7 }
 0x6e7   : > { %6930 = vmatmul.bf16.gmra.mxu3 %v6485_v22  ;;  %v6344_v26 = vpop.f32.mrf.mxu2  ;;  %v13863_v41 = vpack.c.bf16 %v6461_v33, %v6459_v21 }
 0x6e8   : > { %v6768_v47 = vpop.f32.mrf.mxu1 }
 0x6e9   : > { %v6769_v35 = vadd.f32 %v6768_v47, %v6699_v17 }
 0x6ea   : > { %v6411_v52 = vpop.f32.mrf.mxu3 }
 0x6eb   : > { %6966 = vst [vmem:[%s13859_s28] sm:$0xff] %v6769_v35  ;;  %6807 = vmatmul.bf16.gmra.mxu1 %v13863_v41  ;;  %6866 = vmatmul.bf16.gmra.mxu2 %v13821_v62  ;;  %v6412_v16 = vadd.f32 %v6411_v52, %v6342_v51 }
 0x6ed   : > { %v6704_v6 = vpop.f32.mrf.mxu0  ;;  %v6463_v45 = vmax.f32 %v6412_v16, 0.0 }
 0x6ef   : > { %v6347_v31 = vpop.f32.mrf.mxu2 }
 0x6f0   : > { %v6770_v22 = vpop.f32.mrf.mxu1  ;;  %6743 = vmatmul.bf16.gmra.mxu0 %v13868_v42 }
 0x6f1   : > { %v6771_v20 = vadd.f32 %v6770_v22, %v6701_v59 }
 0x6f2   : > { %v6413_v12 = vpop.f32.mrf.mxu3 }
 0x6f3   : > { %6968 = vst [vmem:[%s13859_s28 + $0x10] sm:$0xff] %v6771_v20  ;;  %v6414_v27 = vadd.f32 %v6413_v12, %v6344_v26 }
 0x6f5   : > { %v6465_v40 = vmax.f32 %v6414_v27, 0.0  ;;  %v6706_v56 = vpop.f32.mrf.mxu0 }
 0x6f7   : > { %6935 = vmatmul.bf16.gmra.mxu3 %v13831_v46  ;;  %v6349_v62 = vpop.f32.mrf.mxu2  ;;  %v13876_v4 = vpack.c.bf16 %v6465_v40, %v6463_v45 }
 0x6f8   : > { %v6773_v8 = vpop.f32.mrf.mxu1 }
 0x6f9   : > { %v6774_v48 = vadd.f32 %v6773_v8, %v6704_v6 }
 0x6fa   : > { %v6416_v38 = vpop.f32.mrf.mxu3 }
 0x6fb   : > { %6970 = vst [vmem:[%s13859_s28 + $0x20] sm:$0xff] %v6774_v48  ;;  %6812 = vmatmul.bf16.gmra.mxu1 %v13876_v4  ;;  %6871 = vmatmul.bf16.gmra.mxu2 %v13837_v9  ;;  %v6417_v0 = vadd.f32 %v6416_v38, %v6347_v31 }
 0x6fd   : > { %v6709_v50 = vpop.f32.mrf.mxu0  ;;  %v6467_v63 = vmax.f32 %v6417_v0, 0.0 }
 0x6ff   : > { %v6352_v46 = vpop.f32.mrf.mxu2 }
 0x700   : > { %v6775_v11 = vpop.f32.mrf.mxu1  ;;  %6748 = vmatmul.bf16.gmra.mxu0 %v13881_v34 }
 0x701   : > { %v6776_v30 = vadd.f32 %v6775_v11, %v6706_v56 }
 0x702   : > { %v6418_v23 = vpop.f32.mrf.mxu3 }
 0x703   : > { %6972 = vst [vmem:[%s13859_s28 + $0x30] sm:$0xff] %v6776_v30  ;;  %v6419_v24 = vadd.f32 %v6418_v23, %v6349_v62 }
 0x705   : > { %v6469_v60 = vmax.f32 %v6419_v24, 0.0  ;;  %v6711_v28 = vpop.f32.mrf.mxu0 }
 0x707   : > { %6940 = vmatmul.bf16.gmra.mxu3 %v13847_v19  ;;  %v6354_v9 = vpop.f32.mrf.mxu2  ;;  %v6495_v55 = vpack.c.bf16 %v6469_v60, %v6467_v63 }
 0x708   : > { %v6778_v43 = vpop.f32.mrf.mxu1 }
 0x709   : > { %v6779_v5 = vadd.f32 %v6778_v43, %v6709_v50 }
 0x70a   : > { %v6421_v37 = vpop.f32.mrf.mxu3 }
 0x70b   : > { %6974 = vst [vmem:[%s13859_s28 + $0x40] sm:$0xff] %v6779_v5  ;;  %6817 = vmatmul.bf16.gmra.mxu1 %v6495_v55  ;;  %6876 = vmatmul.bf16.gmra.mxu2 %v13851_v3  ;;  %v6422_v14 = vadd.f32 %v6421_v37, %v6352_v46 }
 0x70d   : > { %v6714_v32 = vpop.f32.mrf.mxu0  ;;  %v6471_v29 = vmax.f32 %v6422_v14, 0.0 }
 0x70f   : > { %v6837_v17 = vpop.f32.mrf.mxu2 }
 0x710   : > { %v6780_v51 = vpop.f32.mrf.mxu1  ;;  %6753 = vmatmul.bf16.gmra.mxu0 %v6496_v58 }
 0x711   : > { %v6781_v19 = vadd.f32 %v6780_v51, %v6711_v28 }
 0x712   : > { %v6423_v54 = vpop.f32.mrf.mxu3 }
 0x713   : > { %6976 = vst [vmem:[%s13859_s28 + $0x50] sm:$0xff] %v6781_v19  ;;  %v6424_v44 = vadd.f32 %v6423_v54, %v6354_v9 }
 0x715   : > { %v6473_v25 = vmax.f32 %v6424_v44, 0.0  ;;  %v6716_v49 = vpop.f32.mrf.mxu0 }
 0x717   : > { %6945 = vmatmul.bf16.gmra.mxu3 %v13863_v41  ;;  %v6839_v33 = vpop.f32.mrf.mxu2  ;;  %v6497_v61 = vpack.c.bf16 %v6473_v25, %v6471_v29 }
 0x718   : > { %v6783_v3 = vpop.f32.mrf.mxu1 }
 0x719   : > { %v6784_v59 = vadd.f32 %v6783_v3, %v6714_v32 }
 0x71a   : > { %v6906_v21 = vpop.f32.mrf.mxu3 }
 0x71b   : > { %6978 = vst [vmem:[%s13859_s28 + $0x60] sm:$0xff] %v6784_v59  ;;  %v6907_v26 = vadd.f32 %v6906_v21, %v6837_v17  ;;  %6822 = vmatmul.bf16.gmra.mxu1 %v6497_v61  ;;  %6881 = vmatmul.bf16.gmra.mxu2 %v13868_v42 }
 0x71d   : > { %6967 = vst [vmem:[%s13859_s28 + $0x8] sm:$0xff] %v6907_v26  ;;  %v6719_v2 = vpop.f32.mrf.mxu0 }
 0x71f   : > { %v6842_v47 = vpop.f32.mrf.mxu2 }
 0x720   : > { %v6785_v35 = vpop.f32.mrf.mxu1 }
 0x721   : > { %v6786_v13 = vadd.f32 %v6785_v35, %v6716_v49 }
 0x722   : > { %v6908_v41 = vpop.f32.mrf.mxu3 }
 0x723   : > { %6980 = vst [vmem:[%s13859_s28 + $0x70] sm:$0xff] %v6786_v13  ;;  %v6909_v52 = vadd.f32 %v6908_v41, %v6839_v33 }
 0x725   : > { %6969 = vst [vmem:[%s13859_s28 + $0x18] sm:$0xff] %v6909_v52  ;;  %v6721_v57 = vpop.f32.mrf.mxu0 }
 0x727   : > { %6950 = vmatmul.bf16.gmra.mxu3 %v13876_v4  ;;  %v6844_v6 = vpop.f32.mrf.mxu2 }
 0x728   : > { %v6788_v31 = vpop.f32.mrf.mxu1 }
 0x729   : > { %v6789_v22 = vadd.f32 %v6788_v31, %v6719_v2 }
 0x72a   : > { %v6911_v42 = vpop.f32.mrf.mxu3 }
 0x72b   : > { %6982 = vst [vmem:[%s13859_s28 + $0x80] sm:$0xff] %v6789_v22  ;;  %v6912_v20 = vadd.f32 %v6911_v42, %v6842_v47  ;;  %6886 = vmatmul.bf16.gmra.mxu2 %v13881_v34 }
 0x72d   : > { %6971 = vst [vmem:[%s13859_s28 + $0x28] sm:$0xff] %v6912_v20  ;;  %v6724_v12 = vpop.f32.mrf.mxu0 }
 0x72f   : > { %v6847_v16 = vpop.f32.mrf.mxu2 }
 0x730   : > { %v6790_v27 = vpop.f32.mrf.mxu1 }
 0x731   : > { %v6791_v40 = vadd.f32 %v6790_v27, %v6721_v57 }
 0x732   : > { %v6913_v56 = vpop.f32.mrf.mxu3 }
 0x733   : > { %6984 = vst [vmem:[%s13859_s28 + $0x90] sm:$0xff] %v6791_v40  ;;  %v6914_v53 = vadd.f32 %v6913_v56, %v6844_v6 }
 0x735   : > { %6973 = vst [vmem:[%s13859_s28 + $0x38] sm:$0xff] %v6914_v53  ;;  %v6726_v45 = vpop.f32.mrf.mxu0 }
 0x737   : > { %6955 = vmatmul.bf16.gmra.mxu3 %v6495_v55  ;;  %v6849_v62 = vpop.f32.mrf.mxu2 }
 0x738   : > { %v6793_v10 = vpop.f32.mrf.mxu1 }
 0x739   : > { %v6794_v8 = vadd.f32 %v6793_v10, %v6724_v12 }
 0x73a   : > { %v6916_v48 = vpop.f32.mrf.mxu3 }
 0x73b   : > { %6986 = vst [vmem:[%s13859_s28 + $0xa0] sm:$0xff] %v6794_v8  ;;  %v6917_v4 = vadd.f32 %v6916_v48, %v6847_v16  ;;  %6891 = vmatmul.bf16.gmra.mxu2 %v6496_v58 }
 0x73d   : > { %6975 = vst [vmem:[%s13859_s28 + $0x48] sm:$0xff] %v6917_v4  ;;  %v6729_v39 = vpop.f32.mrf.mxu0 }
 0x73f   : > { %v6852_v38 = vpop.f32.mrf.mxu2 }
 0x740   : > { %v6795_v1 = vpop.f32.mrf.mxu1 }
 0x741   : > { %v6796_v50 = vadd.f32 %v6795_v1, %v6726_v45 }
 0x742   : > { %v6918_v34 = vpop.f32.mrf.mxu3 }
 0x743   : > { %6988 = vst [vmem:[%s13859_s28 + $0xb0] sm:$0xff] %v6796_v50  ;;  %v6919_v46 = vadd.f32 %v6918_v34, %v6849_v62 }
 0x745   : > { %6977 = vst [vmem:[%s13859_s28 + $0x58] sm:$0xff] %v6919_v46  ;;  %v6731_v11 = vpop.f32.mrf.mxu0 }
 0x747   : > { %6960 = vmatmul.bf16.gmra.mxu3 %v6497_v61  ;;  %v6854_v30 = vpop.f32.mrf.mxu2 }
 0x748   : > { %v6798_v23 = vpop.f32.mrf.mxu1 }
 0x749   : > { %v6799_v0 = vadd.f32 %v6798_v23, %v6729_v39 }
 0x74a   : > { %v6921_v24 = vpop.f32.mrf.mxu3 }
 0x74b   : > { %6990 = vst [vmem:[%s13859_s28 + $0xc0] sm:$0xff] %v6799_v0  ;;  %v6922_v60 = vadd.f32 %v6921_v24, %v6852_v38 }
 0x74d   : > { %6979 = vst [vmem:[%s13859_s28 + $0x68] sm:$0xff] %v6922_v60  ;;  %v6734_v28 = vpop.f32.mrf.mxu0 }
 0x74f   : > { %v6857_v18 = vpop.f32.mrf.mxu2 }
 0x750   : > { %v6800_v63 = vpop.f32.mrf.mxu1 }
 0x751   : > { %v6801_v9 = vadd.f32 %v6800_v63, %v6731_v11 }
 0x752   : > { %v6923_v36 = vpop.f32.mrf.mxu3 }
 0x753   : > { %6992 = vst [vmem:[%s13859_s28 + $0xd0] sm:$0xff] %v6801_v9  ;;  %v6924_v43 = vadd.f32 %v6923_v36, %v6854_v30 }
 0x755   : > { %6981 = vst [vmem:[%s13859_s28 + $0x78] sm:$0xff] %v6924_v43  ;;  %v6736_v5 = vpop.f32.mrf.mxu0 }
 0x757   : > { %v6859_v55 = vpop.f32.mrf.mxu2 }
 0x758   : > { %v6803_v15 = vpop.f32.mrf.mxu1 }
 0x759   : > { %v6804_v37 = vadd.f32 %v6803_v15, %v6734_v28 }
 0x75a   : > { %v6926_v7 = vpop.f32.mrf.mxu3 }
 0x75b   : > { %6994 = vst [vmem:[%s13859_s28 + $0xe0] sm:$0xff] %v6804_v37  ;;  %v6927_v32 = vadd.f32 %v6926_v7, %v6857_v18 }
 0x75d   : > { %6983 = vst [vmem:[%s13859_s28 + $0x88] sm:$0xff] %v6927_v32  ;;  %v6739_v58 = vpop.f32.mrf.mxu0 }
 0x75f   : > { %v6862_v17 = vpop.f32.mrf.mxu2 }
 0x760   : > { %v6805_v51 = vpop.f32.mrf.mxu1 }
 0x761   : > { %v6806_v19 = vadd.f32 %v6805_v51, %v6736_v5 }
 0x762   : > { %v6928_v54 = vpop.f32.mrf.mxu3 }
 0x763   : > { %6996 = vst [vmem:[%s13859_s28 + $0xf0] sm:$0xff] %v6806_v19  ;;  %v6929_v14 = vadd.f32 %v6928_v54, %v6859_v55 }
 0x765   : > { %6985 = vst [vmem:[%s13859_s28 + $0x98] sm:$0xff] %v6929_v14  ;;  %v6741_v44 = vpop.f32.mrf.mxu0 }
 0x767   : > { %v6864_v25 = vpop.f32.mrf.mxu2 }
 0x768   : > { %v6808_v49 = vpop.f32.mrf.mxu1 }
 0x769   : > { %v6809_v29 = vadd.f32 %v6808_v49, %v6739_v58 }
 0x76a   : > { %v6931_v33 = vpop.f32.mrf.mxu3 }
 0x76b   : > { %6998 = vst [vmem:[%s13859_s28 + $0x100] sm:$0xff] %v6809_v29  ;;  %v6932_v3 = vadd.f32 %v6931_v33, %v6862_v17 }
 0x76d   : > { %6987 = vst [vmem:[%s13859_s28 + $0xa8] sm:$0xff] %v6932_v3  ;;  %v6744_v59 = vpop.f32.mrf.mxu0 }
 0x76f   : > { %v6867_v61 = vpop.f32.mrf.mxu2 }
 0x770   : > { %v6810_v21 = vpop.f32.mrf.mxu1 }
 0x771   : > { %v6811_v26 = vadd.f32 %v6810_v21, %v6741_v44 }
 0x772   : > { %v6933_v2 = vpop.f32.mrf.mxu3 }
 0x773   : > { %7000 = vst [vmem:[%s13859_s28 + $0x110] sm:$0xff] %v6811_v26  ;;  %v6934_v47 = vadd.f32 %v6933_v2, %v6864_v25 }
 0x775   : > { %6989 = vst [vmem:[%s13859_s28 + $0xb8] sm:$0xff] %v6934_v47  ;;  %v6746_v35 = vpop.f32.mrf.mxu0 }
 0x777   : > { %v6869_v13 = vpop.f32.mrf.mxu2 }
 0x778   : > { %v6813_v41 = vpop.f32.mrf.mxu1 }
 0x779   : > { %v6814_v52 = vadd.f32 %v6813_v41, %v6744_v59 }
 0x77a   : > { %v6936_v57 = vpop.f32.mrf.mxu3 }
 0x77b   : > { %7002 = vst [vmem:[%s13859_s28 + $0x120] sm:$0xff] %v6814_v52  ;;  %v6937_v6 = vadd.f32 %v6936_v57, %v6867_v61 }
 0x77d   : > { %6991 = vst [vmem:[%s13859_s28 + $0xc8] sm:$0xff] %v6937_v6  ;;  %v6749_v42 = vpop.f32.mrf.mxu0 }
 0x77f   : > { %v6872_v31 = vpop.f32.mrf.mxu2 }
 0x780   : > { %v6815_v22 = vpop.f32.mrf.mxu1 }
 0x781   : > { %v6816_v20 = vadd.f32 %v6815_v22, %v6746_v35 }
 0x782   : > { %v6938_v12 = vpop.f32.mrf.mxu3 }
 0x783   : > { %7004 = vst [vmem:[%s13859_s28 + $0x130] sm:$0xff] %v6816_v20  ;;  %v6939_v16 = vadd.f32 %v6938_v12, %v6869_v13 }
 0x785   : > { %6993 = vst [vmem:[%s13859_s28 + $0xd8] sm:$0xff] %v6939_v16  ;;  %v6751_v45 = vpop.f32.mrf.mxu0 }
 0x787   : > { %v6874_v27 = vpop.f32.mrf.mxu2 }
 0x788   : > { %v6818_v40 = vpop.f32.mrf.mxu1 }
 0x789   : > { %v6819_v56 = vadd.f32 %v6818_v40, %v6749_v42 }
 0x78a   : > { %v6941_v53 = vpop.f32.mrf.mxu3 }
 0x78b   : > { %7006 = vst [vmem:[%s13859_s28 + $0x140] sm:$0xff] %v6819_v56  ;;  %v6942_v62 = vadd.f32 %v6941_v53, %v6872_v31 }
 0x78d   : > { %6995 = vst [vmem:[%s13859_s28 + $0xe8] sm:$0xff] %v6942_v62  ;;  %v6754_v38 = vpop.f32.mrf.mxu0 }
 0x78f   : > { %v6877_v10 = vpop.f32.mrf.mxu2 }
 0x790   : > { %v6820_v8 = vpop.f32.mrf.mxu1 }
 0x791   : > { %v6821_v48 = vadd.f32 %v6820_v8, %v6751_v45 }
 0x792   : > { %v6943_v4 = vpop.f32.mrf.mxu3 }
 0x793   : > { %7008 = vst [vmem:[%s13859_s28 + $0x150] sm:$0xff] %v6821_v48  ;;  %v6944_v39 = vadd.f32 %v6943_v4, %v6874_v27 }
 0x795   : > { %6997 = vst [vmem:[%s13859_s28 + $0xf8] sm:$0xff] %v6944_v39  ;;  %v6756_v30 = vpop.f32.mrf.mxu0 }
 0x797   : > { %v6879_v1 = vpop.f32.mrf.mxu2 }
 0x798   : > { %v6823_v50 = vpop.f32.mrf.mxu1 }
 0x799   : > { %v6824_v34 = vadd.f32 %v6823_v50, %v6754_v38 }
 0x79a   : > { %v6946_v46 = vpop.f32.mrf.mxu3 }
 0x79b   : > { %7010 = vst [vmem:[%s13859_s28 + $0x160] sm:$0xff] %v6824_v34  ;;  %v6947_v11 = vadd.f32 %v6946_v46, %v6877_v10 }
 0x79d   : > { %6999 = vst [vmem:[%s13859_s28 + $0x108] sm:$0xff] %v6947_v11 }
 0x79f   : > { %v6882_v0 = vpop.f32.mrf.mxu2 }
 0x7a0   : > { %v6825_v23 = vpop.f32.mrf.mxu1 }
 0x7a1   : > { %v6826_v24 = vadd.f32 %v6825_v23, %v6756_v30 }
 0x7a2   : > { %v6948_v60 = vpop.f32.mrf.mxu3 }
 0x7a3   : > { %7012 = vst [vmem:[%s13859_s28 + $0x170] sm:$0xff] %v6826_v24  ;;  %v6949_v28 = vadd.f32 %v6948_v60, %v6879_v1 }
 0x7a5   : > { %7001 = vst [vmem:[%s13859_s28 + $0x118] sm:$0xff] %v6949_v28 }
 0x7a7   : > { %v6884_v18 = vpop.f32.mrf.mxu2 }
 0x7aa   : > { %v6951_v63 = vpop.f32.mrf.mxu3 }
 0x7ab   : > { %v6952_v9 = vadd.f32 %v6951_v63, %v6882_v0 }
 0x7ad   : > { %7003 = vst [vmem:[%s13859_s28 + $0x128] sm:$0xff] %v6952_v9 }
 0x7af   : > { %v6887_v5 = vpop.f32.mrf.mxu2 }
 0x7b2   : > { %v6953_v36 = vpop.f32.mrf.mxu3 }
 0x7b3   : > { %v6954_v43 = vadd.f32 %v6953_v36, %v6884_v18 }
 0x7b5   : > { %7005 = vst [vmem:[%s13859_s28 + $0x138] sm:$0xff] %v6954_v43 }
 0x7b7   : > { %v6889_v37 = vpop.f32.mrf.mxu2 }
 0x7ba   : > { %v6956_v55 = vpop.f32.mrf.mxu3 }
 0x7bb   : > { %v6957_v15 = vadd.f32 %v6956_v55, %v6887_v5 }
 0x7bd   : > { %7007 = vst [vmem:[%s13859_s28 + $0x148] sm:$0xff] %v6957_v15 }
 0x7bf   : > { %v6892_v58 = vpop.f32.mrf.mxu2 }
 0x7c2   : > { %v6958_v7 = vpop.f32.mrf.mxu3 }
 0x7c3   : > { %v6959_v32 = vadd.f32 %v6958_v7, %v6889_v37 }
 0x7c5   : > { %7009 = vst [vmem:[%s13859_s28 + $0x158] sm:$0xff] %v6959_v32 }
 0x7c7   : > { %v6894_v19 = vpop.f32.mrf.mxu2 }
 0x7ca   : > { %v6961_v17 = vpop.f32.mrf.mxu3 }
 0x7cb   : > { %v6962_v51 = vadd.f32 %v6961_v17, %v6892_v58 }
 0x7cd   : > { %7011 = vst [vmem:[%s13859_s28 + $0x168] sm:$0xff] %v6962_v51 }
 0x7d2   : > { %v6963_v54 = vpop.f32.mrf.mxu3 }
 0x7d3   : > { %v6964_v14 = vadd.f32 %v6963_v54, %v6894_v19 }
 0x7d5   : > { %7013 = vst [vmem:[%s13859_s28 + $0x178] sm:$0xff] %v6964_v14 }
 0x7d6 PF: > { %s22_s30 = sadd.s32 1, %s9214_s30  }
 0x7d7   : > { %p19_p7 = scmp.ge.s32.totalorder %s22_s30, 4  }
 0x7d9   :  { %21 = sbr.rel (!%p19_p7) target bundleno = 3 (0x3), region = 111 }
 0x7de   :  { %7038 = vsyncpa [#allocation3], 1 }
 0x7df   :  { %7040 = vsyncpa [#allocation3 + $0x1], 1 }
 0x7e0   :  { %7041 = vsyncpa [#allocation5], 1 }
 0x7e1   :  { %7042 = vsyncpa [#allocation8], 1 }

</bundles_post_ra>
